<compile_context>
chip_gen: v7x
topology: tpu7x:2x2x1
jax: 0.10.0
libtpu: 0.0.40
codegen_flags: <defaults>
</compile_context>

<pallas_src>
import functools
from typing import NamedTuple

import numpy as np

import jax
import jax.numpy as jnp
from jax.experimental import pallas as pl
from jax.experimental.pallas import tpu as pltpu

LANE = 128


def _round_up(x, m):
    return (x + m - 1) // m * m


# ---------------------------------------------------------------------------
# Canvas geometry.
# Lane layout of a canvas: [lead zeros | flattened zero-padded images (Lc,
# zero-padded to Lc_pad) | lead zeros].  The lead/tail margins let the kernel
# read a static shifted window of length Lc_pad for every conv tap without
# going out of bounds; values produced at border / lane-pad positions are
# killed by a precomputed interior mask (interior outputs never read outside
# their own image, so garbage never leaks into real pixels).
# ---------------------------------------------------------------------------
class Geom(NamedTuple):
    n: int
    H: int
    W: int
    border: int
    Hc: int
    Wc: int
    Lc: int
    Lc_pad: int
    lead: int
    Lext: int
    margin: int
    mask: np.ndarray  # [1, Lc_pad]: 1.0 on interior pixels, 0.0 elsewhere


@functools.lru_cache(maxsize=None)
def get_geom(n, H, W, border):
    Hc, Wc = H + 2 * border, W + 2 * border
    Lc = n * Hc * Wc
    Lc_pad = _round_up(Lc, LANE)
    margin = border * Wc + border                     # max |flat tap shift|
    lead = _round_up(margin, LANE) if margin else 0
    Lext = lead + Lc_pad + lead
    m = np.zeros((n, Hc, Wc), np.float32)
    m[:, border:border + H, border:border + W] = 1.0
    m = np.pad(m.reshape(-1), (0, Lc_pad - Lc)).reshape(1, Lc_pad)
    return Geom(n, H, W, border, Hc, Wc, Lc, Lc_pad, lead, Lext, margin, m)


class Canvas:
    __slots__ = ("data", "g")

    def __init__(self, data, g):
        self.data, self.g = data, g


def to_canvas(x, g):
    """x: [C, n, H, W] -> [C, Lext] bf16 canvas."""
    C = x.shape[0]
    xp = jnp.pad(x, ((0, 0), (0, 0), (g.border, g.border), (g.border, g.border)))
    flat = xp.reshape(C, g.Lc)
    flat = jnp.pad(flat, ((0, 0), (g.lead, g.Lext - g.lead - g.Lc)))
    return flat.astype(jnp.bfloat16)


def from_canvas(data, g):
    """[C, Lext] canvas -> [C, n, H, W]."""
    C = data.shape[0]
    xp = data[:, g.lead:g.lead + g.Lc].reshape(C, g.n, g.Hc, g.Wc)
    return xp[:, :, g.border:g.border + g.H, g.border:g.border + g.W]


def space_to_depth(x, s):
    C, n, H, W = x.shape
    y = x.reshape(C, n, H // s, s, W // s, s)
    y = jnp.transpose(y, (3, 5, 0, 1, 2, 4))          # r, t, C, n, H/s, W/s
    return y.reshape(s * s * C, n, H // s, W // s)


def depth_to_space(x, s):
    C4, n, H, W = x.shape
    C = C4 // (s * s)
    y = x.reshape(s, s, C, n, H, W)                   # r, t, C, n, H, W
    y = jnp.transpose(y, (2, 3, 4, 0, 5, 1))          # C, n, H, r, W, t
    return y.reshape(C, n, H * s, W * s)


# ---------------------------------------------------------------------------
# Pallas kernel: fused chain of same-geometry convolutions, tap-folded.
# Per layer: build K-stacked window [ntaps*Cin, Lc_pad] from shifted static
# slices of the resident source canvas, ONE dot against the folded weight
# [Cout, ntaps*Cin] (f32 accumulation), + bias, * interior mask, optional
# PReLU, optional residual add of the (possibly pre-combined) chain input,
# optional post-add canvas on the last layer.  Intermediates stay in VMEM.
# Output last dim == Lext (multiple of 128) -> lane-dense stores.
# ---------------------------------------------------------------------------
def _make_chain_kernel(cfg, lead, Lc_pad, has_pre, pre_sign, has_post,
                       post_from_x, need_kstack, has_mid):
    # cfg: tuple of (shifts, cin, cout, act, residual) -- all static.
    n = len(cfg)

    def kernel(*refs):
        i = 0
        x_ref = refs[i]; i += 1
        mask_ref = refs[i]; i += 1
        pre_ref = None
        if has_pre:
            pre_ref = refs[i]; i += 1
        post_ref = None
        if has_post:
            post_ref = refs[i]; i += 1
        w_refs, b_refs = [], []
        for _ in range(n):
            w_refs.append(refs[i]); b_refs.append(refs[i + 1]); i += 2
        a_ref = refs[i]; i += 1                      # (n,) f32 in SMEM: PReLU slopes
        o_ref = refs[i]; i += 1
        kstack = None
        if need_kstack:
            kstack = refs[i]; i += 1                 # [Kmax, Lc_pad] bf16
        mid = None
        if has_mid:
            mid = refs[i]; i += 1                    # [max mid cout, Lext] bf16
        xin = None
        if has_pre:
            xin = refs[i]; i += 1                    # [Cin0, Lext] bf16

        mask = mask_ref[...]                         # [1, Lc_pad] f32

        if has_pre:
            if pre_sign >= 0.0:
                xin[...] = x_ref[...] + pre_ref[...]
            else:
                xin[...] = x_ref[...] - pre_ref[...]
            chain_in = xin
        else:
            chain_in = x_ref

        if mid is not None:
            mid[...] = jnp.zeros(mid.shape, mid.dtype)

        src = chain_in
        for li, (shifts, cin, cout, act, residual) in enumerate(cfg):
            ntaps = len(shifts)
            if ntaps == 1:
                s0 = shifts[0]
                win = src[:cin, lead + s0:lead + s0 + Lc_pad]
            else:
                for t, s in enumerate(shifts):
                    kstack[t * cin:(t + 1) * cin, :] = \
                        src[:cin, lead + s:lead + s + Lc_pad]
                win = kstack[:ntaps * cin, :]
            # Single MXU dot per layer (K = ntaps*cin), f32 accumulation.
            y = jnp.dot(w_refs[li][...], win, preferred_element_type=jnp.float32)
            y = (y + b_refs[li][...]) * mask          # bias, zero border & lane pad
            if act:
                alpha = a_ref[li]
                y = jnp.where(y >= 0.0, y, alpha * y)  # PReLU (scalar slope)
            if residual:
                y = y + chain_in[:cout, lead:lead + Lc_pad].astype(jnp.float32)
            if li + 1 < n:
                mid[:cout, lead:lead + Lc_pad] = y.astype(mid.dtype)
                src = mid
            else:
                if has_post:
                    y = y + post_ref[:, lead:lead + Lc_pad].astype(jnp.float32)
                elif post_from_x:
                    y = y + x_ref[:, lead:lead + Lc_pad].astype(jnp.float32)
                if lead:
                    o_ref[:, :lead] = jnp.zeros((cout, lead), o_ref.dtype)
                o_ref[:, lead:lead + Lc_pad] = y.astype(o_ref.dtype)
                tail = o_ref.shape[1] - lead - Lc_pad
                if tail:
                    o_ref[:, lead + Lc_pad:] = jnp.zeros((cout, tail), o_ref.dtype)

    return kernel


def _conv_chain_call(x_data, g, layers, pre=None, pre_sign=-1.0, post=None):
    """Run a fused chain of convolutions on one canvas; returns output data."""
    n = len(layers)
    cin0 = x_data.shape[0]
    assert x_data.shape == (cin0, g.Lext), (x_data.shape, g.Lext)
    prev = cin0
    for l in layers:
        assert l["cin"] == prev, (l["cin"], prev)
        assert len(l["shifts"]) == l["ntaps"]
        assert max(abs(s) for s in l["shifts"]) <= g.margin
        if l["residual"]:
            assert l["cout"] == cin0
        prev = l["cout"]
    cout_last = layers[-1]["cout"]

    has_pre = pre is not None
    post_from_x = (post is not None) and (post is x_data)
    has_post = (post is not None) and not post_from_x
    if has_pre:
        assert pre.shape == x_data.shape
    if has_post:
        assert post.shape == (cout_last, g.Lext)
    if post_from_x:
        assert cout_last == cin0

    cfg = tuple((tuple(l["shifts"]), l["cin"], l["cout"], bool(l["act"]),
                 bool(l["residual"])) for l in layers)
    multi = [l["ntaps"] * l["cin"] for l in layers if l["ntaps"] > 1]
    need_kstack = bool(multi)
    kmax = max(multi) if multi else 0
    has_mid = n > 1

    kernel = _make_chain_kernel(cfg, g.lead, g.Lc_pad, has_pre, float(pre_sign),
                                has_post, post_from_x, need_kstack, has_mid)

    args = [x_data.astype(jnp.bfloat16), jnp.asarray(g.mask)]
    if has_pre:
        args.append(pre.astype(jnp.bfloat16))
    if has_post:
        args.append(post.astype(jnp.bfloat16))
    for l in layers:
        args.append(l["wf"])
        args.append(l["b"])
    args.append(jnp.stack([l["a"] for l in layers]))

    scratch, scratch_bytes = [], 0
    if need_kstack:
        scratch.append(pltpu.VMEM((kmax, g.Lc_pad), jnp.bfloat16))
        scratch_bytes += kmax * g.Lc_pad * 2
    if has_mid:
        mrows = max(l["cout"] for l in layers[:-1])
        scratch.append(pltpu.VMEM((mrows, g.Lext), jnp.bfloat16))
        scratch_bytes += mrows * g.Lext * 2
    if has_pre:
        scratch.append(pltpu.VMEM((cin0, g.Lext), jnp.bfloat16))
        scratch_bytes += cin0 * g.Lext * 2

    in_bytes = sum(int(np.prod(a.shape)) * jnp.dtype(a.dtype).itemsize for a in args)
    out_bytes = cout_last * g.Lext * 2
    vmem_limit = int(1.5 * (in_bytes + out_bytes)) + scratch_bytes + (4 << 20)
    vmem_limit = min(128 << 20, max(32 << 20, vmem_limit))

    in_specs = ([pl.BlockSpec(memory_space=pltpu.MemorySpace.VMEM)] * (len(args) - 1)
                + [pl.BlockSpec(memory_space=pltpu.MemorySpace.SMEM)])

    return pl.pallas_call(
        kernel,
        out_shape=jax.ShapeDtypeStruct((cout_last, g.Lext), jnp.bfloat16),
        in_specs=in_specs,
        out_specs=pl.BlockSpec(memory_space=pltpu.MemorySpace.VMEM),
        scratch_shapes=scratch,
        compiler_params=pltpu.CompilerParams(vmem_limit_bytes=vmem_limit),
    )(*args)


# ---------------------------------------------------------------------------
# Weight preparation (done ONCE per forward; weights stored [kh, kw, cout, cin]).
# Folded weight layout: [cout, ntaps*cin], tap-major / cin-minor, matching the
# K-stacked window built inside the kernel.
# ---------------------------------------------------------------------------
def conv_shifts(k, pad, Wc):
    return tuple((dh - pad) * Wc + (dw - pad) for dh in range(k) for dw in range(k))


def w_plain(w):
    k = w.shape[0]
    return w.reshape(k * k, w.shape[2], w.shape[3])


def w_strided_s2d(w, s):
    """Strided conv -> equivalent stride-1 conv on a space-to-depth input."""
    k, _, co, ci = w.shape
    k2 = k // s
    y = w.reshape(k2, s, k2, s, co, ci)               # a, r, b, t, co, ci
    y = jnp.transpose(y, (0, 2, 4, 1, 3, 5))          # a, b, co, r, t, ci
    return y.reshape(k2 * k2, co, s * s * ci)


def w_deconv_d2s(w, s):
    """ConvTranspose -> s*s stride-1 sub-kernels followed by depth-to-space."""
    k, _, co, ci = w.shape
    k2 = k // s
    y = w.reshape(k2, s, k2, s, co, ci)               # a, r, b, t, co, ci
    y = y[::-1, :, ::-1]                              # flip sub-kernel taps
    y = jnp.transpose(y, (0, 2, 1, 3, 4, 5))          # dh, dw, r, t, co, ci
    return y.reshape(k2 * k2, s * s * co, ci)


def fold_w(w_taps):
    """[ntaps, cout, cin] -> [cout, ntaps*cin] bf16 (tap-major, cin-minor)."""
    ntaps, cout, cin = w_taps.shape
    return jnp.transpose(w_taps, (1, 0, 2)).reshape(cout, ntaps * cin).astype(jnp.bfloat16)


def _alpha(p):
    return jnp.asarray(p["a"], jnp.float32).reshape(())


def prep_conv(p):
    k = p["w"].shape[0]
    cout, cin = p["w"].shape[2], p["w"].shape[3]
    return dict(wf=fold_w(w_plain(p["w"])),
                b=p["b"].astype(jnp.float32).reshape(-1, 1),
                a=_alpha(p), k=k, pad=(k - 1) // 2,
                cin=cin, cout=cout, ntaps=k * k)


def prep_deconv_d2s(p, k, s, pad):
    k2 = k // s
    co, ci = p["w"].shape[2], p["w"].shape[3]
    return dict(wf=fold_w(w_deconv_d2s(p["w"], s)),
                b=jnp.tile(p["b"].astype(jnp.float32).reshape(-1, 1), (s * s, 1)),
                a=_alpha(p), k=k2, pad=k2 - 1 - pad // s,
                cin=ci, cout=s * s * co, ntaps=k2 * k2)


def prep_strided_s2d(p, k, s, pad):
    k2 = k // s
    co, ci = p["w"].shape[2], p["w"].shape[3]
    return dict(wf=fold_w(w_strided_s2d(p["w"], s)),
                b=p["b"].astype(jnp.float32).reshape(-1, 1),
                a=_alpha(p), k=k2, pad=pad // s,
                cin=s * s * ci, cout=co, ntaps=k2 * k2)


def _fast_updown(k, s, pad):
    return (k % s == 0 and pad % s == 0
            and pad // s <= 1 and (k // s - 1 - pad // s) <= 1)


def prep_updown(p, k, s, pad, kind):
    if _fast_updown(k, s, pad):
        return prep_deconv_d2s(p, k, s, pad) if kind == "deconv" \
            else prep_strided_s2d(p, k, s, pad)
    return dict(raw=p)


def make_layer(prep, Wc, act, residual):
    shifts = conv_shifts(prep["k"], prep["pad"], Wc)
    assert len(shifts) == prep["ntaps"]
    return dict(wf=prep["wf"], b=prep["b"], a=prep["a"],
                cin=prep["cin"], cout=prep["cout"], ntaps=prep["ntaps"],
                shifts=shifts, act=act, residual=residual)


# ---------------------------------------------------------------------------
# Building blocks operating on canvases.
# ---------------------------------------------------------------------------
def conv_block(cv, prep, act=True):
    layer = make_layer(prep, cv.g.Wc, act, False)
    return Canvas(_conv_chain_call(cv.data, cv.g, [layer]), cv.g)


def resnet_block_layers(bp, Wc):
    return [make_layer(bp["conv1"], Wc, True, False),
            make_layer(bp["conv2"], Wc, False, True)]


def run_resblocks(cv, blocks, tail_layers=(), pre=None, pre_sign=-1.0, post=None):
    """ResnetBlocks fused 2 convs/call; last block fused with tail_layers.
    pre is combined (sign) into the first chain's input, post added to the
    last chain's output -- all inside the Pallas kernels."""
    tail_layers = list(tail_layers)
    g = cv.g
    if not blocks:
        if not tail_layers:
            data = cv.data
            if pre is not None:
                data = data + pre if pre_sign >= 0 else data - pre
            if post is not None and post is not cv.data:
                data = data + post
            elif post is not None:
                data = data + data
            return Canvas(data, g)
        return Canvas(_conv_chain_call(cv.data, g, tail_layers, pre=pre,
                                       pre_sign=pre_sign, post=post), g)
    nb = len(blocks)
    for i, bp in enumerate(blocks):
        layers = resnet_block_layers(bp, g.Wc)
        if i == nb - 1:
            layers = layers + tail_layers
        data = _conv_chain_call(cv.data, g, layers,
                                pre=pre if i == 0 else None, pre_sign=pre_sign,
                                post=post if i == nb - 1 else None)
        cv = Canvas(data, g)
    return cv


def _d2s_recanvas(y_data, g, s):
    comp = depth_to_space(from_canvas(y_data, g), s)
    g2 = get_geom(g.n, g.H * s, g.W * s, 1)
    return Canvas(to_canvas(comp, g2), g2)


def deconv_block(cv, prep, k, s, pad, act=True, pre=None, pre_sign=-1.0):
    """ConvTranspose2d(k, s, pad) + optional PReLU (+ optional fused pre-combine)."""
    g = cv.g
    if "raw" not in prep:
        layer = make_layer(prep, g.Wc, act, False)
        y = _conv_chain_call(cv.data, g, [layer], pre=pre, pre_sign=pre_sign)
        return _d2s_recanvas(y, g, s)
    # TODO(synk): scale factors 4/8 fall back to zero-dilation (correct, not optimized).
    p = prep["raw"]
    data = cv.data
    if pre is not None:
        data = data + pre if pre_sign >= 0 else data - pre
    x = from_canvas(data, g)
    ci, n, H, W = x.shape
    Hd, Wd = (H - 1) * s + 1, (W - 1) * s + 1
    xd = jnp.zeros((ci, n, Hd, Wd), x.dtype).at[:, :, ::s, ::s].set(x)
    q = k - 1 - pad
    xpp = jnp.pad(xd, ((0, 0), (0, 0), (q, q), (q, q)))
    gg = get_geom(n, Hd + 2 * q, Wd + 2 * q, k - 1)
    co, cin = p["w"].shape[2], p["w"].shape[3]
    layer = dict(wf=fold_w(w_plain(p["w"][::-1, ::-1])),
                 b=p["b"].astype(jnp.float32).reshape(-1, 1), a=_alpha(p),
                 cin=cin, cout=co, ntaps=k * k,
                 shifts=conv_shifts(k, 0, gg.Wc), act=act, residual=False)
    y = _conv_chain_call(to_canvas(xpp, gg), gg, [layer])
    Ho, Wo = (H - 1) * s - 2 * pad + k, (W - 1) * s - 2 * pad + k
    comp = from_canvas(y, gg)[:, :, :Ho, :Wo]
    g2 = get_geom(n, Ho, Wo, 1)
    return Canvas(to_canvas(comp, g2), g2)


def strided_conv_block(cv, prep, k, s, pad, act=True, post=None):
    """Conv2d(k, stride=s, padding=pad) + optional PReLU (+ optional fused post-add)."""
    g = cv.g
    comp = from_canvas(cv.data, g)
    if "raw" not in prep:
        xs = space_to_depth(comp, s)
        g2 = get_geom(g.n, g.H // s, g.W // s, 1)
        layer = make_layer(prep, g2.Wc, act, False)
        out = _conv_chain_call(to_canvas(xs, g2), g2, [layer],
                               post=post.data if post is not None else None)
        return Canvas(out, g2)
    # TODO(synk): scale factors 4/8 fall back to full stride-1 conv + subsample.
    p = prep["raw"]
    ci, n, H, W = comp.shape
    bd = max(pad, k - 1 - pad)
    gg = get_geom(n, H, W, bd)
    co, cin = p["w"].shape[2], p["w"].shape[3]
    layer = dict(wf=fold_w(w_plain(p["w"])),
                 b=p["b"].astype(jnp.float32).reshape(-1, 1), a=_alpha(p),
                 cin=cin, cout=co, ntaps=k * k,
                 shifts=conv_shifts(k, pad, gg.Wc), act=act, residual=False)
    z = from_canvas(_conv_chain_call(to_canvas(comp, gg), gg, [layer]), gg)
    HO, WO = (H + 2 * pad - k) // s + 1, (W + 2 * pad - k) // s + 1
    out = z[:, :, 0:(HO - 1) * s + 1:s, 0:(WO - 1) * s + 1:s]
    g2 = get_geom(n, HO, WO, 1)
    data = to_canvas(out, g2)
    if post is not None:
        data = data + post.data
    return Canvas(data, g2)


# ---------------------------------------------------------------------------
# RBPN sub-modules.
# ---------------------------------------------------------------------------
def up_block(P, cv, scfg):
    k, s, pad = scfg
    h0 = deconv_block(cv, P["c1"], k, s, pad, act=True)
    l0 = strided_conv_block(h0, P["c2"], k, s, pad, act=True)
    # c3 input (l0 - x) fused into the deconv chain as a pre-combine.
    h1 = deconv_block(l0, P["c3"], k, s, pad, act=True, pre=cv.data, pre_sign=-1.0)
    return Canvas(h1.data + h0.data, h0.g)


def down_block(P, cv, scfg):
    k, s, pad = scfg
    l0 = strided_conv_block(cv, P["c1"], k, s, pad, act=True)
    h0 = deconv_block(l0, P["c2"], k, s, pad, act=True)
    diff = Canvas(h0.data - cv.data, cv.g)     # goes through s2d reindex anyway
    # output (l1 + l0) fused into the strided chain as a post-add.
    return strided_conv_block(diff, P["c3"], k, s, pad, act=True, post=l0)


def dbpn_forward(P, cv, scfg):
    x = conv_block(cv, P["feat"], act=True)            # 1x1 feature conv
    h1 = up_block(P["up1"], x, scfg)
    l1 = down_block(P["down1"], h1, scfg)
    h2 = up_block(P["up2"], l1, scfg)
    cat = Canvas(jnp.concatenate([h2.data, h1.data], axis=0), h1.g)
    return conv_block(cat, P["out"], act=False)


def misr_forward(P, cv, scfg):
    """MISR branch; `cv` may hold all T*B frames at once (batched)."""
    k, s, pad = scfg
    tail = P["tail"]
    if "raw" not in tail:
        tail_layer = make_layer(tail, cv.g.Wc, True, False)
        y = run_resblocks(cv, P["res"], [tail_layer])   # resblocks fused with deconv sub-kernels
        return _d2s_recanvas(y.data, y.g, s)
    cv2 = run_resblocks(cv, P["res"])
    return deconv_block(cv2, tail, k, s, pad, act=True)


def res_forward(P, cv, pre=None, post=None):
    """h = post + Net_res(cv - pre): pre-combine and post-add fused into the chain."""
    tail_layer = make_layer(P["tail"], cv.g.Wc, True, False)
    return run_resblocks(cv, P["res"], [tail_layer], pre=pre, pre_sign=-1.0, post=post)


def netd_forward(P, cv, scfg):
    k, s, pad = scfg
    cv = run_resblocks(cv, P["res"])
    return strided_conv_block(cv, P["tail"], k, s, pad, act=True)


def prepare_params(params, scfg):
    """Fold / cast all weights once so the recurrent T-loop reuses them."""
    k, s, pad = scfg

    def pres(blocks):
        return [dict(conv1=prep_conv(b["conv1"]), conv2=prep_conv(b["conv2"]))
                for b in blocks]

    def pproj(pp, kinds):
        return {name: prep_updown(pp[name], k, s, pad, kind)
                for name, kind in zip(("c1", "c2", "c3"), kinds)}

    return {
        "feat0": prep_conv(params["feat0"]),
        "feat1": prep_conv(params["feat1"]),
        "sisr": {"feat": prep_conv(params["sisr"]["feat"]),
                 "up1": pproj(params["sisr"]["up1"], ("deconv", "strided", "deconv")),
                 "down1": pproj(params["sisr"]["down1"], ("strided", "deconv", "strided")),
                 "up2": pproj(params["sisr"]["up2"], ("deconv", "strided", "deconv")),
                 "out": prep_conv(params["sisr"]["out"])},
        "misr": {"res": pres(params["misr"]["res"]),
                 "tail": prep_updown(params["misr"]["tail"], k, s, pad, "deconv")},
        "res": {"res": pres(params["res"]["res"]),
                "tail": prep_conv(params["res"]["tail"])},
        "netd": {"res": pres(params["netd"]["res"]),
                 "tail": prep_updown(params["netd"]["tail"], k, s, pad, "strided")},
        "out": prep_conv(params["out"]),
    }


# ---------------------------------------------------------------------------
# RBPN_Model.forward
# ---------------------------------------------------------------------------
def rbpn_forward(params, x_nchw, neighbor_nchw, cfg):
    sf = cfg["scale_factor"]
    scfg = {2: (6, 2, 2), 4: (8, 4, 2), 8: (12, 8, 2)}[sf]
    B, _, H, W = x_nchw.shape
    T = cfg["nFrames"] - 1

    P = prepare_params(params, scfg)                          # one-time weight prep

    x = jnp.transpose(x_nchw, (1, 0, 2, 3))                   # [3, B, H, W]
    nb = jnp.transpose(neighbor_nchw, (1, 2, 0, 3, 4))        # [T, 3, B, H, W]

    g_lo = get_geom(B, H, W, 1)
    g_lo_t = get_geom(T * B, H, W, 1)
    g_hi = get_geom(B, H * sf, W * sf, 1)

    feat_input = conv_block(Canvas(to_canvas(x, g_lo), g_lo), P["feat0"], act=True)

    # The T neighbor frames share feat1's weights -> one batched fused call.
    f1_in = jnp.concatenate([jnp.concatenate([x, nb[j]], axis=0) for j in range(T)], axis=1)
    f1 = conv_block(Canvas(to_canvas(f1_in, g_lo_t), g_lo_t), P["feat1"], act=True)

    # MISR is independent of the recurrent state -> run all T frames batched.
    h1_all = misr_forward(P["misr"], f1, scfg)                # [C_h, T*B*Hh*Wh canvas]
    h1_comp = from_canvas(h1_all.data, h1_all.g)              # [C_h, T*B, Hh, Wh]

    Ht = []
    for j in range(T):
        h0 = dbpn_forward(P["sisr"], feat_input, scfg)
        h1_j = to_canvas(h1_comp[:, j * B:(j + 1) * B], g_hi)
        # h = h0 + Net_res(h0 - h1): subtraction fused as pre-combine, the
        # final "+ h0" fused as post-add (reusing the chain input, no extra DMA).
        h = res_forward(P["res"], Canvas(h0.data, h0.g), pre=h1_j, post=h0.data)
        Ht.append(h)
        feat_input = netd_forward(P["netd"], h, scfg)

    out = Canvas(jnp.concatenate([c.data for c in Ht], axis=0), Ht[0].g)
    y = conv_block(out, P["out"], act=False)
    img = from_canvas(y.data, y.g).astype(jnp.float32)        # [3, B, sf*H, sf*W]
    return jnp.transpose(img, (1, 0, 2, 3))


# ---------------------------------------------------------------------------
# Parameter init (deterministic, kaiming-style normal, zero bias, PReLU 0.25).
# Weights are stored as [kh, kw, cout, cin]; exact torch init statistics /
# pretrained-weight loading are not reproduced (self-initialized network).
# ---------------------------------------------------------------------------
class KeyGen:
    def __init__(self, key):
        self.key = key

    def __call__(self):
        self.key, sub = jax.random.split(self.key)
        return sub


def init_conv(kg, cin, cout, k):
    std = (2.0 / (cin * k * k)) ** 0.5
    return {"w": jax.random.normal(kg(), (k, k, cout, cin), jnp.float32) * std,
            "b": jnp.zeros((cout, 1), jnp.float32),
            "a": jnp.asarray(0.25, jnp.float32)}


def init_resblock(kg, c):
    return {"conv1": init_conv(kg, c, c, 3), "conv2": init_conv(kg, c, c, 3)}


def init_params(key, cfg):
    kg = KeyGen(key)
    C_l, C_m, C_h = cfg["C_l"], cfg["C_m"], cfg["C_h"]
    nres, T = cfg["n_resblock"], cfg["nFrames"] - 1
    k = {2: 6, 4: 8, 8: 12}[cfg["scale_factor"]]

    def proj(c):
        return {"c1": init_conv(kg, c, c, k), "c2": init_conv(kg, c, c, k),
                "c3": init_conv(kg, c, c, k)}

    return {
        "feat0": init_conv(kg, 3, C_l, 3),
        "feat1": init_conv(kg, 6, C_m, 3),
        "sisr": {"feat": init_conv(kg, C_l, C_h, 1),
                 "up1": proj(C_h), "down1": proj(C_h), "up2": proj(C_h),
                 "out": init_conv(kg, 2 * C_h, C_h, 3)},
        "misr": {"res": [init_resblock(kg, C_m) for _ in range(nres)],
                 "tail": init_conv(kg, C_m, C_h, k)},
        "res": {"res": [init_resblock(kg, C_h) for _ in range(nres)],
                "tail": init_conv(kg, C_h, C_h, 3)},
        "netd": {"res": [init_resblock(kg, C_h) for _ in range(nres)],
                 "tail": init_conv(kg, C_h, C_l, k)},
        "out": init_conv(kg, T * C_h, 3, 3),
    }


# ---------------------------------------------------------------------------
if __name__ == "__main__":
    cfg = dict(scale_factor=2, C_l=8, C_m=8, C_h=8,
               DBPN_num_stages=2, n_resblock=1, nFrames=3)

    root = jax.random.PRNGKey(0)
    kp, kx, kn = jax.random.split(root, 3)

    params = init_params(kp, cfg)

    B, H, W = 2, 8, 8
    x = jax.random.normal(kx, (B, 3, H, W), jnp.float32)                          # NCHW
    neighbor = jax.random.normal(kn, (B, cfg["nFrames"] - 1, 3, H, W), jnp.float32)

    fwd = jax.jit(functools.partial(rbpn_forward, cfg=cfg))
    out = fwd(params, x, neighbor)
    jax.block_until_ready(out)

    assert out.shape == (B, 3, H * cfg["scale_factor"], W * cfg["scale_factor"]), out.shape
    assert bool(jnp.all(jnp.isfinite(out)))
    print("KERNEL_OK")
</pallas_src>

<mosaic_0001>
module attributes {stable_mosaic.version = 11 : i64} {
  func.func @kernel(%arg0: memref<3x512xbf16, #tpu.memory_space<vmem>>, %arg1: memref<1x256xf32, #tpu.memory_space<vmem>>, %arg2: memref<8x27xbf16, #tpu.memory_space<vmem>>, %arg3: memref<8x1xf32, #tpu.memory_space<vmem>>, %arg4: memref<1xf32, #tpu.memory_space<smem>>, %arg5: memref<8x512xbf16, #tpu.memory_space<vmem>>, %arg6: memref<27x256xbf16, #tpu.memory_space<vmem>>) attributes {dimension_semantics = [], scalar_prefetch = 0 : i64, scratch_operands = 1 : i64, tpu.core_type = #tpu.core_type<tc>} {
    %c0 = arith.constant 0 : index
    %c0_0 = arith.constant 0 : index
    %0 = vector.load %arg1[%c0, %c0_0] : memref<1x256xf32, #tpu.memory_space<vmem>>, vector<1x256xf32>
    %c0_1 = arith.constant 0 : index
    %c117 = arith.constant 117 : index
    %1 = vector.load %arg0[%c0_1, %c117] : memref<3x512xbf16, #tpu.memory_space<vmem>>, vector<3x256xbf16>
    %c0_2 = arith.constant 0 : index
    %c0_3 = arith.constant 0 : index
    %2 = vector.load %arg6[%c0_2, %c0_3] : memref<27x256xbf16, #tpu.memory_space<vmem>>, vector<3x256xbf16>
    tpu.vector_store %arg6[%c0_2, %c0_3], %1 {strides = array<i32>} : memref<27x256xbf16, #tpu.memory_space<vmem>>, vector<3x256xbf16>,
    %c0_4 = arith.constant 0 : index
    %c118 = arith.constant 118 : index
    %3 = vector.load %arg0[%c0_4, %c118] : memref<3x512xbf16, #tpu.memory_space<vmem>>, vector<3x256xbf16>
    %c3 = arith.constant 3 : index
    %c0_5 = arith.constant 0 : index
    %4 = vector.load %arg6[%c3, %c0_5] : memref<27x256xbf16, #tpu.memory_space<vmem>>, vector<3x256xbf16>
    tpu.vector_store %arg6[%c3, %c0_5], %3 {strides = array<i32>} : memref<27x256xbf16, #tpu.memory_space<vmem>>, vector<3x256xbf16>,
    %c0_6 = arith.constant 0 : index
    %c119 = arith.constant 119 : index
    %5 = vector.load %arg0[%c0_6, %c119] : memref<3x512xbf16, #tpu.memory_space<vmem>>, vector<3x256xbf16>
    %c6 = arith.constant 6 : index
    %c0_7 = arith.constant 0 : index
    %6 = vector.load %arg6[%c6, %c0_7] : memref<27x256xbf16, #tpu.memory_space<vmem>>, vector<3x256xbf16>
    tpu.vector_store %arg6[%c6, %c0_7], %5 {strides = array<i32>} : memref<27x256xbf16, #tpu.memory_space<vmem>>, vector<3x256xbf16>,
    %c0_8 = arith.constant 0 : index
    %c127 = arith.constant 127 : index
    %7 = vector.load %arg0[%c0_8, %c127] : memref<3x512xbf16, #tpu.memory_space<vmem>>, vector<3x256xbf16>
    %c9 = arith.constant 9 : index
    %c0_9 = arith.constant 0 : index
    %8 = vector.load %arg6[%c9, %c0_9] : memref<27x256xbf16, #tpu.memory_space<vmem>>, vector<3x256xbf16>
    tpu.vector_store %arg6[%c9, %c0_9], %7 {strides = array<i32>} : memref<27x256xbf16, #tpu.memory_space<vmem>>, vector<3x256xbf16>,
    %c0_10 = arith.constant 0 : index
    %c128 = arith.constant 128 : index
    %9 = vector.load %arg0[%c0_10, %c128] : memref<3x512xbf16, #tpu.memory_space<vmem>>, vector<3x256xbf16>
    %c12 = arith.constant 12 : index
    %c0_11 = arith.constant 0 : index
    %10 = vector.load %arg6[%c12, %c0_11] : memref<27x256xbf16, #tpu.memory_space<vmem>>, vector<3x256xbf16>
    tpu.vector_store %arg6[%c12, %c0_11], %9 {strides = array<i32>} : memref<27x256xbf16, #tpu.memory_space<vmem>>, vector<3x256xbf16>,
    %c0_12 = arith.constant 0 : index
    %c129 = arith.constant 129 : index
    %11 = vector.load %arg0[%c0_12, %c129] : memref<3x512xbf16, #tpu.memory_space<vmem>>, vector<3x256xbf16>
    %c15 = arith.constant 15 : index
    %c0_13 = arith.constant 0 : index
    %12 = vector.load %arg6[%c15, %c0_13] : memref<27x256xbf16, #tpu.memory_space<vmem>>, vector<3x256xbf16>
    tpu.vector_store %arg6[%c15, %c0_13], %11 {strides = array<i32>} : memref<27x256xbf16, #tpu.memory_space<vmem>>, vector<3x256xbf16>,
    %c0_14 = arith.constant 0 : index
    %c137 = arith.constant 137 : index
    %13 = vector.load %arg0[%c0_14, %c137] : memref<3x512xbf16, #tpu.memory_space<vmem>>, vector<3x256xbf16>
    %c18 = arith.constant 18 : index
    %c0_15 = arith.constant 0 : index
    %14 = vector.load %arg6[%c18, %c0_15] : memref<27x256xbf16, #tpu.memory_space<vmem>>, vector<3x256xbf16>
    tpu.vector_store %arg6[%c18, %c0_15], %13 {strides = array<i32>} : memref<27x256xbf16, #tpu.memory_space<vmem>>, vector<3x256xbf16>,
    %c0_16 = arith.constant 0 : index
    %c138 = arith.constant 138 : index
    %15 = vector.load %arg0[%c0_16, %c138] : memref<3x512xbf16, #tpu.memory_space<vmem>>, vector<3x256xbf16>
    %c21 = arith.constant 21 : index
    %c0_17 = arith.constant 0 : index
    %16 = vector.load %arg6[%c21, %c0_17] : memref<27x256xbf16, #tpu.memory_space<vmem>>, vector<3x256xbf16>
    tpu.vector_store %arg6[%c21, %c0_17], %15 {strides = array<i32>} : memref<27x256xbf16, #tpu.memory_space<vmem>>, vector<3x256xbf16>,
    %c0_18 = arith.constant 0 : index
    %c139 = arith.constant 139 : index
    %17 = vector.load %arg0[%c0_18, %c139] : memref<3x512xbf16, #tpu.memory_space<vmem>>, vector<3x256xbf16>
    %c24 = arith.constant 24 : index
    %c0_19 = arith.constant 0 : index
    %18 = vector.load %arg6[%c24, %c0_19] : memref<27x256xbf16, #tpu.memory_space<vmem>>, vector<3x256xbf16>
    tpu.vector_store %arg6[%c24, %c0_19], %17 {strides = array<i32>} : memref<27x256xbf16, #tpu.memory_space<vmem>>, vector<3x256xbf16>,
    %c0_20 = arith.constant 0 : index
    %c0_21 = arith.constant 0 : index
    %19 = vector.load %arg6[%c0_20, %c0_21] : memref<27x256xbf16, #tpu.memory_space<vmem>>, vector<27x256xbf16>
    %c0_22 = arith.constant 0 : index
    %c0_23 = arith.constant 0 : index
    %20 = vector.load %arg2[%c0_22, %c0_23] : memref<8x27xbf16, #tpu.memory_space<vmem>>, vector<8x27xbf16>
    %cst = arith.constant dense<0.000000e+00> : vector<8x256xf32>
    %21 = tpu.matmul %20, %19, %cst {dimension_numbers = #tpu.dot_dimension_numbers<[1], [0], [0], [1], [0, 0, 1, 1], [], []>} : vector<8x27xbf16>, vector<27x256xbf16>, vector<8x256xf32> -> vector<8x256xf32>
    %c0_24 = arith.constant 0 : index
    %c0_25 = arith.constant 0 : index
    %22 = vector.load %arg3[%c0_24, %c0_25] : memref<8x1xf32, #tpu.memory_space<vmem>>, vector<8x1xf32>
    %23 = vector.broadcast %22 : vector<8x1xf32> to vector<8x256xf32>
    %24 = arith.addf %21, %23 : vector<8x256xf32>
    %25 = vector.broadcast %0 : vector<1x256xf32> to vector<8x256xf32>
    %26 = arith.mulf %24, %25 : vector<8x256xf32>
    %c0_26 = arith.constant 0 : index
    %27 = memref.load %arg4[%c0_26] : memref<1xf32, #tpu.memory_space<smem>>
    %cst_27 = arith.constant 0.000000e+00 : f32
    %28 = vector.broadcast %cst_27 : f32 to vector<8x256xf32>
    %29 = arith.cmpf oge, %26, %28 : vector<8x256xf32>
    %30 = vector.broadcast %27 : f32 to vector<8x256xf32>
    %31 = arith.mulf %30, %26 : vector<8x256xf32>
    %32 = arith.select %29, %26, %31 : vector<8x256xi1>, vector<8x256xf32>
    %cst_28 = arith.constant 0.000000e+00 : bf16
    %33 = vector.broadcast %cst_28 : bf16 to vector<8x128xbf16>
    %c0_29 = arith.constant 0 : index
    %c0_30 = arith.constant 0 : index
    %34 = vector.load %arg5[%c0_29, %c0_30] : memref<8x512xbf16, #tpu.memory_space<vmem>>, vector<8x128xbf16>
    tpu.vector_store %arg5[%c0_29, %c0_30], %33 {strides = array<i32>} : memref<8x512xbf16, #tpu.memory_space<vmem>>, vector<8x128xbf16>,
    %35 = arith.truncf %32 : vector<8x256xf32> to vector<8x256xbf16>
    %c0_31 = arith.constant 0 : index
    %c128_32 = arith.constant 128 : index
    %36 = vector.load %arg5[%c0_31, %c128_32] : memref<8x512xbf16, #tpu.memory_space<vmem>>, vector<8x256xbf16>
    tpu.vector_store %arg5[%c0_31, %c128_32], %35 {strides = array<i32>} : memref<8x512xbf16, #tpu.memory_space<vmem>>, vector<8x256xbf16>,
    %cst_33 = arith.constant 0.000000e+00 : bf16
    %37 = vector.broadcast %cst_33 : bf16 to vector<8x128xbf16>
    %c0_34 = arith.constant 0 : index
    %c384 = arith.constant 384 : index
    %38 = vector.load %arg5[%c0_34, %c384] : memref<8x512xbf16, #tpu.memory_space<vmem>>, vector<8x128xbf16>
    tpu.vector_store %arg5[%c0_34, %c384], %37 {strides = array<i32>} : memref<8x512xbf16, #tpu.memory_space<vmem>>, vector<8x128xbf16>,
    return
  }
}

module attributes {stable_mosaic.version = 11 : i64} {
  func.func @kernel(%arg0: memref<8x512xbf16, #tpu.memory_space<vmem>>, %arg1: memref<1x256xf32, #tpu.memory_space<vmem>>, %arg2: memref<8x8xbf16, #tpu.memory_space<vmem>>, %arg3: memref<8x1xf32, #tpu.memory_space<vmem>>, %arg4: memref<1xf32, #tpu.memory_space<smem>>, %arg5: memref<8x512xbf16, #tpu.memory_space<vmem>>) attributes {dimension_semantics = [], scalar_prefetch = 0 : i64, scratch_operands = 0 : i64, tpu.core_type = #tpu.core_type<tc>} {
    %c0 = arith.constant 0 : index
    %c0_0 = arith.constant 0 : index
    %0 = vector.load %arg1[%c0, %c0_0] : memref<1x256xf32, #tpu.memory_space<vmem>>, vector<1x256xf32>
    %c0_1 = arith.constant 0 : index
    %c128 = arith.constant 128 : index
    %1 = vector.load %arg0[%c0_1, %c128] : memref<8x512xbf16, #tpu.memory_space<vmem>>, vector<8x256xbf16>
    %c0_2 = arith.constant 0 : index
    %c0_3 = arith.constant 0 : index
    %2 = vector.load %arg2[%c0_2, %c0_3] : memref<8x8xbf16, #tpu.memory_space<vmem>>, vector<8x8xbf16>
    %cst = arith.constant dense<0.000000e+00> : vector<8x256xf32>
    %3 = tpu.matmul %2, %1, %cst {dimension_numbers = #tpu.dot_dimension_numbers<[1], [0], [0], [1], [0, 0, 1, 1], [], []>} : vector<8x8xbf16>, vector<8x256xbf16>, vector<8x256xf32> -> vector<8x256xf32>
    %c0_4 = arith.constant 0 : index
    %c0_5 = arith.constant 0 : index
    %4 = vector.load %arg3[%c0_4, %c0_5] : memref<8x1xf32, #tpu.memory_space<vmem>>, vector<8x1xf32>
    %5 = vector.broadcast %4 : vector<8x1xf32> to vector<8x256xf32>
    %6 = arith.addf %3, %5 : vector<8x256xf32>
    %7 = vector.broadcast %0 : vector<1x256xf32> to vector<8x256xf32>
    %8 = arith.mulf %6, %7 : vector<8x256xf32>
    %c0_6 = arith.constant 0 : index
    %9 = memref.load %arg4[%c0_6] : memref<1xf32, #tpu.memory_space<smem>>
    %cst_7 = arith.constant 0.000000e+00 : f32
    %10 = vector.broadcast %cst_7 : f32 to vector<8x256xf32>
    %11 = arith.cmpf oge, %8, %10 : vector<8x256xf32>
    %12 = vector.broadcast %9 : f32 to vector<8x256xf32>
    %13 = arith.mulf %12, %8 : vector<8x256xf32>
    %14 = arith.select %11, %8, %13 : vector<8x256xi1>, vector<8x256xf32>
    %cst_8 = arith.constant 0.000000e+00 : bf16
    %15 = vector.broadcast %cst_8 : bf16 to vector<8x128xbf16>
    %c0_9 = arith.constant 0 : index
    %c0_10 = arith.constant 0 : index
    %16 = vector.load %arg5[%c0_9, %c0_10] : memref<8x512xbf16, #tpu.memory_space<vmem>>, vector<8x128xbf16>
    tpu.vector_store %arg5[%c0_9, %c0_10], %15 {strides = array<i32>} : memref<8x512xbf16, #tpu.memory_space<vmem>>, vector<8x128xbf16>,
    %17 = arith.truncf %14 : vector<8x256xf32> to vector<8x256xbf16>
    %c0_11 = arith.constant 0 : index
    %c128_12 = arith.constant 128 : index
    %18 = vector.load %arg5[%c0_11, %c128_12] : memref<8x512xbf16, #tpu.memory_space<vmem>>, vector<8x256xbf16>
    tpu.vector_store %arg5[%c0_11, %c128_12], %17 {strides = array<i32>} : memref<8x512xbf16, #tpu.memory_space<vmem>>, vector<8x256xbf16>,
    %cst_13 = arith.constant 0.000000e+00 : bf16
    %19 = vector.broadcast %cst_13 : bf16 to vector<8x128xbf16>
    %c0_14 = arith.constant 0 : index
    %c384 = arith.constant 384 : index
    %20 = vector.load %arg5[%c0_14, %c384] : memref<8x512xbf16, #tpu.memory_space<vmem>>, vector<8x128xbf16>
    tpu.vector_store %arg5[%c0_14, %c384], %19 {strides = array<i32>} : memref<8x512xbf16, #tpu.memory_space<vmem>>, vector<8x128xbf16>,
    return
  }
}

module attributes {stable_mosaic.version = 11 : i64} {
  func.func @kernel(%arg0: memref<8x512xbf16, #tpu.memory_space<vmem>>, %arg1: memref<1x256xf32, #tpu.memory_space<vmem>>, %arg2: memref<32x72xbf16, #tpu.memory_space<vmem>>, %arg3: memref<32x1xf32, #tpu.memory_space<vmem>>, %arg4: memref<1xf32, #tpu.memory_space<smem>>, %arg5: memref<32x512xbf16, #tpu.memory_space<vmem>>, %arg6: memref<72x256xbf16, #tpu.memory_space<vmem>>) attributes {dimension_semantics = [], scalar_prefetch = 0 : i64, scratch_operands = 1 : i64, tpu.core_type = #tpu.core_type<tc>} {
    %c0 = arith.constant 0 : index
    %c0_0 = arith.constant 0 : index
    %0 = vector.load %arg1[%c0, %c0_0] : memref<1x256xf32, #tpu.memory_space<vmem>>, vector<1x256xf32>
    %c0_1 = arith.constant 0 : index
    %c117 = arith.constant 117 : index
    %1 = vector.load %arg0[%c0_1, %c117] : memref<8x512xbf16, #tpu.memory_space<vmem>>, vector<8x256xbf16>
    %c0_2 = arith.constant 0 : index
    %c0_3 = arith.constant 0 : index
    %2 = vector.load %arg6[%c0_2, %c0_3] : memref<72x256xbf16, #tpu.memory_space<vmem>>, vector<8x256xbf16>
    tpu.vector_store %arg6[%c0_2, %c0_3], %1 {strides = array<i32>} : memref<72x256xbf16, #tpu.memory_space<vmem>>, vector<8x256xbf16>,
    %c0_4 = arith.constant 0 : index
    %c118 = arith.constant 118 : index
    %3 = vector.load %arg0[%c0_4, %c118] : memref<8x512xbf16, #tpu.memory_space<vmem>>, vector<8x256xbf16>
    %c8 = arith.constant 8 : index
    %c0_5 = arith.constant 0 : index
    %4 = vector.load %arg6[%c8, %c0_5] : memref<72x256xbf16, #tpu.memory_space<vmem>>, vector<8x256xbf16>
    tpu.vector_store %arg6[%c8, %c0_5], %3 {strides = array<i32>} : memref<72x256xbf16, #tpu.memory_space<vmem>>, vector<8x256xbf16>,
    %c0_6 = arith.constant 0 : index
    %c119 = arith.constant 119 : index
    %5 = vector.load %arg0[%c0_6, %c119] : memref<8x512xbf16, #tpu.memory_space<vmem>>, vector<8x256xbf16>
    %c16 = arith.constant 16 : index
    %c0_7 = arith.constant 0 : index
    %6 = vector.load %arg6[%c16, %c0_7] : memref<72x256xbf16, #tpu.memory_space<vmem>>, vector<8x256xbf16>
    tpu.vector_store %arg6[%c16, %c0_7], %5 {strides = array<i32>} : memref<72x256xbf16, #tpu.memory_space<vmem>>, vector<8x256xbf16>,
    %c0_8 = arith.constant 0 : index
    %c127 = arith.constant 127 : index
    %7 = vector.load %arg0[%c0_8, %c127] : memref<8x512xbf16, #tpu.memory_space<vmem>>, vector<8x256xbf16>
    %c24 = arith.constant 24 : index
    %c0_9 = arith.constant 0 : index
    %8 = vector.load %arg6[%c24, %c0_9] : memref<72x256xbf16, #tpu.memory_space<vmem>>, vector<8x256xbf16>
    tpu.vector_store %arg6[%c24, %c0_9], %7 {strides = array<i32>} : memref<72x256xbf16, #tpu.memory_space<vmem>>, vector<8x256xbf16>,
    %c0_10 = arith.constant 0 : index
    %c128 = arith.constant 128 : index
    %9 = vector.load %arg0[%c0_10, %c128] : memref<8x512xbf16, #tpu.memory_space<vmem>>, vector<8x256xbf16>
    %c32 = arith.constant 32 : index
    %c0_11 = arith.constant 0 : index
    %10 = vector.load %arg6[%c32, %c0_11] : memref<72x256xbf16, #tpu.memory_space<vmem>>, vector<8x256xbf16>
    tpu.vector_store %arg6[%c32, %c0_11], %9 {strides = array<i32>} : memref<72x256xbf16, #tpu.memory_space<vmem>>, vector<8x256xbf16>,
    %c0_12 = arith.constant 0 : index
    %c129 = arith.constant 129 : index
    %11 = vector.load %arg0[%c0_12, %c129] : memref<8x512xbf16, #tpu.memory_space<vmem>>, vector<8x256xbf16>
    %c40 = arith.constant 40 : index
    %c0_13 = arith.constant 0 : index
    %12 = vector.load %arg6[%c40, %c0_13] : memref<72x256xbf16, #tpu.memory_space<vmem>>, vector<8x256xbf16>
    tpu.vector_store %arg6[%c40, %c0_13], %11 {strides = array<i32>} : memref<72x256xbf16, #tpu.memory_space<vmem>>, vector<8x256xbf16>,
    %c0_14 = arith.constant 0 : index
    %c137 = arith.constant 137 : index
    %13 = vector.load %arg0[%c0_14, %c137] : memref<8x512xbf16, #tpu.memory_space<vmem>>, vector<8x256xbf16>
    %c48 = arith.constant 48 : index
    %c0_15 = arith.constant 0 : index
    %14 = vector.load %arg6[%c48, %c0_15] : memref<72x256xbf16, #tpu.memory_space<vmem>>, vector<8x256xbf16>
    tpu.vector_store %arg6[%c48, %c0_15], %13 {strides = array<i32>} : memref<72x256xbf16, #tpu.memory_space<vmem>>, vector<8x256xbf16>,
    %c0_16 = arith.constant 0 : index
    %c138 = arith.constant 138 : index
    %15 = vector.load %arg0[%c0_16, %c138] : memref<8x512xbf16, #tpu.memory_space<vmem>>, vector<8x256xbf16>
    %c56 = arith.constant 56 : index
    %c0_17 = arith.constant 0 : index
    %16 = vector.load %arg6[%c56, %c0_17] : memref<72x256xbf16, #tpu.memory_space<vmem>>, vector<8x256xbf16>
    tpu.vector_store %arg6[%c56, %c0_17], %15 {strides = array<i32>} : memref<72x256xbf16, #tpu.memory_space<vmem>>, vector<8x256xbf16>,
    %c0_18 = arith.constant 0 : index
    %c139 = arith.constant 139 : index
    %17 = vector.load %arg0[%c0_18, %c139] : memref<8x512xbf16, #tpu.memory_space<vmem>>, vector<8x256xbf16>
    %c64 = arith.constant 64 : index
    %c0_19 = arith.constant 0 : index
    %18 = vector.load %arg6[%c64, %c0_19] : memref<72x256xbf16, #tpu.memory_space<vmem>>, vector<8x256xbf16>
    tpu.vector_store %arg6[%c64, %c0_19], %17 {strides = array<i32>} : memref<72x256xbf16, #tpu.memory_space<vmem>>, vector<8x256xbf16>,
    %c0_20 = arith.constant 0 : index
    %c0_21 = arith.constant 0 : index
    %19 = vector.load %arg6[%c0_20, %c0_21] : memref<72x256xbf16, #tpu.memory_space<vmem>>, vector<72x256xbf16>
    %c0_22 = arith.constant 0 : index
    %c0_23 = arith.constant 0 : index
    %20 = vector.load %arg2[%c0_22, %c0_23] : memref<32x72xbf16, #tpu.memory_space<vmem>>, vector<32x72xbf16>
    %cst = arith.constant dense<0.000000e+00> : vector<32x256xf32>
    %21 = tpu.matmul %20, %19, %cst {dimension_numbers = #tpu.dot_dimension_numbers<[1], [0], [0], [1], [0, 0, 1, 1], [], []>} : vector<32x72xbf16>, vector<72x256xbf16>, vector<32x256xf32> -> vector<32x256xf32>
    %c0_24 = arith.constant 0 : index
    %c0_25 = arith.constant 0 : index
    %22 = vector.load %arg3[%c0_24, %c0_25] : memref<32x1xf32, #tpu.memory_space<vmem>>, vector<32x1xf32>
    %23 = vector.broadcast %22 : vector<32x1xf32> to vector<32x256xf32>
    %24 = arith.addf %21, %23 : vector<32x256xf32>
    %25 = vector.broadcast %0 : vector<1x256xf32> to vector<32x256xf32>
    %26 = arith.mulf %24, %25 : vector<32x256xf32>
    %c0_26 = arith.constant 0 : index
    %27 = memref.load %arg4[%c0_26] : memref<1xf32, #tpu.memory_space<smem>>
    %cst_27 = arith.constant 0.000000e+00 : f32
    %28 = vector.broadcast %cst_27 : f32 to vector<32x256xf32>
    %29 = arith.cmpf oge, %26, %28 : vector<32x256xf32>
    %30 = vector.broadcast %27 : f32 to vector<32x256xf32>
    %31 = arith.mulf %30, %26 : vector<32x256xf32>
    %32 = arith.select %29, %26, %31 : vector<32x256xi1>, vector<32x256xf32>
    %cst_28 = arith.constant 0.000000e+00 : bf16
    %33 = vector.broadcast %cst_28 : bf16 to vector<32x128xbf16>
    %c0_29 = arith.constant 0 : index
    %c0_30 = arith.constant 0 : index
    %34 = vector.load %arg5[%c0_29, %c0_30] : memref<32x512xbf16, #tpu.memory_space<vmem>>, vector<32x128xbf16>
    tpu.vector_store %arg5[%c0_29, %c0_30], %33 {strides = array<i32>} : memref<32x512xbf16, #tpu.memory_space<vmem>>, vector<32x128xbf16>,
    %35 = arith.truncf %32 : vector<32x256xf32> to vector<32x256xbf16>
    %c0_31 = arith.constant 0 : index
    %c128_32 = arith.constant 128 : index
    %36 = vector.load %arg5[%c0_31, %c128_32] : memref<32x512xbf16, #tpu.memory_space<vmem>>, vector<32x256xbf16>
    tpu.vector_store %arg5[%c0_31, %c128_32], %35 {strides = array<i32>} : memref<32x512xbf16, #tpu.memory_space<vmem>>, vector<32x256xbf16>,
    %cst_33 = arith.constant 0.000000e+00 : bf16
    %37 = vector.broadcast %cst_33 : bf16 to vector<32x128xbf16>
    %c0_34 = arith.constant 0 : index
    %c384 = arith.constant 384 : index
    %38 = vector.load %arg5[%c0_34, %c384] : memref<32x512xbf16, #tpu.memory_space<vmem>>, vector<32x128xbf16>
    tpu.vector_store %arg5[%c0_34, %c384], %37 {strides = array<i32>} : memref<32x512xbf16, #tpu.memory_space<vmem>>, vector<32x128xbf16>,
    return
  }
}

module attributes {stable_mosaic.version = 11 : i64} {
  func.func @kernel(%arg0: memref<32x512xbf16, #tpu.memory_space<vmem>>, %arg1: memref<1x256xf32, #tpu.memory_space<vmem>>, %arg2: memref<8x288xbf16, #tpu.memory_space<vmem>>, %arg3: memref<8x1xf32, #tpu.memory_space<vmem>>, %arg4: memref<1xf32, #tpu.memory_space<smem>>, %arg5: memref<8x512xbf16, #tpu.memory_space<vmem>>, %arg6: memref<288x256xbf16, #tpu.memory_space<vmem>>) attributes {dimension_semantics = [], scalar_prefetch = 0 : i64, scratch_operands = 1 : i64, tpu.core_type = #tpu.core_type<tc>} {
    %c0 = arith.constant 0 : index
    %c0_0 = arith.constant 0 : index
    %0 = vector.load %arg1[%c0, %c0_0] : memref<1x256xf32, #tpu.memory_space<vmem>>, vector<1x256xf32>
    %c0_1 = arith.constant 0 : index
    %c117 = arith.constant 117 : index
    %1 = vector.load %arg0[%c0_1, %c117] : memref<32x512xbf16, #tpu.memory_space<vmem>>, vector<32x256xbf16>
    %c0_2 = arith.constant 0 : index
    %c0_3 = arith.constant 0 : index
    %2 = vector.load %arg6[%c0_2, %c0_3] : memref<288x256xbf16, #tpu.memory_space<vmem>>, vector<32x256xbf16>
    tpu.vector_store %arg6[%c0_2, %c0_3], %1 {strides = array<i32>} : memref<288x256xbf16, #tpu.memory_space<vmem>>, vector<32x256xbf16>,
    %c0_4 = arith.constant 0 : index
    %c118 = arith.constant 118 : index
    %3 = vector.load %arg0[%c0_4, %c118] : memref<32x512xbf16, #tpu.memory_space<vmem>>, vector<32x256xbf16>
    %c32 = arith.constant 32 : index
    %c0_5 = arith.constant 0 : index
    %4 = vector.load %arg6[%c32, %c0_5] : memref<288x256xbf16, #tpu.memory_space<vmem>>, vector<32x256xbf16>
    tpu.vector_store %arg6[%c32, %c0_5], %3 {strides = array<i32>} : memref<288x256xbf16, #tpu.memory_space<vmem>>, vector<32x256xbf16>,
    %c0_6 = arith.constant 0 : index
    %c119 = arith.constant 119 : index
    %5 = vector.load %arg0[%c0_6, %c119] : memref<32x512xbf16, #tpu.memory_space<vmem>>, vector<32x256xbf16>
    %c64 = arith.constant 64 : index
    %c0_7 = arith.constant 0 : index
    %6 = vector.load %arg6[%c64, %c0_7] : memref<288x256xbf16, #tpu.memory_space<vmem>>, vector<32x256xbf16>
    tpu.vector_store %arg6[%c64, %c0_7], %5 {strides = array<i32>} : memref<288x256xbf16, #tpu.memory_space<vmem>>, vector<32x256xbf16>,
    %c0_8 = arith.constant 0 : index
    %c127 = arith.constant 127 : index
    %7 = vector.load %arg0[%c0_8, %c127] : memref<32x512xbf16, #tpu.memory_space<vmem>>, vector<32x256xbf16>
    %c96 = arith.constant 96 : index
    %c0_9 = arith.constant 0 : index
    %8 = vector.load %arg6[%c96, %c0_9] : memref<288x256xbf16, #tpu.memory_space<vmem>>, vector<32x256xbf16>
    tpu.vector_store %arg6[%c96, %c0_9], %7 {strides = array<i32>} : memref<288x256xbf16, #tpu.memory_space<vmem>>, vector<32x256xbf16>,
    %c0_10 = arith.constant 0 : index
    %c128 = arith.constant 128 : index
    %9 = vector.load %arg0[%c0_10, %c128] : memref<32x512xbf16, #tpu.memory_space<vmem>>, vector<32x256xbf16>
    %c128_11 = arith.constant 128 : index
    %c0_12 = arith.constant 0 : index
    %10 = vector.load %arg6[%c128_11, %c0_12] : memref<288x256xbf16, #tpu.memory_space<vmem>>, vector<32x256xbf16>
    tpu.vector_store %arg6[%c128_11, %c0_12], %9 {strides = array<i32>} : memref<288x256xbf16, #tpu.memory_space<vmem>>, vector<32x256xbf16>,
    %c0_13 = arith.constant 0 : index
    %c129 = arith.constant 129 : index
    %11 = vector.load %arg0[%c0_13, %c129] : memref<32x512xbf16, #tpu.memory_space<vmem>>, vector<32x256xbf16>
    %c160 = arith.constant 160 : index
    %c0_14 = arith.constant 0 : index
    %12 = vector.load %arg6[%c160, %c0_14] : memref<288x256xbf16, #tpu.memory_space<vmem>>, vector<32x256xbf16>
    tpu.vector_store %arg6[%c160, %c0_14], %11 {strides = array<i32>} : memref<288x256xbf16, #tpu.memory_space<vmem>>, vector<32x256xbf16>,
    %c0_15 = arith.constant 0 : index
    %c137 = arith.constant 137 : index
    %13 = vector.load %arg0[%c0_15, %c137] : memref<32x512xbf16, #tpu.memory_space<vmem>>, vector<32x256xbf16>
    %c192 = arith.constant 192 : index
    %c0_16 = arith.constant 0 : index
    %14 = vector.load %arg6[%c192, %c0_16] : memref<288x256xbf16, #tpu.memory_space<vmem>>, vector<32x256xbf16>
    tpu.vector_store %arg6[%c192, %c0_16], %13 {strides = array<i32>} : memref<288x256xbf16, #tpu.memory_space<vmem>>, vector<32x256xbf16>,
    %c0_17 = arith.constant 0 : index
    %c138 = arith.constant 138 : index
    %15 = vector.load %arg0[%c0_17, %c138] : memref<32x512xbf16, #tpu.memory_space<vmem>>, vector<32x256xbf16>
    %c224 = arith.constant 224 : index
    %c0_18 = arith.constant 0 : index
    %16 = vector.load %arg6[%c224, %c0_18] : memref<288x256xbf16, #tpu.memory_space<vmem>>, vector<32x256xbf16>
    tpu.vector_store %arg6[%c224, %c0_18], %15 {strides = array<i32>} : memref<288x256xbf16, #tpu.memory_space<vmem>>, vector<32x256xbf16>,
    %c0_19 = arith.constant 0 : index
    %c139 = arith.constant 139 : index
    %17 = vector.load %arg0[%c0_19, %c139] : memref<32x512xbf16, #tpu.memory_space<vmem>>, vector<32x256xbf16>
    %c256 = arith.constant 256 : index
    %c0_20 = arith.constant 0 : index
    %18 = vector.load %arg6[%c256, %c0_20] : memref<288x256xbf16, #tpu.memory_space<vmem>>, vector<32x256xbf16>
    tpu.vector_store %arg6[%c256, %c0_20], %17 {strides = array<i32>} : memref<288x256xbf16, #tpu.memory_space<vmem>>, vector<32x256xbf16>,
    %c0_21 = arith.constant 0 : index
    %c0_22 = arith.constant 0 : index
    %19 = vector.load %arg6[%c0_21, %c0_22] : memref<288x256xbf16, #tpu.memory_space<vmem>>, vector<288x256xbf16>
    %c0_23 = arith.constant 0 : index
    %c0_24 = arith.constant 0 : index
    %20 = vector.load %arg2[%c0_23, %c0_24] : memref<8x288xbf16, #tpu.memory_space<vmem>>, vector<8x288xbf16>
    %cst = arith.constant dense<0.000000e+00> : vector<8x256xf32>
    %21 = tpu.matmul %20, %19, %cst {dimension_numbers = #tpu.dot_dimension_numbers<[1], [0], [0], [1], [0, 0, 1, 1], [], []>} : vector<8x288xbf16>, vector<288x256xbf16>, vector<8x256xf32> -> vector<8x256xf32>
    %c0_25 = arith.constant 0 : index
    %c0_26 = arith.constant 0 : index
    %22 = vector.load %arg3[%c0_25, %c0_26] : memref<8x1xf32, #tpu.memory_space<vmem>>, vector<8x1xf32>
    %23 = vector.broadcast %22 : vector<8x1xf32> to vector<8x256xf32>
    %24 = arith.addf %21, %23 : vector<8x256xf32>
    %25 = vector.broadcast %0 : vector<1x256xf32> to vector<8x256xf32>
    %26 = arith.mulf %24, %25 : vector<8x256xf32>
    %c0_27 = arith.constant 0 : index
    %27 = memref.load %arg4[%c0_27] : memref<1xf32, #tpu.memory_space<smem>>
    %cst_28 = arith.constant 0.000000e+00 : f32
    %28 = vector.broadcast %cst_28 : f32 to vector<8x256xf32>
    %29 = arith.cmpf oge, %26, %28 : vector<8x256xf32>
    %30 = vector.broadcast %27 : f32 to vector<8x256xf32>
    %31 = arith.mulf %30, %26 : vector<8x256xf32>
    %32 = arith.select %29, %26, %31 : vector<8x256xi1>, vector<8x256xf32>
    %cst_29 = arith.constant 0.000000e+00 : bf16
    %33 = vector.broadcast %cst_29 : bf16 to vector<8x128xbf16>
    %c0_30 = arith.constant 0 : index
    %c0_31 = arith.constant 0 : index
    %34 = vector.load %arg5[%c0_30, %c0_31] : memref<8x512xbf16, #tpu.memory_space<vmem>>, vector<8x128xbf16>
    tpu.vector_store %arg5[%c0_30, %c0_31], %33 {strides = array<i32>} : memref<8x512xbf16, #tpu.memory_space<vmem>>, vector<8x128xbf16>,
    %35 = arith.truncf %32 : vector<8x256xf32> to vector<8x256xbf16>
    %c0_32 = arith.constant 0 : index
    %c128_33 = arith.constant 128 : index
    %36 = vector.load %arg5[%c0_32, %c128_33] : memref<8x512xbf16, #tpu.memory_space<vmem>>, vector<8x256xbf16>
    tpu.vector_store %arg5[%c0_32, %c128_33], %35 {strides = array<i32>} : memref<8x512xbf16, #tpu.memory_space<vmem>>, vector<8x256xbf16>,
    %cst_34 = arith.constant 0.000000e+00 : bf16
    %37 = vector.broadcast %cst_34 : bf16 to vector<8x128xbf16>
    %c0_35 = arith.constant 0 : index
    %c384 = arith.constant 384 : index
    %38 = vector.load %arg5[%c0_35, %c384] : memref<8x512xbf16, #tpu.memory_space<vmem>>, vector<8x128xbf16>
    tpu.vector_store %arg5[%c0_35, %c384], %37 {strides = array<i32>} : memref<8x512xbf16, #tpu.memory_space<vmem>>, vector<8x128xbf16>,
    return
  }
}

module attributes {stable_mosaic.version = 11 : i64} {
  func.func @kernel(%arg0: memref<8x512xbf16, #tpu.memory_space<vmem>>, %arg1: memref<1x256xf32, #tpu.memory_space<vmem>>, %arg2: memref<8x512xbf16, #tpu.memory_space<vmem>>, %arg3: memref<32x72xbf16, #tpu.memory_space<vmem>>, %arg4: memref<32x1xf32, #tpu.memory_space<vmem>>, %arg5: memref<1xf32, #tpu.memory_space<smem>>, %arg6: memref<32x512xbf16, #tpu.memory_space<vmem>>, %arg7: memref<72x256xbf16, #tpu.memory_space<vmem>>, %arg8: memref<8x512xbf16, #tpu.memory_space<vmem>>) attributes {dimension_semantics = [], scalar_prefetch = 0 : i64, scratch_operands = 2 : i64, tpu.core_type = #tpu.core_type<tc>} {
    %c0 = arith.constant 0 : index
    %c0_0 = arith.constant 0 : index
    %0 = vector.load %arg1[%c0, %c0_0] : memref<1x256xf32, #tpu.memory_space<vmem>>, vector<1x256xf32>
    %c0_1 = arith.constant 0 : index
    %c0_2 = arith.constant 0 : index
    %1 = vector.load %arg0[%c0_1, %c0_2] : memref<8x512xbf16, #tpu.memory_space<vmem>>, vector<8x512xbf16>
    %c0_3 = arith.constant 0 : index
    %c0_4 = arith.constant 0 : index
    %2 = vector.load %arg2[%c0_3, %c0_4] : memref<8x512xbf16, #tpu.memory_space<vmem>>, vector<8x512xbf16>
    %3 = arith.subf %1, %2 : vector<8x512xbf16>
    %c0_5 = arith.constant 0 : index
    %c0_6 = arith.constant 0 : index
    %4 = vector.load %arg8[%c0_5, %c0_6] : memref<8x512xbf16, #tpu.memory_space<vmem>>, vector<8x512xbf16>
    tpu.vector_store %arg8[%c0_5, %c0_6], %3 {strides = array<i32>} : memref<8x512xbf16, #tpu.memory_space<vmem>>, vector<8x512xbf16>,
    %c0_7 = arith.constant 0 : index
    %c117 = arith.constant 117 : index
    %5 = vector.load %arg8[%c0_7, %c117] : memref<8x512xbf16, #tpu.memory_space<vmem>>, vector<8x256xbf16>
    %c0_8 = arith.constant 0 : index
    %c0_9 = arith.constant 0 : index
    %6 = vector.load %arg7[%c0_8, %c0_9] : memref<72x256xbf16, #tpu.memory_space<vmem>>, vector<8x256xbf16>
    tpu.vector_store %arg7[%c0_8, %c0_9], %5 {strides = array<i32>} : memref<72x256xbf16, #tpu.memory_space<vmem>>, vector<8x256xbf16>,
    %c0_10 = arith.constant 0 : index
    %c118 = arith.constant 118 : index
    %7 = vector.load %arg8[%c0_10, %c118] : memref<8x512xbf16, #tpu.memory_space<vmem>>, vector<8x256xbf16>
    %c8 = arith.constant 8 : index
    %c0_11 = arith.constant 0 : index
    %8 = vector.load %arg7[%c8, %c0_11] : memref<72x256xbf16, #tpu.memory_space<vmem>>, vector<8x256xbf16>
    tpu.vector_store %arg7[%c8, %c0_11], %7 {strides = array<i32>} : memref<72x256xbf16, #tpu.memory_space<vmem>>, vector<8x256xbf16>,
    %c0_12 = arith.constant 0 : index
    %c119 = arith.constant 119 : index
    %9 = vector.load %arg8[%c0_12, %c119] : memref<8x512xbf16, #tpu.memory_space<vmem>>, vector<8x256xbf16>
    %c16 = arith.constant 16 : index
    %c0_13 = arith.constant 0 : index
    %10 = vector.load %arg7[%c16, %c0_13] : memref<72x256xbf16, #tpu.memory_space<vmem>>, vector<8x256xbf16>
    tpu.vector_store %arg7[%c16, %c0_13], %9 {strides = array<i32>} : memref<72x256xbf16, #tpu.memory_space<vmem>>, vector<8x256xbf16>,
    %c0_14 = arith.constant 0 : index
    %c127 = arith.constant 127 : index
    %11 = vector.load %arg8[%c0_14, %c127] : memref<8x512xbf16, #tpu.memory_space<vmem>>, vector<8x256xbf16>
    %c24 = arith.constant 24 : index
    %c0_15 = arith.constant 0 : index
    %12 = vector.load %arg7[%c24, %c0_15] : memref<72x256xbf16, #tpu.memory_space<vmem>>, vector<8x256xbf16>
    tpu.vector_store %arg7[%c24, %c0_15], %11 {strides = array<i32>} : memref<72x256xbf16, #tpu.memory_space<vmem>>, vector<8x256xbf16>,
    %c0_16 = arith.constant 0 : index
    %c128 = arith.constant 128 : index
    %13 = vector.load %arg8[%c0_16, %c128] : memref<8x512xbf16, #tpu.memory_space<vmem>>, vector<8x256xbf16>
    %c32 = arith.constant 32 : index
    %c0_17 = arith.constant 0 : index
    %14 = vector.load %arg7[%c32, %c0_17] : memref<72x256xbf16, #tpu.memory_space<vmem>>, vector<8x256xbf16>
    tpu.vector_store %arg7[%c32, %c0_17], %13 {strides = array<i32>} : memref<72x256xbf16, #tpu.memory_space<vmem>>, vector<8x256xbf16>,
    %c0_18 = arith.constant 0 : index
    %c129 = arith.constant 129 : index
    %15 = vector.load %arg8[%c0_18, %c129] : memref<8x512xbf16, #tpu.memory_space<vmem>>, vector<8x256xbf16>
    %c40 = arith.constant 40 : index
    %c0_19 = arith.constant 0 : index
    %16 = vector.load %arg7[%c40, %c0_19] : memref<72x256xbf16, #tpu.memory_space<vmem>>, vector<8x256xbf16>
    tpu.vector_store %arg7[%c40, %c0_19], %15 {strides = array<i32>} : memref<72x256xbf16, #tpu.memory_space<vmem>>, vector<8x256xbf16>,
    %c0_20 = arith.constant 0 : index
    %c137 = arith.constant 137 : index
    %17 = vector.load %arg8[%c0_20, %c137] : memref<8x512xbf16, #tpu.memory_space<vmem>>, vector<8x256xbf16>
    %c48 = arith.constant 48 : index
    %c0_21 = arith.constant 0 : index
    %18 = vector.load %arg7[%c48, %c0_21] : memref<72x256xbf16, #tpu.memory_space<vmem>>, vector<8x256xbf16>
    tpu.vector_store %arg7[%c48, %c0_21], %17 {strides = array<i32>} : memref<72x256xbf16, #tpu.memory_space<vmem>>, vector<8x256xbf16>,
    %c0_22 = arith.constant 0 : index
    %c138 = arith.constant 138 : index
    %19 = vector.load %arg8[%c0_22, %c138] : memref<8x512xbf16, #tpu.memory_space<vmem>>, vector<8x256xbf16>
    %c56 = arith.constant 56 : index
    %c0_23 = arith.constant 0 : index
    %20 = vector.load %arg7[%c56, %c0_23] : memref<72x256xbf16, #tpu.memory_space<vmem>>, vector<8x256xbf16>
    tpu.vector_store %arg7[%c56, %c0_23], %19 {strides = array<i32>} : memref<72x256xbf16, #tpu.memory_space<vmem>>, vector<8x256xbf16>,
    %c0_24 = arith.constant 0 : index
    %c139 = arith.constant 139 : index
    %21 = vector.load %arg8[%c0_24, %c139] : memref<8x512xbf16, #tpu.memory_space<vmem>>, vector<8x256xbf16>
    %c64 = arith.constant 64 : index
    %c0_25 = arith.constant 0 : index
    %22 = vector.load %arg7[%c64, %c0_25] : memref<72x256xbf16, #tpu.memory_space<vmem>>, vector<8x256xbf16>
    tpu.vector_store %arg7[%c64, %c0_25], %21 {strides = array<i32>} : memref<72x256xbf16, #tpu.memory_space<vmem>>, vector<8x256xbf16>,
    %c0_26 = arith.constant 0 : index
    %c0_27 = arith.constant 0 : index
    %23 = vector.load %arg7[%c0_26, %c0_27] : memref<72x256xbf16, #tpu.memory_space<vmem>>, vector<72x256xbf16>
    %c0_28 = arith.constant 0 : index
    %c0_29 = arith.constant 0 : index
    %24 = vector.load %arg3[%c0_28, %c0_29] : memref<32x72xbf16, #tpu.memory_space<vmem>>, vector<32x72xbf16>
    %cst = arith.constant dense<0.000000e+00> : vector<32x256xf32>
    %25 = tpu.matmul %24, %23, %cst {dimension_numbers = #tpu.dot_dimension_numbers<[1], [0], [0], [1], [0, 0, 1, 1], [], []>} : vector<32x72xbf16>, vector<72x256xbf16>, vector<32x256xf32> -> vector<32x256xf32>
    %c0_30 = arith.constant 0 : index
    %c0_31 = arith.constant 0 : index
    %26 = vector.load %arg4[%c0_30, %c0_31] : memref<32x1xf32, #tpu.memory_space<vmem>>, vector<32x1xf32>
    %27 = vector.broadcast %26 : vector<32x1xf32> to vector<32x256xf32>
    %28 = arith.addf %25, %27 : vector<32x256xf32>
    %29 = vector.broadcast %0 : vector<1x256xf32> to vector<32x256xf32>
    %30 = arith.mulf %28, %29 : vector<32x256xf32>
    %c0_32 = arith.constant 0 : index
    %31 = memref.load %arg5[%c0_32] : memref<1xf32, #tpu.memory_space<smem>>
    %cst_33 = arith.constant 0.000000e+00 : f32
    %32 = vector.broadcast %cst_33 : f32 to vector<32x256xf32>
    %33 = arith.cmpf oge, %30, %32 : vector<32x256xf32>
    %34 = vector.broadcast %31 : f32 to vector<32x256xf32>
    %35 = arith.mulf %34, %30 : vector<32x256xf32>
    %36 = arith.select %33, %30, %35 : vector<32x256xi1>, vector<32x256xf32>
    %cst_34 = arith.constant 0.000000e+00 : bf16
    %37 = vector.broadcast %cst_34 : bf16 to vector<32x128xbf16>
    %c0_35 = arith.constant 0 : index
    %c0_36 = arith.constant 0 : index
    %38 = vector.load %arg6[%c0_35, %c0_36] : memref<32x512xbf16, #tpu.memory_space<vmem>>, vector<32x128xbf16>
    tpu.vector_store %arg6[%c0_35, %c0_36], %37 {strides = array<i32>} : memref<32x512xbf16, #tpu.memory_space<vmem>>, vector<32x128xbf16>,
    %39 = arith.truncf %36 : vector<32x256xf32> to vector<32x256xbf16>
    %c0_37 = arith.constant 0 : index
    %c128_38 = arith.constant 128 : index
    %40 = vector.load %arg6[%c0_37, %c128_38] : memref<32x512xbf16, #tpu.memory_space<vmem>>, vector<32x256xbf16>
    tpu.vector_store %arg6[%c0_37, %c128_38], %39 {strides = array<i32>} : memref<32x512xbf16, #tpu.memory_space<vmem>>, vector<32x256xbf16>,
    %cst_39 = arith.constant 0.000000e+00 : bf16
    %41 = vector.broadcast %cst_39 : bf16 to vector<32x128xbf16>
    %c0_40 = arith.constant 0 : index
    %c384 = arith.constant 384 : index
    %42 = vector.load %arg6[%c0_40, %c384] : memref<32x512xbf16, #tpu.memory_space<vmem>>, vector<32x128xbf16>
    tpu.vector_store %arg6[%c0_40, %c384], %41 {strides = array<i32>} : memref<32x512xbf16, #tpu.memory_space<vmem>>, vector<32x128xbf16>,
    return
  }
}

module attributes {stable_mosaic.version = 11 : i64} {
  func.func @kernel(%arg0: memref<32x512xbf16, #tpu.memory_space<vmem>>, %arg1: memref<1x256xf32, #tpu.memory_space<vmem>>, %arg2: memref<8x512xbf16, #tpu.memory_space<vmem>>, %arg3: memref<8x288xbf16, #tpu.memory_space<vmem>>, %arg4: memref<8x1xf32, #tpu.memory_space<vmem>>, %arg5: memref<1xf32, #tpu.memory_space<smem>>, %arg6: memref<8x512xbf16, #tpu.memory_space<vmem>>, %arg7: memref<288x256xbf16, #tpu.memory_space<vmem>>) attributes {dimension_semantics = [], scalar_prefetch = 0 : i64, scratch_operands = 1 : i64, tpu.core_type = #tpu.core_type<tc>} {
    %c0 = arith.constant 0 : index
    %c0_0 = arith.constant 0 : index
    %0 = vector.load %arg1[%c0, %c0_0] : memref<1x256xf32, #tpu.memory_space<vmem>>, vector<1x256xf32>
    %c0_1 = arith.constant 0 : index
    %c117 = arith.constant 117 : index
    %1 = vector.load %arg0[%c0_1, %c117] : memref<32x512xbf16, #tpu.memory_space<vmem>>, vector<32x256xbf16>
    %c0_2 = arith.constant 0 : index
    %c0_3 = arith.constant 0 : index
    %2 = vector.load %arg7[%c0_2, %c0_3] : memref<288x256xbf16, #tpu.memory_space<vmem>>, vector<32x256xbf16>
    tpu.vector_store %arg7[%c0_2, %c0_3], %1 {strides = array<i32>} : memref<288x256xbf16, #tpu.memory_space<vmem>>, vector<32x256xbf16>,
    %c0_4 = arith.constant 0 : index
    %c118 = arith.constant 118 : index
    %3 = vector.load %arg0[%c0_4, %c118] : memref<32x512xbf16, #tpu.memory_space<vmem>>, vector<32x256xbf16>
    %c32 = arith.constant 32 : index
    %c0_5 = arith.constant 0 : index
    %4 = vector.load %arg7[%c32, %c0_5] : memref<288x256xbf16, #tpu.memory_space<vmem>>, vector<32x256xbf16>
    tpu.vector_store %arg7[%c32, %c0_5], %3 {strides = array<i32>} : memref<288x256xbf16, #tpu.memory_space<vmem>>, vector<32x256xbf16>,
    %c0_6 = arith.constant 0 : index
    %c119 = arith.constant 119 : index
    %5 = vector.load %arg0[%c0_6, %c119] : memref<32x512xbf16, #tpu.memory_space<vmem>>, vector<32x256xbf16>
    %c64 = arith.constant 64 : index
    %c0_7 = arith.constant 0 : index
    %6 = vector.load %arg7[%c64, %c0_7] : memref<288x256xbf16, #tpu.memory_space<vmem>>, vector<32x256xbf16>
    tpu.vector_store %arg7[%c64, %c0_7], %5 {strides = array<i32>} : memref<288x256xbf16, #tpu.memory_space<vmem>>, vector<32x256xbf16>,
    %c0_8 = arith.constant 0 : index
    %c127 = arith.constant 127 : index
    %7 = vector.load %arg0[%c0_8, %c127] : memref<32x512xbf16, #tpu.memory_space<vmem>>, vector<32x256xbf16>
    %c96 = arith.constant 96 : index
    %c0_9 = arith.constant 0 : index
    %8 = vector.load %arg7[%c96, %c0_9] : memref<288x256xbf16, #tpu.memory_space<vmem>>, vector<32x256xbf16>
    tpu.vector_store %arg7[%c96, %c0_9], %7 {strides = array<i32>} : memref<288x256xbf16, #tpu.memory_space<vmem>>, vector<32x256xbf16>,
    %c0_10 = arith.constant 0 : index
    %c128 = arith.constant 128 : index
    %9 = vector.load %arg0[%c0_10, %c128] : memref<32x512xbf16, #tpu.memory_space<vmem>>, vector<32x256xbf16>
    %c128_11 = arith.constant 128 : index
    %c0_12 = arith.constant 0 : index
    %10 = vector.load %arg7[%c128_11, %c0_12] : memref<288x256xbf16, #tpu.memory_space<vmem>>, vector<32x256xbf16>
    tpu.vector_store %arg7[%c128_11, %c0_12], %9 {strides = array<i32>} : memref<288x256xbf16, #tpu.memory_space<vmem>>, vector<32x256xbf16>,
    %c0_13 = arith.constant 0 : index
    %c129 = arith.constant 129 : index
    %11 = vector.load %arg0[%c0_13, %c129] : memref<32x512xbf16, #tpu.memory_space<vmem>>, vector<32x256xbf16>
    %c160 = arith.constant 160 : index
    %c0_14 = arith.constant 0 : index
    %12 = vector.load %arg7[%c160, %c0_14] : memref<288x256xbf16, #tpu.memory_space<vmem>>, vector<32x256xbf16>
    tpu.vector_store %arg7[%c160, %c0_14], %11 {strides = array<i32>} : memref<288x256xbf16, #tpu.memory_space<vmem>>, vector<32x256xbf16>,
    %c0_15 = arith.constant 0 : index
    %c137 = arith.constant 137 : index
    %13 = vector.load %arg0[%c0_15, %c137] : memref<32x512xbf16, #tpu.memory_space<vmem>>, vector<32x256xbf16>
    %c192 = arith.constant 192 : index
    %c0_16 = arith.constant 0 : index
    %14 = vector.load %arg7[%c192, %c0_16] : memref<288x256xbf16, #tpu.memory_space<vmem>>, vector<32x256xbf16>
    tpu.vector_store %arg7[%c192, %c0_16], %13 {strides = array<i32>} : memref<288x256xbf16, #tpu.memory_space<vmem>>, vector<32x256xbf16>,
    %c0_17 = arith.constant 0 : index
    %c138 = arith.constant 138 : index
    %15 = vector.load %arg0[%c0_17, %c138] : memref<32x512xbf16, #tpu.memory_space<vmem>>, vector<32x256xbf16>
    %c224 = arith.constant 224 : index
    %c0_18 = arith.constant 0 : index
    %16 = vector.load %arg7[%c224, %c0_18] : memref<288x256xbf16, #tpu.memory_space<vmem>>, vector<32x256xbf16>
    tpu.vector_store %arg7[%c224, %c0_18], %15 {strides = array<i32>} : memref<288x256xbf16, #tpu.memory_space<vmem>>, vector<32x256xbf16>,
    %c0_19 = arith.constant 0 : index
    %c139 = arith.constant 139 : index
    %17 = vector.load %arg0[%c0_19, %c139] : memref<32x512xbf16, #tpu.memory_space<vmem>>, vector<32x256xbf16>
    %c256 = arith.constant 256 : index
    %c0_20 = arith.constant 0 : index
    %18 = vector.load %arg7[%c256, %c0_20] : memref<288x256xbf16, #tpu.memory_space<vmem>>, vector<32x256xbf16>
    tpu.vector_store %arg7[%c256, %c0_20], %17 {strides = array<i32>} : memref<288x256xbf16, #tpu.memory_space<vmem>>, vector<32x256xbf16>,
    %c0_21 = arith.constant 0 : index
    %c0_22 = arith.constant 0 : index
    %19 = vector.load %arg7[%c0_21, %c0_22] : memref<288x256xbf16, #tpu.memory_space<vmem>>, vector<288x256xbf16>
    %c0_23 = arith.constant 0 : index
    %c0_24 = arith.constant 0 : index
    %20 = vector.load %arg3[%c0_23, %c0_24] : memref<8x288xbf16, #tpu.memory_space<vmem>>, vector<8x288xbf16>
    %cst = arith.constant dense<0.000000e+00> : vector<8x256xf32>
    %21 = tpu.matmul %20, %19, %cst {dimension_numbers = #tpu.dot_dimension_numbers<[1], [0], [0], [1], [0, 0, 1, 1], [], []>} : vector<8x288xbf16>, vector<288x256xbf16>, vector<8x256xf32> -> vector<8x256xf32>
    %c0_25 = arith.constant 0 : index
    %c0_26 = arith.constant 0 : index
    %22 = vector.load %arg4[%c0_25, %c0_26] : memref<8x1xf32, #tpu.memory_space<vmem>>, vector<8x1xf32>
    %23 = vector.broadcast %22 : vector<8x1xf32> to vector<8x256xf32>
    %24 = arith.addf %21, %23 : vector<8x256xf32>
    %25 = vector.broadcast %0 : vector<1x256xf32> to vector<8x256xf32>
    %26 = arith.mulf %24, %25 : vector<8x256xf32>
    %c0_27 = arith.constant 0 : index
    %27 = memref.load %arg5[%c0_27] : memref<1xf32, #tpu.memory_space<smem>>
    %cst_28 = arith.constant 0.000000e+00 : f32
    %28 = vector.broadcast %cst_28 : f32 to vector<8x256xf32>
    %29 = arith.cmpf oge, %26, %28 : vector<8x256xf32>
    %30 = vector.broadcast %27 : f32 to vector<8x256xf32>
    %31 = arith.mulf %30, %26 : vector<8x256xf32>
    %32 = arith.select %29, %26, %31 : vector<8x256xi1>, vector<8x256xf32>
    %c0_29 = arith.constant 0 : index
    %c128_30 = arith.constant 128 : index
    %33 = vector.load %arg2[%c0_29, %c128_30] : memref<8x512xbf16, #tpu.memory_space<vmem>>, vector<8x256xbf16>
    %34 = arith.extf %33 : vector<8x256xbf16> to vector<8x256xf32>
    %35 = arith.addf %32, %34 : vector<8x256xf32>
    %cst_31 = arith.constant 0.000000e+00 : bf16
    %36 = vector.broadcast %cst_31 : bf16 to vector<8x128xbf16>
    %c0_32 = arith.constant 0 : index
    %c0_33 = arith.constant 0 : index
    %37 = vector.load %arg6[%c0_32, %c0_33] : memref<8x512xbf16, #tpu.memory_space<vmem>>, vector<8x128xbf16>
    tpu.vector_store %arg6[%c0_32, %c0_33], %36 {strides = array<i32>} : memref<8x512xbf16, #tpu.memory_space<vmem>>, vector<8x128xbf16>,
    %38 = arith.truncf %35 : vector<8x256xf32> to vector<8x256xbf16>
    %c0_34 = arith.constant 0 : index
    %c128_35 = arith.constant 128 : index
    %39 = vector.load %arg6[%c0_34, %c128_35] : memref<8x512xbf16, #tpu.memory_space<vmem>>, vector<8x256xbf16>
    tpu.vector_store %arg6[%c0_34, %c128_35], %38 {strides = array<i32>} : memref<8x512xbf16, #tpu.memory_space<vmem>>, vector<8x256xbf16>,
    %cst_36 = arith.constant 0.000000e+00 : bf16
    %40 = vector.broadcast %cst_36 : bf16 to vector<8x128xbf16>
    %c0_37 = arith.constant 0 : index
    %c384 = arith.constant 384 : index
    %41 = vector.load %arg6[%c0_37, %c384] : memref<8x512xbf16, #tpu.memory_space<vmem>>, vector<8x128xbf16>
    tpu.vector_store %arg6[%c0_37, %c384], %40 {strides = array<i32>} : memref<8x512xbf16, #tpu.memory_space<vmem>>, vector<8x128xbf16>,
    return
  }
}

module attributes {stable_mosaic.version = 11 : i64} {
  func.func @kernel(%arg0: memref<16x1024xbf16, #tpu.memory_space<vmem>>, %arg1: memref<1x768xf32, #tpu.memory_space<vmem>>, %arg2: memref<8x144xbf16, #tpu.memory_space<vmem>>, %arg3: memref<8x1xf32, #tpu.memory_space<vmem>>, %arg4: memref<1xf32, #tpu.memory_space<smem>>, %arg5: memref<8x1024xbf16, #tpu.memory_space<vmem>>, %arg6: memref<144x768xbf16, #tpu.memory_space<vmem>>) attributes {dimension_semantics = [], scalar_prefetch = 0 : i64, scratch_operands = 1 : i64, tpu.core_type = #tpu.core_type<tc>} {
    %c0 = arith.constant 0 : index
    %c0_0 = arith.constant 0 : index
    %0 = vector.load %arg1[%c0, %c0_0] : memref<1x768xf32, #tpu.memory_space<vmem>>, vector<1x768xf32>
    %c0_1 = arith.constant 0 : index
    %c109 = arith.constant 109 : index
    %1 = vector.load %arg0[%c0_1, %c109] : memref<16x1024xbf16, #tpu.memory_space<vmem>>, vector<16x768xbf16>
    %c0_2 = arith.constant 0 : index
    %c0_3 = arith.constant 0 : index
    %2 = vector.load %arg6[%c0_2, %c0_3] : memref<144x768xbf16, #tpu.memory_space<vmem>>, vector<16x768xbf16>
    tpu.vector_store %arg6[%c0_2, %c0_3], %1 {strides = array<i32>} : memref<144x768xbf16, #tpu.memory_space<vmem>>, vector<16x768xbf16>,
    %c0_4 = arith.constant 0 : index
    %c110 = arith.constant 110 : index
    %3 = vector.load %arg0[%c0_4, %c110] : memref<16x1024xbf16, #tpu.memory_space<vmem>>, vector<16x768xbf16>
    %c16 = arith.constant 16 : index
    %c0_5 = arith.constant 0 : index
    %4 = vector.load %arg6[%c16, %c0_5] : memref<144x768xbf16, #tpu.memory_space<vmem>>, vector<16x768xbf16>
    tpu.vector_store %arg6[%c16, %c0_5], %3 {strides = array<i32>} : memref<144x768xbf16, #tpu.memory_space<vmem>>, vector<16x768xbf16>,
    %c0_6 = arith.constant 0 : index
    %c111 = arith.constant 111 : index
    %5 = vector.load %arg0[%c0_6, %c111] : memref<16x1024xbf16, #tpu.memory_space<vmem>>, vector<16x768xbf16>
    %c32 = arith.constant 32 : index
    %c0_7 = arith.constant 0 : index
    %6 = vector.load %arg6[%c32, %c0_7] : memref<144x768xbf16, #tpu.memory_space<vmem>>, vector<16x768xbf16>
    tpu.vector_store %arg6[%c32, %c0_7], %5 {strides = array<i32>} : memref<144x768xbf16, #tpu.memory_space<vmem>>, vector<16x768xbf16>,
    %c0_8 = arith.constant 0 : index
    %c127 = arith.constant 127 : index
    %7 = vector.load %arg0[%c0_8, %c127] : memref<16x1024xbf16, #tpu.memory_space<vmem>>, vector<16x768xbf16>
    %c48 = arith.constant 48 : index
    %c0_9 = arith.constant 0 : index
    %8 = vector.load %arg6[%c48, %c0_9] : memref<144x768xbf16, #tpu.memory_space<vmem>>, vector<16x768xbf16>
    tpu.vector_store %arg6[%c48, %c0_9], %7 {strides = array<i32>} : memref<144x768xbf16, #tpu.memory_space<vmem>>, vector<16x768xbf16>,
    %c0_10 = arith.constant 0 : index
    %c128 = arith.constant 128 : index
    %9 = vector.load %arg0[%c0_10, %c128] : memref<16x1024xbf16, #tpu.memory_space<vmem>>, vector<16x768xbf16>
    %c64 = arith.constant 64 : index
    %c0_11 = arith.constant 0 : index
    %10 = vector.load %arg6[%c64, %c0_11] : memref<144x768xbf16, #tpu.memory_space<vmem>>, vector<16x768xbf16>
    tpu.vector_store %arg6[%c64, %c0_11], %9 {strides = array<i32>} : memref<144x768xbf16, #tpu.memory_space<vmem>>, vector<16x768xbf16>,
    %c0_12 = arith.constant 0 : index
    %c129 = arith.constant 129 : index
    %11 = vector.load %arg0[%c0_12, %c129] : memref<16x1024xbf16, #tpu.memory_space<vmem>>, vector<16x768xbf16>
    %c80 = arith.constant 80 : index
    %c0_13 = arith.constant 0 : index
    %12 = vector.load %arg6[%c80, %c0_13] : memref<144x768xbf16, #tpu.memory_space<vmem>>, vector<16x768xbf16>
    tpu.vector_store %arg6[%c80, %c0_13], %11 {strides = array<i32>} : memref<144x768xbf16, #tpu.memory_space<vmem>>, vector<16x768xbf16>,
    %c0_14 = arith.constant 0 : index
    %c145 = arith.constant 145 : index
    %13 = vector.load %arg0[%c0_14, %c145] : memref<16x1024xbf16, #tpu.memory_space<vmem>>, vector<16x768xbf16>
    %c96 = arith.constant 96 : index
    %c0_15 = arith.constant 0 : index
    %14 = vector.load %arg6[%c96, %c0_15] : memref<144x768xbf16, #tpu.memory_space<vmem>>, vector<16x768xbf16>
    tpu.vector_store %arg6[%c96, %c0_15], %13 {strides = array<i32>} : memref<144x768xbf16, #tpu.memory_space<vmem>>, vector<16x768xbf16>,
    %c0_16 = arith.constant 0 : index
    %c146 = arith.constant 146 : index
    %15 = vector.load %arg0[%c0_16, %c146] : memref<16x1024xbf16, #tpu.memory_space<vmem>>, vector<16x768xbf16>
    %c112 = arith.constant 112 : index
    %c0_17 = arith.constant 0 : index
    %16 = vector.load %arg6[%c112, %c0_17] : memref<144x768xbf16, #tpu.memory_space<vmem>>, vector<16x768xbf16>
    tpu.vector_store %arg6[%c112, %c0_17], %15 {strides = array<i32>} : memref<144x768xbf16, #tpu.memory_space<vmem>>, vector<16x768xbf16>,
    %c0_18 = arith.constant 0 : index
    %c147 = arith.constant 147 : index
    %17 = vector.load %arg0[%c0_18, %c147] : memref<16x1024xbf16, #tpu.memory_space<vmem>>, vector<16x768xbf16>
    %c128_19 = arith.constant 128 : index
    %c0_20 = arith.constant 0 : index
    %18 = vector.load %arg6[%c128_19, %c0_20] : memref<144x768xbf16, #tpu.memory_space<vmem>>, vector<16x768xbf16>
    tpu.vector_store %arg6[%c128_19, %c0_20], %17 {strides = array<i32>} : memref<144x768xbf16, #tpu.memory_space<vmem>>, vector<16x768xbf16>,
    %c0_21 = arith.constant 0 : index
    %c0_22 = arith.constant 0 : index
    %19 = vector.load %arg6[%c0_21, %c0_22] : memref<144x768xbf16, #tpu.memory_space<vmem>>, vector<144x768xbf16>
    %c0_23 = arith.constant 0 : index
    %c0_24 = arith.constant 0 : index
    %20 = vector.load %arg2[%c0_23, %c0_24] : memref<8x144xbf16, #tpu.memory_space<vmem>>, vector<8x144xbf16>
    %cst = arith.constant dense<0.000000e+00> : vector<8x768xf32>
    %21 = tpu.matmul %20, %19, %cst {dimension_numbers = #tpu.dot_dimension_numbers<[1], [0], [0], [1], [0, 0, 1, 1], [], []>} : vector<8x144xbf16>, vector<144x768xbf16>, vector<8x768xf32> -> vector<8x768xf32>
    %c0_25 = arith.constant 0 : index
    %c0_26 = arith.constant 0 : index
    %22 = vector.load %arg3[%c0_25, %c0_26] : memref<8x1xf32, #tpu.memory_space<vmem>>, vector<8x1xf32>
    %23 = vector.broadcast %22 : vector<8x1xf32> to vector<8x768xf32>
    %24 = arith.addf %21, %23 : vector<8x768xf32>
    %25 = vector.broadcast %0 : vector<1x768xf32> to vector<8x768xf32>
    %26 = arith.mulf %24, %25 : vector<8x768xf32>
    %cst_27 = arith.constant 0.000000e+00 : bf16
    %27 = vector.broadcast %cst_27 : bf16 to vector<8x128xbf16>
    %c0_28 = arith.constant 0 : index
    %c0_29 = arith.constant 0 : index
    %28 = vector.load %arg5[%c0_28, %c0_29] : memref<8x1024xbf16, #tpu.memory_space<vmem>>, vector<8x128xbf16>
    tpu.vector_store %arg5[%c0_28, %c0_29], %27 {strides = array<i32>} : memref<8x1024xbf16, #tpu.memory_space<vmem>>, vector<8x128xbf16>,
    %29 = arith.truncf %26 : vector<8x768xf32> to vector<8x768xbf16>
    %c0_30 = arith.constant 0 : index
    %c128_31 = arith.constant 128 : index
    %30 = vector.load %arg5[%c0_30, %c128_31] : memref<8x1024xbf16, #tpu.memory_space<vmem>>, vector<8x768xbf16>
    tpu.vector_store %arg5[%c0_30, %c128_31], %29 {strides = array<i32>} : memref<8x1024xbf16, #tpu.memory_space<vmem>>, vector<8x768xbf16>,
    %cst_32 = arith.constant 0.000000e+00 : bf16
    %31 = vector.broadcast %cst_32 : bf16 to vector<8x128xbf16>
    %c0_33 = arith.constant 0 : index
    %c896 = arith.constant 896 : index
    %32 = vector.load %arg5[%c0_33, %c896] : memref<8x1024xbf16, #tpu.memory_space<vmem>>, vector<8x128xbf16>
    tpu.vector_store %arg5[%c0_33, %c896], %31 {strides = array<i32>} : memref<8x1024xbf16, #tpu.memory_space<vmem>>, vector<8x128xbf16>,
    return
  }
}

module attributes {stable_mosaic.version = 11 : i64} {
  func.func @kernel(%arg0: memref<6x768xbf16, #tpu.memory_space<vmem>>, %arg1: memref<1x512xf32, #tpu.memory_space<vmem>>, %arg2: memref<8x54xbf16, #tpu.memory_space<vmem>>, %arg3: memref<8x1xf32, #tpu.memory_space<vmem>>, %arg4: memref<1xf32, #tpu.memory_space<smem>>, %arg5: memref<8x768xbf16, #tpu.memory_space<vmem>>, %arg6: memref<54x512xbf16, #tpu.memory_space<vmem>>) attributes {dimension_semantics = [], scalar_prefetch = 0 : i64, scratch_operands = 1 : i64, tpu.core_type = #tpu.core_type<tc>} {
    %c0 = arith.constant 0 : index
    %c0_0 = arith.constant 0 : index
    %0 = vector.load %arg1[%c0, %c0_0] : memref<1x512xf32, #tpu.memory_space<vmem>>, vector<1x512xf32>
    %c0_1 = arith.constant 0 : index
    %c117 = arith.constant 117 : index
    %1 = vector.load %arg0[%c0_1, %c117] : memref<6x768xbf16, #tpu.memory_space<vmem>>, vector<6x512xbf16>
    %c0_2 = arith.constant 0 : index
    %c0_3 = arith.constant 0 : index
    %2 = vector.load %arg6[%c0_2, %c0_3] : memref<54x512xbf16, #tpu.memory_space<vmem>>, vector<6x512xbf16>
    tpu.vector_store %arg6[%c0_2, %c0_3], %1 {strides = array<i32>} : memref<54x512xbf16, #tpu.memory_space<vmem>>, vector<6x512xbf16>,
    %c0_4 = arith.constant 0 : index
    %c118 = arith.constant 118 : index
    %3 = vector.load %arg0[%c0_4, %c118] : memref<6x768xbf16, #tpu.memory_space<vmem>>, vector<6x512xbf16>
    %c6 = arith.constant 6 : index
    %c0_5 = arith.constant 0 : index
    %4 = vector.load %arg6[%c6, %c0_5] : memref<54x512xbf16, #tpu.memory_space<vmem>>, vector<6x512xbf16>
    tpu.vector_store %arg6[%c6, %c0_5], %3 {strides = array<i32>} : memref<54x512xbf16, #tpu.memory_space<vmem>>, vector<6x512xbf16>,
    %c0_6 = arith.constant 0 : index
    %c119 = arith.constant 119 : index
    %5 = vector.load %arg0[%c0_6, %c119] : memref<6x768xbf16, #tpu.memory_space<vmem>>, vector<6x512xbf16>
    %c12 = arith.constant 12 : index
    %c0_7 = arith.constant 0 : index
    %6 = vector.load %arg6[%c12, %c0_7] : memref<54x512xbf16, #tpu.memory_space<vmem>>, vector<6x512xbf16>
    tpu.vector_store %arg6[%c12, %c0_7], %5 {strides = array<i32>} : memref<54x512xbf16, #tpu.memory_space<vmem>>, vector<6x512xbf16>,
    %c0_8 = arith.constant 0 : index
    %c127 = arith.constant 127 : index
    %7 = vector.load %arg0[%c0_8, %c127] : memref<6x768xbf16, #tpu.memory_space<vmem>>, vector<6x512xbf16>
    %c18 = arith.constant 18 : index
    %c0_9 = arith.constant 0 : index
    %8 = vector.load %arg6[%c18, %c0_9] : memref<54x512xbf16, #tpu.memory_space<vmem>>, vector<6x512xbf16>
    tpu.vector_store %arg6[%c18, %c0_9], %7 {strides = array<i32>} : memref<54x512xbf16, #tpu.memory_space<vmem>>, vector<6x512xbf16>,
    %c0_10 = arith.constant 0 : index
    %c128 = arith.constant 128 : index
    %9 = vector.load %arg0[%c0_10, %c128] : memref<6x768xbf16, #tpu.memory_space<vmem>>, vector<6x512xbf16>
    %c24 = arith.constant 24 : index
    %c0_11 = arith.constant 0 : index
    %10 = vector.load %arg6[%c24, %c0_11] : memref<54x512xbf16, #tpu.memory_space<vmem>>, vector<6x512xbf16>
    tpu.vector_store %arg6[%c24, %c0_11], %9 {strides = array<i32>} : memref<54x512xbf16, #tpu.memory_space<vmem>>, vector<6x512xbf16>,
    %c0_12 = arith.constant 0 : index
    %c129 = arith.constant 129 : index
    %11 = vector.load %arg0[%c0_12, %c129] : memref<6x768xbf16, #tpu.memory_space<vmem>>, vector<6x512xbf16>
    %c30 = arith.constant 30 : index
    %c0_13 = arith.constant 0 : index
    %12 = vector.load %arg6[%c30, %c0_13] : memref<54x512xbf16, #tpu.memory_space<vmem>>, vector<6x512xbf16>
    tpu.vector_store %arg6[%c30, %c0_13], %11 {strides = array<i32>} : memref<54x512xbf16, #tpu.memory_space<vmem>>, vector<6x512xbf16>,
    %c0_14 = arith.constant 0 : index
    %c137 = arith.constant 137 : index
    %13 = vector.load %arg0[%c0_14, %c137] : memref<6x768xbf16, #tpu.memory_space<vmem>>, vector<6x512xbf16>
    %c36 = arith.constant 36 : index
    %c0_15 = arith.constant 0 : index
    %14 = vector.load %arg6[%c36, %c0_15] : memref<54x512xbf16, #tpu.memory_space<vmem>>, vector<6x512xbf16>
    tpu.vector_store %arg6[%c36, %c0_15], %13 {strides = array<i32>} : memref<54x512xbf16, #tpu.memory_space<vmem>>, vector<6x512xbf16>,
    %c0_16 = arith.constant 0 : index
    %c138 = arith.constant 138 : index
    %15 = vector.load %arg0[%c0_16, %c138] : memref<6x768xbf16, #tpu.memory_space<vmem>>, vector<6x512xbf16>
    %c42 = arith.constant 42 : index
    %c0_17 = arith.constant 0 : index
    %16 = vector.load %arg6[%c42, %c0_17] : memref<54x512xbf16, #tpu.memory_space<vmem>>, vector<6x512xbf16>
    tpu.vector_store %arg6[%c42, %c0_17], %15 {strides = array<i32>} : memref<54x512xbf16, #tpu.memory_space<vmem>>, vector<6x512xbf16>,
    %c0_18 = arith.constant 0 : index
    %c139 = arith.constant 139 : index
    %17 = vector.load %arg0[%c0_18, %c139] : memref<6x768xbf16, #tpu.memory_space<vmem>>, vector<6x512xbf16>
    %c48 = arith.constant 48 : index
    %c0_19 = arith.constant 0 : index
    %18 = vector.load %arg6[%c48, %c0_19] : memref<54x512xbf16, #tpu.memory_space<vmem>>, vector<6x512xbf16>
    tpu.vector_store %arg6[%c48, %c0_19], %17 {strides = array<i32>} : memref<54x512xbf16, #tpu.memory_space<vmem>>, vector<6x512xbf16>,
    %c0_20 = arith.constant 0 : index
    %c0_21 = arith.constant 0 : index
    %19 = vector.load %arg6[%c0_20, %c0_21] : memref<54x512xbf16, #tpu.memory_space<vmem>>, vector<54x512xbf16>
    %c0_22 = arith.constant 0 : index
    %c0_23 = arith.constant 0 : index
    %20 = vector.load %arg2[%c0_22, %c0_23] : memref<8x54xbf16, #tpu.memory_space<vmem>>, vector<8x54xbf16>
    %cst = arith.constant dense<0.000000e+00> : vector<8x512xf32>
    %21 = tpu.matmul %20, %19, %cst {dimension_numbers = #tpu.dot_dimension_numbers<[1], [0], [0], [1], [0, 0, 1, 1], [], []>} : vector<8x54xbf16>, vector<54x512xbf16>, vector<8x512xf32> -> vector<8x512xf32>
    %c0_24 = arith.constant 0 : index
    %c0_25 = arith.constant 0 : index
    %22 = vector.load %arg3[%c0_24, %c0_25] : memref<8x1xf32, #tpu.memory_space<vmem>>, vector<8x1xf32>
    %23 = vector.broadcast %22 : vector<8x1xf32> to vector<8x512xf32>
    %24 = arith.addf %21, %23 : vector<8x512xf32>
    %25 = vector.broadcast %0 : vector<1x512xf32> to vector<8x512xf32>
    %26 = arith.mulf %24, %25 : vector<8x512xf32>
    %c0_26 = arith.constant 0 : index
    %27 = memref.load %arg4[%c0_26] : memref<1xf32, #tpu.memory_space<smem>>
    %cst_27 = arith.constant 0.000000e+00 : f32
    %28 = vector.broadcast %cst_27 : f32 to vector<8x512xf32>
    %29 = arith.cmpf oge, %26, %28 : vector<8x512xf32>
    %30 = vector.broadcast %27 : f32 to vector<8x512xf32>
    %31 = arith.mulf %30, %26 : vector<8x512xf32>
    %32 = arith.select %29, %26, %31 : vector<8x512xi1>, vector<8x512xf32>
    %cst_28 = arith.constant 0.000000e+00 : bf16
    %33 = vector.broadcast %cst_28 : bf16 to vector<8x128xbf16>
    %c0_29 = arith.constant 0 : index
    %c0_30 = arith.constant 0 : index
    %34 = vector.load %arg5[%c0_29, %c0_30] : memref<8x768xbf16, #tpu.memory_space<vmem>>, vector<8x128xbf16>
    tpu.vector_store %arg5[%c0_29, %c0_30], %33 {strides = array<i32>} : memref<8x768xbf16, #tpu.memory_space<vmem>>, vector<8x128xbf16>,
    %35 = arith.truncf %32 : vector<8x512xf32> to vector<8x512xbf16>
    %c0_31 = arith.constant 0 : index
    %c128_32 = arith.constant 128 : index
    %36 = vector.load %arg5[%c0_31, %c128_32] : memref<8x768xbf16, #tpu.memory_space<vmem>>, vector<8x512xbf16>
    tpu.vector_store %arg5[%c0_31, %c128_32], %35 {strides = array<i32>} : memref<8x768xbf16, #tpu.memory_space<vmem>>, vector<8x512xbf16>,
    %cst_33 = arith.constant 0.000000e+00 : bf16
    %37 = vector.broadcast %cst_33 : bf16 to vector<8x128xbf16>
    %c0_34 = arith.constant 0 : index
    %c640 = arith.constant 640 : index
    %38 = vector.load %arg5[%c0_34, %c640] : memref<8x768xbf16, #tpu.memory_space<vmem>>, vector<8x128xbf16>
    tpu.vector_store %arg5[%c0_34, %c640], %37 {strides = array<i32>} : memref<8x768xbf16, #tpu.memory_space<vmem>>, vector<8x128xbf16>,
    return
  }
}

module attributes {stable_mosaic.version = 11 : i64} {
  func.func @kernel(%arg0: memref<8x768xbf16, #tpu.memory_space<vmem>>, %arg1: memref<1x512xf32, #tpu.memory_space<vmem>>, %arg2: memref<8x72xbf16, #tpu.memory_space<vmem>>, %arg3: memref<8x1xf32, #tpu.memory_space<vmem>>, %arg4: memref<8x72xbf16, #tpu.memory_space<vmem>>, %arg5: memref<8x1xf32, #tpu.memory_space<vmem>>, %arg6: memref<32x72xbf16, #tpu.memory_space<vmem>>, %arg7: memref<32x1xf32, #tpu.memory_space<vmem>>, %arg8: memref<3xf32, #tpu.memory_space<smem>>, %arg9: memref<32x768xbf16, #tpu.memory_space<vmem>>, %arg10: memref<72x512xbf16, #tpu.memory_space<vmem>>, %arg11: memref<8x768xbf16, #tpu.memory_space<vmem>>) attributes {dimension_semantics = [], scalar_prefetch = 0 : i64, scratch_operands = 2 : i64, tpu.core_type = #tpu.core_type<tc>} {
    %c0 = arith.constant 0 : index
    %c0_0 = arith.constant 0 : index
    %0 = vector.load %arg1[%c0, %c0_0] : memref<1x512xf32, #tpu.memory_space<vmem>>, vector<1x512xf32>
    %cst = arith.constant 0.000000e+00 : bf16
    %1 = vector.broadcast %cst : bf16 to vector<8x768xbf16>
    %c0_1 = arith.constant 0 : index
    %c0_2 = arith.constant 0 : index
    %2 = vector.load %arg11[%c0_1, %c0_2] : memref<8x768xbf16, #tpu.memory_space<vmem>>, vector<8x768xbf16>
    tpu.vector_store %arg11[%c0_1, %c0_2], %1 {strides = array<i32>} : memref<8x768xbf16, #tpu.memory_space<vmem>>, vector<8x768xbf16>,
    %c0_3 = arith.constant 0 : index
    %c117 = arith.constant 117 : index
    %3 = vector.load %arg0[%c0_3, %c117] : memref<8x768xbf16, #tpu.memory_space<vmem>>, vector<8x512xbf16>
    %c0_4 = arith.constant 0 : index
    %c0_5 = arith.constant 0 : index
    %4 = vector.load %arg10[%c0_4, %c0_5] : memref<72x512xbf16, #tpu.memory_space<vmem>>, vector<8x512xbf16>
    tpu.vector_store %arg10[%c0_4, %c0_5], %3 {strides = array<i32>} : memref<72x512xbf16, #tpu.memory_space<vmem>>, vector<8x512xbf16>,
    %c0_6 = arith.constant 0 : index
    %c118 = arith.constant 118 : index
    %5 = vector.load %arg0[%c0_6, %c118] : memref<8x768xbf16, #tpu.memory_space<vmem>>, vector<8x512xbf16>
    %c8 = arith.constant 8 : index
    %c0_7 = arith.constant 0 : index
    %6 = vector.load %arg10[%c8, %c0_7] : memref<72x512xbf16, #tpu.memory_space<vmem>>, vector<8x512xbf16>
    tpu.vector_store %arg10[%c8, %c0_7], %5 {strides = array<i32>} : memref<72x512xbf16, #tpu.memory_space<vmem>>, vector<8x512xbf16>,
    %c0_8 = arith.constant 0 : index
    %c119 = arith.constant 119 : index
    %7 = vector.load %arg0[%c0_8, %c119] : memref<8x768xbf16, #tpu.memory_space<vmem>>, vector<8x512xbf16>
    %c16 = arith.constant 16 : index
    %c0_9 = arith.constant 0 : index
    %8 = vector.load %arg10[%c16, %c0_9] : memref<72x512xbf16, #tpu.memory_space<vmem>>, vector<8x512xbf16>
    tpu.vector_store %arg10[%c16, %c0_9], %7 {strides = array<i32>} : memref<72x512xbf16, #tpu.memory_space<vmem>>, vector<8x512xbf16>,
    %c0_10 = arith.constant 0 : index
    %c127 = arith.constant 127 : index
    %9 = vector.load %arg0[%c0_10, %c127] : memref<8x768xbf16, #tpu.memory_space<vmem>>, vector<8x512xbf16>
    %c24 = arith.constant 24 : index
    %c0_11 = arith.constant 0 : index
    %10 = vector.load %arg10[%c24, %c0_11] : memref<72x512xbf16, #tpu.memory_space<vmem>>, vector<8x512xbf16>
    tpu.vector_store %arg10[%c24, %c0_11], %9 {strides = array<i32>} : memref<72x512xbf16, #tpu.memory_space<vmem>>, vector<8x512xbf16>,
    %c0_12 = arith.constant 0 : index
    %c128 = arith.constant 128 : index
    %11 = vector.load %arg0[%c0_12, %c128] : memref<8x768xbf16, #tpu.memory_space<vmem>>, vector<8x512xbf16>
    %c32 = arith.constant 32 : index
    %c0_13 = arith.constant 0 : index
    %12 = vector.load %arg10[%c32, %c0_13] : memref<72x512xbf16, #tpu.memory_space<vmem>>, vector<8x512xbf16>
    tpu.vector_store %arg10[%c32, %c0_13], %11 {strides = array<i32>} : memref<72x512xbf16, #tpu.memory_space<vmem>>, vector<8x512xbf16>,
    %c0_14 = arith.constant 0 : index
    %c129 = arith.constant 129 : index
    %13 = vector.load %arg0[%c0_14, %c129] : memref<8x768xbf16, #tpu.memory_space<vmem>>, vector<8x512xbf16>
    %c40 = arith.constant 40 : index
    %c0_15 = arith.constant 0 : index
    %14 = vector.load %arg10[%c40, %c0_15] : memref<72x512xbf16, #tpu.memory_space<vmem>>, vector<8x512xbf16>
    tpu.vector_store %arg10[%c40, %c0_15], %13 {strides = array<i32>} : memref<72x512xbf16, #tpu.memory_space<vmem>>, vector<8x512xbf16>,
    %c0_16 = arith.constant 0 : index
    %c137 = arith.constant 137 : index
    %15 = vector.load %arg0[%c0_16, %c137] : memref<8x768xbf16, #tpu.memory_space<vmem>>, vector<8x512xbf16>
    %c48 = arith.constant 48 : index
    %c0_17 = arith.constant 0 : index
    %16 = vector.load %arg10[%c48, %c0_17] : memref<72x512xbf16, #tpu.memory_space<vmem>>, vector<8x512xbf16>
    tpu.vector_store %arg10[%c48, %c0_17], %15 {strides = array<i32>} : memref<72x512xbf16, #tpu.memory_space<vmem>>, vector<8x512xbf16>,
    %c0_18 = arith.constant 0 : index
    %c138 = arith.constant 138 : index
    %17 = vector.load %arg0[%c0_18, %c138] : memref<8x768xbf16, #tpu.memory_space<vmem>>, vector<8x512xbf16>
    %c56 = arith.constant 56 : index
    %c0_19 = arith.constant 0 : index
    %18 = vector.load %arg10[%c56, %c0_19] : memref<72x512xbf16, #tpu.memory_space<vmem>>, vector<8x512xbf16>
    tpu.vector_store %arg10[%c56, %c0_19], %17 {strides = array<i32>} : memref<72x512xbf16, #tpu.memory_space<vmem>>, vector<8x512xbf16>,
    %c0_20 = arith.constant 0 : index
    %c139 = arith.constant 139 : index
    %19 = vector.load %arg0[%c0_20, %c139] : memref<8x768xbf16, #tpu.memory_space<vmem>>, vector<8x512xbf16>
    %c64 = arith.constant 64 : index
    %c0_21 = arith.constant 0 : index
    %20 = vector.load %arg10[%c64, %c0_21] : memref<72x512xbf16, #tpu.memory_space<vmem>>, vector<8x512xbf16>
    tpu.vector_store %arg10[%c64, %c0_21], %19 {strides = array<i32>} : memref<72x512xbf16, #tpu.memory_space<vmem>>, vector<8x512xbf16>,
    %c0_22 = arith.constant 0 : index
    %c0_23 = arith.constant 0 : index
    %21 = vector.load %arg10[%c0_22, %c0_23] : memref<72x512xbf16, #tpu.memory_space<vmem>>, vector<72x512xbf16>
    %c0_24 = arith.constant 0 : index
    %c0_25 = arith.constant 0 : index
    %22 = vector.load %arg2[%c0_24, %c0_25] : memref<8x72xbf16, #tpu.memory_space<vmem>>, vector<8x72xbf16>
    %cst_26 = arith.constant dense<0.000000e+00> : vector<8x512xf32>
    %23 = tpu.matmul %22, %21, %cst_26 {dimension_numbers = #tpu.dot_dimension_numbers<[1], [0], [0], [1], [0, 0, 1, 1], [], []>} : vector<8x72xbf16>, vector<72x512xbf16>, vector<8x512xf32> -> vector<8x512xf32>
    %c0_27 = arith.constant 0 : index
    %c0_28 = arith.constant 0 : index
    %24 = vector.load %arg3[%c0_27, %c0_28] : memref<8x1xf32, #tpu.memory_space<vmem>>, vector<8x1xf32>
    %25 = vector.broadcast %24 : vector<8x1xf32> to vector<8x512xf32>
    %26 = arith.addf %23, %25 : vector<8x512xf32>
    %27 = vector.broadcast %0 : vector<1x512xf32> to vector<8x512xf32>
    %28 = arith.mulf %26, %27 : vector<8x512xf32>
    %c0_29 = arith.constant 0 : index
    %29 = memref.load %arg8[%c0_29] : memref<3xf32, #tpu.memory_space<smem>>
    %cst_30 = arith.constant 0.000000e+00 : f32
    %30 = vector.broadcast %cst_30 : f32 to vector<8x512xf32>
    %31 = arith.cmpf oge, %28, %30 : vector<8x512xf32>
    %32 = vector.broadcast %29 : f32 to vector<8x512xf32>
    %33 = arith.mulf %32, %28 : vector<8x512xf32>
    %34 = arith.select %31, %28, %33 : vector<8x512xi1>, vector<8x512xf32>
    %35 = arith.truncf %34 : vector<8x512xf32> to vector<8x512xbf16>
    %c0_31 = arith.constant 0 : index
    %c128_32 = arith.constant 128 : index
    %36 = vector.load %arg11[%c0_31, %c128_32] : memref<8x768xbf16, #tpu.memory_space<vmem>>, vector<8x512xbf16>
    tpu.vector_store %arg11[%c0_31, %c128_32], %35 {strides = array<i32>} : memref<8x768xbf16, #tpu.memory_space<vmem>>, vector<8x512xbf16>,
    %c0_33 = arith.constant 0 : index
    %c117_34 = arith.constant 117 : index
    %37 = vector.load %arg11[%c0_33, %c117_34] : memref<8x768xbf16, #tpu.memory_space<vmem>>, vector<8x512xbf16>
    %c0_35 = arith.constant 0 : index
    %c0_36 = arith.constant 0 : index
    %38 = vector.load %arg10[%c0_35, %c0_36] : memref<72x512xbf16, #tpu.memory_space<vmem>>, vector<8x512xbf16>
    tpu.vector_store %arg10[%c0_35, %c0_36], %37 {strides = array<i32>} : memref<72x512xbf16, #tpu.memory_space<vmem>>, vector<8x512xbf16>,
    %c0_37 = arith.constant 0 : index
    %c118_38 = arith.constant 118 : index
    %39 = vector.load %arg11[%c0_37, %c118_38] : memref<8x768xbf16, #tpu.memory_space<vmem>>, vector<8x512xbf16>
    %c8_39 = arith.constant 8 : index
    %c0_40 = arith.constant 0 : index
    %40 = vector.load %arg10[%c8_39, %c0_40] : memref<72x512xbf16, #tpu.memory_space<vmem>>, vector<8x512xbf16>
    tpu.vector_store %arg10[%c8_39, %c0_40], %39 {strides = array<i32>} : memref<72x512xbf16, #tpu.memory_space<vmem>>, vector<8x512xbf16>,
    %c0_41 = arith.constant 0 : index
    %c119_42 = arith.constant 119 : index
    %41 = vector.load %arg11[%c0_41, %c119_42] : memref<8x768xbf16, #tpu.memory_space<vmem>>, vector<8x512xbf16>
    %c16_43 = arith.constant 16 : index
    %c0_44 = arith.constant 0 : index
    %42 = vector.load %arg10[%c16_43, %c0_44] : memref<72x512xbf16, #tpu.memory_space<vmem>>, vector<8x512xbf16>
    tpu.vector_store %arg10[%c16_43, %c0_44], %41 {strides = array<i32>} : memref<72x512xbf16, #tpu.memory_space<vmem>>, vector<8x512xbf16>,
    %c0_45 = arith.constant 0 : index
    %c127_46 = arith.constant 127 : index
    %43 = vector.load %arg11[%c0_45, %c127_46] : memref<8x768xbf16, #tpu.memory_space<vmem>>, vector<8x512xbf16>
    %c24_47 = arith.constant 24 : index
    %c0_48 = arith.constant 0 : index
    %44 = vector.load %arg10[%c24_47, %c0_48] : memref<72x512xbf16, #tpu.memory_space<vmem>>, vector<8x512xbf16>
    tpu.vector_store %arg10[%c24_47, %c0_48], %43 {strides = array<i32>} : memref<72x512xbf16, #tpu.memory_space<vmem>>, vector<8x512xbf16>,
    %c0_49 = arith.constant 0 : index
    %c128_50 = arith.constant 128 : index
    %45 = vector.load %arg11[%c0_49, %c128_50] : memref<8x768xbf16, #tpu.memory_space<vmem>>, vector<8x512xbf16>
    %c32_51 = arith.constant 32 : index
    %c0_52 = arith.constant 0 : index
    %46 = vector.load %arg10[%c32_51, %c0_52] : memref<72x512xbf16, #tpu.memory_space<vmem>>, vector<8x512xbf16>
    tpu.vector_store %arg10[%c32_51, %c0_52], %45 {strides = array<i32>} : memref<72x512xbf16, #tpu.memory_space<vmem>>, vector<8x512xbf16>,
    %c0_53 = arith.constant 0 : index
    %c129_54 = arith.constant 129 : index
    %47 = vector.load %arg11[%c0_53, %c129_54] : memref<8x768xbf16, #tpu.memory_space<vmem>>, vector<8x512xbf16>
    %c40_55 = arith.constant 40 : index
    %c0_56 = arith.constant 0 : index
    %48 = vector.load %arg10[%c40_55, %c0_56] : memref<72x512xbf16, #tpu.memory_space<vmem>>, vector<8x512xbf16>
    tpu.vector_store %arg10[%c40_55, %c0_56], %47 {strides = array<i32>} : memref<72x512xbf16, #tpu.memory_space<vmem>>, vector<8x512xbf16>,
    %c0_57 = arith.constant 0 : index
    %c137_58 = arith.constant 137 : index
    %49 = vector.load %arg11[%c0_57, %c137_58] : memref<8x768xbf16, #tpu.memory_space<vmem>>, vector<8x512xbf16>
    %c48_59 = arith.constant 48 : index
    %c0_60 = arith.constant 0 : index
    %50 = vector.load %arg10[%c48_59, %c0_60] : memref<72x512xbf16, #tpu.memory_space<vmem>>, vector<8x512xbf16>
    tpu.vector_store %arg10[%c48_59, %c0_60], %49 {strides = array<i32>} : memref<72x512xbf16, #tpu.memory_space<vmem>>, vector<8x512xbf16>,
    %c0_61 = arith.constant 0 : index
    %c138_62 = arith.constant 138 : index
    %51 = vector.load %arg11[%c0_61, %c138_62] : memref<8x768xbf16, #tpu.memory_space<vmem>>, vector<8x512xbf16>
    %c56_63 = arith.constant 56 : index
    %c0_64 = arith.constant 0 : index
    %52 = vector.load %arg10[%c56_63, %c0_64] : memref<72x512xbf16, #tpu.memory_space<vmem>>, vector<8x512xbf16>
    tpu.vector_store %arg10[%c56_63, %c0_64], %51 {strides = array<i32>} : memref<72x512xbf16, #tpu.memory_space<vmem>>, vector<8x512xbf16>,
    %c0_65 = arith.constant 0 : index
    %c139_66 = arith.constant 139 : index
    %53 = vector.load %arg11[%c0_65, %c139_66] : memref<8x768xbf16, #tpu.memory_space<vmem>>, vector<8x512xbf16>
    %c64_67 = arith.constant 64 : index
    %c0_68 = arith.constant 0 : index
    %54 = vector.load %arg10[%c64_67, %c0_68] : memref<72x512xbf16, #tpu.memory_space<vmem>>, vector<8x512xbf16>
    tpu.vector_store %arg10[%c64_67, %c0_68], %53 {strides = array<i32>} : memref<72x512xbf16, #tpu.memory_space<vmem>>, vector<8x512xbf16>,
    %c0_69 = arith.constant 0 : index
    %c0_70 = arith.constant 0 : index
    %55 = vector.load %arg10[%c0_69, %c0_70] : memref<72x512xbf16, #tpu.memory_space<vmem>>, vector<72x512xbf16>
    %c0_71 = arith.constant 0 : index
    %c0_72 = arith.constant 0 : index
    %56 = vector.load %arg4[%c0_71, %c0_72] : memref<8x72xbf16, #tpu.memory_space<vmem>>, vector<8x72xbf16>
    %cst_73 = arith.constant dense<0.000000e+00> : vector<8x512xf32>
    %57 = tpu.matmul %56, %55, %cst_73 {dimension_numbers = #tpu.dot_dimension_numbers<[1], [0], [0], [1], [0, 0, 1, 1], [], []>} : vector<8x72xbf16>, vector<72x512xbf16>, vector<8x512xf32> -> vector<8x512xf32>
    %c0_74 = arith.constant 0 : index
    %c0_75 = arith.constant 0 : index
    %58 = vector.load %arg5[%c0_74, %c0_75] : memref<8x1xf32, #tpu.memory_space<vmem>>, vector<8x1xf32>
    %59 = vector.broadcast %58 : vector<8x1xf32> to vector<8x512xf32>
    %60 = arith.addf %57, %59 : vector<8x512xf32>
    %61 = vector.broadcast %0 : vector<1x512xf32> to vector<8x512xf32>
    %62 = arith.mulf %60, %61 : vector<8x512xf32>
    %c0_76 = arith.constant 0 : index
    %c128_77 = arith.constant 128 : index
    %63 = vector.load %arg0[%c0_76, %c128_77] : memref<8x768xbf16, #tpu.memory_space<vmem>>, vector<8x512xbf16>
    %64 = arith.extf %63 : vector<8x512xbf16> to vector<8x512xf32>
    %65 = arith.addf %62, %64 : vector<8x512xf32>
    %66 = arith.truncf %65 : vector<8x512xf32> to vector<8x512xbf16>
    %c0_78 = arith.constant 0 : index
    %c128_79 = arith.constant 128 : index
    %67 = vector.load %arg11[%c0_78, %c128_79] : memref<8x768xbf16, #tpu.memory_space<vmem>>, vector<8x512xbf16>
    tpu.vector_store %arg11[%c0_78, %c128_79], %66 {strides = array<i32>} : memref<8x768xbf16, #tpu.memory_space<vmem>>, vector<8x512xbf16>,
    %c0_80 = arith.constant 0 : index
    %c117_81 = arith.constant 117 : index
    %68 = vector.load %arg11[%c0_80, %c117_81] : memref<8x768xbf16, #tpu.memory_space<vmem>>, vector<8x512xbf16>
    %c0_82 = arith.constant 0 : index
    %c0_83 = arith.constant 0 : index
    %69 = vector.load %arg10[%c0_82, %c0_83] : memref<72x512xbf16, #tpu.memory_space<vmem>>, vector<8x512xbf16>
    tpu.vector_store %arg10[%c0_82, %c0_83], %68 {strides = array<i32>} : memref<72x512xbf16, #tpu.memory_space<vmem>>, vector<8x512xbf16>,
    %c0_84 = arith.constant 0 : index
    %c118_85 = arith.constant 118 : index
    %70 = vector.load %arg11[%c0_84, %c118_85] : memref<8x768xbf16, #tpu.memory_space<vmem>>, vector<8x512xbf16>
    %c8_86 = arith.constant 8 : index
    %c0_87 = arith.constant 0 : index
    %71 = vector.load %arg10[%c8_86, %c0_87] : memref<72x512xbf16, #tpu.memory_space<vmem>>, vector<8x512xbf16>
    tpu.vector_store %arg10[%c8_86, %c0_87], %70 {strides = array<i32>} : memref<72x512xbf16, #tpu.memory_space<vmem>>, vector<8x512xbf16>,
    %c0_88 = arith.constant 0 : index
    %c119_89 = arith.constant 119 : index
    %72 = vector.load %arg11[%c0_88, %c119_89] : memref<8x768xbf16, #tpu.memory_space<vmem>>, vector<8x512xbf16>
    %c16_90 = arith.constant 16 : index
    %c0_91 = arith.constant 0 : index
    %73 = vector.load %arg10[%c16_90, %c0_91] : memref<72x512xbf16, #tpu.memory_space<vmem>>, vector<8x512xbf16>
    tpu.vector_store %arg10[%c16_90, %c0_91], %72 {strides = array<i32>} : memref<72x512xbf16, #tpu.memory_space<vmem>>, vector<8x512xbf16>,
    %c0_92 = arith.constant 0 : index
    %c127_93 = arith.constant 127 : index
    %74 = vector.load %arg11[%c0_92, %c127_93] : memref<8x768xbf16, #tpu.memory_space<vmem>>, vector<8x512xbf16>
    %c24_94 = arith.constant 24 : index
    %c0_95 = arith.constant 0 : index
    %75 = vector.load %arg10[%c24_94, %c0_95] : memref<72x512xbf16, #tpu.memory_space<vmem>>, vector<8x512xbf16>
    tpu.vector_store %arg10[%c24_94, %c0_95], %74 {strides = array<i32>} : memref<72x512xbf16, #tpu.memory_space<vmem>>, vector<8x512xbf16>,
    %c0_96 = arith.constant 0 : index
    %c128_97 = arith.constant 128 : index
    %76 = vector.load %arg11[%c0_96, %c128_97] : memref<8x768xbf16, #tpu.memory_space<vmem>>, vector<8x512xbf16>
    %c32_98 = arith.constant 32 : index
    %c0_99 = arith.constant 0 : index
    %77 = vector.load %arg10[%c32_98, %c0_99] : memref<72x512xbf16, #tpu.memory_space<vmem>>, vector<8x512xbf16>
    tpu.vector_store %arg10[%c32_98, %c0_99], %76 {strides = array<i32>} : memref<72x512xbf16, #tpu.memory_space<vmem>>, vector<8x512xbf16>,
    %c0_100 = arith.constant 0 : index
    %c129_101 = arith.constant 129 : index
    %78 = vector.load %arg11[%c0_100, %c129_101] : memref<8x768xbf16, #tpu.memory_space<vmem>>, vector<8x512xbf16>
    %c40_102 = arith.constant 40 : index
    %c0_103 = arith.constant 0 : index
    %79 = vector.load %arg10[%c40_102, %c0_103] : memref<72x512xbf16, #tpu.memory_space<vmem>>, vector<8x512xbf16>
    tpu.vector_store %arg10[%c40_102, %c0_103], %78 {strides = array<i32>} : memref<72x512xbf16, #tpu.memory_space<vmem>>, vector<8x512xbf16>,
    %c0_104 = arith.constant 0 : index
    %c137_105 = arith.constant 137 : index
    %80 = vector.load %arg11[%c0_104, %c137_105] : memref<8x768xbf16, #tpu.memory_space<vmem>>, vector<8x512xbf16>
    %c48_106 = arith.constant 48 : index
    %c0_107 = arith.constant 0 : index
    %81 = vector.load %arg10[%c48_106, %c0_107] : memref<72x512xbf16, #tpu.memory_space<vmem>>, vector<8x512xbf16>
    tpu.vector_store %arg10[%c48_106, %c0_107], %80 {strides = array<i32>} : memref<72x512xbf16, #tpu.memory_space<vmem>>, vector<8x512xbf16>,
    %c0_108 = arith.constant 0 : index
    %c138_109 = arith.constant 138 : index
    %82 = vector.load %arg11[%c0_108, %c138_109] : memref<8x768xbf16, #tpu.memory_space<vmem>>, vector<8x512xbf16>
    %c56_110 = arith.constant 56 : index
    %c0_111 = arith.constant 0 : index
    %83 = vector.load %arg10[%c56_110, %c0_111] : memref<72x512xbf16, #tpu.memory_space<vmem>>, vector<8x512xbf16>
    tpu.vector_store %arg10[%c56_110, %c0_111], %82 {strides = array<i32>} : memref<72x512xbf16, #tpu.memory_space<vmem>>, vector<8x512xbf16>,
    %c0_112 = arith.constant 0 : index
    %c139_113 = arith.constant 139 : index
    %84 = vector.load %arg11[%c0_112, %c139_113] : memref<8x768xbf16, #tpu.memory_space<vmem>>, vector<8x512xbf16>
    %c64_114 = arith.constant 64 : index
    %c0_115 = arith.constant 0 : index
    %85 = vector.load %arg10[%c64_114, %c0_115] : memref<72x512xbf16, #tpu.memory_space<vmem>>, vector<8x512xbf16>
    tpu.vector_store %arg10[%c64_114, %c0_115], %84 {strides = array<i32>} : memref<72x512xbf16, #tpu.memory_space<vmem>>, vector<8x512xbf16>,
    %c0_116 = arith.constant 0 : index
    %c0_117 = arith.constant 0 : index
    %86 = vector.load %arg10[%c0_116, %c0_117] : memref<72x512xbf16, #tpu.memory_space<vmem>>, vector<72x512xbf16>
    %c0_118 = arith.constant 0 : index
    %c0_119 = arith.constant 0 : index
    %87 = vector.load %arg6[%c0_118, %c0_119] : memref<32x72xbf16, #tpu.memory_space<vmem>>, vector<32x72xbf16>
    %cst_120 = arith.constant dense<0.000000e+00> : vector<32x512xf32>
    %88 = tpu.matmul %87, %86, %cst_120 {dimension_numbers = #tpu.dot_dimension_numbers<[1], [0], [0], [1], [0, 0, 1, 1], [], []>} : vector<32x72xbf16>, vector<72x512xbf16>, vector<32x512xf32> -> vector<32x512xf32>
    %c0_121 = arith.constant 0 : index
    %c0_122 = arith.constant 0 : index
    %89 = vector.load %arg7[%c0_121, %c0_122] : memref<32x1xf32, #tpu.memory_space<vmem>>, vector<32x1xf32>
    %90 = vector.broadcast %89 : vector<32x1xf32> to vector<32x512xf32>
    %91 = arith.addf %88, %90 : vector<32x512xf32>
    %92 = vector.broadcast %0 : vector<1x512xf32> to vector<32x512xf32>
    %93 = arith.mulf %91, %92 : vector<32x512xf32>
    %c2 = arith.constant 2 : index
    %94 = memref.load %arg8[%c2] : memref<3xf32, #tpu.memory_space<smem>>
    %cst_123 = arith.constant 0.000000e+00 : f32
    %95 = vector.broadcast %cst_123 : f32 to vector<32x512xf32>
    %96 = arith.cmpf oge, %93, %95 : vector<32x512xf32>
    %97 = vector.broadcast %94 : f32 to vector<32x512xf32>
    %98 = arith.mulf %97, %93 : vector<32x512xf32>
    %99 = arith.select %96, %93, %98 : vector<32x512xi1>, vector<32x512xf32>
    %cst_124 = arith.constant 0.000000e+00 : bf16
    %100 = vector.broadcast %cst_124 : bf16 to vector<32x128xbf16>
    %c0_125 = arith.constant 0 : index
    %c0_126 = arith.constant 0 : index
    %101 = vector.load %arg9[%c0_125, %c0_126] : memref<32x768xbf16, #tpu.memory_space<vmem>>, vector<32x128xbf16>
    tpu.vector_store %arg9[%c0_125, %c0_126], %100 {strides = array<i32>} : memref<32x768xbf16, #tpu.memory_space<vmem>>, vector<32x128xbf16>,
    %102 = arith.truncf %99 : vector<32x512xf32> to vector<32x512xbf16>
    %c0_127 = arith.constant 0 : index
    %c128_128 = arith.constant 128 : index
    %103 = vector.load %arg9[%c0_127, %c128_128] : memref<32x768xbf16, #tpu.memory_space<vmem>>, vector<32x512xbf16>
    tpu.vector_store %arg9[%c0_127, %c128_128], %102 {strides = array<i32>} : memref<32x768xbf16, #tpu.memory_space<vmem>>, vector<32x512xbf16>,
    %cst_129 = arith.constant 0.000000e+00 : bf16
    %104 = vector.broadcast %cst_129 : bf16 to vector<32x128xbf16>
    %c0_130 = arith.constant 0 : index
    %c640 = arith.constant 640 : index
    %105 = vector.load %arg9[%c0_130, %c640] : memref<32x768xbf16, #tpu.memory_space<vmem>>, vector<32x128xbf16>
    tpu.vector_store %arg9[%c0_130, %c640], %104 {strides = array<i32>} : memref<32x768xbf16, #tpu.memory_space<vmem>>, vector<32x128xbf16>,
    return
  }
}

module attributes {stable_mosaic.version = 11 : i64} {
  func.func @kernel(%arg0: memref<8x1024xbf16, #tpu.memory_space<vmem>>, %arg1: memref<1x768xf32, #tpu.memory_space<vmem>>, %arg2: memref<8x1024xbf16, #tpu.memory_space<vmem>>, %arg3: memref<8x72xbf16, #tpu.memory_space<vmem>>, %arg4: memref<8x1xf32, #tpu.memory_space<vmem>>, %arg5: memref<8x72xbf16, #tpu.memory_space<vmem>>, %arg6: memref<8x1xf32, #tpu.memory_space<vmem>>, %arg7: memref<8x72xbf16, #tpu.memory_space<vmem>>, %arg8: memref<8x1xf32, #tpu.memory_space<vmem>>, %arg9: memref<3xf32, #tpu.memory_space<smem>>, %arg10: memref<8x1024xbf16, #tpu.memory_space<vmem>>, %arg11: memref<72x768xbf16, #tpu.memory_space<vmem>>, %arg12: memref<8x1024xbf16, #tpu.memory_space<vmem>>, %arg13: memref<8x1024xbf16, #tpu.memory_space<vmem>>) attributes {dimension_semantics = [], scalar_prefetch = 0 : i64, scratch_operands = 3 : i64, tpu.core_type = #tpu.core_type<tc>} {
    %c0 = arith.constant 0 : index
    %c0_0 = arith.constant 0 : index
    %0 = vector.load %arg1[%c0, %c0_0] : memref<1x768xf32, #tpu.memory_space<vmem>>, vector<1x768xf32>
    %c0_1 = arith.constant 0 : index
    %c0_2 = arith.constant 0 : index
    %1 = vector.load %arg0[%c0_1, %c0_2] : memref<8x1024xbf16, #tpu.memory_space<vmem>>, vector<8x1024xbf16>
    %c0_3 = arith.constant 0 : index
    %c0_4 = arith.constant 0 : index
    %2 = vector.load %arg2[%c0_3, %c0_4] : memref<8x1024xbf16, #tpu.memory_space<vmem>>, vector<8x1024xbf16>
    %3 = arith.subf %1, %2 : vector<8x1024xbf16>
    %c0_5 = arith.constant 0 : index
    %c0_6 = arith.constant 0 : index
    %4 = vector.load %arg13[%c0_5, %c0_6] : memref<8x1024xbf16, #tpu.memory_space<vmem>>, vector<8x1024xbf16>
    tpu.vector_store %arg13[%c0_5, %c0_6], %3 {strides = array<i32>} : memref<8x1024xbf16, #tpu.memory_space<vmem>>, vector<8x1024xbf16>,
    %cst = arith.constant 0.000000e+00 : bf16
    %5 = vector.broadcast %cst : bf16 to vector<8x1024xbf16>
    %c0_7 = arith.constant 0 : index
    %c0_8 = arith.constant 0 : index
    %6 = vector.load %arg12[%c0_7, %c0_8] : memref<8x1024xbf16, #tpu.memory_space<vmem>>, vector<8x1024xbf16>
    tpu.vector_store %arg12[%c0_7, %c0_8], %5 {strides = array<i32>} : memref<8x1024xbf16, #tpu.memory_space<vmem>>, vector<8x1024xbf16>,
    %c0_9 = arith.constant 0 : index
    %c109 = arith.constant 109 : index
    %7 = vector.load %arg13[%c0_9, %c109] : memref<8x1024xbf16, #tpu.memory_space<vmem>>, vector<8x768xbf16>
    %c0_10 = arith.constant 0 : index
    %c0_11 = arith.constant 0 : index
    %8 = vector.load %arg11[%c0_10, %c0_11] : memref<72x768xbf16, #tpu.memory_space<vmem>>, vector<8x768xbf16>
    tpu.vector_store %arg11[%c0_10, %c0_11], %7 {strides = array<i32>} : memref<72x768xbf16, #tpu.memory_space<vmem>>, vector<8x768xbf16>,
    %c0_12 = arith.constant 0 : index
    %c110 = arith.constant 110 : index
    %9 = vector.load %arg13[%c0_12, %c110] : memref<8x1024xbf16, #tpu.memory_space<vmem>>, vector<8x768xbf16>
    %c8 = arith.constant 8 : index
    %c0_13 = arith.constant 0 : index
    %10 = vector.load %arg11[%c8, %c0_13] : memref<72x768xbf16, #tpu.memory_space<vmem>>, vector<8x768xbf16>
    tpu.vector_store %arg11[%c8, %c0_13], %9 {strides = array<i32>} : memref<72x768xbf16, #tpu.memory_space<vmem>>, vector<8x768xbf16>,
    %c0_14 = arith.constant 0 : index
    %c111 = arith.constant 111 : index
    %11 = vector.load %arg13[%c0_14, %c111] : memref<8x1024xbf16, #tpu.memory_space<vmem>>, vector<8x768xbf16>
    %c16 = arith.constant 16 : index
    %c0_15 = arith.constant 0 : index
    %12 = vector.load %arg11[%c16, %c0_15] : memref<72x768xbf16, #tpu.memory_space<vmem>>, vector<8x768xbf16>
    tpu.vector_store %arg11[%c16, %c0_15], %11 {strides = array<i32>} : memref<72x768xbf16, #tpu.memory_space<vmem>>, vector<8x768xbf16>,
    %c0_16 = arith.constant 0 : index
    %c127 = arith.constant 127 : index
    %13 = vector.load %arg13[%c0_16, %c127] : memref<8x1024xbf16, #tpu.memory_space<vmem>>, vector<8x768xbf16>
    %c24 = arith.constant 24 : index
    %c0_17 = arith.constant 0 : index
    %14 = vector.load %arg11[%c24, %c0_17] : memref<72x768xbf16, #tpu.memory_space<vmem>>, vector<8x768xbf16>
    tpu.vector_store %arg11[%c24, %c0_17], %13 {strides = array<i32>} : memref<72x768xbf16, #tpu.memory_space<vmem>>, vector<8x768xbf16>,
    %c0_18 = arith.constant 0 : index
    %c128 = arith.constant 128 : index
    %15 = vector.load %arg13[%c0_18, %c128] : memref<8x1024xbf16, #tpu.memory_space<vmem>>, vector<8x768xbf16>
    %c32 = arith.constant 32 : index
    %c0_19 = arith.constant 0 : index
    %16 = vector.load %arg11[%c32, %c0_19] : memref<72x768xbf16, #tpu.memory_space<vmem>>, vector<8x768xbf16>
    tpu.vector_store %arg11[%c32, %c0_19], %15 {strides = array<i32>} : memref<72x768xbf16, #tpu.memory_space<vmem>>, vector<8x768xbf16>,
    %c0_20 = arith.constant 0 : index
    %c129 = arith.constant 129 : index
    %17 = vector.load %arg13[%c0_20, %c129] : memref<8x1024xbf16, #tpu.memory_space<vmem>>, vector<8x768xbf16>
    %c40 = arith.constant 40 : index
    %c0_21 = arith.constant 0 : index
    %18 = vector.load %arg11[%c40, %c0_21] : memref<72x768xbf16, #tpu.memory_space<vmem>>, vector<8x768xbf16>
    tpu.vector_store %arg11[%c40, %c0_21], %17 {strides = array<i32>} : memref<72x768xbf16, #tpu.memory_space<vmem>>, vector<8x768xbf16>,
    %c0_22 = arith.constant 0 : index
    %c145 = arith.constant 145 : index
    %19 = vector.load %arg13[%c0_22, %c145] : memref<8x1024xbf16, #tpu.memory_space<vmem>>, vector<8x768xbf16>
    %c48 = arith.constant 48 : index
    %c0_23 = arith.constant 0 : index
    %20 = vector.load %arg11[%c48, %c0_23] : memref<72x768xbf16, #tpu.memory_space<vmem>>, vector<8x768xbf16>
    tpu.vector_store %arg11[%c48, %c0_23], %19 {strides = array<i32>} : memref<72x768xbf16, #tpu.memory_space<vmem>>, vector<8x768xbf16>,
    %c0_24 = arith.constant 0 : index
    %c146 = arith.constant 146 : index
    %21 = vector.load %arg13[%c0_24, %c146] : memref<8x1024xbf16, #tpu.memory_space<vmem>>, vector<8x768xbf16>
    %c56 = arith.constant 56 : index
    %c0_25 = arith.constant 0 : index
    %22 = vector.load %arg11[%c56, %c0_25] : memref<72x768xbf16, #tpu.memory_space<vmem>>, vector<8x768xbf16>
    tpu.vector_store %arg11[%c56, %c0_25], %21 {strides = array<i32>} : memref<72x768xbf16, #tpu.memory_space<vmem>>, vector<8x768xbf16>,
    %c0_26 = arith.constant 0 : index
    %c147 = arith.constant 147 : index
    %23 = vector.load %arg13[%c0_26, %c147] : memref<8x1024xbf16, #tpu.memory_space<vmem>>, vector<8x768xbf16>
    %c64 = arith.constant 64 : index
    %c0_27 = arith.constant 0 : index
    %24 = vector.load %arg11[%c64, %c0_27] : memref<72x768xbf16, #tpu.memory_space<vmem>>, vector<8x768xbf16>
    tpu.vector_store %arg11[%c64, %c0_27], %23 {strides = array<i32>} : memref<72x768xbf16, #tpu.memory_space<vmem>>, vector<8x768xbf16>,
    %c0_28 = arith.constant 0 : index
    %c0_29 = arith.constant 0 : index
    %25 = vector.load %arg11[%c0_28, %c0_29] : memref<72x768xbf16, #tpu.memory_space<vmem>>, vector<72x768xbf16>
    %c0_30 = arith.constant 0 : index
    %c0_31 = arith.constant 0 : index
    %26 = vector.load %arg3[%c0_30, %c0_31] : memref<8x72xbf16, #tpu.memory_space<vmem>>, vector<8x72xbf16>
    %cst_32 = arith.constant dense<0.000000e+00> : vector<8x768xf32>
    %27 = tpu.matmul %26, %25, %cst_32 {dimension_numbers = #tpu.dot_dimension_numbers<[1], [0], [0], [1], [0, 0, 1, 1], [], []>} : vector<8x72xbf16>, vector<72x768xbf16>, vector<8x768xf32> -> vector<8x768xf32>
    %c0_33 = arith.constant 0 : index
    %c0_34 = arith.constant 0 : index
    %28 = vector.load %arg4[%c0_33, %c0_34] : memref<8x1xf32, #tpu.memory_space<vmem>>, vector<8x1xf32>
    %29 = vector.broadcast %28 : vector<8x1xf32> to vector<8x768xf32>
    %30 = arith.addf %27, %29 : vector<8x768xf32>
    %31 = vector.broadcast %0 : vector<1x768xf32> to vector<8x768xf32>
    %32 = arith.mulf %30, %31 : vector<8x768xf32>
    %c0_35 = arith.constant 0 : index
    %33 = memref.load %arg9[%c0_35] : memref<3xf32, #tpu.memory_space<smem>>
    %cst_36 = arith.constant 0.000000e+00 : f32
    %34 = vector.broadcast %cst_36 : f32 to vector<8x768xf32>
    %35 = arith.cmpf oge, %32, %34 : vector<8x768xf32>
    %36 = vector.broadcast %33 : f32 to vector<8x768xf32>
    %37 = arith.mulf %36, %32 : vector<8x768xf32>
    %38 = arith.select %35, %32, %37 : vector<8x768xi1>, vector<8x768xf32>
    %39 = arith.truncf %38 : vector<8x768xf32> to vector<8x768xbf16>
    %c0_37 = arith.constant 0 : index
    %c128_38 = arith.constant 128 : index
    %40 = vector.load %arg12[%c0_37, %c128_38] : memref<8x1024xbf16, #tpu.memory_space<vmem>>, vector<8x768xbf16>
    tpu.vector_store %arg12[%c0_37, %c128_38], %39 {strides = array<i32>} : memref<8x1024xbf16, #tpu.memory_space<vmem>>, vector<8x768xbf16>,
    %c0_39 = arith.constant 0 : index
    %c109_40 = arith.constant 109 : index
    %41 = vector.load %arg12[%c0_39, %c109_40] : memref<8x1024xbf16, #tpu.memory_space<vmem>>, vector<8x768xbf16>
    %c0_41 = arith.constant 0 : index
    %c0_42 = arith.constant 0 : index
    %42 = vector.load %arg11[%c0_41, %c0_42] : memref<72x768xbf16, #tpu.memory_space<vmem>>, vector<8x768xbf16>
    tpu.vector_store %arg11[%c0_41, %c0_42], %41 {strides = array<i32>} : memref<72x768xbf16, #tpu.memory_space<vmem>>, vector<8x768xbf16>,
    %c0_43 = arith.constant 0 : index
    %c110_44 = arith.constant 110 : index
    %43 = vector.load %arg12[%c0_43, %c110_44] : memref<8x1024xbf16, #tpu.memory_space<vmem>>, vector<8x768xbf16>
    %c8_45 = arith.constant 8 : index
    %c0_46 = arith.constant 0 : index
    %44 = vector.load %arg11[%c8_45, %c0_46] : memref<72x768xbf16, #tpu.memory_space<vmem>>, vector<8x768xbf16>
    tpu.vector_store %arg11[%c8_45, %c0_46], %43 {strides = array<i32>} : memref<72x768xbf16, #tpu.memory_space<vmem>>, vector<8x768xbf16>,
    %c0_47 = arith.constant 0 : index
    %c111_48 = arith.constant 111 : index
    %45 = vector.load %arg12[%c0_47, %c111_48] : memref<8x1024xbf16, #tpu.memory_space<vmem>>, vector<8x768xbf16>
    %c16_49 = arith.constant 16 : index
    %c0_50 = arith.constant 0 : index
    %46 = vector.load %arg11[%c16_49, %c0_50] : memref<72x768xbf16, #tpu.memory_space<vmem>>, vector<8x768xbf16>
    tpu.vector_store %arg11[%c16_49, %c0_50], %45 {strides = array<i32>} : memref<72x768xbf16, #tpu.memory_space<vmem>>, vector<8x768xbf16>,
    %c0_51 = arith.constant 0 : index
    %c127_52 = arith.constant 127 : index
    %47 = vector.load %arg12[%c0_51, %c127_52] : memref<8x1024xbf16, #tpu.memory_space<vmem>>, vector<8x768xbf16>
    %c24_53 = arith.constant 24 : index
    %c0_54 = arith.constant 0 : index
    %48 = vector.load %arg11[%c24_53, %c0_54] : memref<72x768xbf16, #tpu.memory_space<vmem>>, vector<8x768xbf16>
    tpu.vector_store %arg11[%c24_53, %c0_54], %47 {strides = array<i32>} : memref<72x768xbf16, #tpu.memory_space<vmem>>, vector<8x768xbf16>,
    %c0_55 = arith.constant 0 : index
    %c128_56 = arith.constant 128 : index
    %49 = vector.load %arg12[%c0_55, %c128_56] : memref<8x1024xbf16, #tpu.memory_space<vmem>>, vector<8x768xbf16>
    %c32_57 = arith.constant 32 : index
    %c0_58 = arith.constant 0 : index
    %50 = vector.load %arg11[%c32_57, %c0_58] : memref<72x768xbf16, #tpu.memory_space<vmem>>, vector<8x768xbf16>
    tpu.vector_store %arg11[%c32_57, %c0_58], %49 {strides = array<i32>} : memref<72x768xbf16, #tpu.memory_space<vmem>>, vector<8x768xbf16>,
    %c0_59 = arith.constant 0 : index
    %c129_60 = arith.constant 129 : index
    %51 = vector.load %arg12[%c0_59, %c129_60] : memref<8x1024xbf16, #tpu.memory_space<vmem>>, vector<8x768xbf16>
    %c40_61 = arith.constant 40 : index
    %c0_62 = arith.constant 0 : index
    %52 = vector.load %arg11[%c40_61, %c0_62] : memref<72x768xbf16, #tpu.memory_space<vmem>>, vector<8x768xbf16>
    tpu.vector_store %arg11[%c40_61, %c0_62], %51 {strides = array<i32>} : memref<72x768xbf16, #tpu.memory_space<vmem>>, vector<8x768xbf16>,
    %c0_63 = arith.constant 0 : index
    %c145_64 = arith.constant 145 : index
    %53 = vector.load %arg12[%c0_63, %c145_64] : memref<8x1024xbf16, #tpu.memory_space<vmem>>, vector<8x768xbf16>
    %c48_65 = arith.constant 48 : index
    %c0_66 = arith.constant 0 : index
    %54 = vector.load %arg11[%c48_65, %c0_66] : memref<72x768xbf16, #tpu.memory_space<vmem>>, vector<8x768xbf16>
    tpu.vector_store %arg11[%c48_65, %c0_66], %53 {strides = array<i32>} : memref<72x768xbf16, #tpu.memory_space<vmem>>, vector<8x768xbf16>,
    %c0_67 = arith.constant 0 : index
    %c146_68 = arith.constant 146 : index
    %55 = vector.load %arg12[%c0_67, %c146_68] : memref<8x1024xbf16, #tpu.memory_space<vmem>>, vector<8x768xbf16>
    %c56_69 = arith.constant 56 : index
    %c0_70 = arith.constant 0 : index
    %56 = vector.load %arg11[%c56_69, %c0_70] : memref<72x768xbf16, #tpu.memory_space<vmem>>, vector<8x768xbf16>
    tpu.vector_store %arg11[%c56_69, %c0_70], %55 {strides = array<i32>} : memref<72x768xbf16, #tpu.memory_space<vmem>>, vector<8x768xbf16>,
    %c0_71 = arith.constant 0 : index
    %c147_72 = arith.constant 147 : index
    %57 = vector.load %arg12[%c0_71, %c147_72] : memref<8x1024xbf16, #tpu.memory_space<vmem>>, vector<8x768xbf16>
    %c64_73 = arith.constant 64 : index
    %c0_74 = arith.constant 0 : index
    %58 = vector.load %arg11[%c64_73, %c0_74] : memref<72x768xbf16, #tpu.memory_space<vmem>>, vector<8x768xbf16>
    tpu.vector_store %arg11[%c64_73, %c0_74], %57 {strides = array<i32>} : memref<72x768xbf16, #tpu.memory_space<vmem>>, vector<8x768xbf16>,
    %c0_75 = arith.constant 0 : index
    %c0_76 = arith.constant 0 : index
    %59 = vector.load %arg11[%c0_75, %c0_76] : memref<72x768xbf16, #tpu.memory_space<vmem>>, vector<72x768xbf16>
    %c0_77 = arith.constant 0 : index
    %c0_78 = arith.constant 0 : index
    %60 = vector.load %arg5[%c0_77, %c0_78] : memref<8x72xbf16, #tpu.memory_space<vmem>>, vector<8x72xbf16>
    %cst_79 = arith.constant dense<0.000000e+00> : vector<8x768xf32>
    %61 = tpu.matmul %60, %59, %cst_79 {dimension_numbers = #tpu.dot_dimension_numbers<[1], [0], [0], [1], [0, 0, 1, 1], [], []>} : vector<8x72xbf16>, vector<72x768xbf16>, vector<8x768xf32> -> vector<8x768xf32>
    %c0_80 = arith.constant 0 : index
    %c0_81 = arith.constant 0 : index
    %62 = vector.load %arg6[%c0_80, %c0_81] : memref<8x1xf32, #tpu.memory_space<vmem>>, vector<8x1xf32>
    %63 = vector.broadcast %62 : vector<8x1xf32> to vector<8x768xf32>
    %64 = arith.addf %61, %63 : vector<8x768xf32>
    %65 = vector.broadcast %0 : vector<1x768xf32> to vector<8x768xf32>
    %66 = arith.mulf %64, %65 : vector<8x768xf32>
    %c0_82 = arith.constant 0 : index
    %c128_83 = arith.constant 128 : index
    %67 = vector.load %arg13[%c0_82, %c128_83] : memref<8x1024xbf16, #tpu.memory_space<vmem>>, vector<8x768xbf16>
    %68 = arith.extf %67 : vector<8x768xbf16> to vector<8x768xf32>
    %69 = arith.addf %66, %68 : vector<8x768xf32>
    %70 = arith.truncf %69 : vector<8x768xf32> to vector<8x768xbf16>
    %c0_84 = arith.constant 0 : index
    %c128_85 = arith.constant 128 : index
    %71 = vector.load %arg12[%c0_84, %c128_85] : memref<8x1024xbf16, #tpu.memory_space<vmem>>, vector<8x768xbf16>
    tpu.vector_store %arg12[%c0_84, %c128_85], %70 {strides = array<i32>} : memref<8x1024xbf16, #tpu.memory_space<vmem>>, vector<8x768xbf16>,
    %c0_86 = arith.constant 0 : index
    %c109_87 = arith.constant 109 : index
    %72 = vector.load %arg12[%c0_86, %c109_87] : memref<8x1024xbf16, #tpu.memory_space<vmem>>, vector<8x768xbf16>
    %c0_88 = arith.constant 0 : index
    %c0_89 = arith.constant 0 : index
    %73 = vector.load %arg11[%c0_88, %c0_89] : memref<72x768xbf16, #tpu.memory_space<vmem>>, vector<8x768xbf16>
    tpu.vector_store %arg11[%c0_88, %c0_89], %72 {strides = array<i32>} : memref<72x768xbf16, #tpu.memory_space<vmem>>, vector<8x768xbf16>,
    %c0_90 = arith.constant 0 : index
    %c110_91 = arith.constant 110 : index
    %74 = vector.load %arg12[%c0_90, %c110_91] : memref<8x1024xbf16, #tpu.memory_space<vmem>>, vector<8x768xbf16>
    %c8_92 = arith.constant 8 : index
    %c0_93 = arith.constant 0 : index
    %75 = vector.load %arg11[%c8_92, %c0_93] : memref<72x768xbf16, #tpu.memory_space<vmem>>, vector<8x768xbf16>
    tpu.vector_store %arg11[%c8_92, %c0_93], %74 {strides = array<i32>} : memref<72x768xbf16, #tpu.memory_space<vmem>>, vector<8x768xbf16>,
    %c0_94 = arith.constant 0 : index
    %c111_95 = arith.constant 111 : index
    %76 = vector.load %arg12[%c0_94, %c111_95] : memref<8x1024xbf16, #tpu.memory_space<vmem>>, vector<8x768xbf16>
    %c16_96 = arith.constant 16 : index
    %c0_97 = arith.constant 0 : index
    %77 = vector.load %arg11[%c16_96, %c0_97] : memref<72x768xbf16, #tpu.memory_space<vmem>>, vector<8x768xbf16>
    tpu.vector_store %arg11[%c16_96, %c0_97], %76 {strides = array<i32>} : memref<72x768xbf16, #tpu.memory_space<vmem>>, vector<8x768xbf16>,
    %c0_98 = arith.constant 0 : index
    %c127_99 = arith.constant 127 : index
    %78 = vector.load %arg12[%c0_98, %c127_99] : memref<8x1024xbf16, #tpu.memory_space<vmem>>, vector<8x768xbf16>
    %c24_100 = arith.constant 24 : index
    %c0_101 = arith.constant 0 : index
    %79 = vector.load %arg11[%c24_100, %c0_101] : memref<72x768xbf16, #tpu.memory_space<vmem>>, vector<8x768xbf16>
    tpu.vector_store %arg11[%c24_100, %c0_101], %78 {strides = array<i32>} : memref<72x768xbf16, #tpu.memory_space<vmem>>, vector<8x768xbf16>,
    %c0_102 = arith.constant 0 : index
    %c128_103 = arith.constant 128 : index
    %80 = vector.load %arg12[%c0_102, %c128_103] : memref<8x1024xbf16, #tpu.memory_space<vmem>>, vector<8x768xbf16>
    %c32_104 = arith.constant 32 : index
    %c0_105 = arith.constant 0 : index
    %81 = vector.load %arg11[%c32_104, %c0_105] : memref<72x768xbf16, #tpu.memory_space<vmem>>, vector<8x768xbf16>
    tpu.vector_store %arg11[%c32_104, %c0_105], %80 {strides = array<i32>} : memref<72x768xbf16, #tpu.memory_space<vmem>>, vector<8x768xbf16>,
    %c0_106 = arith.constant 0 : index
    %c129_107 = arith.constant 129 : index
    %82 = vector.load %arg12[%c0_106, %c129_107] : memref<8x1024xbf16, #tpu.memory_space<vmem>>, vector<8x768xbf16>
    %c40_108 = arith.constant 40 : index
    %c0_109 = arith.constant 0 : index
    %83 = vector.load %arg11[%c40_108, %c0_109] : memref<72x768xbf16, #tpu.memory_space<vmem>>, vector<8x768xbf16>
    tpu.vector_store %arg11[%c40_108, %c0_109], %82 {strides = array<i32>} : memref<72x768xbf16, #tpu.memory_space<vmem>>, vector<8x768xbf16>,
    %c0_110 = arith.constant 0 : index
    %c145_111 = arith.constant 145 : index
    %84 = vector.load %arg12[%c0_110, %c145_111] : memref<8x1024xbf16, #tpu.memory_space<vmem>>, vector<8x768xbf16>
    %c48_112 = arith.constant 48 : index
    %c0_113 = arith.constant 0 : index
    %85 = vector.load %arg11[%c48_112, %c0_113] : memref<72x768xbf16, #tpu.memory_space<vmem>>, vector<8x768xbf16>
    tpu.vector_store %arg11[%c48_112, %c0_113], %84 {strides = array<i32>} : memref<72x768xbf16, #tpu.memory_space<vmem>>, vector<8x768xbf16>,
    %c0_114 = arith.constant 0 : index
    %c146_115 = arith.constant 146 : index
    %86 = vector.load %arg12[%c0_114, %c146_115] : memref<8x1024xbf16, #tpu.memory_space<vmem>>, vector<8x768xbf16>
    %c56_116 = arith.constant 56 : index
    %c0_117 = arith.constant 0 : index
    %87 = vector.load %arg11[%c56_116, %c0_117] : memref<72x768xbf16, #tpu.memory_space<vmem>>, vector<8x768xbf16>
    tpu.vector_store %arg11[%c56_116, %c0_117], %86 {strides = array<i32>} : memref<72x768xbf16, #tpu.memory_space<vmem>>, vector<8x768xbf16>,
    %c0_118 = arith.constant 0 : index
    %c147_119 = arith.constant 147 : index
    %88 = vector.load %arg12[%c0_118, %c147_119] : memref<8x1024xbf16, #tpu.memory_space<vmem>>, vector<8x768xbf16>
    %c64_120 = arith.constant 64 : index
    %c0_121 = arith.constant 0 : index
    %89 = vector.load %arg11[%c64_120, %c0_121] : memref<72x768xbf16, #tpu.memory_space<vmem>>, vector<8x768xbf16>
    tpu.vector_store %arg11[%c64_120, %c0_121], %88 {strides = array<i32>} : memref<72x768xbf16, #tpu.memory_space<vmem>>, vector<8x768xbf16>,
    %c0_122 = arith.constant 0 : index
    %c0_123 = arith.constant 0 : index
    %90 = vector.load %arg11[%c0_122, %c0_123] : memref<72x768xbf16, #tpu.memory_space<vmem>>, vector<72x768xbf16>
    %c0_124 = arith.constant 0 : index
    %c0_125 = arith.constant 0 : index
    %91 = vector.load %arg7[%c0_124, %c0_125] : memref<8x72xbf16, #tpu.memory_space<vmem>>, vector<8x72xbf16>
    %cst_126 = arith.constant dense<0.000000e+00> : vector<8x768xf32>
    %92 = tpu.matmul %91, %90, %cst_126 {dimension_numbers = #tpu.dot_dimension_numbers<[1], [0], [0], [1], [0, 0, 1, 1], [], []>} : vector<8x72xbf16>, vector<72x768xbf16>, vector<8x768xf32> -> vector<8x768xf32>
    %c0_127 = arith.constant 0 : index
    %c0_128 = arith.constant 0 : index
    %93 = vector.load %arg8[%c0_127, %c0_128] : memref<8x1xf32, #tpu.memory_space<vmem>>, vector<8x1xf32>
    %94 = vector.broadcast %93 : vector<8x1xf32> to vector<8x768xf32>
    %95 = arith.addf %92, %94 : vector<8x768xf32>
    %96 = vector.broadcast %0 : vector<1x768xf32> to vector<8x768xf32>
    %97 = arith.mulf %95, %96 : vector<8x768xf32>
    %c2 = arith.constant 2 : index
    %98 = memref.load %arg9[%c2] : memref<3xf32, #tpu.memory_space<smem>>
    %cst_129 = arith.constant 0.000000e+00 : f32
    %99 = vector.broadcast %cst_129 : f32 to vector<8x768xf32>
    %100 = arith.cmpf oge, %97, %99 : vector<8x768xf32>
    %101 = vector.broadcast %98 : f32 to vector<8x768xf32>
    %102 = arith.mulf %101, %97 : vector<8x768xf32>
    %103 = arith.select %100, %97, %102 : vector<8x768xi1>, vector<8x768xf32>
    %c0_130 = arith.constant 0 : index
    %c128_131 = arith.constant 128 : index
    %104 = vector.load %arg0[%c0_130, %c128_131] : memref<8x1024xbf16, #tpu.memory_space<vmem>>, vector<8x768xbf16>
    %105 = arith.extf %104 : vector<8x768xbf16> to vector<8x768xf32>
    %106 = arith.addf %103, %105 : vector<8x768xf32>
    %cst_132 = arith.constant 0.000000e+00 : bf16
    %107 = vector.broadcast %cst_132 : bf16 to vector<8x128xbf16>
    %c0_133 = arith.constant 0 : index
    %c0_134 = arith.constant 0 : index
    %108 = vector.load %arg10[%c0_133, %c0_134] : memref<8x1024xbf16, #tpu.memory_space<vmem>>, vector<8x128xbf16>
    tpu.vector_store %arg10[%c0_133, %c0_134], %107 {strides = array<i32>} : memref<8x1024xbf16, #tpu.memory_space<vmem>>, vector<8x128xbf16>,
    %109 = arith.truncf %106 : vector<8x768xf32> to vector<8x768xbf16>
    %c0_135 = arith.constant 0 : index
    %c128_136 = arith.constant 128 : index
    %110 = vector.load %arg10[%c0_135, %c128_136] : memref<8x1024xbf16, #tpu.memory_space<vmem>>, vector<8x768xbf16>
    tpu.vector_store %arg10[%c0_135, %c128_136], %109 {strides = array<i32>} : memref<8x1024xbf16, #tpu.memory_space<vmem>>, vector<8x768xbf16>,
    %cst_137 = arith.constant 0.000000e+00 : bf16
    %111 = vector.broadcast %cst_137 : bf16 to vector<8x128xbf16>
    %c0_138 = arith.constant 0 : index
    %c896 = arith.constant 896 : index
    %112 = vector.load %arg10[%c0_138, %c896] : memref<8x1024xbf16, #tpu.memory_space<vmem>>, vector<8x128xbf16>
    tpu.vector_store %arg10[%c0_138, %c896], %111 {strides = array<i32>} : memref<8x1024xbf16, #tpu.memory_space<vmem>>, vector<8x128xbf16>,
    return
  }
}

module attributes {stable_mosaic.version = 11 : i64} {
  func.func @kernel(%arg0: memref<8x1024xbf16, #tpu.memory_space<vmem>>, %arg1: memref<1x768xf32, #tpu.memory_space<vmem>>, %arg2: memref<8x72xbf16, #tpu.memory_space<vmem>>, %arg3: memref<8x1xf32, #tpu.memory_space<vmem>>, %arg4: memref<8x72xbf16, #tpu.memory_space<vmem>>, %arg5: memref<8x1xf32, #tpu.memory_space<vmem>>, %arg6: memref<2xf32, #tpu.memory_space<smem>>, %arg7: memref<8x1024xbf16, #tpu.memory_space<vmem>>, %arg8: memref<72x768xbf16, #tpu.memory_space<vmem>>, %arg9: memref<8x1024xbf16, #tpu.memory_space<vmem>>) attributes {dimension_semantics = [], scalar_prefetch = 0 : i64, scratch_operands = 2 : i64, tpu.core_type = #tpu.core_type<tc>} {
    %c0 = arith.constant 0 : index
    %c0_0 = arith.constant 0 : index
    %0 = vector.load %arg1[%c0, %c0_0] : memref<1x768xf32, #tpu.memory_space<vmem>>, vector<1x768xf32>
    %cst = arith.constant 0.000000e+00 : bf16
    %1 = vector.broadcast %cst : bf16 to vector<8x1024xbf16>
    %c0_1 = arith.constant 0 : index
    %c0_2 = arith.constant 0 : index
    %2 = vector.load %arg9[%c0_1, %c0_2] : memref<8x1024xbf16, #tpu.memory_space<vmem>>, vector<8x1024xbf16>
    tpu.vector_store %arg9[%c0_1, %c0_2], %1 {strides = array<i32>} : memref<8x1024xbf16, #tpu.memory_space<vmem>>, vector<8x1024xbf16>,
    %c0_3 = arith.constant 0 : index
    %c109 = arith.constant 109 : index
    %3 = vector.load %arg0[%c0_3, %c109] : memref<8x1024xbf16, #tpu.memory_space<vmem>>, vector<8x768xbf16>
    %c0_4 = arith.constant 0 : index
    %c0_5 = arith.constant 0 : index
    %4 = vector.load %arg8[%c0_4, %c0_5] : memref<72x768xbf16, #tpu.memory_space<vmem>>, vector<8x768xbf16>
    tpu.vector_store %arg8[%c0_4, %c0_5], %3 {strides = array<i32>} : memref<72x768xbf16, #tpu.memory_space<vmem>>, vector<8x768xbf16>,
    %c0_6 = arith.constant 0 : index
    %c110 = arith.constant 110 : index
    %5 = vector.load %arg0[%c0_6, %c110] : memref<8x1024xbf16, #tpu.memory_space<vmem>>, vector<8x768xbf16>
    %c8 = arith.constant 8 : index
    %c0_7 = arith.constant 0 : index
    %6 = vector.load %arg8[%c8, %c0_7] : memref<72x768xbf16, #tpu.memory_space<vmem>>, vector<8x768xbf16>
    tpu.vector_store %arg8[%c8, %c0_7], %5 {strides = array<i32>} : memref<72x768xbf16, #tpu.memory_space<vmem>>, vector<8x768xbf16>,
    %c0_8 = arith.constant 0 : index
    %c111 = arith.constant 111 : index
    %7 = vector.load %arg0[%c0_8, %c111] : memref<8x1024xbf16, #tpu.memory_space<vmem>>, vector<8x768xbf16>
    %c16 = arith.constant 16 : index
    %c0_9 = arith.constant 0 : index
    %8 = vector.load %arg8[%c16, %c0_9] : memref<72x768xbf16, #tpu.memory_space<vmem>>, vector<8x768xbf16>
    tpu.vector_store %arg8[%c16, %c0_9], %7 {strides = array<i32>} : memref<72x768xbf16, #tpu.memory_space<vmem>>, vector<8x768xbf16>,
    %c0_10 = arith.constant 0 : index
    %c127 = arith.constant 127 : index
    %9 = vector.load %arg0[%c0_10, %c127] : memref<8x1024xbf16, #tpu.memory_space<vmem>>, vector<8x768xbf16>
    %c24 = arith.constant 24 : index
    %c0_11 = arith.constant 0 : index
    %10 = vector.load %arg8[%c24, %c0_11] : memref<72x768xbf16, #tpu.memory_space<vmem>>, vector<8x768xbf16>
    tpu.vector_store %arg8[%c24, %c0_11], %9 {strides = array<i32>} : memref<72x768xbf16, #tpu.memory_space<vmem>>, vector<8x768xbf16>,
    %c0_12 = arith.constant 0 : index
    %c128 = arith.constant 128 : index
    %11 = vector.load %arg0[%c0_12, %c128] : memref<8x1024xbf16, #tpu.memory_space<vmem>>, vector<8x768xbf16>
    %c32 = arith.constant 32 : index
    %c0_13 = arith.constant 0 : index
    %12 = vector.load %arg8[%c32, %c0_13] : memref<72x768xbf16, #tpu.memory_space<vmem>>, vector<8x768xbf16>
    tpu.vector_store %arg8[%c32, %c0_13], %11 {strides = array<i32>} : memref<72x768xbf16, #tpu.memory_space<vmem>>, vector<8x768xbf16>,
    %c0_14 = arith.constant 0 : index
    %c129 = arith.constant 129 : index
    %13 = vector.load %arg0[%c0_14, %c129] : memref<8x1024xbf16, #tpu.memory_space<vmem>>, vector<8x768xbf16>
    %c40 = arith.constant 40 : index
    %c0_15 = arith.constant 0 : index
    %14 = vector.load %arg8[%c40, %c0_15] : memref<72x768xbf16, #tpu.memory_space<vmem>>, vector<8x768xbf16>
    tpu.vector_store %arg8[%c40, %c0_15], %13 {strides = array<i32>} : memref<72x768xbf16, #tpu.memory_space<vmem>>, vector<8x768xbf16>,
    %c0_16 = arith.constant 0 : index
    %c145 = arith.constant 145 : index
    %15 = vector.load %arg0[%c0_16, %c145] : memref<8x1024xbf16, #tpu.memory_space<vmem>>, vector<8x768xbf16>
    %c48 = arith.constant 48 : index
    %c0_17 = arith.constant 0 : index
    %16 = vector.load %arg8[%c48, %c0_17] : memref<72x768xbf16, #tpu.memory_space<vmem>>, vector<8x768xbf16>
    tpu.vector_store %arg8[%c48, %c0_17], %15 {strides = array<i32>} : memref<72x768xbf16, #tpu.memory_space<vmem>>, vector<8x768xbf16>,
    %c0_18 = arith.constant 0 : index
    %c146 = arith.constant 146 : index
    %17 = vector.load %arg0[%c0_18, %c146] : memref<8x1024xbf16, #tpu.memory_space<vmem>>, vector<8x768xbf16>
    %c56 = arith.constant 56 : index
    %c0_19 = arith.constant 0 : index
    %18 = vector.load %arg8[%c56, %c0_19] : memref<72x768xbf16, #tpu.memory_space<vmem>>, vector<8x768xbf16>
    tpu.vector_store %arg8[%c56, %c0_19], %17 {strides = array<i32>} : memref<72x768xbf16, #tpu.memory_space<vmem>>, vector<8x768xbf16>,
    %c0_20 = arith.constant 0 : index
    %c147 = arith.constant 147 : index
    %19 = vector.load %arg0[%c0_20, %c147] : memref<8x1024xbf16, #tpu.memory_space<vmem>>, vector<8x768xbf16>
    %c64 = arith.constant 64 : index
    %c0_21 = arith.constant 0 : index
    %20 = vector.load %arg8[%c64, %c0_21] : memref<72x768xbf16, #tpu.memory_space<vmem>>, vector<8x768xbf16>
    tpu.vector_store %arg8[%c64, %c0_21], %19 {strides = array<i32>} : memref<72x768xbf16, #tpu.memory_space<vmem>>, vector<8x768xbf16>,
    %c0_22 = arith.constant 0 : index
    %c0_23 = arith.constant 0 : index
    %21 = vector.load %arg8[%c0_22, %c0_23] : memref<72x768xbf16, #tpu.memory_space<vmem>>, vector<72x768xbf16>
    %c0_24 = arith.constant 0 : index
    %c0_25 = arith.constant 0 : index
    %22 = vector.load %arg2[%c0_24, %c0_25] : memref<8x72xbf16, #tpu.memory_space<vmem>>, vector<8x72xbf16>
    %cst_26 = arith.constant dense<0.000000e+00> : vector<8x768xf32>
    %23 = tpu.matmul %22, %21, %cst_26 {dimension_numbers = #tpu.dot_dimension_numbers<[1], [0], [0], [1], [0, 0, 1, 1], [], []>} : vector<8x72xbf16>, vector<72x768xbf16>, vector<8x768xf32> -> vector<8x768xf32>
    %c0_27 = arith.constant 0 : index
    %c0_28 = arith.constant 0 : index
    %24 = vector.load %arg3[%c0_27, %c0_28] : memref<8x1xf32, #tpu.memory_space<vmem>>, vector<8x1xf32>
    %25 = vector.broadcast %24 : vector<8x1xf32> to vector<8x768xf32>
    %26 = arith.addf %23, %25 : vector<8x768xf32>
    %27 = vector.broadcast %0 : vector<1x768xf32> to vector<8x768xf32>
    %28 = arith.mulf %26, %27 : vector<8x768xf32>
    %c0_29 = arith.constant 0 : index
    %29 = memref.load %arg6[%c0_29] : memref<2xf32, #tpu.memory_space<smem>>
    %cst_30 = arith.constant 0.000000e+00 : f32
    %30 = vector.broadcast %cst_30 : f32 to vector<8x768xf32>
    %31 = arith.cmpf oge, %28, %30 : vector<8x768xf32>
    %32 = vector.broadcast %29 : f32 to vector<8x768xf32>
    %33 = arith.mulf %32, %28 : vector<8x768xf32>
    %34 = arith.select %31, %28, %33 : vector<8x768xi1>, vector<8x768xf32>
    %35 = arith.truncf %34 : vector<8x768xf32> to vector<8x768xbf16>
    %c0_31 = arith.constant 0 : index
    %c128_32 = arith.constant 128 : index
    %36 = vector.load %arg9[%c0_31, %c128_32] : memref<8x1024xbf16, #tpu.memory_space<vmem>>, vector<8x768xbf16>
    tpu.vector_store %arg9[%c0_31, %c128_32], %35 {strides = array<i32>} : memref<8x1024xbf16, #tpu.memory_space<vmem>>, vector<8x768xbf16>,
    %c0_33 = arith.constant 0 : index
    %c109_34 = arith.constant 109 : index
    %37 = vector.load %arg9[%c0_33, %c109_34] : memref<8x1024xbf16, #tpu.memory_space<vmem>>, vector<8x768xbf16>
    %c0_35 = arith.constant 0 : index
    %c0_36 = arith.constant 0 : index
    %38 = vector.load %arg8[%c0_35, %c0_36] : memref<72x768xbf16, #tpu.memory_space<vmem>>, vector<8x768xbf16>
    tpu.vector_store %arg8[%c0_35, %c0_36], %37 {strides = array<i32>} : memref<72x768xbf16, #tpu.memory_space<vmem>>, vector<8x768xbf16>,
    %c0_37 = arith.constant 0 : index
    %c110_38 = arith.constant 110 : index
    %39 = vector.load %arg9[%c0_37, %c110_38] : memref<8x1024xbf16, #tpu.memory_space<vmem>>, vector<8x768xbf16>
    %c8_39 = arith.constant 8 : index
    %c0_40 = arith.constant 0 : index
    %40 = vector.load %arg8[%c8_39, %c0_40] : memref<72x768xbf16, #tpu.memory_space<vmem>>, vector<8x768xbf16>
    tpu.vector_store %arg8[%c8_39, %c0_40], %39 {strides = array<i32>} : memref<72x768xbf16, #tpu.memory_space<vmem>>, vector<8x768xbf16>,
    %c0_41 = arith.constant 0 : index
    %c111_42 = arith.constant 111 : index
    %41 = vector.load %arg9[%c0_41, %c111_42] : memref<8x1024xbf16, #tpu.memory_space<vmem>>, vector<8x768xbf16>
    %c16_43 = arith.constant 16 : index
    %c0_44 = arith.constant 0 : index
    %42 = vector.load %arg8[%c16_43, %c0_44] : memref<72x768xbf16, #tpu.memory_space<vmem>>, vector<8x768xbf16>
    tpu.vector_store %arg8[%c16_43, %c0_44], %41 {strides = array<i32>} : memref<72x768xbf16, #tpu.memory_space<vmem>>, vector<8x768xbf16>,
    %c0_45 = arith.constant 0 : index
    %c127_46 = arith.constant 127 : index
    %43 = vector.load %arg9[%c0_45, %c127_46] : memref<8x1024xbf16, #tpu.memory_space<vmem>>, vector<8x768xbf16>
    %c24_47 = arith.constant 24 : index
    %c0_48 = arith.constant 0 : index
    %44 = vector.load %arg8[%c24_47, %c0_48] : memref<72x768xbf16, #tpu.memory_space<vmem>>, vector<8x768xbf16>
    tpu.vector_store %arg8[%c24_47, %c0_48], %43 {strides = array<i32>} : memref<72x768xbf16, #tpu.memory_space<vmem>>, vector<8x768xbf16>,
    %c0_49 = arith.constant 0 : index
    %c128_50 = arith.constant 128 : index
    %45 = vector.load %arg9[%c0_49, %c128_50] : memref<8x1024xbf16, #tpu.memory_space<vmem>>, vector<8x768xbf16>
    %c32_51 = arith.constant 32 : index
    %c0_52 = arith.constant 0 : index
    %46 = vector.load %arg8[%c32_51, %c0_52] : memref<72x768xbf16, #tpu.memory_space<vmem>>, vector<8x768xbf16>
    tpu.vector_store %arg8[%c32_51, %c0_52], %45 {strides = array<i32>} : memref<72x768xbf16, #tpu.memory_space<vmem>>, vector<8x768xbf16>,
    %c0_53 = arith.constant 0 : index
    %c129_54 = arith.constant 129 : index
    %47 = vector.load %arg9[%c0_53, %c129_54] : memref<8x1024xbf16, #tpu.memory_space<vmem>>, vector<8x768xbf16>
    %c40_55 = arith.constant 40 : index
    %c0_56 = arith.constant 0 : index
    %48 = vector.load %arg8[%c40_55, %c0_56] : memref<72x768xbf16, #tpu.memory_space<vmem>>, vector<8x768xbf16>
    tpu.vector_store %arg8[%c40_55, %c0_56], %47 {strides = array<i32>} : memref<72x768xbf16, #tpu.memory_space<vmem>>, vector<8x768xbf16>,
    %c0_57 = arith.constant 0 : index
    %c145_58 = arith.constant 145 : index
    %49 = vector.load %arg9[%c0_57, %c145_58] : memref<8x1024xbf16, #tpu.memory_space<vmem>>, vector<8x768xbf16>
    %c48_59 = arith.constant 48 : index
    %c0_60 = arith.constant 0 : index
    %50 = vector.load %arg8[%c48_59, %c0_60] : memref<72x768xbf16, #tpu.memory_space<vmem>>, vector<8x768xbf16>
    tpu.vector_store %arg8[%c48_59, %c0_60], %49 {strides = array<i32>} : memref<72x768xbf16, #tpu.memory_space<vmem>>, vector<8x768xbf16>,
    %c0_61 = arith.constant 0 : index
    %c146_62 = arith.constant 146 : index
    %51 = vector.load %arg9[%c0_61, %c146_62] : memref<8x1024xbf16, #tpu.memory_space<vmem>>, vector<8x768xbf16>
    %c56_63 = arith.constant 56 : index
    %c0_64 = arith.constant 0 : index
    %52 = vector.load %arg8[%c56_63, %c0_64] : memref<72x768xbf16, #tpu.memory_space<vmem>>, vector<8x768xbf16>
    tpu.vector_store %arg8[%c56_63, %c0_64], %51 {strides = array<i32>} : memref<72x768xbf16, #tpu.memory_space<vmem>>, vector<8x768xbf16>,
    %c0_65 = arith.constant 0 : index
    %c147_66 = arith.constant 147 : index
    %53 = vector.load %arg9[%c0_65, %c147_66] : memref<8x1024xbf16, #tpu.memory_space<vmem>>, vector<8x768xbf16>
    %c64_67 = arith.constant 64 : index
    %c0_68 = arith.constant 0 : index
    %54 = vector.load %arg8[%c64_67, %c0_68] : memref<72x768xbf16, #tpu.memory_space<vmem>>, vector<8x768xbf16>
    tpu.vector_store %arg8[%c64_67, %c0_68], %53 {strides = array<i32>} : memref<72x768xbf16, #tpu.memory_space<vmem>>, vector<8x768xbf16>,
    %c0_69 = arith.constant 0 : index
    %c0_70 = arith.constant 0 : index
    %55 = vector.load %arg8[%c0_69, %c0_70] : memref<72x768xbf16, #tpu.memory_space<vmem>>, vector<72x768xbf16>
    %c0_71 = arith.constant 0 : index
    %c0_72 = arith.constant 0 : index
    %56 = vector.load %arg4[%c0_71, %c0_72] : memref<8x72xbf16, #tpu.memory_space<vmem>>, vector<8x72xbf16>
    %cst_73 = arith.constant dense<0.000000e+00> : vector<8x768xf32>
    %57 = tpu.matmul %56, %55, %cst_73 {dimension_numbers = #tpu.dot_dimension_numbers<[1], [0], [0], [1], [0, 0, 1, 1], [], []>} : vector<8x72xbf16>, vector<72x768xbf16>, vector<8x768xf32> -> vector<8x768xf32>
    %c0_74 = arith.constant 0 : index
    %c0_75 = arith.constant 0 : index
    %58 = vector.load %arg5[%c0_74, %c0_75] : memref<8x1xf32, #tpu.memory_space<vmem>>, vector<8x1xf32>
    %59 = vector.broadcast %58 : vector<8x1xf32> to vector<8x768xf32>
    %60 = arith.addf %57, %59 : vector<8x768xf32>
    %61 = vector.broadcast %0 : vector<1x768xf32> to vector<8x768xf32>
    %62 = arith.mulf %60, %61 : vector<8x768xf32>
    %c0_76 = arith.constant 0 : index
    %c128_77 = arith.constant 128 : index
    %63 = vector.load %arg0[%c0_76, %c128_77] : memref<8x1024xbf16, #tpu.memory_space<vmem>>, vector<8x768xbf16>
    %64 = arith.extf %63 : vector<8x768xbf16> to vector<8x768xf32>
    %65 = arith.addf %62, %64 : vector<8x768xf32>
    %cst_78 = arith.constant 0.000000e+00 : bf16
    %66 = vector.broadcast %cst_78 : bf16 to vector<8x128xbf16>
    %c0_79 = arith.constant 0 : index
    %c0_80 = arith.constant 0 : index
    %67 = vector.load %arg7[%c0_79, %c0_80] : memref<8x1024xbf16, #tpu.memory_space<vmem>>, vector<8x128xbf16>
    tpu.vector_store %arg7[%c0_79, %c0_80], %66 {strides = array<i32>} : memref<8x1024xbf16, #tpu.memory_space<vmem>>, vector<8x128xbf16>,
    %68 = arith.truncf %65 : vector<8x768xf32> to vector<8x768xbf16>
    %c0_81 = arith.constant 0 : index
    %c128_82 = arith.constant 128 : index
    %69 = vector.load %arg7[%c0_81, %c128_82] : memref<8x1024xbf16, #tpu.memory_space<vmem>>, vector<8x768xbf16>
    tpu.vector_store %arg7[%c0_81, %c128_82], %68 {strides = array<i32>} : memref<8x1024xbf16, #tpu.memory_space<vmem>>, vector<8x768xbf16>,
    %cst_83 = arith.constant 0.000000e+00 : bf16
    %70 = vector.broadcast %cst_83 : bf16 to vector<8x128xbf16>
    %c0_84 = arith.constant 0 : index
    %c896 = arith.constant 896 : index
    %71 = vector.load %arg7[%c0_84, %c896] : memref<8x1024xbf16, #tpu.memory_space<vmem>>, vector<8x128xbf16>
    tpu.vector_store %arg7[%c0_84, %c896], %70 {strides = array<i32>} : memref<8x1024xbf16, #tpu.memory_space<vmem>>, vector<8x128xbf16>,
    return
  }
}

module attributes {stable_mosaic.version = 11 : i64} {
  func.func @kernel(%arg0: memref<16x1024xbf16, #tpu.memory_space<vmem>>, %arg1: memref<1x768xf32, #tpu.memory_space<vmem>>, %arg2: memref<3x144xbf16, #tpu.memory_space<vmem>>, %arg3: memref<3x1xf32, #tpu.memory_space<vmem>>, %arg4: memref<1xf32, #tpu.memory_space<smem>>, %arg5: memref<3x1024xbf16, #tpu.memory_space<vmem>>, %arg6: memref<144x768xbf16, #tpu.memory_space<vmem>>) attributes {dimension_semantics = [], scalar_prefetch = 0 : i64, scratch_operands = 1 : i64, tpu.core_type = #tpu.core_type<tc>} {
    %c0 = arith.constant 0 : index
    %c0_0 = arith.constant 0 : index
    %0 = vector.load %arg1[%c0, %c0_0] : memref<1x768xf32, #tpu.memory_space<vmem>>, vector<1x768xf32>
    %c0_1 = arith.constant 0 : index
    %c109 = arith.constant 109 : index
    %1 = vector.load %arg0[%c0_1, %c109] : memref<16x1024xbf16, #tpu.memory_space<vmem>>, vector<16x768xbf16>
    %c0_2 = arith.constant 0 : index
    %c0_3 = arith.constant 0 : index
    %2 = vector.load %arg6[%c0_2, %c0_3] : memref<144x768xbf16, #tpu.memory_space<vmem>>, vector<16x768xbf16>
    tpu.vector_store %arg6[%c0_2, %c0_3], %1 {strides = array<i32>} : memref<144x768xbf16, #tpu.memory_space<vmem>>, vector<16x768xbf16>,
    %c0_4 = arith.constant 0 : index
    %c110 = arith.constant 110 : index
    %3 = vector.load %arg0[%c0_4, %c110] : memref<16x1024xbf16, #tpu.memory_space<vmem>>, vector<16x768xbf16>
    %c16 = arith.constant 16 : index
    %c0_5 = arith.constant 0 : index
    %4 = vector.load %arg6[%c16, %c0_5] : memref<144x768xbf16, #tpu.memory_space<vmem>>, vector<16x768xbf16>
    tpu.vector_store %arg6[%c16, %c0_5], %3 {strides = array<i32>} : memref<144x768xbf16, #tpu.memory_space<vmem>>, vector<16x768xbf16>,
    %c0_6 = arith.constant 0 : index
    %c111 = arith.constant 111 : index
    %5 = vector.load %arg0[%c0_6, %c111] : memref<16x1024xbf16, #tpu.memory_space<vmem>>, vector<16x768xbf16>
    %c32 = arith.constant 32 : index
    %c0_7 = arith.constant 0 : index
    %6 = vector.load %arg6[%c32, %c0_7] : memref<144x768xbf16, #tpu.memory_space<vmem>>, vector<16x768xbf16>
    tpu.vector_store %arg6[%c32, %c0_7], %5 {strides = array<i32>} : memref<144x768xbf16, #tpu.memory_space<vmem>>, vector<16x768xbf16>,
    %c0_8 = arith.constant 0 : index
    %c127 = arith.constant 127 : index
    %7 = vector.load %arg0[%c0_8, %c127] : memref<16x1024xbf16, #tpu.memory_space<vmem>>, vector<16x768xbf16>
    %c48 = arith.constant 48 : index
    %c0_9 = arith.constant 0 : index
    %8 = vector.load %arg6[%c48, %c0_9] : memref<144x768xbf16, #tpu.memory_space<vmem>>, vector<16x768xbf16>
    tpu.vector_store %arg6[%c48, %c0_9], %7 {strides = array<i32>} : memref<144x768xbf16, #tpu.memory_space<vmem>>, vector<16x768xbf16>,
    %c0_10 = arith.constant 0 : index
    %c128 = arith.constant 128 : index
    %9 = vector.load %arg0[%c0_10, %c128] : memref<16x1024xbf16, #tpu.memory_space<vmem>>, vector<16x768xbf16>
    %c64 = arith.constant 64 : index
    %c0_11 = arith.constant 0 : index
    %10 = vector.load %arg6[%c64, %c0_11] : memref<144x768xbf16, #tpu.memory_space<vmem>>, vector<16x768xbf16>
    tpu.vector_store %arg6[%c64, %c0_11], %9 {strides = array<i32>} : memref<144x768xbf16, #tpu.memory_space<vmem>>, vector<16x768xbf16>,
    %c0_12 = arith.constant 0 : index
    %c129 = arith.constant 129 : index
    %11 = vector.load %arg0[%c0_12, %c129] : memref<16x1024xbf16, #tpu.memory_space<vmem>>, vector<16x768xbf16>
    %c80 = arith.constant 80 : index
    %c0_13 = arith.constant 0 : index
    %12 = vector.load %arg6[%c80, %c0_13] : memref<144x768xbf16, #tpu.memory_space<vmem>>, vector<16x768xbf16>
    tpu.vector_store %arg6[%c80, %c0_13], %11 {strides = array<i32>} : memref<144x768xbf16, #tpu.memory_space<vmem>>, vector<16x768xbf16>,
    %c0_14 = arith.constant 0 : index
    %c145 = arith.constant 145 : index
    %13 = vector.load %arg0[%c0_14, %c145] : memref<16x1024xbf16, #tpu.memory_space<vmem>>, vector<16x768xbf16>
    %c96 = arith.constant 96 : index
    %c0_15 = arith.constant 0 : index
    %14 = vector.load %arg6[%c96, %c0_15] : memref<144x768xbf16, #tpu.memory_space<vmem>>, vector<16x768xbf16>
    tpu.vector_store %arg6[%c96, %c0_15], %13 {strides = array<i32>} : memref<144x768xbf16, #tpu.memory_space<vmem>>, vector<16x768xbf16>,
    %c0_16 = arith.constant 0 : index
    %c146 = arith.constant 146 : index
    %15 = vector.load %arg0[%c0_16, %c146] : memref<16x1024xbf16, #tpu.memory_space<vmem>>, vector<16x768xbf16>
    %c112 = arith.constant 112 : index
    %c0_17 = arith.constant 0 : index
    %16 = vector.load %arg6[%c112, %c0_17] : memref<144x768xbf16, #tpu.memory_space<vmem>>, vector<16x768xbf16>
    tpu.vector_store %arg6[%c112, %c0_17], %15 {strides = array<i32>} : memref<144x768xbf16, #tpu.memory_space<vmem>>, vector<16x768xbf16>,
    %c0_18 = arith.constant 0 : index
    %c147 = arith.constant 147 : index
    %17 = vector.load %arg0[%c0_18, %c147] : memref<16x1024xbf16, #tpu.memory_space<vmem>>, vector<16x768xbf16>
    %c128_19 = arith.constant 128 : index
    %c0_20 = arith.constant 0 : index
    %18 = vector.load %arg6[%c128_19, %c0_20] : memref<144x768xbf16, #tpu.memory_space<vmem>>, vector<16x768xbf16>
    tpu.vector_store %arg6[%c128_19, %c0_20], %17 {strides = array<i32>} : memref<144x768xbf16, #tpu.memory_space<vmem>>, vector<16x768xbf16>,
    %c0_21 = arith.constant 0 : index
    %c0_22 = arith.constant 0 : index
    %19 = vector.load %arg6[%c0_21, %c0_22] : memref<144x768xbf16, #tpu.memory_space<vmem>>, vector<144x768xbf16>
    %c0_23 = arith.constant 0 : index
    %c0_24 = arith.constant 0 : index
    %20 = vector.load %arg2[%c0_23, %c0_24] : memref<3x144xbf16, #tpu.memory_space<vmem>>, vector<3x144xbf16>
    %cst = arith.constant dense<0.000000e+00> : vector<3x768xf32>
    %21 = tpu.matmul %20, %19, %cst {dimension_numbers = #tpu.dot_dimension_numbers<[1], [0], [0], [1], [0, 0, 1, 1], [], []>} : vector<3x144xbf16>, vector<144x768xbf16>, vector<3x768xf32> -> vector<3x768xf32>
    %c0_25 = arith.constant 0 : index
    %c0_26 = arith.constant 0 : index
    %22 = vector.load %arg3[%c0_25, %c0_26] : memref<3x1xf32, #tpu.memory_space<vmem>>, vector<3x1xf32>
    %23 = vector.broadcast %22 : vector<3x1xf32> to vector<3x768xf32>
    %24 = arith.addf %21, %23 : vector<3x768xf32>
    %25 = vector.broadcast %0 : vector<1x768xf32> to vector<3x768xf32>
    %26 = arith.mulf %24, %25 : vector<3x768xf32>
    %cst_27 = arith.constant 0.000000e+00 : bf16
    %27 = vector.broadcast %cst_27 : bf16 to vector<3x128xbf16>
    %c0_28 = arith.constant 0 : index
    %c0_29 = arith.constant 0 : index
    %28 = vector.load %arg5[%c0_28, %c0_29] : memref<3x1024xbf16, #tpu.memory_space<vmem>>, vector<3x128xbf16>
    tpu.vector_store %arg5[%c0_28, %c0_29], %27 {strides = array<i32>} : memref<3x1024xbf16, #tpu.memory_space<vmem>>, vector<3x128xbf16>,
    %29 = arith.truncf %26 : vector<3x768xf32> to vector<3x768xbf16>
    %c0_30 = arith.constant 0 : index
    %c128_31 = arith.constant 128 : index
    %30 = vector.load %arg5[%c0_30, %c128_31] : memref<3x1024xbf16, #tpu.memory_space<vmem>>, vector<3x768xbf16>
    tpu.vector_store %arg5[%c0_30, %c128_31], %29 {strides = array<i32>} : memref<3x1024xbf16, #tpu.memory_space<vmem>>, vector<3x768xbf16>,
    %cst_32 = arith.constant 0.000000e+00 : bf16
    %31 = vector.broadcast %cst_32 : bf16 to vector<3x128xbf16>
    %c0_33 = arith.constant 0 : index
    %c896 = arith.constant 896 : index
    %32 = vector.load %arg5[%c0_33, %c896] : memref<3x1024xbf16, #tpu.memory_space<vmem>>, vector<3x128xbf16>
    tpu.vector_store %arg5[%c0_33, %c896], %31 {strides = array<i32>} : memref<3x1024xbf16, #tpu.memory_space<vmem>>, vector<3x128xbf16>,
    return
  }
}

</mosaic_0001>

<bundles_post_ra>
// kernel: rbpn_forward.33
= control target key start
LH: loop header
LB: loop body
LE: loop exit
PB: predicated region body
PF: predicated region fallthrough
CT: control target
= control target key end

     0   :  { %vm40_vm0 = vcmask 1043456   ;;  %v134_v1 = vmov 0   ;;  %vm36_vm1 = vcmask 64512   ;;  %v89_v7 = vlaneseq  ;;  %s189_s0 = inlined_call_operand.vmem [shape: bf16[8,512], index: 0, kind: input, shape index: {}]   ;;  %s190_s5 = inlined_call_operand.vmem [shape: bf16[8,512], index: 5, kind: output, shape index: {}]   ;;  %s191_s3 = inlined_call_operand.vmem [shape: f32[8,1], index: 3, kind: input, shape index: {}]   ;;  %s192_s2 = inlined_call_operand.vmem [shape: bf16[8,8], index: 2, kind: input, shape index: {}]   ;;  %s193_s1 = inlined_call_operand.vmem [shape: f32[1,256], index: 1, kind: input, shape index: {}]   ;;  %s194_s4 = inlined_call_operand.<no memory space> [shape: f32[1], index: 4, kind: input, shape index: {}]  }
   0x1   :  { %v23_v0 = vld [vmem:[%s189_s0 + $0x4] sm:$0xff]  ;;  %79 = vmatprep.mubr.bf16.mxu0 %v134_v1  ;;  %109 = vst [vmem:[%s190_s5] sm:$0xf] %v134_v1  ;;  %119 = vst [vmem:[%s190_s5 + $0xc] sm:$0xf] %v134_v1  ;;  %131 = vset.pattern.permute.xlu0 %v134_v1  ;;  %v24_v6 = vld [vmem:[%s192_s2] sm:$0xf] }
   0x2   :  { %v25_v2 = vld [vmem:[%s191_s3] sm:$0xff]  ;;  %v125_v3 = vcombine.high %v23_v0, %v23_v0  ;;  %v124_v4 = vcombine.low %v23_v0, %v23_v0  ;;  %v90_v8 = vshrl.u32 %v89_v7, 7  ;;  %v104_v18 = vstv %s194_s4 }
   0x3   :  { %28 = vperm.xlu0 %131, %v25_v2   ;;  %v22_v10 = vld [vmem:[%s193_s1] sm:$0x3] }
   0x4   :  { %126 = vmatprep.subr.msk.bf16.mxu0 %vm40_vm0, %v125_v3  ;;  %v42_v5 = vsel %vm40_vm0, %v124_v4, 0  ;;  %v91_v9 = vsub.s32 0, %v90_v8  ;;  %v95_v11 = vsub.s32 1, %v90_v8 }
   0x5   :  { %48 = vmatpush1.bf16.msra.mxu0 %v42_v5 }
   0x6   :  { %v92_v13 = vrot.slane %v22_v10, %v91_v9  ;;  %v96_v15 = vrot.slane %v22_v10, %v95_v11 }
   0x8   :  { %127 = vmatmul.mubr.msk.bf16.vlgmr.msra.gmra.mrb[0].mxu0 %vm36_vm1, %v24_v6 }
  0x82   :  { %v29_v12 = vpop.permute.xlu0 %28 }
  0xdb   :  { %v81_v14 = vpop.f32.mrb[0].mxu0 }
  0xdc   :  { %v82_v16 = vadd.f32 %v81_v14, %v29_v12  ;;  %v83_v17 = vpop.f32.mrb[1].mxu0 }
  0xdd   :  { %v84_v19 = vadd.f32 %v83_v17, %v29_v12  ;;  %v85_v20 = vpop.f32.mrb[2].mxu0 }
  0xde   :  { %v99_v21 = vmul.f32 %v92_v13, %v82_v16  ;;  %v86_v22 = vpop.f32.mrb[3].mxu0 }
  0xdf   :  { %v100_v23 = vmul.f32 %v96_v15, %v84_v19 }
  0xe0   :  { %vm102_vm2 = vcmp.ge.f32.partialorder %v99_v21, 0.0  ;;  %v105_v24 = vmul.f32 %v104_v18, %v99_v21 }
  0xe1   :  { %vm103_vm3 = vcmp.ge.f32.partialorder %v100_v23, 0.0  ;;  %v106_v25 = vmul.f32 %v104_v18, %v100_v23 }
  0xe2   :  { %v107_v26 = vsel %vm102_vm2, %v99_v21, %v105_v24 }
  0xe3   :  { %v108_v27 = vsel %vm103_vm3, %v100_v23, %v106_v25 }
  0xe4   :  { %v129_v28 = vpack.c.bf16 %v108_v27, %v107_v26 }
  0xe6   :  { %118 = vst [vmem:[%s190_s5 + $0x4] sm:$0xff] %v129_v28 }

// kernel: rbpn_forward.30
= control target key start
LH: loop header
LB: loop body
LE: loop exit
PB: predicated region body
PF: predicated region fallthrough
CT: control target
= control target key end

     0   :  { %v29_v0 = vlaneseq  ;;  %v578_v1 = vmov 1983009808   ;;  %s579_s30 = smov 11   ;;  %s580_s6 = smov 119   ;;  %vm225_vm0 = vcmask 1043458   ;;  %vm228_vm2 = vcmask 1047558   ;;  %s841_s0 = inlined_call_operand.vmem [shape: bf16[3,512], index: 0, kind: input, shape index: {}]   ;;  %s842_s5 = inlined_call_operand.vmem [shape: bf16[8,512], index: 5, kind: output, shape index: {}]   ;;  %s843_s3 = inlined_call_operand.vmem [shape: f32[8,1], index: 3, kind: input, shape index: {}]   ;;  %s844_s2 = inlined_call_operand.vmem [shape: bf16[8,27], index: 2, kind: input, shape index: {}]   ;;  %s845_s1 = inlined_call_operand.vmem [shape: f32[1,256], index: 1, kind: input, shape index: {}]   ;;  %s846_s4 = inlined_call_operand.<no memory space> [shape: f32[1], index: 4, kind: input, shape index: {}]  }
   0x1   :  { %v27_v2 = vunpack.c.l.s4 %v578_v1  ;;  %v300_v3 = vld [vmem:[%s841_s0 + $0x2] sm:$0x3f]  ;;  %s581_s9 = smov 9   ;;  %s582_s10 = smov 10   ;;  %vm226_vm1 = vsmask.f32 3328 }
   0x2   :  { %v622_v4 = vshrl.u32 %v29_v0, 7  ;;  %v61_v5 = vld [vmem:[%s841_s0] sm:$0x3f]  ;;  %v302_v8 = vcombine.high %v300_v3, %v300_v3  ;;  %s583_s11 = smov 1   ;;  %s584_s12 = smov 127   ;;  %vm227_vm4 = vmand %vm225_vm0, %vm226_vm1  ;;  %vm848_vm12 = vcmask 1041408  }
   0x3   :  { %v23_v6 = vld [vmem:[%s841_s0] sm:$0x3f]  ;;  %v28_v7 = vunpack.c.0.s8 %v27_v2  ;;  %v63_v13 = vcombine.high %v61_v5, %v61_v5  ;;  %vm229_vm3 = vsmask.f32 7424  ;;  %vm380_vm7 = vsmask.f32 7946 }
   0x4   :  { %v114_v9 = vld [vmem:[%s841_s0] sm:$0x3f]  ;;  %v25_v11 = vcombine.high %v23_v6, %v23_v6  ;;  %vm230_vm5 = vmand %vm228_vm2, %vm229_vm3  ;;  %vm382_vm8 = vsmask.f32 7962  ;;  %s586_s17 = smov 117   ;;  %vm847_vm14 = vcmask 1045508  }
   0x5   :  { %v165_v10 = vld [vmem:[%s841_s0] sm:$0x3f]  ;;  %v116_v12 = vcombine.high %v114_v9, %v114_v9  ;;  %v637_v14 = vsub.s32 %v28_v7, %v622_v4  ;;  %vm231_vm6 = vmor %vm230_vm5, %vm227_vm4  ;;  %vm52_vm13 = vsmask.f32 1280  ;;  %vm55_vm15 = vsmask.f32 5376 }
   0x6   :  { %v167_v15 = vcombine.high %v165_v10, %v165_v10  ;;  %v235_v19 = vld [vmem:[%s841_s0 + $0x2] sm:$0x3f]  ;;  %vm683_vm9 = vmand %vm225_vm0, %vm380_vm7  ;;  %vm104_vm3 = vcmask 1042433   ;;  %vm329_vm4 = vsmask.f32 2304  ;;  %vm46_vm5 = vcmask 1043456  }
   0x7   :  { %v32_v16 = vrot.slane %v23_v6, %v637_v14  ;;  %v316_v17 = vrot.slane %v302_v8, %v637_v14  ;;  %v123_v18 = vrot.slane %v114_v9, %v637_v14  ;;  %v39_v20 = vrot.slane %v25_v11, %v637_v14  ;;  %v337_v40 = vld [vmem:[%s841_s0 + $0x2] sm:$0x3f]  ;;  %vm688_vm10 = vmand %vm228_vm2, %vm382_vm8 }
   0x8   :  { %v647_v21 = vrot.slane %v116_v12, %v637_v14  ;;  %v70_v22 = vrot.slane %v61_v5, %v637_v14  ;;  %v77_v23 = vrot.slane %v63_v13, %v637_v14  ;;  %v309_v26 = vrot.slane %v300_v3, %v637_v14  ;;  %v388_v11 = vld [vmem:[%s841_s0 + $0x2] sm:$0x3f]  ;;  %vm708_vm0 = vmand %vm848_vm12, %vm52_vm13 }
   0x9   :  { %40 = vrot.lane.b32.xlu0 %v32_v16, %s579_s30  ;;  %v318_v24 = vrot.slane %v316_v17, 7  ;;  %v651_v25 = vrot.slane %v123_v18, 5  ;;  %v174_v27 = vrot.slane %v165_v10, %v637_v14  ;;  %v181_v30 = vrot.slane %v167_v15, %v637_v14  ;;  %v571_v10 = vld [vmem:[%s841_s0 + $0x2] ss:$0 sps:$4 sm:$0xff]   ;;  %s585_s0 = smov 118   ;;  %vm713_vm1 = vmand %vm847_vm14, %vm55_vm15 }
   0xa   :  { %v79_v28 = vshrl.u32 %v70_v22, 16  ;;  %v82_v29 = vshll.u32 %v70_v22, 16  ;;  %v237_v31 = vcombine.high %v235_v19, %v235_v19  ;;  %v132_v33 = vrot.slane %v647_v21, 5  ;;  %vm727_vm12 = vmand %vm104_vm3, %vm329_vm4 }
   0xb   :  { %321 = vrot.lane.b32.xlu1 %v318_v24, %s580_s6  ;;  %v133_v32 = vrot.slane %v651_v25, 4  ;;  %v87_v34 = vshrl.u32 %v77_v23, 16  ;;  %v90_v35 = vshll.u32 %v77_v23, 16  ;;  %v317_v36 = vrot.slane %v309_v26, 7 }
   0xc   :  { %v81_v37 = vrot.slane %v79_v28, 6  ;;  %v84_v38 = vrot.slane %v82_v29, 7  ;;  %v183_v39 = vshrl.u32 %v174_v27, 16  ;;  %v244_v41 = vrot.slane %v235_v19, %v637_v14  ;;  %v232_v19 = vld [vmem:[#allocation2 + $0x8] sm:$0xcc]  ;;  %v423_v29 = vld [vmem:[%s843_s3] sm:$0xff] }
   0xd   :  { %42 = vrot.lane.b32.xlu0 %v39_v20, %s579_s30  ;;  %v251_v42 = vrot.slane %v237_v31, %v637_v14  ;;  %v134_v43 = vrot.slane %v132_v33, 4  ;;  %v89_v44 = vrot.slane %v87_v34, 6  ;;  %v92_v45 = vrot.slane %v90_v35, 7 }
   0xe   :  { %v190_v46 = vshrl.u32 %v181_v30, 16  ;;  %v186_v47 = vshll.u32 %v174_v27, 16  ;;  %v339_v48 = vcombine.high %v337_v40, %v337_v40  ;;  %v85_v49 = vor.u32 %v84_v38, %v81_v37  ;;  %v58_v38 = vld [vmem:[#allocation2] sm:$0x33] }
   0xf   :  { %139 = vrot.lane.b32.xlu1 %v133_v32, %s581_s9  ;;  %v185_v50 = vrot.slane %v183_v39, 7  ;;  %v253_v51 = vshll.u32 %v244_v41, 16  ;;  %v257_v52 = vshll.u32 %v251_v42, 16  ;;  %v93_v53 = vor.u32 %v92_v45, %v89_v44 }
  0x10   :  { %v192_v54 = vrot.slane %v190_v46, 7  ;;  %v193_v55 = vshll.u32 %v181_v30, 16  ;;  %v346_v56 = vrot.slane %v337_v40, %v637_v14  ;;  %v353_v60 = vrot.slane %v339_v48, %v637_v14 }
  0x11   :  { %319 = vrot.lane.b32.xlu0 %v317_v36, %s580_s6  ;;  %v188_v57 = vor.u32 %v186_v47, %v185_v50  ;;  %v255_v58 = vrot.slane %v253_v51, 5  ;;  %v259_v59 = vrot.slane %v257_v52, 5  ;;  %v260_v6 = vshrl.u32 %v244_v41, 16  ;;  %v334_v50 = vld [vmem:[#allocation2 + $0x10] sm:$0x66] }
  0x12   :  { %v195_v61 = vor.u32 %v193_v55, %v192_v54  ;;  %v355_v62 = vshrl.u32 %v346_v56, 16  ;;  %v358_v63 = vshll.u32 %v346_v56, 16  ;;  %v363_v1 = vshrl.u32 %v353_v60, 16 }
  0x13   :  { %141 = vrot.lane.b32.xlu1 %v134_v43, %s581_s9  ;;  %v556_v0 = vpack.i.bf16 %v259_v59, %v255_v58  ;;  %v366_v2 = vshll.u32 %v353_v60, 16  ;;  %v265_v9 = vshrl.u32 %v251_v42, 16  ;;  %v262_v13 = vrot.slane %v260_v6, 4 }
  0x14   :  { %v357_v3 = vrot.slane %v355_v62, 5  ;;  %v360_v5 = vrot.slane %v358_v63, 6  ;;  %v365_v7 = vrot.slane %v363_v1, 5  ;;  %v390_v16 = vcombine.high %v388_v11, %v388_v11 }
  0x15   :  { %94 = vrot.lane.b32.xlu0 %v85_v49, %s582_s10  ;;  %v368_v8 = vrot.slane %v366_v2, 6  ;;  %v267_v17 = vrot.slane %v265_v9, 4  ;;  %v223_v18 = vrot.slane %v571_v10, %v637_v14  ;;  %v397_v20 = vrot.slane %v388_v11, %v637_v14 }
  0x16   :  { %v361_v12 = vor.u32 %v360_v5, %v357_v3  ;;  %v263_v21 = vor.u32 %v262_v13, %v255_v58  ;;  %v404_v22 = vrot.slane %v390_v16, %v637_v14  ;;  %v853_v26 = vmov 0 }
  0x17   :  { %96 = vrot.lane.b32.xlu1 %v93_v53, %s582_s10  ;;  %v369_v15 = vor.u32 %v368_v8, %v365_v7  ;;  %v268_v23 = vor.u32 %v267_v17, %v259_v59  ;;  %v233_v24 = vsel %vm231_vm6, %v223_v18, %v232_v19  ;;  %v854_v26 = vsel %vm683_vm9, 4294967295, %v853_v26 }
  0x18   :  { %234 = vst [vmem:[#allocation2 + $0x8] sm:$0xcc] %v233_v24  ;;  %v855_v28 = vmov 0  ;;  %v587_v14 = vmov 0   ;;  %vm105_vm2 = vsmask.f32 7942 }
  0x19   :  { %196 = vrot.lane.b32.xlu0 %v188_v57, %s583_s11  ;;  %v269_v27 = vrot.slane %v268_v23, 4  ;;  %v856_v28 = vsel %vm688_vm10, 4294967295, %v855_v28  ;;  %493 = vmatprep.mubr.bf16.mxu0 %v587_v14  ;;  %523 = vst [vmem:[%s842_s5] sm:$0xf] %v587_v14  ;;  %533 = vst [vmem:[%s842_s5 + $0xc] sm:$0xf] %v587_v14  ;;  %vm107_vm8 = vcmask 1046533  }
  0x1a   :  { %561 = vset.pattern.permute.xlu1 %v587_v14  ;;  %562 = vset.pattern.permute.xlu0 %v587_v14  ;;  %vm331_vm13 = vsmask.f32 6400  ;;  %vm722_vm15 = vmand %vm104_vm3, %vm105_vm2  ;;  %v861_v37 = vmov 0  ;;  %vm155_vm11 = vcmask 1040384   ;;  %vm156_vm14 = vsmask.f32 256 }
  0x1b   :  { %198 = vrot.lane.b32.xlu1 %v195_v61, %s583_s11  ;;  %v862_v37 = vsel %vm722_vm15, 4294967295, %v861_v37  ;;  %vm158_vm7 = vcmask 1044484   ;;  %vm159_vm6 = vsmask.f32 4352  ;;  %vm733_vm9 = vmand %vm107_vm8, %vm331_vm13  ;;  %vm867_vm2 = vcmask 89088  }
  0x1c   :  { %vm108_vm10 = vsmask.f32 7958  ;;  %vm738_vm15 = vmand %vm155_vm11, %vm156_vm14  ;;  %vm326_vm4 = vcmask 973824   ;;  %v162_v57 = vld [vmem:[#allocation2 + $0x8] sm:$0x11]  ;;  %v505_v2 = vsub.s32 0, %v622_v4 }
  0x1d   :  { %557 = vrot.lane.b32.xlu0 %v556_v0, %s584_s12  ;;  %vm870_vm3 = vmor %vm713_vm1, %vm708_vm0  ;;  %v509_v5 = vsub.s32 1, %v622_v4 }
  0x1e   :  { %vm747_vm13 = vmand %vm158_vm7, %vm159_vm6  ;;  %vm852_vm6 = vcmask 72704  }
  0x1f   :  { %135 = vrot.lane.b32.xlu1 %v651_v25, %s581_s9  ;;  %v264_v25 = vrot.slane %v263_v21, 4  ;;  %vm333_vm11 = vmor %vm733_vm9, %vm727_vm12  ;;  %vm206_vm9 = vsmask.f32 7938  ;;  %vm875_vm12 = vnez %v862_v37  ;;  %v296_v14 = vld [vmem:[#allocation2 + $0x8] sm:$0x88] }
  0x20   :  { %vm756_vm14 = vmand %vm107_vm8, %vm108_vm10  ;;  %vm208_vm10 = vsmask.f32 7954  ;;  %vm293_vm8 = vsmask.f32 7966 }
  0x21   :  { %137 = vrot.lane.b32.xlu0 %v132_v33, %s581_s9  ;;  %vm161_vm7 = vmor %vm747_vm13, %vm738_vm15  ;;  %vm876_vm15 = vcmask 1041408  }
  0x23   :  { %370 = vrot.lane.b32.xlu1 %v361_v12, %s585_s0 }
  0x25   :  { %372 = vrot.lane.b32.xlu0 %v369_v15, %s585_s0 }
  0x27   :  { %405 = vrot.lane.b32.xlu1 %v397_v20, %s586_s17 }
  0x29   :  { %407 = vrot.lane.b32.xlu0 %v404_v22, %s586_s17 }
  0x2b   :  { %274 = vrot.lane.b32.xlu1 %v264_v25, %s584_s12 }
  0x2d   :  { %276 = vrot.lane.b32.xlu0 %v269_v27, %s584_s12 }
  0x2f   :  { %426 = vperm.xlu1 %561, %v423_v29  }
  0x7b   :  { %v41_v30 = vpop.permute.xlu0 %40 }
  0x7c   :  { %v44_v35 = vrot.slane %v41_v30, 4 }
  0x7d   :  { %v322_v33 = vpop.permute.xlu1 %321 }
  0x7e   :  { %v324_v46 = vrot.slane %v322_v33, 4 }
  0x7f   :  { %v43_v34 = vpop.permute.xlu0 %42 }
  0x80   :  { %v45_v36 = vrot.slane %v43_v34, 4 }
  0x81   :  { %v140_v39 = vpop.permute.xlu1 %139 }
  0x82   :  { %v47_v41 = vsel %vm46_vm5, %v44_v35, %v45_v36  ;;  %v145_v52 = vrot.slane %v140_v39, 4 }
  0x83   :  { %v49_v43 = vsel %vm867_vm2, %v41_v30, %v47_v41  ;;  %v320_v44 = vpop.permute.xlu0 %319  ;;  %vm101_vm2 = vcmask 80896  }
  0x84   :  { %v59_v47 = vsel %vm870_vm3, %v49_v43, %v58_v38  ;;  %v323_v48 = vrot.slane %v320_v44, 4  ;;  %vm772_vm3 = vmand %vm876_vm15, %vm206_vm9 }
  0x85   :  { %60 = vst [vmem:[#allocation2] sm:$0x33] %v59_v47  ;;  %v142_v51 = vpop.permute.xlu1 %141  ;;  %vm882_vm9 = vmor %vm756_vm14, %vm875_vm12  ;;  %vm283_vm14 = vcmask 1039360   ;;  %vm887_vm12 = vcmask 72704  }
  0x86   :  { %v325_v54 = vsel %vm46_vm5, %v323_v48, %v324_v46  ;;  %v146_v55 = vrot.slane %v142_v51, 4 }
  0x87   :  { %v327_v56 = vsel %vm326_vm4, %v320_v44, %v325_v54  ;;  %v95_v58 = vpop.permute.xlu0 %94  ;;  %vm879_vm4 = vcmask 1045508  }
  0x88   :  { %v335_v59 = vsel %vm333_vm11, %v327_v56, %v334_v50  ;;  %v150_v60 = vsel %vm46_vm5, %v145_v52, %v146_v55  ;;  %v98_v0 = vrot.slane %v95_v58, 4  ;;  %vm777_vm13 = vmand %vm879_vm4, %vm208_vm10  ;;  %vm289_vm11 = vcmask 1043459   ;;  %v415_v50 = vld [vmem:[#allocation2 + $0x18] sm:$0x33] }
  0x89   :  { %336 = vst [vmem:[#allocation2 + $0x10] sm:$0x66] %v335_v59  ;;  %v151_v61 = vsel %vm852_vm6, %v140_v39, %v150_v60  ;;  %v97_v62 = vpop.permute.xlu1 %96  ;;  %vm292_vm6 = vcmask 1047559   ;;  %vm203_vm10 = vcmask 7168   ;;  %vm210_vm15 = vmor %vm777_vm13, %vm772_vm3  ;;  %vm888_vm3 = vnez %v856_v28 }
  0x8a   :  { %v163_v63 = vsel %vm161_vm7, %v151_v61, %v162_v57  ;;  %v99_v1 = vrot.slane %v97_v62, 4  ;;  %vm290_vm7 = vsmask.f32 7950  ;;  %vm889_vm13 = vnez %v854_v26 }
  0x8b   :  { %164 = vst [vmem:[#allocation2 + $0x8] sm:$0x11] %v163_v63  ;;  %v197_v3 = vpop.permute.xlu0 %196  ;;  %vm791_vm4 = vmand %vm289_vm11, %vm290_vm7  ;;  %vm412_vm7 = vcmask 957440   ;;  %v588_v60 = vmov 65535  }
  0x8c   :  { %v100_v6 = vsel %vm46_vm5, %v98_v0, %v99_v1  ;;  %v111_v7 = vld [vmem:[#allocation2] sm:$0x66]  ;;  %v200_v11 = vrot.slane %v197_v3, 4  ;;  %vm890_vm11 = vmor %vm888_vm3, %vm889_vm13 }
  0x8d   :  { %v102_v8 = vsel %vm101_vm2, %v95_v58, %v100_v6  ;;  %v199_v9 = vpop.permute.xlu1 %198  ;;  %vm796_vm2 = vmand %vm292_vm6, %vm293_vm8  ;;  %vm377_vm8 = vcmask 965632   ;;  %v422_v1 = vld [vmem:[%s844_s2] sm:$0xf] }
  0x8e   :  { %v112_v10 = vsel %vm882_vm9, %v102_v8, %v111_v7  ;;  %v201_v12 = vrot.slane %v199_v9, 4  ;;  %vm295_vm6 = vmor %vm796_vm2, %vm791_vm4 }
  0x8f   :  { %113 = vst [vmem:[#allocation2] sm:$0x66] %v112_v10  ;;  %v558_v15 = vpop.permute.xlu0 %557  ;;  %vm891_vm9 = vmor %vm713_vm1, %vm708_vm0  ;;  %vm447_vm0 = vcmask 220160  }
  0x90   :  { %v202_v16 = vsel %vm46_vm5, %v200_v11, %v201_v12  ;;  %v560_v18 = vunpack.i.h.bf16 %v558_v15  ;;  %v559_v19 = vunpack.i.l.bf16 %v558_v15  ;;  %v385_v45 = vld [vmem:[#allocation2 + $0x10] sm:$0xcc]  ;;  %v518_v12 = vstv %s846_s4 }
  0x91   :  { %v204_v20 = vsel %vm203_vm10, %v197_v3, %v202_v16  ;;  %v136_v21 = vpop.permute.xlu1 %135  ;;  %vm451_vm10 = vcmask 1044480   ;;  %v22_v3 = vld [vmem:[%s845_s1] sm:$0x3] }
  0x92   :  { %v211_v22 = vld [vmem:[#allocation2 + $0x8] sm:$0x33]  ;;  %v279_v23 = vrot.slane %v560_v18, 4  ;;  %v278_v24 = vrot.slane %v559_v19, 4  ;;  %v143_v25 = vrot.slane %v136_v21, 4  ;;  %v453_v61 = vsel %vm451_vm10, 4294967295, %v588_v60 }
  0x93   :  { %v212_v27 = vsel %vm210_vm15, %v204_v20, %v211_v22  ;;  %v138_v29 = vpop.permute.xlu0 %137  ;;  %vm452_vm15 = vcmask 1045504   ;;  %v506_v7 = vrot.slane %v22_v3, %v505_v2  ;;  %v510_v9 = vrot.slane %v22_v3, %v509_v5 }
  0x94   :  { %213 = vst [vmem:[#allocation2 + $0x8] sm:$0x33] %v212_v27  ;;  %v282_v30 = vsel %vm46_vm5, %v278_v24, %v279_v23  ;;  %v144_v33 = vrot.slane %v138_v29, 4  ;;  %v454_v62 = vsel %vm452_vm15, %v453_v61, 0 }
  0x95   :  { %v284_v34 = vsel %vm283_vm14, %v559_v19, %v282_v30  ;;  %v371_v35 = vpop.permute.xlu1 %370 }
  0x96   :  { %v297_v36 = vsel %vm295_vm6, %v284_v34, %v296_v14  ;;  %v147_v37 = vsel %vm46_vm5, %v143_v25, %v144_v33  ;;  %v374_v38 = vrot.slane %v371_v35, 4 }
  0x97   :  { %298 = vst [vmem:[#allocation2 + $0x8] sm:$0x88] %v297_v36  ;;  %v149_v39 = vsel %vm887_vm12, %v136_v21, %v147_v37  ;;  %v373_v40 = vpop.permute.xlu0 %372 }
  0x98   :  { %154 = vst [vmem:[#allocation2] sm:$0x88] %v149_v39  ;;  %v375_v41 = vrot.slane %v373_v40, 4 }
  0x99   :  { %v406_v42 = vpop.permute.xlu1 %405 }
  0x9a   :  { %v376_v43 = vsel %vm46_vm5, %v374_v38, %v375_v41  ;;  %v409_v44 = vrot.slane %v406_v42, 4 }
  0x9b   :  { %v378_v46 = vsel %vm377_vm8, %v371_v35, %v376_v43  ;;  %v408_v47 = vpop.permute.xlu0 %407 }
  0x9c   :  { %v386_v48 = vsel %vm890_vm11, %v378_v46, %v385_v45  ;;  %v410_v49 = vrot.slane %v408_v47, 4 }
  0x9d   :  { %387 = vst [vmem:[#allocation2 + $0x10] sm:$0xcc] %v386_v48  ;;  %v275_v51 = vpop.permute.xlu1 %274 }
  0x9e   :  { %v411_v52 = vsel %vm46_vm5, %v409_v44, %v410_v49  ;;  %v280_v53 = vrot.slane %v275_v51, 4 }
  0x9f   :  { %v413_v54 = vsel %vm412_vm7, %v406_v42, %v411_v52  ;;  %v277_v55 = vpop.permute.xlu0 %276  ;;  %v572_v56 = vld [vmem:[#allocation2 + $0x4] ss:$8 sps:$4 sm:$0xff]   ;;  %v574_v57 = vld [vmem:[#allocation2] ss:$8 sps:$4 sm:$0xff]  }
  0xa0   :  { %v416_v26 = vsel %vm891_vm9, %v413_v54, %v415_v50  ;;  %v281_v28 = vrot.slane %v277_v55, 4  ;;  %461 = vmatprep.subr.bf16.mxu0 %v572_v56 }
  0xa1   :  { %417 = vst [vmem:[#allocation2 + $0x18] sm:$0x33] %v416_v26  ;;  %462 = vmatpush1.bf16.msra.mxu0 %v574_v57 }
  0xa2   :  { %v285_v58 = vsel %vm46_vm5, %v280_v53, %v281_v28 }
  0xa3   :  { %v286_v59 = vsel %vm283_vm14, %v275_v51, %v285_v58 }
  0xa4   :  { %299 = vst [vmem:[#allocation2 + $0x10] sm:$0x11] %v286_v59 }
  0xab   :  { %v575_v63 = vld [vmem:[#allocation2 + $0x14] ss:$8 sps:$4 sm:$0x3f]   ;;  %v577_v32 = vld [vmem:[#allocation2 + $0x10] ss:$8 sps:$4 sm:$0x3f]  }
  0xac   :  { %v459_v0 = vand.u32 %v575_v63, %v454_v62  ;;  %v456_v31 = vand.u32 %v577_v32, %v454_v62 }
  0xae   :  { %463 = vmatprep.subr.bf16.mxu0 %v459_v0  ;;  %v427_v6 = vpop.permute.xlu1 %426 }
  0xaf   :  { %464 = vmatpush1.bf16.msra.mxu0 %v456_v31 }
  0xb2   :  { %542 = vmatmul.mubr.msk.bf16.vlgmr.msra.gmra.mrb[0].mxu0 %vm447_vm0, %v422_v1 }
 0x185   :  { %v495_v8 = vpop.f32.mrb[0].mxu0 }
 0x186   :  { %v496_v10 = vadd.f32 %v495_v8, %v427_v6  ;;  %v497_v11 = vpop.f32.mrb[1].mxu0 }
 0x187   :  { %v498_v13 = vadd.f32 %v497_v11, %v427_v6  ;;  %v499_v15 = vpop.f32.mrb[2].mxu0 }
 0x188   :  { %v513_v16 = vmul.f32 %v506_v7, %v496_v10  ;;  %v500_v17 = vpop.f32.mrb[3].mxu0 }
 0x189   :  { %v514_v18 = vmul.f32 %v510_v9, %v498_v13 }
 0x18a   :  { %vm516_vm1 = vcmp.ge.f32.partialorder %v513_v16, 0.0  ;;  %v519_v19 = vmul.f32 %v518_v12, %v513_v16 }
 0x18b   :  { %vm517_vm5 = vcmp.ge.f32.partialorder %v514_v18, 0.0  ;;  %v520_v20 = vmul.f32 %v518_v12, %v514_v18 }
 0x18c   :  { %v521_v4 = vsel %vm516_vm1, %v513_v16, %v519_v19 }
 0x18d   :  { %v522_v21 = vsel %vm517_vm5, %v514_v18, %v520_v20 }
 0x18e   :  { %v544_v22 = vpack.c.bf16 %v522_v21, %v521_v4 }
 0x190   :  { %532 = vst [vmem:[%s842_s5 + $0x4] sm:$0xff] %v544_v22 }

// kernel: rbpn_forward.34
= control target key start
LH: loop header
LB: loop body
LE: loop exit
PB: predicated region body
PF: predicated region fallthrough
CT: control target
= control target key end

     0   :  { %s436_s20 = smov 10   ;;  %s437_s21 = smov 11   ;;  %v442_v9 = vmov 0   ;;  %vm33_vm0 = vcmask 1043456   ;;  %vm35_vm1 = vcmask 89088   ;;  %vm50_vm2 = vcmask 80896   ;;  %s596_s0 = inlined_call_operand.vmem [shape: bf16[8,512], index: 0, kind: input, shape index: {}]   ;;  %s597_s2 = inlined_call_operand.vmem [shape: bf16[32,72], index: 2, kind: input, shape index: {}]   ;;  %s598_s3 = inlined_call_operand.vmem [shape: f32[32,1], index: 3, kind: input, shape index: {}]   ;;  %s599_s5 = inlined_call_operand.vmem [shape: bf16[32,512], index: 5, kind: output, shape index: {}]   ;;  %s600_s1 = inlined_call_operand.vmem [shape: f32[1,256], index: 1, kind: input, shape index: {}]   ;;  %s601_s4 = inlined_call_operand.<no memory space> [shape: f32[1], index: 4, kind: input, shape index: {}]  }
   0x1   :  { %v39_v0 = vld [vmem:[%s596_s0] sm:$0xff]  ;;  %v40_v1 = vld [vmem:[%s596_s0 + $0x8] sm:$0xf]  ;;  %s438_s28 = smov 9   ;;  %s439_s6 = smov 1   ;;  %284 = vmatprep.mubr.bf16.mxu0 %v442_v9  ;;  %294 = vmatprep.mubr.bf16.mxu1 %v442_v9  ;;  %v161_v13 = vld [vmem:[%s598_s3 + $0x10] sm:$0xff] }
   0x2   :  { %43 = vrot.lane.b32.xlu1 %v39_v0, %s436_s20  ;;  %27 = vrot.lane.b32.xlu0 %v39_v0, %s437_s21  ;;  %v24_v2 = vld [vmem:[%s596_s0 + $0x8] sm:$0xf]  ;;  %v87_v5 = vld [vmem:[%s596_s0 + $0xc] sm:$0xf]  ;;  %s440_s11 = smov 127   ;;  %s441_s14 = smov 119  }
   0x3   :  { %v55_v3 = vld [vmem:[%s596_s0 + $0x8] sm:$0xf]  ;;  %v102_v7 = vld [vmem:[%s596_s0 + $0xc] sm:$0xf]  ;;  %s443_s17 = smov 118   ;;  %433 = vset.pattern.permute.xlu1 %v442_v9  ;;  %432 = vset.pattern.permute.xlu0 %v442_v9  ;;  %v159_v12 = vld [vmem:[%s598_s3] sm:$0xff] }
   0x4   :  { %v70_v4 = vld [vmem:[%s596_s0 + $0x8] sm:$0xf]  ;;  %v117_v8 = vld [vmem:[%s596_s0 + $0xc] sm:$0xf]  ;;  %v162_v14 = vld [vmem:[%s598_s3 + $0x18] sm:$0xff]  ;;  %vm65_vm3 = vcmask 72704  }
   0x5   :  { %v496_v6 = vld [vmem:[%s596_s0 + $0x4] sm:$0xff]  ;;  %v132_v10 = vld [vmem:[%s596_s0 + $0xc] sm:$0xf]  ;;  %vm80_vm4 = vcmask 7168   ;;  %vm97_vm5 = vcmask 1039360   ;;  %vm112_vm6 = vcmask 973824  }
   0x6   :  { %45 = vrot.lane.b32.xlu1 %v40_v1, %s436_s20  ;;  %29 = vrot.lane.b32.xlu0 %v24_v2, %s437_s21  ;;  %s444_s20 = smov 117   ;;  %v160_v11 = vld [vmem:[%s598_s3 + $0x8] sm:$0xff]  ;;  %vm127_vm7 = vcmask 965632   ;;  %vm142_vm8 = vcmask 957440   ;;  %vm238_vm9 = vcmask 588800   ;;  %350 = vst [vmem:[%s599_s5] sm:$0xf] %v442_v9 }
   0x7   :  { %351 = vst [vmem:[%s599_s5 + $0x10] sm:$0xf] %v442_v9  ;;  %352 = vst [vmem:[%s599_s5 + $0x20] sm:$0xf] %v442_v9 }
   0x8   :  { %353 = vst [vmem:[%s599_s5 + $0x30] sm:$0xf] %v442_v9  ;;  %382 = vst [vmem:[%s599_s5 + $0xc] sm:$0xf] %v442_v9 }
   0x9   :  { %383 = vst [vmem:[%s599_s5 + $0x1c] sm:$0xf] %v442_v9  ;;  %384 = vst [vmem:[%s599_s5 + $0x2c] sm:$0xf] %v442_v9 }
   0xa   :  { %60 = vrot.lane.b32.xlu1 %v55_v3, %s438_s28  ;;  %58 = vrot.lane.b32.xlu0 %v39_v0, %s438_s28  ;;  %385 = vst [vmem:[%s599_s5 + $0x3c] sm:$0xf] %v442_v9 }
   0xe   :  { %75 = vrot.lane.b32.xlu1 %v70_v4, %s439_s6  ;;  %73 = vrot.lane.b32.xlu0 %v39_v0, %s439_s6 }
  0x12   :  { %92 = vrot.lane.b32.xlu1 %v87_v5, %s440_s11  ;;  %90 = vrot.lane.b32.xlu0 %v496_v6, %s440_s11 }
  0x16   :  { %107 = vrot.lane.b32.xlu1 %v102_v7, %s441_s14  ;;  %105 = vrot.lane.b32.xlu0 %v496_v6, %s441_s14 }
  0x1a   :  { %122 = vrot.lane.b32.xlu1 %v117_v8, %s443_s17  ;;  %120 = vrot.lane.b32.xlu0 %v496_v6, %s443_s17 }
  0x1e   :  { %137 = vrot.lane.b32.xlu1 %v132_v10, %s444_s20  ;;  %135 = vrot.lane.b32.xlu0 %v496_v6, %s444_s20 }
  0x22   :  { %170 = vperm.xlu1 %433, %v160_v11   ;;  %165 = vperm.xlu0 %432, %v159_v12   ;;  %v434_v11 = vld [vmem:[%s597_s2] sm:$0xff]   ;;  %v435_v12 = vld [vmem:[%s597_s2 + $0x8] sm:$0xff]  }
  0x26   :  { %175 = vperm.xlu1 %433, %v161_v13   ;;  %180 = vperm.xlu0 %432, %v162_v14   ;;  %v306_v13 = vlaneseq }
  0x28   :  { %v307_v14 = vshrl.u32 %v306_v13, 7 }
  0x74   :  { %v44_v15 = vpop.permute.xlu1 %43  ;;  %v28_v16 = vpop.permute.xlu0 %27 }
  0x75   :  { %v47_v19 = vrot.slane %v44_v15, 4  ;;  %v31_v20 = vrot.slane %v28_v16, 4 }
  0x78   :  { %v46_v17 = vpop.permute.xlu1 %45  ;;  %v30_v18 = vpop.permute.xlu0 %29 }
  0x79   :  { %v48_v21 = vrot.slane %v46_v17, 4  ;;  %v32_v22 = vrot.slane %v30_v18, 4  ;;  %v308_v17 = vsub.s32 0, %v307_v14  ;;  %v22_v18 = vld [vmem:[%s600_s1] sm:$0x3] }
  0x7b   :  { %v34_v23 = vsel %vm33_vm0, %v31_v20, %v32_v22  ;;  %v49_v24 = vsel %vm33_vm0, %v47_v19, %v48_v21  ;;  %v312_v19 = vsub.s32 1, %v307_v14  ;;  %v309_v22 = vrot.slane %v22_v18, %v308_v17 }
  0x7c   :  { %v61_v25 = vpop.permute.xlu1 %60  ;;  %v59_v26 = vpop.permute.xlu0 %58  ;;  %v36_v27 = vsel %vm35_vm1, %v28_v16, %v34_v23  ;;  %v51_v28 = vsel %vm50_vm2, %v44_v15, %v49_v24 }
  0x7d   :  { %v63_v29 = vrot.slane %v61_v25, 4  ;;  %v62_v30 = vrot.slane %v59_v26, 4  ;;  %v393_v31 = vcombine.high %v36_v27, %v51_v28  ;;  %v392_v32 = vcombine.low %v36_v27, %v51_v28 }
  0x7e   :  { %v313_v25 = vrot.slane %v22_v18, %v312_v19 }
  0x7f   :  { %252 = vmatprep.subr.bf16.mxu0 %v393_v31  ;;  %413 = vmatprep.subr.bf16.mxu1 %v393_v31  ;;  %v64_v35 = vsel %vm33_vm0, %v62_v30, %v63_v29  ;;  %v333_v29 = vstv %s601_s4 }
  0x80   :  { %v76_v33 = vpop.permute.xlu1 %75  ;;  %253 = vmatpush1.bf16.msra.mxu0 %v392_v32  ;;  %418 = vmatpush1.bf16.msra.mxu1 %v392_v32  ;;  %v74_v34 = vpop.permute.xlu0 %73  ;;  %v66_v39 = vsel %vm65_vm3, %v59_v26, %v64_v35 }
  0x81   :  { %v78_v36 = vrot.slane %v76_v33, 4  ;;  %v77_v37 = vrot.slane %v74_v34, 4 }
  0x83   :  { %v79_v38 = vsel %vm33_vm0, %v77_v37, %v78_v36 }
  0x84   :  { %v81_v40 = vsel %vm80_vm4, %v74_v34, %v79_v38  ;;  %v93_v41 = vpop.permute.xlu1 %92  ;;  %v91_v42 = vpop.permute.xlu0 %90 }
  0x85   :  { %v394_v43 = vcombine.low %v66_v39, %v81_v40  ;;  %v395_v44 = vcombine.high %v66_v39, %v81_v40  ;;  %v95_v45 = vrot.slane %v93_v41, 4  ;;  %v94_v46 = vrot.slane %v91_v42, 4 }
  0x87   :  { %v96_v47 = vsel %vm33_vm0, %v94_v46, %v95_v45  ;;  %254 = vmatprep.subr.bf16.mxu0 %v395_v44  ;;  %414 = vmatprep.subr.bf16.mxu1 %v395_v44 }
  0x88   :  { %v98_v48 = vsel %vm97_vm5, %v91_v42, %v96_v47  ;;  %v108_v49 = vpop.permute.xlu1 %107  ;;  %255 = vmatpush1.bf16.msra.mxu0 %v394_v43  ;;  %419 = vmatpush1.bf16.msra.mxu1 %v394_v43  ;;  %v106_v50 = vpop.permute.xlu0 %105 }
  0x89   :  { %v396_v51 = vcombine.low %v496_v6, %v98_v48  ;;  %v397_v52 = vcombine.high %v496_v6, %v98_v48  ;;  %v110_v53 = vrot.slane %v108_v49, 4  ;;  %v109_v54 = vrot.slane %v106_v50, 4 }
  0x8b   :  { %256 = vmatprep.subr.bf16.mxu0 %v397_v52  ;;  %415 = vmatprep.subr.bf16.mxu1 %v397_v52  ;;  %v111_v57 = vsel %vm33_vm0, %v109_v54, %v110_v53 }
  0x8c   :  { %v123_v55 = vpop.permute.xlu1 %122  ;;  %257 = vmatpush1.bf16.msra.mxu0 %v396_v51  ;;  %420 = vmatpush1.bf16.msra.mxu1 %v396_v51  ;;  %v121_v56 = vpop.permute.xlu0 %120  ;;  %v113_v61 = vsel %vm112_vm6, %v106_v50, %v111_v57 }
  0x8d   :  { %v125_v58 = vrot.slane %v123_v55, 4  ;;  %v124_v59 = vrot.slane %v121_v56, 4 }
  0x8f   :  { %v126_v60 = vsel %vm33_vm0, %v124_v59, %v125_v58 }
  0x90   :  { %v128_v62 = vsel %vm127_vm7, %v121_v56, %v126_v60  ;;  %v138_v63 = vpop.permute.xlu1 %137  ;;  %v136_v0 = vpop.permute.xlu0 %135 }
  0x91   :  { %v398_v1 = vcombine.low %v113_v61, %v128_v62  ;;  %v399_v2 = vcombine.high %v113_v61, %v128_v62  ;;  %v140_v3 = vrot.slane %v138_v63, 4  ;;  %v139_v4 = vrot.slane %v136_v0, 4 }
  0x93   :  { %v141_v5 = vsel %vm33_vm0, %v139_v4, %v140_v3  ;;  %258 = vmatprep.subr.bf16.mxu0 %v399_v2  ;;  %416 = vmatprep.subr.bf16.mxu1 %v399_v2 }
  0x94   :  { %v143_v6 = vsel %vm142_vm8, %v136_v0, %v141_v5  ;;  %259 = vmatpush1.bf16.msra.mxu0 %v398_v1  ;;  %421 = vmatpush1.bf16.msra.mxu1 %v398_v1 }
  0x95   :  { %v400_v7 = vcombine.low %v143_v6, %v143_v6  ;;  %v401_v8 = vcombine.high %v143_v6, %v143_v6 }
  0x97   :  { %402 = vmatprep.subr.msk.bf16.mxu0 %vm33_vm0, %v401_v8  ;;  %417 = vmatprep.subr.msk.bf16.mxu1 %vm33_vm0, %v401_v8  ;;  %v247_v10 = vsel %vm33_vm0, %v400_v7, 0 }
  0x98   :  { %261 = vmatpush1.bf16.msra.mxu0 %v247_v10  ;;  %422 = vmatpush1.bf16.msra.mxu1 %v247_v10 }
  0x9b   :  { %403 = vmatmul.mubr.msk.bf16.vlgmr.msra.gmra.mrb[0].mxu0 %vm238_vm9, %v434_v11  ;;  %404 = vmatmul.mubr.msk.bf16.vlgmr.msra.gmra.mrb[0].mxu1 %vm238_vm9, %v435_v12 }
  0xa1   :  { %v171_v15 = vpop.permute.xlu1 %170  ;;  %v166_v16 = vpop.permute.xlu0 %165 }
  0xa5   :  { %v176_v20 = vpop.permute.xlu1 %175  ;;  %v181_v21 = vpop.permute.xlu0 %180 }
 0x16e   :  { %v286_v23 = vpop.f32.mrb[0].mxu0  ;;  %v296_v24 = vpop.f32.mrb[0].mxu1 }
 0x16f   :  { %v287_v26 = vadd.f32 %v286_v23, %v166_v16  ;;  %v297_v27 = vadd.f32 %v296_v24, %v176_v20  ;;  %v288_v28 = vpop.f32.mrb[1].mxu0  ;;  %v298_v9 = vpop.f32.mrb[1].mxu1 }
 0x170   :  { %v289_v30 = vadd.f32 %v288_v28, %v166_v16  ;;  %v299_v31 = vadd.f32 %v298_v9, %v176_v20  ;;  %v290_v32 = vpop.f32.mrb[2].mxu0  ;;  %v300_v33 = vpop.f32.mrb[2].mxu1 }
 0x171   :  { %v316_v34 = vmul.f32 %v309_v22, %v287_v26  ;;  %v320_v35 = vmul.f32 %v309_v22, %v297_v27  ;;  %v291_v36 = vadd.f32 %v290_v32, %v171_v15  ;;  %v301_v37 = vadd.f32 %v300_v33, %v181_v21  ;;  %v292_v38 = vpop.f32.mrb[3].mxu0  ;;  %v302_v39 = vpop.f32.mrb[3].mxu1 }
 0x172   :  { %v317_v40 = vmul.f32 %v313_v25, %v289_v30  ;;  %v321_v41 = vmul.f32 %v313_v25, %v299_v31  ;;  %v293_v42 = vadd.f32 %v292_v38, %v171_v15  ;;  %v303_v43 = vadd.f32 %v302_v39, %v181_v21 }
 0x173   :  { %vm325_vm10 = vcmp.ge.f32.partialorder %v316_v34, 0.0  ;;  %v334_v44 = vmul.f32 %v333_v29, %v316_v34  ;;  %vm329_vm11 = vcmp.ge.f32.partialorder %v320_v35, 0.0  ;;  %v338_v45 = vmul.f32 %v333_v29, %v320_v35 }
 0x174   :  { %vm326_vm12 = vcmp.ge.f32.partialorder %v317_v40, 0.0  ;;  %v335_v46 = vmul.f32 %v333_v29, %v317_v40  ;;  %vm330_vm13 = vcmp.ge.f32.partialorder %v321_v41, 0.0  ;;  %v339_v47 = vmul.f32 %v333_v29, %v321_v41 }
 0x175   :  { %v342_v48 = vsel %vm325_vm10, %v316_v34, %v334_v44  ;;  %v346_v49 = vsel %vm329_vm11, %v320_v35, %v338_v45  ;;  %v318_v50 = vmul.f32 %v309_v22, %v291_v36  ;;  %v322_v51 = vmul.f32 %v309_v22, %v301_v37 }
 0x176   :  { %v343_v52 = vsel %vm326_vm12, %v317_v40, %v335_v46  ;;  %v347_v53 = vsel %vm330_vm13, %v321_v41, %v339_v47  ;;  %v319_v54 = vmul.f32 %v313_v25, %v293_v42  ;;  %v323_v55 = vmul.f32 %v313_v25, %v303_v43 }
 0x177   :  { %v409_v56 = vpack.c.bf16 %v343_v52, %v342_v48  ;;  %v411_v57 = vpack.c.bf16 %v347_v53, %v346_v49  ;;  %vm327_vm14 = vcmp.ge.f32.partialorder %v318_v50, 0.0  ;;  %v336_v58 = vmul.f32 %v333_v29, %v318_v50 }
 0x178   :  { %vm331_vm15 = vcmp.ge.f32.partialorder %v322_v51, 0.0  ;;  %v340_v59 = vmul.f32 %v333_v29, %v322_v51  ;;  %vm328_vm0 = vcmp.ge.f32.partialorder %v319_v54, 0.0  ;;  %v337_v60 = vmul.f32 %v333_v29, %v319_v54 }
 0x179   :  { %378 = vst [vmem:[%s599_s5 + $0x4] sm:$0xff] %v409_v56  ;;  %380 = vst [vmem:[%s599_s5 + $0x24] sm:$0xff] %v411_v57  ;;  %v344_v61 = vsel %vm327_vm14, %v318_v50, %v336_v58  ;;  %vm332_vm1 = vcmp.ge.f32.partialorder %v323_v55, 0.0  ;;  %v341_v62 = vmul.f32 %v333_v29, %v323_v55 }
 0x17a   :  { %v348_v63 = vsel %vm331_vm15, %v322_v51, %v340_v59  ;;  %v345_v0 = vsel %vm328_vm0, %v319_v54, %v337_v60 }
 0x17b   :  { %v410_v1 = vpack.c.bf16 %v345_v0, %v344_v61  ;;  %v349_v2 = vsel %vm332_vm1, %v323_v55, %v341_v62 }
 0x17c   :  { %v412_v3 = vpack.c.bf16 %v349_v2, %v348_v63 }
 0x17d   :  { %379 = vst [vmem:[%s599_s5 + $0x14] sm:$0xff] %v410_v1 }
 0x17e   :  { %381 = vst [vmem:[%s599_s5 + $0x34] sm:$0xff] %v412_v3 }

// kernel: rbpn_forward.36
= control target key start
LH: loop header
LB: loop body
LE: loop exit
PB: predicated region body
PF: predicated region fallthrough
CT: control target
= control target key end

     0   :  { %s447_s29 = smov 10   ;;  %s448_s30 = smov 11   ;;  %v453_v14 = vmov 0   ;;  %vm44_vm0 = vcmask 1043456   ;;  %vm46_vm1 = vcmask 89088   ;;  %vm61_vm2 = vcmask 80896   ;;  %s594_s0 = inlined_call_operand.vmem [shape: bf16[8,512], index: 0, kind: input, shape index: {}]   ;;  %s595_s2 = inlined_call_operand.vmem [shape: bf16[8,512], index: 2, kind: input, shape index: {}]   ;;  %s596_s3 = inlined_call_operand.vmem [shape: bf16[32,72], index: 3, kind: input, shape index: {}]   ;;  %s597_s4 = inlined_call_operand.vmem [shape: f32[32,1], index: 4, kind: input, shape index: {}]   ;;  %s598_s6 = inlined_call_operand.vmem [shape: bf16[32,512], index: 6, kind: output, shape index: {}]   ;;  %s599_s1 = inlined_call_operand.vmem [shape: f32[1,256], index: 1, kind: input, shape index: {}]   ;;  %s600_s5 = inlined_call_operand.<no memory space> [shape: f32[1], index: 5, kind: input, shape index: {}]  }
   0x1   :  { %v26_v0 = vld [vmem:[%s594_s0] sm:$0xff]  ;;  %v27_v2 = vld [vmem:[%s594_s0 + $0x8] sm:$0xff]  ;;  %s449_s7 = smov 9   ;;  %s450_s0 = smov 1   ;;  %295 = vmatprep.mubr.bf16.mxu0 %v453_v14  ;;  %305 = vmatprep.mubr.bf16.mxu1 %v453_v14  ;;  %v172_v18 = vld [vmem:[%s597_s4 + $0x10] sm:$0xff]  ;;  %vm76_vm3 = vcmask 72704  }
   0x2   :  { %v28_v1 = vld [vmem:[%s595_s2] sm:$0xff]  ;;  %v29_v4 = vld [vmem:[%s595_s2 + $0x8] sm:$0xff]  ;;  %s451_s2 = smov 127   ;;  %s452_s8 = smov 119   ;;  %444 = vset.pattern.permute.xlu1 %v453_v14  ;;  %443 = vset.pattern.permute.xlu0 %v453_v14  ;;  %v173_v19 = vld [vmem:[%s597_s4 + $0x18] sm:$0xff]  ;;  %vm91_vm4 = vcmask 7168  }
   0x3   :  { %v30_v3 = vsub.bf16 %v26_v0, %v28_v1  ;;  %v31_v5 = vsub.bf16 %v27_v2, %v29_v4  ;;  %s454_s9 = smov 118   ;;  %s455_s10 = smov 117   ;;  %v171_v16 = vld [vmem:[%s597_s4 + $0x8] sm:$0xff]  ;;  %v170_v17 = vld [vmem:[%s597_s4] sm:$0xff]  ;;  %vm108_vm5 = vcmask 1039360   ;;  %vm123_vm6 = vcmask 973824  }
   0x4   :  { %vm138_vm7 = vcmask 965632   ;;  %vm153_vm8 = vcmask 957440   ;;  %vm249_vm9 = vcmask 588800   ;;  %361 = vst [vmem:[%s598_s6] sm:$0xf] %v453_v14  ;;  %362 = vst [vmem:[%s598_s6 + $0x10] sm:$0xf] %v453_v14 }
   0x5   :  { %32 = vst [vmem:[#allocation3] sm:$0xff] %v30_v3  ;;  %54 = vrot.lane.b32.xlu1 %v30_v3, %s447_s29  ;;  %38 = vrot.lane.b32.xlu0 %v30_v3, %s448_s30  ;;  %33 = vst [vmem:[#allocation3 + $0x8] sm:$0xff] %v31_v5 }
   0x6   :  { %363 = vst [vmem:[%s598_s6 + $0x20] sm:$0xf] %v453_v14  ;;  %364 = vst [vmem:[%s598_s6 + $0x30] sm:$0xf] %v453_v14 }
   0x7   :  { %393 = vst [vmem:[%s598_s6 + $0xc] sm:$0xf] %v453_v14  ;;  %394 = vst [vmem:[%s598_s6 + $0x1c] sm:$0xf] %v453_v14 }
   0x8   :  { %395 = vst [vmem:[%s598_s6 + $0x2c] sm:$0xf] %v453_v14  ;;  %396 = vst [vmem:[%s598_s6 + $0x3c] sm:$0xf] %v453_v14 }
   0xc   :  { %v51_v6 = vld [vmem:[#allocation3 + $0x8] sm:$0xf]  ;;  %v98_v10 = vld [vmem:[#allocation3 + $0xc] sm:$0xf] }
   0xd   :  { %v35_v7 = vld [vmem:[#allocation3 + $0x8] sm:$0xf]  ;;  %56 = vrot.lane.b32.xlu1 %v51_v6, %s447_s29  ;;  %v113_v12 = vld [vmem:[#allocation3 + $0xc] sm:$0xf] }
   0xe   :  { %40 = vrot.lane.b32.xlu0 %v35_v7, %s448_s30  ;;  %v66_v8 = vld [vmem:[#allocation3 + $0x8] sm:$0xf]  ;;  %v128_v13 = vld [vmem:[#allocation3 + $0xc] sm:$0xf] }
   0xf   :  { %v81_v9 = vld [vmem:[#allocation3 + $0x8] sm:$0xf]  ;;  %v143_v15 = vld [vmem:[#allocation3 + $0xc] sm:$0xf] }
  0x10   :  { %v503_v11 = vld [vmem:[#allocation3 + $0x4] sm:$0xff] }
  0x11   :  { %71 = vrot.lane.b32.xlu1 %v66_v8, %s449_s7 }
  0x12   :  { %69 = vrot.lane.b32.xlu0 %v30_v3, %s449_s7 }
  0x15   :  { %86 = vrot.lane.b32.xlu1 %v81_v9, %s450_s0 }
  0x16   :  { %84 = vrot.lane.b32.xlu0 %v30_v3, %s450_s0 }
  0x19   :  { %103 = vrot.lane.b32.xlu1 %v98_v10, %s451_s2 }
  0x1a   :  { %101 = vrot.lane.b32.xlu0 %v503_v11, %s451_s2 }
  0x1d   :  { %118 = vrot.lane.b32.xlu1 %v113_v12, %s452_s8 }
  0x1e   :  { %116 = vrot.lane.b32.xlu0 %v503_v11, %s452_s8 }
  0x21   :  { %133 = vrot.lane.b32.xlu1 %v128_v13, %s454_s9 }
  0x22   :  { %131 = vrot.lane.b32.xlu0 %v503_v11, %s454_s9 }
  0x25   :  { %148 = vrot.lane.b32.xlu1 %v143_v15, %s455_s10 }
  0x26   :  { %146 = vrot.lane.b32.xlu0 %v503_v11, %s455_s10 }
  0x29   :  { %181 = vperm.xlu1 %444, %v171_v16   ;;  %v445_v16 = vld [vmem:[%s596_s3] sm:$0xff]  }
  0x2a   :  { %176 = vperm.xlu0 %443, %v170_v17   ;;  %v446_v17 = vld [vmem:[%s596_s3 + $0x8] sm:$0xff]  }
  0x2d   :  { %186 = vperm.xlu1 %444, %v172_v18   ;;  %v317_v18 = vlaneseq }
  0x2e   :  { %191 = vperm.xlu0 %443, %v173_v19  }
  0x2f   :  { %v318_v19 = vshrl.u32 %v317_v18, 7 }
  0x77   :  { %v55_v20 = vpop.permute.xlu1 %54  ;;  %v39_v21 = vpop.permute.xlu0 %38 }
  0x78   :  { %v58_v24 = vrot.slane %v55_v20, 4  ;;  %v42_v25 = vrot.slane %v39_v21, 4 }
  0x7f   :  { %v57_v22 = vpop.permute.xlu1 %56 }
  0x80   :  { %v41_v23 = vpop.permute.xlu0 %40  ;;  %v59_v26 = vrot.slane %v57_v22, 4  ;;  %v319_v22 = vsub.s32 0, %v318_v19 }
  0x81   :  { %v43_v27 = vrot.slane %v41_v23, 4  ;;  %v25_v23 = vld [vmem:[%s599_s1] sm:$0x3] }
  0x82   :  { %v60_v29 = vsel %vm44_vm0, %v58_v24, %v59_v26  ;;  %v323_v24 = vsub.s32 1, %v318_v19 }
  0x83   :  { %v45_v28 = vsel %vm44_vm0, %v42_v25, %v43_v27  ;;  %v72_v30 = vpop.permute.xlu1 %71  ;;  %v62_v33 = vsel %vm61_vm2, %v55_v20, %v60_v29  ;;  %v320_v27 = vrot.slane %v25_v23, %v319_v22 }
  0x84   :  { %v70_v31 = vpop.permute.xlu0 %69  ;;  %v47_v32 = vsel %vm46_vm1, %v39_v21, %v45_v28  ;;  %v74_v34 = vrot.slane %v72_v30, 4  ;;  %v324_v30 = vrot.slane %v25_v23, %v323_v24 }
  0x85   :  { %v73_v35 = vrot.slane %v70_v31, 4  ;;  %v404_v36 = vcombine.high %v47_v32, %v62_v33  ;;  %v403_v37 = vcombine.low %v47_v32, %v62_v33 }
  0x87   :  { %263 = vmatprep.subr.bf16.mxu0 %v404_v36  ;;  %424 = vmatprep.subr.bf16.mxu1 %v404_v36  ;;  %v87_v38 = vpop.permute.xlu1 %86  ;;  %v75_v40 = vsel %vm44_vm0, %v73_v35, %v74_v34  ;;  %v344_v34 = vstv %s600_s5 }
  0x88   :  { %264 = vmatpush1.bf16.msra.mxu0 %v403_v37  ;;  %429 = vmatpush1.bf16.msra.mxu1 %v403_v37  ;;  %v85_v39 = vpop.permute.xlu0 %84  ;;  %v89_v41 = vrot.slane %v87_v38, 4  ;;  %v77_v44 = vsel %vm76_vm3, %v70_v31, %v75_v40 }
  0x89   :  { %v88_v42 = vrot.slane %v85_v39, 4 }
  0x8b   :  { %v90_v43 = vsel %vm44_vm0, %v88_v42, %v89_v41  ;;  %v104_v46 = vpop.permute.xlu1 %103 }
  0x8c   :  { %v92_v45 = vsel %vm91_vm4, %v85_v39, %v90_v43  ;;  %v102_v47 = vpop.permute.xlu0 %101  ;;  %v106_v50 = vrot.slane %v104_v46, 4 }
  0x8d   :  { %v405_v48 = vcombine.low %v77_v44, %v92_v45  ;;  %v406_v49 = vcombine.high %v77_v44, %v92_v45  ;;  %v105_v51 = vrot.slane %v102_v47, 4 }
  0x8f   :  { %v107_v52 = vsel %vm44_vm0, %v105_v51, %v106_v50  ;;  %265 = vmatprep.subr.bf16.mxu0 %v406_v49  ;;  %425 = vmatprep.subr.bf16.mxu1 %v406_v49  ;;  %v119_v54 = vpop.permute.xlu1 %118 }
  0x90   :  { %v109_v53 = vsel %vm108_vm5, %v102_v47, %v107_v52  ;;  %266 = vmatpush1.bf16.msra.mxu0 %v405_v48  ;;  %430 = vmatpush1.bf16.msra.mxu1 %v405_v48  ;;  %v117_v55 = vpop.permute.xlu0 %116  ;;  %v121_v58 = vrot.slane %v119_v54, 4 }
  0x91   :  { %v407_v56 = vcombine.low %v503_v11, %v109_v53  ;;  %v408_v57 = vcombine.high %v503_v11, %v109_v53  ;;  %v120_v59 = vrot.slane %v117_v55, 4 }
  0x93   :  { %267 = vmatprep.subr.bf16.mxu0 %v408_v57  ;;  %426 = vmatprep.subr.bf16.mxu1 %v408_v57  ;;  %v134_v60 = vpop.permute.xlu1 %133  ;;  %v122_v62 = vsel %vm44_vm0, %v120_v59, %v121_v58 }
  0x94   :  { %268 = vmatpush1.bf16.msra.mxu0 %v407_v56  ;;  %431 = vmatpush1.bf16.msra.mxu1 %v407_v56  ;;  %v132_v61 = vpop.permute.xlu0 %131  ;;  %v136_v63 = vrot.slane %v134_v60, 4  ;;  %v124_v2 = vsel %vm123_vm6, %v117_v55, %v122_v62 }
  0x95   :  { %v135_v0 = vrot.slane %v132_v61, 4 }
  0x97   :  { %v137_v1 = vsel %vm44_vm0, %v135_v0, %v136_v63  ;;  %v149_v4 = vpop.permute.xlu1 %148 }
  0x98   :  { %v139_v3 = vsel %vm138_vm7, %v132_v61, %v137_v1  ;;  %v147_v5 = vpop.permute.xlu0 %146  ;;  %v151_v8 = vrot.slane %v149_v4, 4 }
  0x99   :  { %v409_v6 = vcombine.low %v124_v2, %v139_v3  ;;  %v410_v7 = vcombine.high %v124_v2, %v139_v3  ;;  %v150_v9 = vrot.slane %v147_v5, 4 }
  0x9b   :  { %v152_v10 = vsel %vm44_vm0, %v150_v9, %v151_v8  ;;  %269 = vmatprep.subr.bf16.mxu0 %v410_v7  ;;  %427 = vmatprep.subr.bf16.mxu1 %v410_v7 }
  0x9c   :  { %v154_v11 = vsel %vm153_vm8, %v147_v5, %v152_v10  ;;  %270 = vmatpush1.bf16.msra.mxu0 %v409_v6  ;;  %432 = vmatpush1.bf16.msra.mxu1 %v409_v6 }
  0x9d   :  { %v411_v12 = vcombine.low %v154_v11, %v154_v11  ;;  %v412_v13 = vcombine.high %v154_v11, %v154_v11 }
  0x9f   :  { %413 = vmatprep.subr.msk.bf16.mxu0 %vm44_vm0, %v412_v13  ;;  %428 = vmatprep.subr.msk.bf16.mxu1 %vm44_vm0, %v412_v13  ;;  %v258_v15 = vsel %vm44_vm0, %v411_v12, 0 }
  0xa0   :  { %272 = vmatpush1.bf16.msra.mxu0 %v258_v15  ;;  %433 = vmatpush1.bf16.msra.mxu1 %v258_v15 }
  0xa3   :  { %414 = vmatmul.mubr.msk.bf16.vlgmr.msra.gmra.mrb[0].mxu0 %vm249_vm9, %v445_v16  ;;  %415 = vmatmul.mubr.msk.bf16.vlgmr.msra.gmra.mrb[0].mxu1 %vm249_vm9, %v446_v17 }
  0xa8   :  { %v182_v20 = vpop.permute.xlu1 %181 }
  0xa9   :  { %v177_v21 = vpop.permute.xlu0 %176 }
  0xac   :  { %v187_v25 = vpop.permute.xlu1 %186 }
  0xad   :  { %v192_v26 = vpop.permute.xlu0 %191 }
 0x176   :  { %v297_v28 = vpop.f32.mrb[0].mxu0  ;;  %v307_v29 = vpop.f32.mrb[0].mxu1 }
 0x177   :  { %v298_v31 = vadd.f32 %v297_v28, %v177_v21  ;;  %v308_v32 = vadd.f32 %v307_v29, %v187_v25  ;;  %v299_v33 = vpop.f32.mrb[1].mxu0  ;;  %v309_v14 = vpop.f32.mrb[1].mxu1 }
 0x178   :  { %v300_v35 = vadd.f32 %v299_v33, %v177_v21  ;;  %v310_v36 = vadd.f32 %v309_v14, %v187_v25  ;;  %v301_v37 = vpop.f32.mrb[2].mxu0  ;;  %v311_v38 = vpop.f32.mrb[2].mxu1 }
 0x179   :  { %v327_v39 = vmul.f32 %v320_v27, %v298_v31  ;;  %v331_v40 = vmul.f32 %v320_v27, %v308_v32  ;;  %v302_v41 = vadd.f32 %v301_v37, %v182_v20  ;;  %v312_v42 = vadd.f32 %v311_v38, %v192_v26  ;;  %v303_v43 = vpop.f32.mrb[3].mxu0  ;;  %v313_v44 = vpop.f32.mrb[3].mxu1 }
 0x17a   :  { %v328_v45 = vmul.f32 %v324_v30, %v300_v35  ;;  %v332_v46 = vmul.f32 %v324_v30, %v310_v36  ;;  %v304_v47 = vadd.f32 %v303_v43, %v182_v20  ;;  %v314_v48 = vadd.f32 %v313_v44, %v192_v26 }
 0x17b   :  { %vm336_vm10 = vcmp.ge.f32.partialorder %v327_v39, 0.0  ;;  %v345_v49 = vmul.f32 %v344_v34, %v327_v39  ;;  %vm340_vm11 = vcmp.ge.f32.partialorder %v331_v40, 0.0  ;;  %v349_v50 = vmul.f32 %v344_v34, %v331_v40 }
 0x17c   :  { %vm337_vm12 = vcmp.ge.f32.partialorder %v328_v45, 0.0  ;;  %v346_v51 = vmul.f32 %v344_v34, %v328_v45  ;;  %vm341_vm13 = vcmp.ge.f32.partialorder %v332_v46, 0.0  ;;  %v350_v52 = vmul.f32 %v344_v34, %v332_v46 }
 0x17d   :  { %v353_v53 = vsel %vm336_vm10, %v327_v39, %v345_v49  ;;  %v357_v54 = vsel %vm340_vm11, %v331_v40, %v349_v50  ;;  %v329_v55 = vmul.f32 %v320_v27, %v302_v41  ;;  %v333_v56 = vmul.f32 %v320_v27, %v312_v42 }
 0x17e   :  { %v354_v57 = vsel %vm337_vm12, %v328_v45, %v346_v51  ;;  %v358_v58 = vsel %vm341_vm13, %v332_v46, %v350_v52  ;;  %v330_v59 = vmul.f32 %v324_v30, %v304_v47  ;;  %v334_v60 = vmul.f32 %v324_v30, %v314_v48 }
 0x17f   :  { %v420_v61 = vpack.c.bf16 %v354_v57, %v353_v53  ;;  %v422_v62 = vpack.c.bf16 %v358_v58, %v357_v54  ;;  %vm338_vm14 = vcmp.ge.f32.partialorder %v329_v55, 0.0  ;;  %v347_v63 = vmul.f32 %v344_v34, %v329_v55 }
 0x180   :  { %vm342_vm15 = vcmp.ge.f32.partialorder %v333_v56, 0.0  ;;  %v351_v0 = vmul.f32 %v344_v34, %v333_v56  ;;  %vm339_vm0 = vcmp.ge.f32.partialorder %v330_v59, 0.0  ;;  %v348_v1 = vmul.f32 %v344_v34, %v330_v59 }
 0x181   :  { %389 = vst [vmem:[%s598_s6 + $0x4] sm:$0xff] %v420_v61  ;;  %391 = vst [vmem:[%s598_s6 + $0x24] sm:$0xff] %v422_v62  ;;  %v355_v2 = vsel %vm338_vm14, %v329_v55, %v347_v63  ;;  %vm343_vm1 = vcmp.ge.f32.partialorder %v334_v60, 0.0  ;;  %v352_v3 = vmul.f32 %v344_v34, %v334_v60 }
 0x182   :  { %v359_v4 = vsel %vm342_vm15, %v333_v56, %v351_v0  ;;  %v356_v5 = vsel %vm339_vm0, %v330_v59, %v348_v1 }
 0x183   :  { %v421_v6 = vpack.c.bf16 %v356_v5, %v355_v2  ;;  %v360_v7 = vsel %vm343_vm1, %v334_v60, %v352_v3 }
 0x184   :  { %v423_v8 = vpack.c.bf16 %v360_v7, %v359_v4 }
 0x185   :  { %390 = vst [vmem:[%s598_s6 + $0x14] sm:$0xff] %v421_v6 }
 0x186   :  { %392 = vst [vmem:[%s598_s6 + $0x34] sm:$0xff] %v423_v8 }

// kernel: rbpn_forward.35
= control target key start
LH: loop header
LB: loop body
LE: loop exit
PB: predicated region body
PF: predicated region fallthrough
CT: control target
= control target key end

     0   :  { %s802_s22 = smov 11   ;;  %s803_s8 = smov 10   ;;  %v810_v25 = vmov 0   ;;  %vm69_vm0 = vcmask 89088   ;;  %vm128_vm1 = vcmask 80896   ;;  %vm187_vm2 = vcmask 72704   ;;  %s979_s0 = inlined_call_operand.vmem [shape: bf16[32,512], index: 0, kind: input, shape index: {}]   ;;  %s980_s2 = inlined_call_operand.vmem [shape: bf16[8,288], index: 2, kind: input, shape index: {}]   ;;  %s981_s5 = inlined_call_operand.vmem [shape: bf16[8,512], index: 5, kind: output, shape index: {}]   ;;  %s982_s3 = inlined_call_operand.vmem [shape: f32[8,1], index: 3, kind: input, shape index: {}]   ;;  %s983_s1 = inlined_call_operand.vmem [shape: f32[1,256], index: 1, kind: input, shape index: {}]   ;;  %s984_s4 = inlined_call_operand.<no memory space> [shape: f32[1], index: 4, kind: input, shape index: {}]  }
   0x1   :  { %v771_v0 = vld [vmem:[%s979_s0 + $0x4] ss:$16 sps:$4 sm:$0xff]   ;;  %v773_v1 = vld [vmem:[%s979_s0] ss:$16 sps:$4 sm:$0xff]   ;;  %v774_v2 = vld [vmem:[%s979_s0 + $0x8] ss:$16 sps:$4 sm:$0xff]   ;;  %654 = vmatprep.mubr.bf16.mxu0 %v810_v25  ;;  %770 = vset.pattern.permute.xlu0 %v810_v25 }
   0x2   :  { %59 = vrot.lane.b32.xlu0 %v771_v0, %s802_s22  ;;  %57 = vrot.lane.b32.xlu1 %v773_v1, %s802_s22  ;;  %v775_v3 = vld [vmem:[%s979_s0 + $0x24] ss:$16 sps:$4 sm:$0xff]   ;;  %v777_v4 = vld [vmem:[%s979_s0 + $0x28] ss:$16 sps:$4 sm:$0xff]   ;;  %s804_s13 = smov 9   ;;  %s805_s18 = smov 1  }
   0x3   :  { %v778_v5 = vld [vmem:[%s979_s0 + $0x20] ss:$16 sps:$4 sm:$0xff]   ;;  %v779_v6 = vld [vmem:[%s979_s0 + $0x8] ss:$16 sps:$4 sm:$0xff]   ;;  %v787_v13 = vld [vmem:[%s979_s0 + $0xc] ss:$16 sps:$4 sm:$0xff]  }
   0x4   :  { %v780_v7 = vld [vmem:[%s979_s0 + $0x28] ss:$16 sps:$4 sm:$0xff]   ;;  %s806_s25 = smov 127   ;;  %v889_v14 = vld [vmem:[%s979_s0 + $0x4] ss:$16 sps:$4 sm:$0xff]   ;;  %s807_s11 = smov 119  }
   0x5   :  { %v781_v8 = vld [vmem:[%s979_s0 + $0x8] ss:$16 sps:$4 sm:$0xff]   ;;  %v791_v16 = vld [vmem:[%s979_s0 + $0x2c] ss:$16 sps:$4 sm:$0xff]   ;;  %v904_v17 = vld [vmem:[%s979_s0 + $0x24] ss:$16 sps:$4 sm:$0xff]  }
   0x6   :  { %61 = vrot.lane.b32.xlu0 %v774_v2, %s802_s22  ;;  %65 = vrot.lane.b32.xlu1 %v775_v3, %s802_s22  ;;  %v782_v9 = vld [vmem:[%s979_s0 + $0x28] ss:$16 sps:$4 sm:$0xff]   ;;  %v793_v18 = vld [vmem:[%s979_s0 + $0xc] ss:$16 sps:$4 sm:$0xff]   ;;  %s808_s16 = smov 118   ;;  %s809_s21 = smov 117  }
   0x7   :  { %v783_v10 = vld [vmem:[%s979_s0 + $0x8] ss:$16 sps:$4 sm:$0xff]   ;;  %v794_v19 = vld [vmem:[%s979_s0 + $0x2c] ss:$16 sps:$4 sm:$0xff]   ;;  %v928_v22 = vld [vmem:[%s980_s2] sm:$0xff]  ;;  %684 = vst [vmem:[%s981_s5] sm:$0xf] %v810_v25 }
   0x8   :  { %v784_v11 = vld [vmem:[%s979_s0 + $0x28] ss:$16 sps:$4 sm:$0xff]   ;;  %v795_v20 = vld [vmem:[%s979_s0 + $0xc] ss:$16 sps:$4 sm:$0xff]   ;;  %v752_v23 = vcombine.high %v928_v22, %v928_v22  ;;  %694 = vst [vmem:[%s981_s5 + $0xc] sm:$0xf] %v810_v25 }
   0x9   :  { %v880_v12 = vld [vmem:[%s979_s0 + $0x8] ss:$16 sps:$4 sm:$0xff]   ;;  %v796_v21 = vld [vmem:[%s979_s0 + $0xc] ss:$16 sps:$4 sm:$0xff]   ;;  %v561_v27 = vld [vmem:[%s982_s3] sm:$0xff]  ;;  %vm246_vm3 = vcmask 7168  }
   0xa   :  { %67 = vrot.lane.b32.xlu0 %v777_v4, %s802_s22  ;;  %63 = vrot.lane.b32.xlu1 %v778_v5, %s802_s22  ;;  %v894_v15 = vld [vmem:[%s979_s0 + $0x28] ss:$16 sps:$4 sm:$0xff]   ;;  %v797_v24 = vld [vmem:[%s979_s0 + $0x2c] ss:$16 sps:$4 sm:$0xff]   ;;  %vm333_vm4 = vcmask 1039360   ;;  %vm392_vm5 = vcmask 973824  }
   0xb   :  { %613 = vmatprep.mubr.bf16.mxu1 %v752_v23  ;;  %v798_v26 = vld [vmem:[%s979_s0 + $0x2c] ss:$16 sps:$4 sm:$0xff]   ;;  %vm451_vm6 = vcmask 965632   ;;  %vm510_vm7 = vcmask 957440   ;;  %vm577_vm8 = vcmask 261120  }
   0xe   :  { %118 = vrot.lane.b32.xlu0 %v771_v0, %s803_s8  ;;  %120 = vrot.lane.b32.xlu1 %v779_v6, %s803_s8 }
  0x12   :  { %116 = vrot.lane.b32.xlu0 %v773_v1, %s803_s8  ;;  %124 = vrot.lane.b32.xlu1 %v775_v3, %s803_s8 }
  0x16   :  { %126 = vrot.lane.b32.xlu0 %v780_v7, %s803_s8  ;;  %122 = vrot.lane.b32.xlu1 %v778_v5, %s803_s8 }
  0x1a   :  { %177 = vrot.lane.b32.xlu0 %v771_v0, %s804_s13  ;;  %179 = vrot.lane.b32.xlu1 %v781_v8, %s804_s13 }
  0x1e   :  { %175 = vrot.lane.b32.xlu0 %v773_v1, %s804_s13  ;;  %183 = vrot.lane.b32.xlu1 %v775_v3, %s804_s13 }
  0x22   :  { %185 = vrot.lane.b32.xlu0 %v782_v9, %s804_s13  ;;  %181 = vrot.lane.b32.xlu1 %v778_v5, %s804_s13 }
  0x26   :  { %236 = vrot.lane.b32.xlu0 %v771_v0, %s805_s18  ;;  %238 = vrot.lane.b32.xlu1 %v783_v10, %s805_s18 }
  0x2a   :  { %234 = vrot.lane.b32.xlu0 %v773_v1, %s805_s18  ;;  %242 = vrot.lane.b32.xlu1 %v775_v3, %s805_s18 }
  0x2e   :  { %244 = vrot.lane.b32.xlu0 %v784_v11, %s805_s18  ;;  %240 = vrot.lane.b32.xlu1 %v778_v5, %s805_s18 }
  0x32   :  { %323 = vrot.lane.b32.xlu0 %v880_v12, %s806_s25  ;;  %325 = vrot.lane.b32.xlu1 %v787_v13, %s806_s25 }
  0x36   :  { %321 = vrot.lane.b32.xlu0 %v889_v14, %s806_s25  ;;  %329 = vrot.lane.b32.xlu1 %v894_v15, %s806_s25 }
  0x3a   :  { %331 = vrot.lane.b32.xlu0 %v791_v16, %s806_s25  ;;  %327 = vrot.lane.b32.xlu1 %v904_v17, %s806_s25 }
  0x3e   :  { %382 = vrot.lane.b32.xlu0 %v880_v12, %s807_s11  ;;  %384 = vrot.lane.b32.xlu1 %v793_v18, %s807_s11 }
  0x42   :  { %380 = vrot.lane.b32.xlu0 %v889_v14, %s807_s11  ;;  %388 = vrot.lane.b32.xlu1 %v894_v15, %s807_s11 }
  0x46   :  { %390 = vrot.lane.b32.xlu0 %v794_v19, %s807_s11  ;;  %386 = vrot.lane.b32.xlu1 %v904_v17, %s807_s11 }
  0x4a   :  { %441 = vrot.lane.b32.xlu0 %v880_v12, %s808_s16  ;;  %443 = vrot.lane.b32.xlu1 %v795_v20, %s808_s16 }
  0x4e   :  { %439 = vrot.lane.b32.xlu0 %v889_v14, %s808_s16  ;;  %500 = vrot.lane.b32.xlu1 %v880_v12, %s809_s21 }
  0x52   :  { %502 = vrot.lane.b32.xlu0 %v796_v21, %s809_s21  ;;  %498 = vrot.lane.b32.xlu1 %v889_v14, %s809_s21 }
  0x56   :  { %447 = vrot.lane.b32.xlu0 %v894_v15, %s808_s16  ;;  %449 = vrot.lane.b32.xlu1 %v797_v24, %s808_s16 }
  0x5a   :  { %445 = vrot.lane.b32.xlu0 %v904_v17, %s808_s16  ;;  %506 = vrot.lane.b32.xlu1 %v894_v15, %s809_s21 }
  0x5e   :  { %508 = vrot.lane.b32.xlu0 %v798_v26, %s809_s21  ;;  %504 = vrot.lane.b32.xlu1 %v904_v17, %s809_s21 }
  0x62   :  { %564 = vperm.xlu0 %770, %v561_v27  }
  0x74   :  { %v60_v28 = vpop.permute.xlu0 %59  ;;  %v58_v29 = vpop.permute.xlu1 %57 }
  0x75   :  { %v70_v33 = vsel %vm69_vm0, %v58_v29, %v60_v28 }
  0x78   :  { %v62_v30 = vpop.permute.xlu0 %61  ;;  %v66_v31 = vpop.permute.xlu1 %65 }
  0x79   :  { %v71_v32 = vsel %vm69_vm0, %v60_v28, %v62_v30 }
  0x7a   :  { %581 = vmatprep.subr.bf16.mxu1 %v71_v32 }
  0x7b   :  { %582 = vmatpush1.bf16.msra.mxu1 %v70_v33 }
  0x7c   :  { %v68_v34 = vpop.permute.xlu0 %67  ;;  %v64_v35 = vpop.permute.xlu1 %63 }
  0x7d   :  { %v73_v36 = vsel %vm69_vm0, %v66_v31, %v68_v34  ;;  %v72_v37 = vsel %vm69_vm0, %v64_v35, %v66_v31 }
  0x7e   :  { %583 = vmatprep.subr.bf16.mxu1 %v73_v36 }
  0x7f   :  { %584 = vmatpush1.bf16.msra.mxu1 %v72_v37 }
  0x80   :  { %v119_v38 = vpop.permute.xlu0 %118  ;;  %v121_v39 = vpop.permute.xlu1 %120 }
  0x81   :  { %v130_v40 = vsel %vm128_vm1, %v119_v38, %v121_v39 }
  0x82   :  { %585 = vmatprep.subr.bf16.mxu1 %v130_v40 }
  0x84   :  { %v117_v41 = vpop.permute.xlu0 %116  ;;  %v125_v42 = vpop.permute.xlu1 %124 }
  0x85   :  { %v129_v43 = vsel %vm128_vm1, %v117_v41, %v119_v38  ;;  %v751_v41 = vcombine.low %v928_v22, %v928_v22 }
  0x86   :  { %586 = vmatpush1.bf16.msra.mxu1 %v129_v43 }
  0x88   :  { %v127_v44 = vpop.permute.xlu0 %126  ;;  %v123_v45 = vpop.permute.xlu1 %122 }
  0x89   :  { %v132_v46 = vsel %vm128_vm1, %v125_v42, %v127_v44  ;;  %v131_v47 = vsel %vm128_vm1, %v123_v45, %v125_v42  ;;  %v801_v45 = vld [vmem:[%s980_s2 + $0x8] ss:$0 sps:$4 sm:$0xff]  }
  0x8a   :  { %587 = vmatprep.subr.bf16.mxu1 %v132_v46 }
  0x8b   :  { %588 = vmatpush1.bf16.msra.mxu1 %v131_v47  ;;  %v664_v47 = vlaneseq }
  0x8c   :  { %v178_v48 = vpop.permute.xlu0 %177  ;;  %v180_v49 = vpop.permute.xlu1 %179 }
  0x8d   :  { %v189_v50 = vsel %vm187_vm2, %v178_v48, %v180_v49 }
  0x8e   :  { %589 = vmatprep.subr.bf16.mxu1 %v189_v50 }
  0x90   :  { %v176_v51 = vpop.permute.xlu0 %175  ;;  %v184_v52 = vpop.permute.xlu1 %183 }
  0x91   :  { %v188_v53 = vsel %vm187_vm2, %v176_v51, %v178_v48  ;;  %v665_v48 = vshrl.u32 %v664_v47, 7 }
  0x92   :  { %590 = vmatpush1.bf16.msra.mxu1 %v188_v53 }
  0x93   :  { %v666_v50 = vsub.s32 0, %v665_v48  ;;  %v670_v53 = vsub.s32 1, %v665_v48 }
  0x94   :  { %v186_v54 = vpop.permute.xlu0 %185  ;;  %v182_v55 = vpop.permute.xlu1 %181 }
  0x95   :  { %v191_v56 = vsel %vm187_vm2, %v184_v52, %v186_v54  ;;  %v190_v57 = vsel %vm187_vm2, %v182_v55, %v184_v52  ;;  %v22_v52 = vld [vmem:[%s983_s1] sm:$0x3] }
  0x96   :  { %591 = vmatprep.subr.bf16.mxu1 %v191_v56 }
  0x97   :  { %592 = vmatpush1.bf16.msra.mxu1 %v190_v57 }
  0x98   :  { %v237_v58 = vpop.permute.xlu0 %236  ;;  %v239_v59 = vpop.permute.xlu1 %238 }
  0x99   :  { %v248_v60 = vsel %vm246_vm3, %v237_v58, %v239_v59 }
  0x9a   :  { %593 = vmatprep.subr.bf16.mxu1 %v248_v60  ;;  %v671_v60 = vrot.slane %v22_v52, %v670_v53 }
  0x9c   :  { %v235_v61 = vpop.permute.xlu0 %234  ;;  %v243_v62 = vpop.permute.xlu1 %242 }
  0x9d   :  { %v247_v63 = vsel %vm246_vm3, %v235_v61, %v237_v58  ;;  %v667_v58 = vrot.slane %v22_v52, %v666_v50 }
  0x9e   :  { %594 = vmatpush1.bf16.msra.mxu1 %v247_v63  ;;  %v679_v63 = vstv %s984_s4 }
  0xa0   :  { %v245_v0 = vpop.permute.xlu0 %244  ;;  %v241_v1 = vpop.permute.xlu1 %240 }
  0xa1   :  { %v250_v2 = vsel %vm246_vm3, %v243_v62, %v245_v0  ;;  %v249_v3 = vsel %vm246_vm3, %v241_v1, %v243_v62 }
  0xa2   :  { %595 = vmatprep.subr.bf16.mxu1 %v250_v2 }
  0xa3   :  { %596 = vmatpush1.bf16.msra.mxu1 %v249_v3 }
  0xa4   :  { %v324_v4 = vpop.permute.xlu0 %323  ;;  %597 = vmatprep.subr.bf16.mxu1 %v880_v12  ;;  %v326_v5 = vpop.permute.xlu1 %325 }
  0xa5   :  { %v335_v8 = vsel %vm333_vm4, %v324_v4, %v326_v5 }
  0xa7   :  { %598 = vmatpush1.bf16.msra.mxu1 %v889_v14 }
  0xa8   :  { %v322_v6 = vpop.permute.xlu0 %321  ;;  %599 = vmatprep.subr.bf16.mxu1 %v894_v15  ;;  %v330_v7 = vpop.permute.xlu1 %329 }
  0xa9   :  { %v334_v11 = vsel %vm333_vm4, %v322_v6, %v324_v4 }
  0xab   :  { %600 = vmatpush1.bf16.msra.mxu1 %v904_v17 }
  0xac   :  { %v332_v9 = vpop.permute.xlu0 %331  ;;  %601 = vmatprep.subr.bf16.mxu1 %v335_v8  ;;  %v328_v10 = vpop.permute.xlu1 %327 }
  0xad   :  { %v337_v13 = vsel %vm333_vm4, %v330_v7, %v332_v9  ;;  %v336_v18 = vsel %vm333_vm4, %v328_v10, %v330_v7 }
  0xaf   :  { %602 = vmatpush1.bf16.msra.mxu1 %v334_v11 }
  0xb0   :  { %v383_v16 = vpop.permute.xlu0 %382  ;;  %603 = vmatprep.subr.bf16.mxu1 %v337_v13  ;;  %v385_v12 = vpop.permute.xlu1 %384 }
  0xb1   :  { %v394_v14 = vsel %vm392_vm5, %v383_v16, %v385_v12 }
  0xb3   :  { %604 = vmatpush1.bf16.msra.mxu1 %v336_v18 }
  0xb4   :  { %v381_v19 = vpop.permute.xlu0 %380  ;;  %605 = vmatprep.subr.bf16.mxu1 %v394_v14  ;;  %v389_v15 = vpop.permute.xlu1 %388 }
  0xb5   :  { %v393_v20 = vsel %vm392_vm5, %v381_v19, %v383_v16 }
  0xb7   :  { %606 = vmatpush1.bf16.msra.mxu1 %v393_v20 }
  0xb8   :  { %v391_v17 = vpop.permute.xlu0 %390  ;;  %v387_v21 = vpop.permute.xlu1 %386 }
  0xb9   :  { %v396_v23 = vsel %vm392_vm5, %v389_v15, %v391_v17  ;;  %v395_v24 = vsel %vm392_vm5, %v387_v21, %v389_v15 }
  0xba   :  { %607 = vmatprep.subr.bf16.mxu1 %v396_v23 }
  0xbb   :  { %608 = vmatpush1.bf16.msra.mxu1 %v395_v24 }
  0xbc   :  { %v442_v25 = vpop.permute.xlu0 %441  ;;  %v444_v26 = vpop.permute.xlu1 %443 }
  0xbd   :  { %v453_v27 = vsel %vm451_vm6, %v442_v25, %v444_v26 }
  0xbe   :  { %609 = vmatprep.subr.bf16.mxu1 %v453_v27 }
  0xc0   :  { %v440_v28 = vpop.permute.xlu0 %439  ;;  %v501_v29 = vpop.permute.xlu1 %500 }
  0xc1   :  { %v452_v30 = vsel %vm451_vm6, %v440_v28, %v442_v25 }
  0xc2   :  { %610 = vmatpush1.bf16.msra.mxu1 %v452_v30 }
  0xc4   :  { %v503_v31 = vpop.permute.xlu0 %502  ;;  %v499_v32 = vpop.permute.xlu1 %498 }
  0xc5   :  { %v512_v33 = vsel %vm510_vm7, %v501_v29, %v503_v31  ;;  %v511_v34 = vsel %vm510_vm7, %v499_v32, %v501_v29 }
  0xc6   :  { %622 = vmatprep.subr.bf16.mxu0 %v512_v33 }
  0xc7   :  { %623 = vmatpush1.bf16.msra.mxu0 %v511_v34 }
  0xc8   :  { %v448_v35 = vpop.permute.xlu0 %447  ;;  %v450_v36 = vpop.permute.xlu1 %449 }
  0xc9   :  { %v455_v37 = vsel %vm451_vm6, %v448_v35, %v450_v36 }
  0xca   :  { %611 = vmatprep.subr.bf16.mxu1 %v455_v37 }
  0xcc   :  { %v446_v38 = vpop.permute.xlu0 %445  ;;  %v507_v39 = vpop.permute.xlu1 %506 }
  0xcd   :  { %v454_v40 = vsel %vm451_vm6, %v446_v38, %v448_v35 }
  0xce   :  { %612 = vmatpush1.bf16.msra.mxu1 %v454_v40 }
  0xd0   :  { %v509_v42 = vpop.permute.xlu0 %508  ;;  %v505_v43 = vpop.permute.xlu1 %504 }
  0xd1   :  { %614 = vmatmul.mubr.bf16.vlgmr.msra.gmra.mrb[0].mxu1 %v751_v41  ;;  %v514_v44 = vsel %vm510_vm7, %v507_v39, %v509_v42  ;;  %v513_v46 = vsel %vm510_vm7, %v505_v43, %v507_v39 }
  0xd2   :  { %624 = vmatprep.subr.bf16.mxu0 %v514_v44 }
  0xd3   :  { %625 = vmatpush1.bf16.msra.mxu0 %v513_v46 }
  0xd6   :  { %754 = vmatmul.mubr.msk.bf16.vlgmr.msra.gmra.mrb[0].mxu0 %vm577_vm8, %v801_v45 }
  0xe1   :  { %v565_v49 = vpop.permute.xlu0 %564 }
 0x1a4   :  { %v615_v22 = vpop.f32.mrb[0].mxu1 }
 0x1a5   :  { %v617_v51 = vpop.f32.mrb[1].mxu1  ;;  %v616_v55 = vadd.f32 %v615_v22, %v565_v49 }
 0x1a6   :  { %v619_v54 = vpop.f32.mrb[2].mxu1  ;;  %v618_v56 = vadd.f32 %v617_v51, %v565_v49 }
 0x1a7   :  { %v620_v57 = vpop.f32.mrb[3].mxu1 }
 0x1a9   :  { %v656_v59 = vpop.f32.mrb[0].mxu0 }
 0x1aa   :  { %v657_v61 = vadd.f32 %v656_v59, %v616_v55  ;;  %v658_v62 = vpop.f32.mrb[1].mxu0 }
 0x1ab   :  { %v659_v0 = vadd.f32 %v658_v62, %v618_v56  ;;  %v660_v1 = vpop.f32.mrb[2].mxu0 }
 0x1ac   :  { %v674_v2 = vmul.f32 %v667_v58, %v657_v61  ;;  %v661_v3 = vpop.f32.mrb[3].mxu0 }
 0x1ad   :  { %v675_v4 = vmul.f32 %v671_v60, %v659_v0 }
 0x1ae   :  { %vm677_vm9 = vcmp.ge.f32.partialorder %v674_v2, 0.0  ;;  %v680_v5 = vmul.f32 %v679_v63, %v674_v2 }
 0x1af   :  { %vm678_vm10 = vcmp.ge.f32.partialorder %v675_v4, 0.0  ;;  %v681_v6 = vmul.f32 %v679_v63, %v675_v4 }
 0x1b0   :  { %v682_v7 = vsel %vm677_vm9, %v674_v2, %v680_v5 }
 0x1b1   :  { %v683_v8 = vsel %vm678_vm10, %v675_v4, %v681_v6 }
 0x1b2   :  { %v756_v9 = vpack.c.bf16 %v683_v8, %v682_v7 }
 0x1b4   :  { %693 = vst [vmem:[%s981_s5 + $0x4] sm:$0xff] %v756_v9 }

// kernel: rbpn_forward.39
= control target key start
LH: loop header
LB: loop body
LE: loop exit
PB: predicated region body
PF: predicated region fallthrough
CT: control target
= control target key end

     0   :  { %s810_s25 = smov 11   ;;  %s811_s12 = smov 10   ;;  %v818_v25 = vmov 0   ;;  %vm72_vm0 = vcmask 89088   ;;  %vm131_vm1 = vcmask 80896   ;;  %vm190_vm2 = vcmask 72704   ;;  %s995_s0 = inlined_call_operand.vmem [shape: bf16[32,512], index: 0, kind: input, shape index: {}]   ;;  %s996_s3 = inlined_call_operand.vmem [shape: bf16[8,288], index: 3, kind: input, shape index: {}]   ;;  %s997_s6 = inlined_call_operand.vmem [shape: bf16[8,512], index: 6, kind: output, shape index: {}]   ;;  %s998_s4 = inlined_call_operand.vmem [shape: f32[8,1], index: 4, kind: input, shape index: {}]   ;;  %s999_s1 = inlined_call_operand.vmem [shape: f32[1,256], index: 1, kind: input, shape index: {}]   ;;  %s1000_s2 = inlined_call_operand.vmem [shape: bf16[8,512], index: 2, kind: input, shape index: {}]   ;;  %s1001_s5 = inlined_call_operand.<no memory space> [shape: f32[1], index: 5, kind: input, shape index: {}]  }
   0x1   :  { %v779_v0 = vld [vmem:[%s995_s0 + $0x4] ss:$16 sps:$4 sm:$0xff]   ;;  %v781_v1 = vld [vmem:[%s995_s0] ss:$16 sps:$4 sm:$0xff]   ;;  %v782_v2 = vld [vmem:[%s995_s0 + $0x8] ss:$16 sps:$4 sm:$0xff]   ;;  %657 = vmatprep.mubr.bf16.mxu0 %v818_v25  ;;  %778 = vset.pattern.permute.xlu0 %v818_v25 }
   0x2   :  { %62 = vrot.lane.b32.xlu0 %v779_v0, %s810_s25  ;;  %60 = vrot.lane.b32.xlu1 %v781_v1, %s810_s25  ;;  %v783_v3 = vld [vmem:[%s995_s0 + $0x24] ss:$16 sps:$4 sm:$0xff]   ;;  %v785_v4 = vld [vmem:[%s995_s0 + $0x28] ss:$16 sps:$4 sm:$0xff]   ;;  %s812_s17 = smov 9   ;;  %s813_s22 = smov 1  }
   0x3   :  { %v786_v5 = vld [vmem:[%s995_s0 + $0x20] ss:$16 sps:$4 sm:$0xff]   ;;  %v787_v6 = vld [vmem:[%s995_s0 + $0x8] ss:$16 sps:$4 sm:$0xff]   ;;  %v795_v13 = vld [vmem:[%s995_s0 + $0xc] ss:$16 sps:$4 sm:$0xff]  }
   0x4   :  { %v788_v7 = vld [vmem:[%s995_s0 + $0x28] ss:$16 sps:$4 sm:$0xff]   ;;  %s814_s29 = smov 127   ;;  %v902_v14 = vld [vmem:[%s995_s0 + $0x4] ss:$16 sps:$4 sm:$0xff]   ;;  %s815_s16 = smov 119  }
   0x5   :  { %v789_v8 = vld [vmem:[%s995_s0 + $0x8] ss:$16 sps:$4 sm:$0xff]   ;;  %v799_v16 = vld [vmem:[%s995_s0 + $0x2c] ss:$16 sps:$4 sm:$0xff]   ;;  %v917_v17 = vld [vmem:[%s995_s0 + $0x24] ss:$16 sps:$4 sm:$0xff]  }
   0x6   :  { %64 = vrot.lane.b32.xlu0 %v782_v2, %s810_s25  ;;  %68 = vrot.lane.b32.xlu1 %v783_v3, %s810_s25  ;;  %v790_v9 = vld [vmem:[%s995_s0 + $0x28] ss:$16 sps:$4 sm:$0xff]   ;;  %v801_v18 = vld [vmem:[%s995_s0 + $0xc] ss:$16 sps:$4 sm:$0xff]   ;;  %s816_s21 = smov 118   ;;  %s817_s26 = smov 117  }
   0x7   :  { %v791_v10 = vld [vmem:[%s995_s0 + $0x8] ss:$16 sps:$4 sm:$0xff]   ;;  %v802_v19 = vld [vmem:[%s995_s0 + $0x2c] ss:$16 sps:$4 sm:$0xff]   ;;  %v941_v22 = vld [vmem:[%s996_s3] sm:$0xff]  ;;  %692 = vst [vmem:[%s997_s6] sm:$0xf] %v818_v25 }
   0x8   :  { %v792_v11 = vld [vmem:[%s995_s0 + $0x28] ss:$16 sps:$4 sm:$0xff]   ;;  %v803_v20 = vld [vmem:[%s995_s0 + $0xc] ss:$16 sps:$4 sm:$0xff]   ;;  %v760_v23 = vcombine.high %v941_v22, %v941_v22  ;;  %702 = vst [vmem:[%s997_s6 + $0xc] sm:$0xf] %v818_v25 }
   0x9   :  { %v893_v12 = vld [vmem:[%s995_s0 + $0x8] ss:$16 sps:$4 sm:$0xff]   ;;  %v804_v21 = vld [vmem:[%s995_s0 + $0xc] ss:$16 sps:$4 sm:$0xff]   ;;  %v564_v27 = vld [vmem:[%s998_s4] sm:$0xff]  ;;  %vm249_vm3 = vcmask 7168  }
   0xa   :  { %70 = vrot.lane.b32.xlu0 %v785_v4, %s810_s25  ;;  %66 = vrot.lane.b32.xlu1 %v786_v5, %s810_s25  ;;  %v907_v15 = vld [vmem:[%s995_s0 + $0x28] ss:$16 sps:$4 sm:$0xff]   ;;  %v805_v24 = vld [vmem:[%s995_s0 + $0x2c] ss:$16 sps:$4 sm:$0xff]   ;;  %vm336_vm4 = vcmask 1039360   ;;  %vm395_vm5 = vcmask 973824  }
   0xb   :  { %616 = vmatprep.mubr.bf16.mxu1 %v760_v23  ;;  %v806_v26 = vld [vmem:[%s995_s0 + $0x2c] ss:$16 sps:$4 sm:$0xff]   ;;  %vm454_vm6 = vcmask 965632   ;;  %vm513_vm7 = vcmask 957440   ;;  %vm580_vm8 = vcmask 261120  }
   0xe   :  { %121 = vrot.lane.b32.xlu0 %v779_v0, %s811_s12  ;;  %123 = vrot.lane.b32.xlu1 %v787_v6, %s811_s12 }
  0x12   :  { %119 = vrot.lane.b32.xlu0 %v781_v1, %s811_s12  ;;  %127 = vrot.lane.b32.xlu1 %v783_v3, %s811_s12 }
  0x16   :  { %129 = vrot.lane.b32.xlu0 %v788_v7, %s811_s12  ;;  %125 = vrot.lane.b32.xlu1 %v786_v5, %s811_s12 }
  0x1a   :  { %180 = vrot.lane.b32.xlu0 %v779_v0, %s812_s17  ;;  %182 = vrot.lane.b32.xlu1 %v789_v8, %s812_s17 }
  0x1e   :  { %178 = vrot.lane.b32.xlu0 %v781_v1, %s812_s17  ;;  %186 = vrot.lane.b32.xlu1 %v783_v3, %s812_s17 }
  0x22   :  { %188 = vrot.lane.b32.xlu0 %v790_v9, %s812_s17  ;;  %184 = vrot.lane.b32.xlu1 %v786_v5, %s812_s17 }
  0x26   :  { %239 = vrot.lane.b32.xlu0 %v779_v0, %s813_s22  ;;  %241 = vrot.lane.b32.xlu1 %v791_v10, %s813_s22 }
  0x2a   :  { %237 = vrot.lane.b32.xlu0 %v781_v1, %s813_s22  ;;  %245 = vrot.lane.b32.xlu1 %v783_v3, %s813_s22 }
  0x2e   :  { %247 = vrot.lane.b32.xlu0 %v792_v11, %s813_s22  ;;  %243 = vrot.lane.b32.xlu1 %v786_v5, %s813_s22 }
  0x32   :  { %326 = vrot.lane.b32.xlu0 %v893_v12, %s814_s29  ;;  %328 = vrot.lane.b32.xlu1 %v795_v13, %s814_s29 }
  0x36   :  { %324 = vrot.lane.b32.xlu0 %v902_v14, %s814_s29  ;;  %332 = vrot.lane.b32.xlu1 %v907_v15, %s814_s29 }
  0x3a   :  { %334 = vrot.lane.b32.xlu0 %v799_v16, %s814_s29  ;;  %330 = vrot.lane.b32.xlu1 %v917_v17, %s814_s29 }
  0x3e   :  { %385 = vrot.lane.b32.xlu0 %v893_v12, %s815_s16  ;;  %387 = vrot.lane.b32.xlu1 %v801_v18, %s815_s16 }
  0x42   :  { %383 = vrot.lane.b32.xlu0 %v902_v14, %s815_s16  ;;  %391 = vrot.lane.b32.xlu1 %v907_v15, %s815_s16 }
  0x46   :  { %393 = vrot.lane.b32.xlu0 %v802_v19, %s815_s16  ;;  %389 = vrot.lane.b32.xlu1 %v917_v17, %s815_s16 }
  0x4a   :  { %444 = vrot.lane.b32.xlu0 %v893_v12, %s816_s21  ;;  %446 = vrot.lane.b32.xlu1 %v803_v20, %s816_s21 }
  0x4e   :  { %442 = vrot.lane.b32.xlu0 %v902_v14, %s816_s21  ;;  %503 = vrot.lane.b32.xlu1 %v893_v12, %s817_s26 }
  0x52   :  { %505 = vrot.lane.b32.xlu0 %v804_v21, %s817_s26  ;;  %501 = vrot.lane.b32.xlu1 %v902_v14, %s817_s26 }
  0x56   :  { %450 = vrot.lane.b32.xlu0 %v907_v15, %s816_s21  ;;  %452 = vrot.lane.b32.xlu1 %v805_v24, %s816_s21 }
  0x5a   :  { %448 = vrot.lane.b32.xlu0 %v917_v17, %s816_s21  ;;  %509 = vrot.lane.b32.xlu1 %v907_v15, %s817_s26 }
  0x5e   :  { %511 = vrot.lane.b32.xlu0 %v806_v26, %s817_s26  ;;  %507 = vrot.lane.b32.xlu1 %v917_v17, %s817_s26 }
  0x62   :  { %567 = vperm.xlu0 %778, %v564_v27  }
  0x74   :  { %v63_v28 = vpop.permute.xlu0 %62  ;;  %v61_v29 = vpop.permute.xlu1 %60 }
  0x75   :  { %v73_v33 = vsel %vm72_vm0, %v61_v29, %v63_v28 }
  0x78   :  { %v65_v30 = vpop.permute.xlu0 %64  ;;  %v69_v31 = vpop.permute.xlu1 %68 }
  0x79   :  { %v74_v32 = vsel %vm72_vm0, %v63_v28, %v65_v30 }
  0x7a   :  { %584 = vmatprep.subr.bf16.mxu1 %v74_v32 }
  0x7b   :  { %585 = vmatpush1.bf16.msra.mxu1 %v73_v33 }
  0x7c   :  { %v71_v34 = vpop.permute.xlu0 %70  ;;  %v67_v35 = vpop.permute.xlu1 %66 }
  0x7d   :  { %v76_v36 = vsel %vm72_vm0, %v69_v31, %v71_v34  ;;  %v75_v37 = vsel %vm72_vm0, %v67_v35, %v69_v31 }
  0x7e   :  { %586 = vmatprep.subr.bf16.mxu1 %v76_v36 }
  0x7f   :  { %587 = vmatpush1.bf16.msra.mxu1 %v75_v37 }
  0x80   :  { %v122_v38 = vpop.permute.xlu0 %121  ;;  %v124_v39 = vpop.permute.xlu1 %123 }
  0x81   :  { %v133_v40 = vsel %vm131_vm1, %v122_v38, %v124_v39 }
  0x82   :  { %588 = vmatprep.subr.bf16.mxu1 %v133_v40 }
  0x84   :  { %v120_v41 = vpop.permute.xlu0 %119  ;;  %v128_v42 = vpop.permute.xlu1 %127 }
  0x85   :  { %v132_v43 = vsel %vm131_vm1, %v120_v41, %v122_v38  ;;  %v759_v41 = vcombine.low %v941_v22, %v941_v22 }
  0x86   :  { %589 = vmatpush1.bf16.msra.mxu1 %v132_v43 }
  0x88   :  { %v130_v44 = vpop.permute.xlu0 %129  ;;  %v126_v45 = vpop.permute.xlu1 %125 }
  0x89   :  { %v135_v46 = vsel %vm131_vm1, %v128_v42, %v130_v44  ;;  %v134_v47 = vsel %vm131_vm1, %v126_v45, %v128_v42  ;;  %v809_v45 = vld [vmem:[%s996_s3 + $0x8] ss:$0 sps:$4 sm:$0xff]  }
  0x8a   :  { %590 = vmatprep.subr.bf16.mxu1 %v135_v46 }
  0x8b   :  { %591 = vmatpush1.bf16.msra.mxu1 %v134_v47  ;;  %v667_v47 = vlaneseq }
  0x8c   :  { %v181_v48 = vpop.permute.xlu0 %180  ;;  %v183_v49 = vpop.permute.xlu1 %182 }
  0x8d   :  { %v192_v50 = vsel %vm190_vm2, %v181_v48, %v183_v49 }
  0x8e   :  { %592 = vmatprep.subr.bf16.mxu1 %v192_v50 }
  0x90   :  { %v179_v51 = vpop.permute.xlu0 %178  ;;  %v187_v52 = vpop.permute.xlu1 %186 }
  0x91   :  { %v191_v53 = vsel %vm190_vm2, %v179_v51, %v181_v48  ;;  %v668_v48 = vshrl.u32 %v667_v47, 7 }
  0x92   :  { %593 = vmatpush1.bf16.msra.mxu1 %v191_v53 }
  0x93   :  { %v669_v50 = vsub.s32 0, %v668_v48  ;;  %v673_v53 = vsub.s32 1, %v668_v48 }
  0x94   :  { %v189_v54 = vpop.permute.xlu0 %188  ;;  %v185_v55 = vpop.permute.xlu1 %184 }
  0x95   :  { %v194_v56 = vsel %vm190_vm2, %v187_v52, %v189_v54  ;;  %v193_v57 = vsel %vm190_vm2, %v185_v55, %v187_v52  ;;  %v25_v52 = vld [vmem:[%s999_s1] sm:$0x3] }
  0x96   :  { %594 = vmatprep.subr.bf16.mxu1 %v194_v56 }
  0x97   :  { %595 = vmatpush1.bf16.msra.mxu1 %v193_v57 }
  0x98   :  { %v240_v58 = vpop.permute.xlu0 %239  ;;  %v242_v59 = vpop.permute.xlu1 %241 }
  0x99   :  { %v251_v60 = vsel %vm249_vm3, %v240_v58, %v242_v59 }
  0x9a   :  { %596 = vmatprep.subr.bf16.mxu1 %v251_v60  ;;  %v674_v60 = vrot.slane %v25_v52, %v673_v53 }
  0x9c   :  { %v238_v61 = vpop.permute.xlu0 %237  ;;  %v246_v62 = vpop.permute.xlu1 %245 }
  0x9d   :  { %v250_v63 = vsel %vm249_vm3, %v238_v61, %v240_v58  ;;  %v670_v58 = vrot.slane %v25_v52, %v669_v50 }
  0x9e   :  { %597 = vmatpush1.bf16.msra.mxu1 %v250_v63 }
  0xa0   :  { %v248_v0 = vpop.permute.xlu0 %247  ;;  %v244_v1 = vpop.permute.xlu1 %243 }
  0xa1   :  { %v253_v2 = vsel %vm249_vm3, %v246_v62, %v248_v0  ;;  %v252_v3 = vsel %vm249_vm3, %v244_v1, %v246_v62  ;;  %v687_v62 = vld [vmem:[%s1000_s2 + $0x4] sm:$0xff]  ;;  %v682_v0 = vstv %s1001_s5 }
  0xa2   :  { %598 = vmatprep.subr.bf16.mxu1 %v253_v2 }
  0xa3   :  { %599 = vmatpush1.bf16.msra.mxu1 %v252_v3 }
  0xa4   :  { %v327_v4 = vpop.permute.xlu0 %326  ;;  %600 = vmatprep.subr.bf16.mxu1 %v893_v12  ;;  %v329_v5 = vpop.permute.xlu1 %328 }
  0xa5   :  { %v338_v8 = vsel %vm336_vm4, %v327_v4, %v329_v5  ;;  %v688_v5 = vunpack.c.l.bf16 %v687_v62 }
  0xa7   :  { %601 = vmatpush1.bf16.msra.mxu1 %v902_v14 }
  0xa8   :  { %v325_v6 = vpop.permute.xlu0 %324  ;;  %602 = vmatprep.subr.bf16.mxu1 %v907_v15  ;;  %v333_v7 = vpop.permute.xlu1 %332 }
  0xa9   :  { %v337_v11 = vsel %vm336_vm4, %v325_v6, %v327_v4 }
  0xab   :  { %603 = vmatpush1.bf16.msra.mxu1 %v917_v17 }
  0xac   :  { %v335_v9 = vpop.permute.xlu0 %334  ;;  %604 = vmatprep.subr.bf16.mxu1 %v338_v8  ;;  %v331_v10 = vpop.permute.xlu1 %330  ;;  %v689_v8 = vunpack.c.h.bf16 %v687_v62 }
  0xad   :  { %v340_v13 = vsel %vm336_vm4, %v333_v7, %v335_v9  ;;  %v339_v18 = vsel %vm336_vm4, %v331_v10, %v333_v7 }
  0xaf   :  { %605 = vmatpush1.bf16.msra.mxu1 %v337_v11 }
  0xb0   :  { %v386_v16 = vpop.permute.xlu0 %385  ;;  %606 = vmatprep.subr.bf16.mxu1 %v340_v13  ;;  %v388_v12 = vpop.permute.xlu1 %387 }
  0xb1   :  { %v397_v14 = vsel %vm395_vm5, %v386_v16, %v388_v12 }
  0xb3   :  { %607 = vmatpush1.bf16.msra.mxu1 %v339_v18 }
  0xb4   :  { %v384_v19 = vpop.permute.xlu0 %383  ;;  %608 = vmatprep.subr.bf16.mxu1 %v397_v14  ;;  %v392_v15 = vpop.permute.xlu1 %391 }
  0xb5   :  { %v396_v20 = vsel %vm395_vm5, %v384_v19, %v386_v16 }
  0xb7   :  { %609 = vmatpush1.bf16.msra.mxu1 %v396_v20 }
  0xb8   :  { %v394_v17 = vpop.permute.xlu0 %393  ;;  %v390_v21 = vpop.permute.xlu1 %389 }
  0xb9   :  { %v399_v23 = vsel %vm395_vm5, %v392_v15, %v394_v17  ;;  %v398_v24 = vsel %vm395_vm5, %v390_v21, %v392_v15 }
  0xba   :  { %610 = vmatprep.subr.bf16.mxu1 %v399_v23 }
  0xbb   :  { %611 = vmatpush1.bf16.msra.mxu1 %v398_v24 }
  0xbc   :  { %v445_v25 = vpop.permute.xlu0 %444  ;;  %v447_v26 = vpop.permute.xlu1 %446 }
  0xbd   :  { %v456_v27 = vsel %vm454_vm6, %v445_v25, %v447_v26 }
  0xbe   :  { %612 = vmatprep.subr.bf16.mxu1 %v456_v27 }
  0xc0   :  { %v443_v28 = vpop.permute.xlu0 %442  ;;  %v504_v29 = vpop.permute.xlu1 %503 }
  0xc1   :  { %v455_v30 = vsel %vm454_vm6, %v443_v28, %v445_v25 }
  0xc2   :  { %613 = vmatpush1.bf16.msra.mxu1 %v455_v30 }
  0xc4   :  { %v506_v31 = vpop.permute.xlu0 %505  ;;  %v502_v32 = vpop.permute.xlu1 %501 }
  0xc5   :  { %v515_v33 = vsel %vm513_vm7, %v504_v29, %v506_v31  ;;  %v514_v34 = vsel %vm513_vm7, %v502_v32, %v504_v29 }
  0xc6   :  { %625 = vmatprep.subr.bf16.mxu0 %v515_v33 }
  0xc7   :  { %626 = vmatpush1.bf16.msra.mxu0 %v514_v34 }
  0xc8   :  { %v451_v35 = vpop.permute.xlu0 %450  ;;  %v453_v36 = vpop.permute.xlu1 %452 }
  0xc9   :  { %v458_v37 = vsel %vm454_vm6, %v451_v35, %v453_v36 }
  0xca   :  { %614 = vmatprep.subr.bf16.mxu1 %v458_v37 }
  0xcc   :  { %v449_v38 = vpop.permute.xlu0 %448  ;;  %v510_v39 = vpop.permute.xlu1 %509 }
  0xcd   :  { %v457_v40 = vsel %vm454_vm6, %v449_v38, %v451_v35 }
  0xce   :  { %615 = vmatpush1.bf16.msra.mxu1 %v457_v40 }
  0xd0   :  { %v512_v42 = vpop.permute.xlu0 %511  ;;  %v508_v43 = vpop.permute.xlu1 %507 }
  0xd1   :  { %617 = vmatmul.mubr.bf16.vlgmr.msra.gmra.mrb[0].mxu1 %v759_v41  ;;  %v517_v44 = vsel %vm513_vm7, %v510_v39, %v512_v42  ;;  %v516_v46 = vsel %vm513_vm7, %v508_v43, %v510_v39 }
  0xd2   :  { %627 = vmatprep.subr.bf16.mxu0 %v517_v44 }
  0xd3   :  { %628 = vmatpush1.bf16.msra.mxu0 %v516_v46 }
  0xd6   :  { %762 = vmatmul.mubr.msk.bf16.vlgmr.msra.gmra.mrb[0].mxu0 %vm580_vm8, %v809_v45 }
  0xe1   :  { %v568_v49 = vpop.permute.xlu0 %567 }
 0x1a4   :  { %v618_v22 = vpop.f32.mrb[0].mxu1 }
 0x1a5   :  { %v620_v51 = vpop.f32.mrb[1].mxu1  ;;  %v619_v55 = vadd.f32 %v618_v22, %v568_v49 }
 0x1a6   :  { %v622_v54 = vpop.f32.mrb[2].mxu1  ;;  %v621_v56 = vadd.f32 %v620_v51, %v568_v49 }
 0x1a7   :  { %v623_v57 = vpop.f32.mrb[3].mxu1 }
 0x1a9   :  { %v659_v59 = vpop.f32.mrb[0].mxu0 }
 0x1aa   :  { %v660_v61 = vadd.f32 %v659_v59, %v619_v55  ;;  %v661_v63 = vpop.f32.mrb[1].mxu0 }
 0x1ab   :  { %v662_v1 = vadd.f32 %v661_v63, %v621_v56  ;;  %v663_v2 = vpop.f32.mrb[2].mxu0 }
 0x1ac   :  { %v677_v3 = vmul.f32 %v670_v58, %v660_v61  ;;  %v664_v4 = vpop.f32.mrb[3].mxu0 }
 0x1ad   :  { %v678_v6 = vmul.f32 %v674_v60, %v662_v1 }
 0x1ae   :  { %vm680_vm9 = vcmp.ge.f32.partialorder %v677_v3, 0.0  ;;  %v683_v7 = vmul.f32 %v682_v0, %v677_v3 }
 0x1af   :  { %vm681_vm10 = vcmp.ge.f32.partialorder %v678_v6, 0.0  ;;  %v684_v9 = vmul.f32 %v682_v0, %v678_v6 }
 0x1b0   :  { %v685_v10 = vsel %vm680_vm9, %v677_v3, %v683_v7 }
 0x1b1   :  { %v690_v11 = vadd.f32 %v688_v5, %v685_v10  ;;  %v686_v13 = vsel %vm681_vm10, %v678_v6, %v684_v9 }
 0x1b2   :  { %v691_v16 = vadd.f32 %v689_v8, %v686_v13 }
 0x1b4   :  { %v764_v12 = vpack.c.bf16 %v691_v16, %v690_v11 }
 0x1b6   :  { %701 = vst [vmem:[%s997_s6 + $0x4] sm:$0xff] %v764_v12 }

// kernel: rbpn_forward.43
= control target key start
LH: loop header
LB: loop body
LE: loop exit
PB: predicated region body
PF: predicated region fallthrough
CT: control target
= control target key end

     0   :  { %s974_s25 = smov 19   ;;  %s975_s26 = smov 18   ;;  %vm692_vm0 = vcmask 130048   ;;  %v982_v49 = vmov 0   ;;  %vm74_vm1 = vcmask 154624   ;;  %vm144_vm2 = vcmask 146432   ;;  %s1326_s0 = inlined_call_operand.vmem [shape: bf16[16,1024], index: 0, kind: input, shape index: {}]   ;;  %s1327_s4 = inlined_call_operand.<no memory space> [shape: f32[1], index: 4, kind: input, shape index: {}]   ;;  %s1328_s2 = inlined_call_operand.vmem [shape: bf16[8,144], index: 2, kind: input, shape index: {}]   ;;  %s1329_s5 = inlined_call_operand.vmem [shape: bf16[8,1024], index: 5, kind: output, shape index: {}]   ;;  %s1330_s3 = inlined_call_operand.vmem [shape: f32[8,1], index: 3, kind: input, shape index: {}]   ;;  %s1331_s1 = inlined_call_operand.vmem [shape: f32[1,768], index: 1, kind: input, shape index: {}]  }
   0x1   :  { %v23_v0 = vld [vmem:[%s1326_s0] sm:$0xff]  ;;  %v24_v2 = vld [vmem:[%s1326_s0 + $0x8] sm:$0xff]  ;;  %s976_s27 = smov 17   ;;  %s977_s28 = smov 1   ;;  %v25_v16 = vld [vmem:[%s1326_s0 + $0x10] sm:$0xff]  ;;  %971 = vset.pattern.permute.xlu0 %v982_v49  ;;  %856 = vst [vmem:[%s1329_s5] sm:$0xf] %v982_v49 }
   0x2   :  { %v27_v1 = vld [vmem:[%s1326_s0 + $0x20] sm:$0xff]  ;;  %v28_v5 = vld [vmem:[%s1326_s0 + $0x28] sm:$0xff]  ;;  %s978_s12 = smov 127   ;;  %s979_s13 = smov 111   ;;  %v29_v17 = vld [vmem:[%s1326_s0 + $0x30] sm:$0xff]  ;;  %vm214_vm3 = vcmask 138240  }
   0x3   :  { %v890_v3 = vcombine.high %v23_v0, %v27_v1  ;;  %v889_v4 = vcombine.low %v23_v0, %v27_v1  ;;  %v891_v6 = vcombine.low %v24_v2, %v28_v5  ;;  %v345_v7 = vld [vmem:[%s1326_s0 + $0x4] sm:$0xff]  ;;  %v1044_v9 = vld [vmem:[%s1326_s0 + $0xc] sm:$0xff]  ;;  %s980_s14 = smov 110   ;;  %s981_s17 = smov 109   ;;  %v892_v18 = vcombine.high %v24_v2, %v28_v5  ;;  %v26_v20 = vld [vmem:[%s1326_s0 + $0x18] sm:$0xf] }
   0x4   :  { %v349_v8 = vld [vmem:[%s1326_s0 + $0x24] sm:$0xff]  ;;  %v1049_v10 = vld [vmem:[%s1326_s0 + $0x2c] sm:$0xff]  ;;  %v893_v19 = vcombine.low %v25_v16, %v29_v17  ;;  %v30_v21 = vld [vmem:[%s1326_s0 + $0x38] sm:$0xf]  ;;  %v894_v22 = vcombine.high %v25_v16, %v29_v17  ;;  %884 = vst [vmem:[%s1329_s5 + $0x1c] sm:$0xf] %v982_v49 }
   0x5   :  { %62 = vrot.lane.b32.xlu0 %v890_v3, %s974_s25  ;;  %60 = vrot.lane.b32.xlu1 %v889_v4, %s974_s25  ;;  %v1053_v11 = vcombine.high %v345_v7, %v349_v8  ;;  %v1057_v12 = vcombine.low %v1044_v9, %v1049_v10  ;;  %v1063_v13 = vcombine.low %v345_v7, %v349_v8  ;;  %v1080_v14 = vld [vmem:[%s1328_s2] sm:$0xff]  ;;  %v96_v24 = vld [vmem:[%s1326_s0 + $0x18] sm:$0xf]  ;;  %vm284_vm4 = vcmask 7168  }
   0x6   :  { %v1084_v15 = vcombine.high %v1080_v14, %v1080_v14  ;;  %v895_v23 = vcombine.low %v26_v20, %v30_v21  ;;  %v100_v25 = vld [vmem:[%s1326_s0 + $0x38] sm:$0xf]  ;;  %v1152_v35 = vcombine.high %v1044_v9, %v1049_v10  ;;  %v348_v37 = vld [vmem:[%s1326_s0 + $0x1c] sm:$0xf]  ;;  %v680_v51 = vld [vmem:[%s1330_s3] sm:$0xff]  ;;  %vm396_vm5 = vcmask 1039360  }
   0x7   :  { %v902_v26 = vcombine.low %v96_v24, %v100_v25  ;;  %v166_v27 = vld [vmem:[%s1326_s0 + $0x18] sm:$0xf]  ;;  %v352_v38 = vld [vmem:[%s1326_s0 + $0x3c] sm:$0xf]  ;;  %vm466_vm6 = vcmask 908288   ;;  %vm536_vm7 = vcmask 900096  }
   0x8   :  { %953 = vmatprep.mubr.msk.bf16.mxu0 %vm692_vm0, %v1084_v15  ;;  %954 = vmatprep.mubr.msk.bf16.mxu1 %vm692_vm0, %v1084_v15  ;;  %v170_v28 = vld [vmem:[%s1326_s0 + $0x38] sm:$0xf]  ;;  %v929_v40 = vcombine.low %v348_v37, %v352_v38  ;;  %v418_v41 = vld [vmem:[%s1326_s0 + $0x1c] sm:$0xf]  ;;  %vm606_vm8 = vcmask 891904  }
   0x9   :  { %64 = vrot.lane.b32.xlu0 %v891_v6, %s974_s25  ;;  %132 = vrot.lane.b32.xlu1 %v890_v3, %s975_s26  ;;  %v909_v29 = vcombine.low %v166_v27, %v170_v28  ;;  %v236_v30 = vld [vmem:[%s1326_s0 + $0x18] sm:$0xf]  ;;  %v422_v42 = vld [vmem:[%s1326_s0 + $0x3c] sm:$0xf] }
   0xa   :  { %v240_v31 = vld [vmem:[%s1326_s0 + $0x38] sm:$0xf]  ;;  %v936_v43 = vcombine.low %v418_v41, %v422_v42  ;;  %v488_v44 = vld [vmem:[%s1326_s0 + $0x1c] sm:$0xf] }
   0xb   :  { %v916_v32 = vcombine.low %v236_v30, %v240_v31  ;;  %v347_v33 = vld [vmem:[%s1326_s0 + $0x14] sm:$0xff]  ;;  %v492_v45 = vld [vmem:[%s1326_s0 + $0x3c] sm:$0xf]  ;;  %v1263_v31 = vcombine.low %v1080_v14, %v1080_v14 }
   0xc   :  { %v351_v34 = vld [vmem:[%s1326_s0 + $0x34] sm:$0xff]  ;;  %v943_v46 = vcombine.low %v488_v44, %v492_v45  ;;  %v558_v47 = vld [vmem:[%s1326_s0 + $0x1c] sm:$0xf] }
   0xd   :  { %134 = vrot.lane.b32.xlu0 %v891_v6, %s975_s26  ;;  %130 = vrot.lane.b32.xlu1 %v889_v4, %s975_s26  ;;  %v1154_v36 = vcombine.low %v347_v33, %v351_v34  ;;  %v1166_v39 = vcombine.high %v347_v33, %v351_v34  ;;  %v562_v48 = vld [vmem:[%s1326_s0 + $0x3c] sm:$0xf] }
   0xe   :  { %v950_v50 = vcombine.low %v558_v47, %v562_v48 }
  0x11   :  { %202 = vrot.lane.b32.xlu0 %v890_v3, %s976_s27  ;;  %204 = vrot.lane.b32.xlu1 %v891_v6, %s976_s27 }
  0x15   :  { %200 = vrot.lane.b32.xlu0 %v889_v4, %s976_s27  ;;  %272 = vrot.lane.b32.xlu1 %v890_v3, %s977_s28 }
  0x19   :  { %274 = vrot.lane.b32.xlu0 %v891_v6, %s977_s28  ;;  %270 = vrot.lane.b32.xlu1 %v889_v4, %s977_s28 }
  0x1d   :  { %384 = vrot.lane.b32.xlu0 %v1053_v11, %s978_s12  ;;  %386 = vrot.lane.b32.xlu1 %v1057_v12, %s978_s12 }
  0x21   :  { %382 = vrot.lane.b32.xlu0 %v1063_v13, %s978_s12  ;;  %454 = vrot.lane.b32.xlu1 %v1053_v11, %s979_s13 }
  0x25   :  { %456 = vrot.lane.b32.xlu0 %v1057_v12, %s979_s13  ;;  %452 = vrot.lane.b32.xlu1 %v1063_v13, %s979_s13 }
  0x29   :  { %524 = vrot.lane.b32.xlu0 %v1053_v11, %s980_s14  ;;  %526 = vrot.lane.b32.xlu1 %v1057_v12, %s980_s14 }
  0x2d   :  { %522 = vrot.lane.b32.xlu0 %v1063_v13, %s980_s14  ;;  %594 = vrot.lane.b32.xlu1 %v1053_v11, %s981_s17 }
  0x31   :  { %596 = vrot.lane.b32.xlu0 %v1057_v12, %s981_s17  ;;  %592 = vrot.lane.b32.xlu1 %v1063_v13, %s981_s17 }
  0x35   :  { %66 = vrot.lane.b32.xlu0 %v892_v18, %s974_s25  ;;  %68 = vrot.lane.b32.xlu1 %v893_v19, %s974_s25 }
  0x39   :  { %70 = vrot.lane.b32.xlu0 %v894_v22, %s974_s25  ;;  %72 = vrot.lane.b32.xlu1 %v895_v23, %s974_s25 }
  0x3d   :  { %136 = vrot.lane.b32.xlu0 %v892_v18, %s975_s26  ;;  %138 = vrot.lane.b32.xlu1 %v893_v19, %s975_s26 }
  0x41   :  { %140 = vrot.lane.b32.xlu0 %v894_v22, %s975_s26  ;;  %142 = vrot.lane.b32.xlu1 %v902_v26, %s975_s26 }
  0x45   :  { %206 = vrot.lane.b32.xlu0 %v892_v18, %s976_s27  ;;  %208 = vrot.lane.b32.xlu1 %v893_v19, %s976_s27 }
  0x49   :  { %210 = vrot.lane.b32.xlu0 %v894_v22, %s976_s27  ;;  %212 = vrot.lane.b32.xlu1 %v909_v29, %s976_s27 }
  0x4d   :  { %276 = vrot.lane.b32.xlu0 %v892_v18, %s977_s28  ;;  %278 = vrot.lane.b32.xlu1 %v893_v19, %s977_s28 }
  0x51   :  { %280 = vrot.lane.b32.xlu0 %v894_v22, %s977_s28  ;;  %282 = vrot.lane.b32.xlu1 %v916_v32, %s977_s28 }
  0x55   :  { %388 = vrot.lane.b32.xlu0 %v1152_v35, %s978_s12  ;;  %390 = vrot.lane.b32.xlu1 %v1154_v36, %s978_s12 }
  0x59   :  { %392 = vrot.lane.b32.xlu0 %v1166_v39, %s978_s12  ;;  %394 = vrot.lane.b32.xlu1 %v929_v40, %s978_s12 }
  0x5d   :  { %458 = vrot.lane.b32.xlu0 %v1152_v35, %s979_s13  ;;  %460 = vrot.lane.b32.xlu1 %v1154_v36, %s979_s13 }
  0x61   :  { %462 = vrot.lane.b32.xlu0 %v1166_v39, %s979_s13  ;;  %464 = vrot.lane.b32.xlu1 %v936_v43, %s979_s13 }
  0x65   :  { %528 = vrot.lane.b32.xlu0 %v1152_v35, %s980_s14  ;;  %530 = vrot.lane.b32.xlu1 %v1154_v36, %s980_s14 }
  0x69   :  { %532 = vrot.lane.b32.xlu0 %v1166_v39, %s980_s14  ;;  %534 = vrot.lane.b32.xlu1 %v943_v46, %s980_s14 }
  0x6d   :  { %598 = vrot.lane.b32.xlu0 %v1152_v35, %s981_s17  ;;  %600 = vrot.lane.b32.xlu1 %v1154_v36, %s981_s17 }
  0x71   :  { %602 = vrot.lane.b32.xlu0 %v1166_v39, %s981_s17  ;;  %604 = vrot.lane.b32.xlu1 %v950_v50, %s981_s17 }
  0x75   :  { %683 = vperm.xlu0 %971, %v680_v51  }
  0x77   :  { %v63_v52 = vpop.permute.xlu0 %62  ;;  %v61_v53 = vpop.permute.xlu1 %60 }
  0x78   :  { %v75_v57 = vsel %vm74_vm1, %v61_v53, %v63_v52 }
  0x7b   :  { %v1219_v54 = vpop.permute.xlu0 %64  ;;  %v133_v55 = vpop.permute.xlu1 %132 }
  0x7c   :  { %v76_v56 = vsel %vm74_vm1, %v63_v52, %v1219_v54 }
  0x7d   :  { %696 = vmatprep.subr.bf16.mxu0 %v76_v56 }
  0x7e   :  { %697 = vmatpush1.bf16.msra.mxu0 %v75_v57 }
  0x7f   :  { %v1224_v58 = vpop.permute.xlu0 %134  ;;  %v131_v59 = vpop.permute.xlu1 %130 }
  0x80   :  { %v146_v60 = vsel %vm144_vm2, %v133_v55, %v1224_v58  ;;  %v145_v61 = vsel %vm144_vm2, %v131_v59, %v133_v55 }
  0x81   :  { %698 = vmatprep.subr.bf16.mxu0 %v146_v60 }
  0x82   :  { %699 = vmatpush1.bf16.msra.mxu0 %v145_v61 }
  0x83   :  { %v203_v62 = vpop.permute.xlu0 %202  ;;  %v1229_v63 = vpop.permute.xlu1 %204 }
  0x84   :  { %v216_v0 = vsel %vm214_vm3, %v203_v62, %v1229_v63 }
  0x85   :  { %700 = vmatprep.subr.bf16.mxu0 %v216_v0 }
  0x87   :  { %v201_v1 = vpop.permute.xlu0 %200  ;;  %v273_v2 = vpop.permute.xlu1 %272 }
  0x88   :  { %v215_v3 = vsel %vm214_vm3, %v201_v1, %v203_v62 }
  0x89   :  { %701 = vmatpush1.bf16.msra.mxu0 %v215_v3 }
  0x8b   :  { %v1234_v4 = vpop.permute.xlu0 %274  ;;  %v271_v5 = vpop.permute.xlu1 %270 }
  0x8c   :  { %v286_v6 = vsel %vm284_vm4, %v273_v2, %v1234_v4  ;;  %v285_v7 = vsel %vm284_vm4, %v271_v5, %v273_v2 }
  0x8d   :  { %702 = vmatprep.subr.bf16.mxu0 %v286_v6 }
  0x8e   :  { %703 = vmatpush1.bf16.msra.mxu0 %v285_v7 }
  0x8f   :  { %v385_v8 = vpop.permute.xlu0 %384  ;;  %v1239_v9 = vpop.permute.xlu1 %386  ;;  %704 = vmatprep.subr.bf16.mxu0 %v1053_v11 }
  0x90   :  { %v398_v10 = vsel %vm396_vm5, %v385_v8, %v1239_v9 }
  0x92   :  { %705 = vmatpush1.bf16.msra.mxu0 %v1063_v13 }
  0x93   :  { %v383_v16 = vpop.permute.xlu0 %382  ;;  %706 = vmatprep.subr.bf16.mxu0 %v398_v10  ;;  %v455_v17 = vpop.permute.xlu1 %454 }
  0x94   :  { %v397_v18 = vsel %vm396_vm5, %v383_v16, %v385_v8 }
  0x96   :  { %707 = vmatpush1.bf16.msra.mxu0 %v397_v18 }
  0x97   :  { %v1246_v19 = vpop.permute.xlu0 %456  ;;  %v453_v20 = vpop.permute.xlu1 %452 }
  0x98   :  { %v468_v21 = vsel %vm466_vm6, %v455_v17, %v1246_v19  ;;  %v467_v11 = vsel %vm466_vm6, %v453_v20, %v455_v17 }
  0x99   :  { %708 = vmatprep.subr.bf16.mxu0 %v468_v21 }
  0x9a   :  { %709 = vmatpush1.bf16.msra.mxu0 %v467_v11 }
  0x9b   :  { %v525_v13 = vpop.permute.xlu0 %524  ;;  %v1251_v22 = vpop.permute.xlu1 %526 }
  0x9c   :  { %v538_v23 = vsel %vm536_vm7, %v525_v13, %v1251_v22 }
  0x9d   :  { %710 = vmatprep.subr.bf16.mxu0 %v538_v23 }
  0x9f   :  { %v523_v24 = vpop.permute.xlu0 %522  ;;  %v595_v25 = vpop.permute.xlu1 %594 }
  0xa0   :  { %v537_v26 = vsel %vm536_vm7, %v523_v24, %v525_v13 }
  0xa1   :  { %711 = vmatpush1.bf16.msra.mxu0 %v537_v26 }
  0xa3   :  { %v1256_v27 = vpop.permute.xlu0 %596  ;;  %v593_v28 = vpop.permute.xlu1 %592 }
  0xa4   :  { %v608_v29 = vsel %vm606_vm8, %v595_v25, %v1256_v27  ;;  %v607_v30 = vsel %vm606_vm8, %v593_v28, %v595_v25 }
  0xa5   :  { %712 = vmatprep.subr.bf16.mxu0 %v608_v29 }
  0xa6   :  { %713 = vmatpush1.bf16.msra.mxu0 %v607_v30 }
  0xa7   :  { %v67_v32 = vpop.permute.xlu0 %66  ;;  %v69_v33 = vpop.permute.xlu1 %68 }
  0xa8   :  { %v78_v34 = vsel %vm74_vm1, %v67_v32, %v69_v33  ;;  %v77_v37 = vsel %vm74_vm1, %v1219_v54, %v67_v32 }
  0xa9   :  { %737 = vmatprep.subr.bf16.mxu1 %v78_v34  ;;  %729 = vmatmul.mubr.bf16.vlgmr.msra.gmra.mrb[0].mxu0 %v1263_v31  ;;  %v820_v34 = vlaneseq }
  0xaa   :  { %738 = vmatpush1.bf16.msra.mxu1 %v77_v37  ;;  %955 = vmatprep.mubr.msk.bf16.mxu0 %vm692_vm0, %v1084_v15 }
  0xab   :  { %v71_v38 = vpop.permute.xlu0 %70  ;;  %v73_v40 = vpop.permute.xlu1 %72  ;;  %v821_v37 = vshrl.u32 %v820_v34, 7 }
  0xac   :  { %v79_v14 = vsel %vm74_vm1, %v69_v33, %v71_v38  ;;  %v80_v41 = vsel %vm74_vm1, %v71_v38, %v73_v40 }
  0xad   :  { %778 = vmatprep.subr.bf16.mxu0 %v80_v41  ;;  %v838_v38 = vsub.s32 4, %v821_v37  ;;  %v842_v40 = vsub.s32 5, %v821_v37 }
  0xae   :  { %779 = vmatpush1.bf16.msra.mxu0 %v79_v14 }
  0xaf   :  { %v137_v42 = vpop.permute.xlu0 %136  ;;  %v139_v43 = vpop.permute.xlu1 %138 }
  0xb0   :  { %v148_v44 = vsel %vm144_vm2, %v137_v42, %v139_v43  ;;  %v147_v45 = vsel %vm144_vm2, %v1224_v58, %v137_v42  ;;  %v822_v42 = vsub.s32 0, %v821_v37 }
  0xb1   :  { %739 = vmatprep.subr.bf16.mxu1 %v148_v44 }
  0xb2   :  { %740 = vmatpush1.bf16.msra.mxu1 %v147_v45 }
  0xb3   :  { %v141_v46 = vpop.permute.xlu0 %140  ;;  %v143_v47 = vpop.permute.xlu1 %142 }
  0xb4   :  { %v149_v15 = vsel %vm144_vm2, %v139_v43, %v141_v46  ;;  %v150_v48 = vsel %vm144_vm2, %v141_v46, %v143_v47  ;;  %v826_v43 = vsub.s32 1, %v821_v37 }
  0xb5   :  { %780 = vmatprep.subr.bf16.mxu0 %v150_v48 }
  0xb6   :  { %781 = vmatpush1.bf16.msra.mxu0 %v149_v15 }
  0xb7   :  { %v207_v49 = vpop.permute.xlu0 %206  ;;  %v209_v50 = vpop.permute.xlu1 %208 }
  0xb8   :  { %v218_v51 = vsel %vm214_vm3, %v207_v49, %v209_v50  ;;  %v217_v52 = vsel %vm214_vm3, %v1229_v63, %v207_v49 }
  0xb9   :  { %741 = vmatprep.subr.bf16.mxu1 %v218_v51 }
  0xba   :  { %742 = vmatpush1.bf16.msra.mxu1 %v217_v52 }
  0xbb   :  { %v211_v53 = vpop.permute.xlu0 %210  ;;  %v213_v54 = vpop.permute.xlu1 %212 }
  0xbc   :  { %v219_v55 = vsel %vm214_vm3, %v209_v50, %v211_v53  ;;  %v220_v56 = vsel %vm214_vm3, %v211_v53, %v213_v54  ;;  %v830_v54 = vsub.s32 2, %v821_v37 }
  0xbd   :  { %782 = vmatprep.subr.bf16.mxu0 %v220_v56 }
  0xbe   :  { %783 = vmatpush1.bf16.msra.mxu0 %v219_v55  ;;  %v834_v55 = vsub.s32 3, %v821_v37 }
  0xbf   :  { %v277_v57 = vpop.permute.xlu0 %276  ;;  %v279_v58 = vpop.permute.xlu1 %278 }
  0xc0   :  { %v288_v59 = vsel %vm284_vm4, %v277_v57, %v279_v58  ;;  %v287_v60 = vsel %vm284_vm4, %v1234_v4, %v277_v57 }
  0xc1   :  { %743 = vmatprep.subr.bf16.mxu1 %v288_v59 }
  0xc2   :  { %744 = vmatpush1.bf16.msra.mxu1 %v287_v60 }
  0xc3   :  { %v281_v61 = vpop.permute.xlu0 %280  ;;  %v283_v62 = vpop.permute.xlu1 %282  ;;  %745 = vmatprep.subr.bf16.mxu1 %v1152_v35 }
  0xc4   :  { %v289_v63 = vsel %vm284_vm4, %v279_v58, %v281_v61  ;;  %v290_v0 = vsel %vm284_vm4, %v281_v61, %v283_v62 }
  0xc5   :  { %784 = vmatprep.subr.bf16.mxu0 %v290_v0 }
  0xc6   :  { %746 = vmatpush1.bf16.msra.mxu1 %v1057_v12  ;;  %785 = vmatpush1.bf16.msra.mxu0 %v289_v63 }
  0xc7   :  { %v389_v1 = vpop.permute.xlu0 %388  ;;  %v391_v2 = vpop.permute.xlu1 %390  ;;  %786 = vmatprep.subr.bf16.mxu0 %v1166_v39 }
  0xc8   :  { %v400_v3 = vsel %vm396_vm5, %v389_v1, %v391_v2  ;;  %v399_v4 = vsel %vm396_vm5, %v1239_v9, %v389_v1 }
  0xc9   :  { %747 = vmatprep.subr.bf16.mxu1 %v400_v3 }
  0xca   :  { %748 = vmatpush1.bf16.msra.mxu1 %v399_v4  ;;  %787 = vmatpush1.bf16.msra.mxu0 %v1154_v36 }
  0xcb   :  { %v393_v35 = vpop.permute.xlu0 %392  ;;  %v395_v5 = vpop.permute.xlu1 %394 }
  0xcc   :  { %v401_v6 = vsel %vm396_vm5, %v391_v2, %v393_v35  ;;  %v402_v12 = vsel %vm396_vm5, %v393_v35, %v395_v5 }
  0xcd   :  { %788 = vmatprep.subr.bf16.mxu0 %v402_v12 }
  0xce   :  { %789 = vmatpush1.bf16.msra.mxu0 %v401_v6 }
  0xcf   :  { %v459_v7 = vpop.permute.xlu0 %458  ;;  %v461_v8 = vpop.permute.xlu1 %460 }
  0xd0   :  { %v470_v39 = vsel %vm466_vm6, %v459_v7, %v461_v8  ;;  %v469_v10 = vsel %vm466_vm6, %v1246_v19, %v459_v7 }
  0xd1   :  { %749 = vmatprep.subr.bf16.mxu1 %v470_v39 }
  0xd2   :  { %750 = vmatpush1.bf16.msra.mxu1 %v469_v10 }
  0xd3   :  { %v463_v9 = vpop.permute.xlu0 %462  ;;  %v465_v16 = vpop.permute.xlu1 %464 }
  0xd4   :  { %v471_v36 = vsel %vm466_vm6, %v461_v8, %v463_v9  ;;  %v472_v17 = vsel %vm466_vm6, %v463_v9, %v465_v16 }
  0xd5   :  { %790 = vmatprep.subr.bf16.mxu0 %v472_v17 }
  0xd6   :  { %791 = vmatpush1.bf16.msra.mxu0 %v471_v36 }
  0xd7   :  { %v529_v18 = vpop.permute.xlu0 %528  ;;  %v531_v20 = vpop.permute.xlu1 %530 }
  0xd8   :  { %v540_v21 = vsel %vm536_vm7, %v529_v18, %v531_v20  ;;  %v539_v11 = vsel %vm536_vm7, %v1251_v22, %v529_v18 }
  0xd9   :  { %751 = vmatprep.subr.bf16.mxu1 %v540_v21 }
  0xda   :  { %752 = vmatpush1.bf16.msra.mxu1 %v539_v11 }
  0xdb   :  { %v533_v19 = vpop.permute.xlu0 %532  ;;  %v535_v13 = vpop.permute.xlu1 %534 }
  0xdc   :  { %v541_v23 = vsel %vm536_vm7, %v531_v20, %v533_v19  ;;  %v542_v24 = vsel %vm536_vm7, %v533_v19, %v535_v13 }
  0xdd   :  { %792 = vmatprep.subr.bf16.mxu0 %v542_v24 }
  0xde   :  { %793 = vmatpush1.bf16.msra.mxu0 %v541_v23 }
  0xdf   :  { %v599_v25 = vpop.permute.xlu0 %598  ;;  %v601_v26 = vpop.permute.xlu1 %600 }
  0xe0   :  { %v610_v28 = vsel %vm606_vm8, %v599_v25, %v601_v26  ;;  %v609_v29 = vsel %vm606_vm8, %v1256_v27, %v599_v25  ;;  %v22_v27 = vld [vmem:[%s1331_s1] sm:$0x3f] }
  0xe1   :  { %753 = vmatprep.subr.bf16.mxu1 %v610_v28  ;;  %v839_v14 = vrot.slane %v22_v27, %v838_v38  ;;  %v843_v41 = vrot.slane %v22_v27, %v842_v40  ;;  %v823_v45 = vrot.slane %v22_v27, %v822_v42  ;;  %v827_v47 = vrot.slane %v22_v27, %v826_v43 }
  0xe2   :  { %754 = vmatpush1.bf16.msra.mxu1 %v609_v29  ;;  %v831_v56 = vrot.slane %v22_v27, %v830_v54  ;;  %v835_v58 = vrot.slane %v22_v27, %v834_v55 }
  0xe3   :  { %v603_v22 = vpop.permute.xlu0 %602  ;;  %v605_v30 = vpop.permute.xlu1 %604 }
  0xe4   :  { %v611_v32 = vsel %vm606_vm8, %v601_v26, %v603_v22  ;;  %v612_v33 = vsel %vm606_vm8, %v603_v22, %v605_v30 }
  0xe5   :  { %794 = vmatprep.subr.bf16.mxu0 %v612_v33  ;;  %770 = vmatmul.mubr.bf16.vlgmr.msra.gmra.mrb[0].mxu1 %v1263_v31 }
  0xe6   :  { %795 = vmatpush1.bf16.msra.mxu0 %v611_v32 }
  0xe9   :  { %811 = vmatmul.mubr.bf16.vlgmr.msra.gmra.mrb[4].mxu0 %v1263_v31 }
  0xf4   :  { %v684_v44 = vpop.permute.xlu0 %683 }
 0x17c   :  { %v730_v46 = vpop.f32.mrb[0].mxu0 }
 0x17d   :  { %v732_v15 = vpop.f32.mrb[1].mxu0  ;;  %v731_v48 = vadd.f32 %v730_v46, %v684_v44 }
 0x17e   :  { %v734_v49 = vpop.f32.mrb[2].mxu0  ;;  %v733_v31 = vadd.f32 %v732_v15, %v684_v44 }
 0x17f   :  { %v850_v50 = vmul.f32 %v823_v45, %v731_v48  ;;  %v735_v51 = vpop.f32.mrb[3].mxu0 }
 0x180   :  { %v851_v52 = vmul.f32 %v827_v47, %v733_v31 }
 0x182   :  { %v959_v53 = vpack.c.bf16 %v851_v52, %v850_v50 }
 0x184   :  { %881 = vst [vmem:[%s1329_s5 + $0x4] sm:$0xff] %v959_v53 }
 0x1b8   :  { %v771_v57 = vpop.f32.mrb[0].mxu1 }
 0x1b9   :  { %v772_v59 = vadd.f32 %v771_v57, %v684_v44  ;;  %v773_v60 = vpop.f32.mrb[1].mxu1 }
 0x1ba   :  { %v774_v61 = vadd.f32 %v773_v60, %v684_v44  ;;  %v775_v62 = vpop.f32.mrb[2].mxu1 }
 0x1bb   :  { %v852_v63 = vmul.f32 %v831_v56, %v772_v59  ;;  %v776_v0 = vpop.f32.mrb[3].mxu1 }
 0x1bc   :  { %v853_v1 = vmul.f32 %v835_v58, %v774_v61  ;;  %v812_v2 = vpop.f32.mrb[4].mxu0 }
 0x1bd   :  { %v813_v3 = vadd.f32 %v812_v2, %v684_v44  ;;  %v814_v4 = vpop.f32.mrb[5].mxu0 }
 0x1be   :  { %v960_v35 = vpack.c.bf16 %v853_v1, %v852_v63  ;;  %v815_v5 = vadd.f32 %v814_v4, %v684_v44  ;;  %v816_v6 = vpop.f32.mrb[6].mxu0 }
 0x1bf   :  { %v854_v12 = vmul.f32 %v839_v14, %v813_v3  ;;  %v817_v7 = vpop.f32.mrb[7].mxu0 }
 0x1c0   :  { %882 = vst [vmem:[%s1329_s5 + $0xc] sm:$0xff] %v960_v35  ;;  %v855_v8 = vmul.f32 %v843_v41, %v815_v5 }
 0x1c2   :  { %v961_v39 = vpack.c.bf16 %v855_v8, %v854_v12 }
 0x1c4   :  { %883 = vst [vmem:[%s1329_s5 + $0x14] sm:$0xff] %v961_v39 }

// kernel: rbpn_forward.31
= control target key start
LH: loop header
LB: loop body
LE: loop exit
PB: predicated region body
PF: predicated region fallthrough
CT: control target
= control target key end

     0   :  { %s627_s24 = smov 11   ;;  %s628_s6 = smov 10   ;;  %v635_v56 = vmov 0   ;;  %vm38_vm0 = vcmask 1043456   ;;  %vm40_vm1 = vcmask 89088   ;;  %vm79_vm2 = vcmask 80896   ;;  %s808_s0 = inlined_call_operand.vmem [shape: bf16[6,768], index: 0, kind: input, shape index: {}]   ;;  %s809_s5 = inlined_call_operand.vmem [shape: bf16[8,768], index: 5, kind: output, shape index: {}]   ;;  %s810_s3 = inlined_call_operand.vmem [shape: f32[8,1], index: 3, kind: input, shape index: {}]   ;;  %s811_s2 = inlined_call_operand.vmem [shape: bf16[8,54], index: 2, kind: input, shape index: {}]   ;;  %s812_s1 = inlined_call_operand.vmem [shape: f32[1,512], index: 1, kind: input, shape index: {}]   ;;  %s813_s4 = inlined_call_operand.<no memory space> [shape: f32[1], index: 4, kind: input, shape index: {}]  }
   0x1   :  { %v25_v0 = vld [vmem:[%s808_s0 + $0x10] sm:$0x7]  ;;  %v23_v1 = vld [vmem:[%s808_s0] sm:$0x77]  ;;  %v24_v4 = vld [vmem:[%s808_s0 + $0x8] sm:$0x77]  ;;  %458 = vmatprep.mubr.bf16.mxu0 %v635_v56  ;;  %499 = vmatprep.mubr.bf16.mxu1 %v635_v56 }
   0x2   :  { %v48_v2 = vld [vmem:[%s808_s0] sm:$0x77]  ;;  %33 = vrot.lane.b32.xlu1 %v25_v0, %s627_s24  ;;  %29 = vrot.lane.b32.xlu0 %v23_v1, %s627_s24  ;;  %v50_v5 = vld [vmem:[%s808_s0 + $0x10] sm:$0x7]  ;;  %s629_s13 = smov 9   ;;  %s630_s20 = smov 1  }
   0x3   :  { %v54_v3 = vrot.slane %v48_v2, 5  ;;  %v49_v6 = vld [vmem:[%s808_s0 + $0x8] sm:$0x77]  ;;  %v56_v7 = vrot.slane %v50_v5, 5  ;;  %v95_v11 = vld [vmem:[%s808_s0] sm:$0x77]  ;;  %604 = vset.pattern.permute.xlu0 %v635_v56 }
   0x4   :  { %v55_v8 = vrot.slane %v49_v6, 5  ;;  %v101_v12 = vrot.slane %v95_v11, 6  ;;  %v97_v14 = vld [vmem:[%s808_s0 + $0x10] sm:$0x7]  ;;  %v96_v15 = vld [vmem:[%s808_s0 + $0x8] sm:$0x77] }
   0x5   :  { %v57_v10 = vrot.slane %v54_v3, 4  ;;  %v59_v13 = vrot.slane %v56_v7, 4  ;;  %v103_v16 = vrot.slane %v97_v14, 6  ;;  %v102_v17 = vrot.slane %v96_v15, 6  ;;  %v142_v20 = vld [vmem:[%s808_s0] sm:$0x77] }
   0x6   :  { %60 = vrot.lane.b32.xlu1 %v54_v3, %s628_s6  ;;  %31 = vrot.lane.b32.xlu0 %v24_v4, %s627_s24  ;;  %v58_v9 = vrot.slane %v55_v8, 4  ;;  %v104_v19 = vrot.slane %v101_v12, 4  ;;  %v148_v21 = vrot.slane %v142_v20, 7  ;;  %v144_v23 = vld [vmem:[%s808_s0 + $0x10] sm:$0x7]  ;;  %s634_s23 = smov 117  }
   0x7   :  { %v105_v18 = vrot.slane %v102_v17, 4  ;;  %v106_v22 = vrot.slane %v103_v16, 4  ;;  %v143_v24 = vld [vmem:[%s808_s0 + $0x8] sm:$0x77]  ;;  %v150_v25 = vrot.slane %v144_v23, 7  ;;  %547 = vst [vmem:[%s809_s5] sm:$0xf] %v635_v56 }
   0x8   :  { %v149_v26 = vrot.slane %v143_v24, 7  ;;  %v169_v27 = vld [vmem:[%s808_s0 + $0x4] sm:$0x77]  ;;  %v174_v28 = vld [vmem:[%s808_s0 + $0xc] sm:$0x77]  ;;  %vm126_vm3 = vcmask 72704  }
   0x9   :  { %v173_v29 = vld [vmem:[%s808_s0 + $0x4] sm:$0x77]  ;;  %171 = vst [vmem:[#allocation2 + $0x30] sm:$0x77] %v169_v27  ;;  %v180_v30 = vrot.slane %v174_v28, 5  ;;  %vm161_vm4 = vcmask 7168  }
   0xa   :  { %64 = vrot.lane.b32.xlu1 %v56_v7, %s628_s6  ;;  %62 = vrot.lane.b32.xlu0 %v55_v8, %s628_s6  ;;  %v179_v31 = vrot.slane %v173_v29, 5  ;;  %v170_v32 = vld [vmem:[%s808_s0 + $0xc] sm:$0x77]  ;;  %v175_v33 = vld [vmem:[%s808_s0 + $0x14] sm:$0x7]  ;;  %vm204_vm5 = vcmask 1039360  }
   0xb   :  { %172 = vst [vmem:[#allocation2 + $0x38] sm:$0x77] %v170_v32  ;;  %v181_v35 = vrot.slane %v175_v33, 5  ;;  %v183_v37 = vrot.slane %v180_v30, 4  ;;  %v221_v38 = vld [vmem:[%s808_s0 + $0xc] sm:$0x77] }
   0xc   :  { %v182_v34 = vrot.slane %v179_v31, 4  ;;  %v220_v39 = vld [vmem:[%s808_s0 + $0x4] sm:$0x77]  ;;  %v227_v40 = vrot.slane %v221_v38, 6  ;;  %v222_v42 = vld [vmem:[%s808_s0 + $0x14] sm:$0x7] }
   0xd   :  { %v184_v36 = vrot.slane %v181_v35, 4  ;;  %v226_v41 = vrot.slane %v220_v39, 6  ;;  %v228_v44 = vrot.slane %v222_v42, 6  ;;  %v268_v47 = vld [vmem:[%s808_s0 + $0xc] sm:$0x77]  ;;  %v333_v57 = vld [vmem:[%s810_s3] sm:$0xff] }
   0xe   :  { %68 = vrot.lane.b32.xlu1 %v58_v9, %s628_s6  ;;  %66 = vrot.lane.b32.xlu0 %v57_v10, %s628_s6  ;;  %v230_v46 = vrot.slane %v227_v40, 4  ;;  %v267_v48 = vld [vmem:[%s808_s0 + $0x4] sm:$0x77]  ;;  %v274_v49 = vrot.slane %v268_v47, 7  ;;  %v269_v51 = vld [vmem:[%s808_s0 + $0x14] sm:$0x7] }
   0xf   :  { %v229_v43 = vrot.slane %v226_v41, 4  ;;  %v231_v45 = vrot.slane %v228_v44, 4  ;;  %v273_v50 = vrot.slane %v267_v48, 7  ;;  %v275_v52 = vrot.slane %v269_v51, 7  ;;  %v294_v53 = vld [vmem:[%s808_s0 + $0x4] sm:$0x77] }
  0x10   :  { %v296_v54 = vld [vmem:[%s808_s0 + $0x14] sm:$0x7]  ;;  %v295_v55 = vld [vmem:[%s808_s0 + $0xc] sm:$0x77]  ;;  %566 = vst [vmem:[%s809_s5 + $0x14] sm:$0xf] %v635_v56 }
  0x11   :  { %vm251_vm6 = vcmask 973824   ;;  %vm286_vm7 = vcmask 965632   ;;  %vm310_vm8 = vcmask 957440   ;;  %vm413_vm9 = vcmask 1042432  }
  0x12   :  { %107 = vrot.lane.b32.xlu1 %v101_v12, %s629_s13  ;;  %70 = vrot.lane.b32.xlu0 %v59_v13, %s628_s6  ;;  %s631_s6 = smov 127   ;;  %vm409_vm10 = vcmask 441344  }
  0x16   :  { %111 = vrot.lane.b32.xlu1 %v103_v16, %s629_s13  ;;  %109 = vrot.lane.b32.xlu0 %v102_v17, %s629_s13 }
  0x1a   :  { %115 = vrot.lane.b32.xlu1 %v105_v18, %s629_s13  ;;  %113 = vrot.lane.b32.xlu0 %v104_v19, %s629_s13 }
  0x1e   :  { %151 = vrot.lane.b32.xlu1 %v148_v21, %s630_s20  ;;  %117 = vrot.lane.b32.xlu0 %v106_v22, %s629_s13  ;;  %s632_s13 = smov 119  }
  0x22   :  { %155 = vrot.lane.b32.xlu1 %v150_v25, %s630_s20  ;;  %153 = vrot.lane.b32.xlu0 %v149_v26, %s630_s20  ;;  %s633_s20 = smov 118  }
  0x26   :  { %187 = vrot.lane.b32.xlu1 %v180_v30, %s631_s6  ;;  %185 = vrot.lane.b32.xlu0 %v179_v31, %s631_s6 }
  0x2a   :  { %191 = vrot.lane.b32.xlu1 %v182_v34, %s631_s6  ;;  %189 = vrot.lane.b32.xlu0 %v181_v35, %s631_s6 }
  0x2e   :  { %195 = vrot.lane.b32.xlu1 %v184_v36, %s631_s6  ;;  %193 = vrot.lane.b32.xlu0 %v183_v37, %s631_s6 }
  0x32   :  { %234 = vrot.lane.b32.xlu1 %v227_v40, %s632_s13  ;;  %232 = vrot.lane.b32.xlu0 %v226_v41, %s632_s13 }
  0x36   :  { %238 = vrot.lane.b32.xlu1 %v229_v43, %s632_s13  ;;  %236 = vrot.lane.b32.xlu0 %v228_v44, %s632_s13 }
  0x3a   :  { %242 = vrot.lane.b32.xlu1 %v231_v45, %s632_s13  ;;  %240 = vrot.lane.b32.xlu0 %v230_v46, %s632_s13 }
  0x3e   :  { %278 = vrot.lane.b32.xlu1 %v274_v49, %s633_s20  ;;  %276 = vrot.lane.b32.xlu0 %v273_v50, %s633_s20 }
  0x42   :  { %300 = vrot.lane.b32.xlu1 %v294_v53, %s634_s23  ;;  %280 = vrot.lane.b32.xlu0 %v275_v52, %s633_s20 }
  0x46   :  { %304 = vrot.lane.b32.xlu1 %v296_v54, %s634_s23  ;;  %302 = vrot.lane.b32.xlu0 %v295_v55, %s634_s23 }
  0x4a   :  { %336 = vperm.xlu0 %604, %v333_v57  }
  0x74   :  { %v34_v58 = vpop.permute.xlu1 %33  ;;  %v30_v59 = vpop.permute.xlu0 %29 }
  0x75   :  { %v37_v62 = vrot.slane %v34_v58, 4  ;;  %v35_v63 = vrot.slane %v30_v59, 4 }
  0x78   :  { %v61_v60 = vpop.permute.xlu1 %60  ;;  %v32_v61 = vpop.permute.xlu0 %31 }
  0x79   :  { %v36_v0 = vrot.slane %v32_v61, 4  ;;  %v72_v7 = vrot.slane %v61_v60, 4 }
  0x7b   :  { %v39_v1 = vsel %vm38_vm0, %v35_v63, %v36_v0  ;;  %v42_v2 = vsel %vm38_vm0, %v36_v0, %v37_v62 }
  0x7c   :  { %v41_v3 = vsel %vm40_vm1, %v30_v59, %v39_v1  ;;  %v43_v4 = vsel %vm40_vm1, %v32_v61, %v42_v2  ;;  %v65_v5 = vpop.permute.xlu1 %64  ;;  %v63_v6 = vpop.permute.xlu0 %62 }
  0x7d   :  { %46 = vst [vmem:[#allocation2] sm:$0x77] %v41_v3  ;;  %47 = vst [vmem:[#allocation2 + $0x8] sm:$0x77] %v43_v4  ;;  %v74_v8 = vrot.slane %v65_v5, 4  ;;  %v73_v9 = vrot.slane %v63_v6, 4 }
  0x7f   :  { %v78_v10 = vsel %vm38_vm0, %v72_v7, %v73_v9  ;;  %v81_v11 = vsel %vm38_vm0, %v73_v9, %v74_v8 }
  0x80   :  { %v80_v12 = vsel %vm79_vm2, %v61_v60, %v78_v10  ;;  %v82_v13 = vsel %vm79_vm2, %v63_v6, %v81_v11  ;;  %v69_v14 = vpop.permute.xlu1 %68  ;;  %v67_v15 = vpop.permute.xlu0 %66 }
  0x81   :  { %91 = vst [vmem:[#allocation2] sm:$0x88] %v80_v12  ;;  %92 = vst [vmem:[#allocation2 + $0x8] sm:$0x88] %v82_v13  ;;  %v76_v16 = vrot.slane %v69_v14, 4  ;;  %v75_v17 = vrot.slane %v67_v15, 4 }
  0x83   :  { %v83_v18 = vsel %vm38_vm0, %v75_v17, %v76_v16 }
  0x84   :  { %v84_v19 = vsel %vm79_vm2, %v67_v15, %v83_v18  ;;  %v108_v20 = vpop.permute.xlu1 %107  ;;  %v71_v21 = vpop.permute.xlu0 %70 }
  0x85   :  { %93 = vst [vmem:[#allocation2 + $0x10] sm:$0x33] %v84_v19  ;;  %v77_v22 = vrot.slane %v71_v21, 4  ;;  %v119_v27 = vrot.slane %v108_v20, 4 }
  0x87   :  { %v85_v23 = vsel %vm38_vm0, %v76_v16, %v77_v22 }
  0x88   :  { %v86_v24 = vsel %vm79_vm2, %v69_v14, %v85_v23  ;;  %v112_v25 = vpop.permute.xlu1 %111  ;;  %v110_v26 = vpop.permute.xlu0 %109 }
  0x89   :  { %94 = vst [vmem:[#allocation2 + $0x18] sm:$0x33] %v86_v24  ;;  %v121_v28 = vrot.slane %v112_v25, 4  ;;  %v120_v29 = vrot.slane %v110_v26, 4 }
  0x8b   :  { %v125_v30 = vsel %vm38_vm0, %v119_v27, %v120_v29  ;;  %v128_v31 = vsel %vm38_vm0, %v120_v29, %v121_v28 }
  0x8c   :  { %v127_v32 = vsel %vm126_vm3, %v108_v20, %v125_v30  ;;  %v129_v33 = vsel %vm126_vm3, %v110_v26, %v128_v31  ;;  %v116_v34 = vpop.permute.xlu1 %115  ;;  %v114_v35 = vpop.permute.xlu0 %113 }
  0x8d   :  { %138 = vst [vmem:[#allocation2 + $0x10] sm:$0xcc] %v127_v32  ;;  %139 = vst [vmem:[#allocation2 + $0x18] sm:$0xcc] %v129_v33  ;;  %v123_v36 = vrot.slane %v116_v34, 4  ;;  %v122_v37 = vrot.slane %v114_v35, 4 }
  0x8f   :  { %v130_v38 = vsel %vm38_vm0, %v122_v37, %v123_v36 }
  0x90   :  { %v131_v39 = vsel %vm126_vm3, %v114_v35, %v130_v38  ;;  %v152_v40 = vpop.permute.xlu1 %151  ;;  %v118_v41 = vpop.permute.xlu0 %117 }
  0x91   :  { %140 = vst [vmem:[#allocation2 + $0x20] sm:$0x11] %v131_v39  ;;  %v124_v42 = vrot.slane %v118_v41, 4  ;;  %v157_v44 = vrot.slane %v152_v40, 4 }
  0x93   :  { %v132_v43 = vsel %vm38_vm0, %v123_v36, %v124_v42 }
  0x94   :  { %v133_v45 = vsel %vm126_vm3, %v116_v34, %v132_v43  ;;  %v156_v46 = vpop.permute.xlu1 %155  ;;  %v154_v47 = vpop.permute.xlu0 %153  ;;  %v605_v48 = vld [vmem:[#allocation2 + $0x4] ss:$16 sps:$4 sm:$0xff]   ;;  %v607_v51 = vld [vmem:[#allocation2 + $0xc] ss:$16 sps:$4 sm:$0xff]   ;;  %v609_v52 = vld [vmem:[#allocation2] ss:$16 sps:$4 sm:$0xff]  }
  0x95   :  { %141 = vst [vmem:[#allocation2 + $0x28] sm:$0x11] %v133_v45  ;;  %v159_v49 = vrot.slane %v156_v46, 4  ;;  %v158_v50 = vrot.slane %v154_v47, 4  ;;  %426 = vmatprep.subr.bf16.mxu0 %v605_v48  ;;  %v610_v53 = vld [vmem:[#allocation2 + $0x8] ss:$16 sps:$4 sm:$0xff]   ;;  %467 = vmatprep.subr.bf16.mxu1 %v607_v51 }
  0x96   :  { %427 = vmatpush1.bf16.msra.mxu0 %v609_v52  ;;  %468 = vmatpush1.bf16.msra.mxu1 %v610_v53 }
  0x97   :  { %v160_v54 = vsel %vm38_vm0, %v157_v44, %v158_v50  ;;  %v163_v55 = vsel %vm38_vm0, %v158_v50, %v159_v49 }
  0x98   :  { %v162_v56 = vsel %vm161_vm4, %v152_v40, %v160_v54  ;;  %v164_v57 = vsel %vm161_vm4, %v154_v47, %v163_v55  ;;  %v188_v58 = vpop.permute.xlu1 %187  ;;  %v186_v59 = vpop.permute.xlu0 %185 }
  0x99   :  { %167 = vst [vmem:[#allocation2 + $0x20] sm:$0xee] %v162_v56  ;;  %168 = vst [vmem:[#allocation2 + $0x28] sm:$0xee] %v164_v57  ;;  %v198_v60 = vrot.slane %v188_v58, 4  ;;  %v197_v61 = vrot.slane %v186_v59, 4 }
  0x9b   :  { %v203_v62 = vsel %vm38_vm0, %v197_v61, %v198_v60 }
  0x9c   :  { %v205_v63 = vsel %vm204_vm5, %v186_v59, %v203_v62  ;;  %v192_v0 = vpop.permute.xlu1 %191  ;;  %v190_v1 = vpop.permute.xlu0 %189 }
  0x9d   :  { %216 = vst [vmem:[#allocation2 + $0x30] sm:$0x88] %v205_v63  ;;  %v199_v2 = vrot.slane %v190_v1, 4  ;;  %v200_v7 = vrot.slane %v192_v0, 4 }
  0x9f   :  { %v206_v3 = vsel %vm38_vm0, %v198_v60, %v199_v2 }
  0xa0   :  { %v207_v4 = vsel %vm204_vm5, %v188_v58, %v206_v3  ;;  %v196_v5 = vpop.permute.xlu1 %195  ;;  %v194_v6 = vpop.permute.xlu0 %193 }
  0xa1   :  { %217 = vst [vmem:[#allocation2 + $0x38] sm:$0x88] %v207_v4  ;;  %v202_v8 = vrot.slane %v196_v5, 4  ;;  %v201_v9 = vrot.slane %v194_v6, 4 }
  0xa3   :  { %v208_v10 = vsel %vm38_vm0, %v200_v7, %v201_v9  ;;  %v210_v11 = vsel %vm38_vm0, %v201_v9, %v202_v8  ;;  %v509_v7 = vlaneseq }
  0xa4   :  { %v209_v12 = vsel %vm204_vm5, %v192_v0, %v208_v10  ;;  %v211_v13 = vsel %vm204_vm5, %v194_v6, %v210_v11  ;;  %v235_v14 = vpop.permute.xlu1 %234  ;;  %v233_v15 = vpop.permute.xlu0 %232  ;;  %v611_v16 = vld [vmem:[#allocation2 + $0x24] ss:$16 sps:$4 sm:$0xff]   ;;  %v613_v17 = vld [vmem:[#allocation2 + $0x20] ss:$16 sps:$4 sm:$0xff]  }
  0xa5   :  { %218 = vst [vmem:[#allocation2 + $0x40] sm:$0x33] %v209_v12  ;;  %219 = vst [vmem:[#allocation2 + $0x48] sm:$0x33] %v211_v13  ;;  %v245_v18 = vrot.slane %v235_v14, 4  ;;  %v244_v19 = vrot.slane %v233_v15, 4  ;;  %428 = vmatprep.subr.bf16.mxu0 %v611_v16 }
  0xa6   :  { %429 = vmatpush1.bf16.msra.mxu0 %v613_v17  ;;  %v332_v6 = vld [vmem:[%s811_s2] sm:$0xf]  ;;  %v510_v8 = vshrl.u32 %v509_v7, 7 }
  0xa7   :  { %v250_v20 = vsel %vm38_vm0, %v244_v19, %v245_v18  ;;  %v22_v11 = vld [vmem:[%s812_s1] sm:$0xf] }
  0xa8   :  { %v252_v21 = vsel %vm251_vm6, %v233_v15, %v250_v20  ;;  %v239_v22 = vpop.permute.xlu1 %238  ;;  %v237_v23 = vpop.permute.xlu0 %236  ;;  %v614_v24 = vld [vmem:[#allocation2 + $0x2c] ss:$16 sps:$4 sm:$0xff]   ;;  %v616_v25 = vld [vmem:[#allocation2 + $0x28] ss:$16 sps:$4 sm:$0xff]   ;;  %v511_v9 = vsub.s32 0, %v510_v8  ;;  %v519_v10 = vsub.s32 2, %v510_v8 }
  0xa9   :  { %263 = vst [vmem:[#allocation2 + $0x40] sm:$0xcc] %v252_v21  ;;  %v246_v26 = vrot.slane %v237_v23, 4  ;;  %469 = vmatprep.subr.bf16.mxu1 %v614_v24  ;;  %v247_v31 = vrot.slane %v239_v22, 4  ;;  %v515_v12 = vsub.s32 1, %v510_v8  ;;  %v523_v13 = vsub.s32 3, %v510_v8 }
  0xaa   :  { %470 = vmatpush1.bf16.msra.mxu1 %v616_v25  ;;  %v512_v15 = vrot.slane %v22_v11, %v511_v9  ;;  %v520_v16 = vrot.slane %v22_v11, %v519_v10  ;;  %v538_v25 = vstv %s813_s4 }
  0xab   :  { %v253_v27 = vsel %vm38_vm0, %v245_v18, %v246_v26  ;;  %v516_v19 = vrot.slane %v22_v11, %v515_v12  ;;  %v524_v20 = vrot.slane %v22_v11, %v523_v13 }
  0xac   :  { %v254_v28 = vsel %vm251_vm6, %v235_v14, %v253_v27  ;;  %v243_v29 = vpop.permute.xlu1 %242  ;;  %v241_v30 = vpop.permute.xlu0 %240 }
  0xad   :  { %264 = vst [vmem:[#allocation2 + $0x48] sm:$0xcc] %v254_v28  ;;  %v249_v32 = vrot.slane %v243_v29, 4  ;;  %v248_v33 = vrot.slane %v241_v30, 4 }
  0xaf   :  { %v255_v34 = vsel %vm38_vm0, %v247_v31, %v248_v33  ;;  %v257_v35 = vsel %vm38_vm0, %v248_v33, %v249_v32 }
  0xb0   :  { %v256_v36 = vsel %vm251_vm6, %v239_v22, %v255_v34  ;;  %v258_v37 = vsel %vm251_vm6, %v241_v30, %v257_v35  ;;  %v279_v38 = vpop.permute.xlu1 %278  ;;  %v277_v39 = vpop.permute.xlu0 %276 }
  0xb1   :  { %265 = vst [vmem:[#allocation2 + $0x50] sm:$0x11] %v256_v36  ;;  %266 = vst [vmem:[#allocation2 + $0x58] sm:$0x11] %v258_v37  ;;  %v283_v40 = vrot.slane %v279_v38, 4  ;;  %v282_v41 = vrot.slane %v277_v39, 4 }
  0xb3   :  { %v285_v42 = vsel %vm38_vm0, %v282_v41, %v283_v40 }
  0xb4   :  { %v287_v43 = vsel %vm286_vm7, %v277_v39, %v285_v42  ;;  %v301_v44 = vpop.permute.xlu1 %300  ;;  %v281_v45 = vpop.permute.xlu0 %280 }
  0xb5   :  { %292 = vst [vmem:[#allocation2 + $0x50] sm:$0xee] %v287_v43  ;;  %v284_v46 = vrot.slane %v281_v45, 4  ;;  %v306_v51 = vrot.slane %v301_v44, 4 }
  0xb7   :  { %v288_v47 = vsel %vm38_vm0, %v283_v40, %v284_v46 }
  0xb8   :  { %v289_v48 = vsel %vm286_vm7, %v279_v38, %v288_v47  ;;  %v305_v49 = vpop.permute.xlu1 %304  ;;  %v303_v50 = vpop.permute.xlu0 %302 }
  0xb9   :  { %293 = vst [vmem:[#allocation2 + $0x58] sm:$0xee] %v289_v48  ;;  %v308_v52 = vrot.slane %v305_v49, 4  ;;  %v307_v53 = vrot.slane %v303_v50, 4 }
  0xbb   :  { %v309_v54 = vsel %vm38_vm0, %v306_v51, %v307_v53  ;;  %v312_v55 = vsel %vm38_vm0, %v307_v53, %v308_v52 }
  0xbc   :  { %v311_v56 = vsel %vm310_vm8, %v301_v44, %v309_v54  ;;  %v313_v57 = vsel %vm310_vm8, %v303_v50, %v312_v55  ;;  %v617_v58 = vld [vmem:[#allocation2 + $0x44] ss:$16 sps:$4 sm:$0xff]   ;;  %v619_v59 = vld [vmem:[#allocation2 + $0x40] ss:$16 sps:$4 sm:$0xff]  }
  0xbd   :  { %316 = vst [vmem:[#allocation2 + $0x60] sm:$0x77] %v311_v56  ;;  %317 = vst [vmem:[#allocation2 + $0x68] sm:$0x77] %v313_v57  ;;  %430 = vmatprep.subr.bf16.mxu0 %v617_v58 }
  0xbe   :  { %431 = vmatpush1.bf16.msra.mxu0 %v619_v59 }
  0xc0   :  { %v620_v60 = vld [vmem:[#allocation2 + $0x4c] ss:$16 sps:$4 sm:$0xff]   ;;  %v622_v61 = vld [vmem:[#allocation2 + $0x48] ss:$16 sps:$4 sm:$0xff]  }
  0xc1   :  { %471 = vmatprep.subr.bf16.mxu1 %v620_v60 }
  0xc2   :  { %472 = vmatpush1.bf16.msra.mxu1 %v622_v61 }
  0xc4   :  { %v330_v62 = vld [vmem:[#allocation2 + $0x60] sm:$0x77]  ;;  %v331_v63 = vld [vmem:[#allocation2 + $0x68] sm:$0x77] }
  0xc5   :  { %v584_v0 = vcombine.high %v330_v62, %v330_v62  ;;  %v586_v1 = vcombine.high %v331_v63, %v331_v63  ;;  %v583_v2 = vcombine.low %v330_v62, %v330_v62  ;;  %v585_v3 = vcombine.low %v331_v63, %v331_v63 }
  0xc7   :  { %587 = vmatprep.subr.msk.bf16.mxu0 %vm413_vm9, %v584_v0  ;;  %589 = vmatprep.subr.msk.bf16.mxu1 %vm413_vm9, %v586_v1  ;;  %v415_v4 = vsel %vm413_vm9, %v583_v2, 0  ;;  %v421_v5 = vsel %vm413_vm9, %v585_v3, 0 }
  0xc8   :  { %433 = vmatpush1.bf16.msra.mxu0 %v415_v4  ;;  %474 = vmatpush1.bf16.msra.mxu1 %v421_v5 }
  0xc9   :  { %v337_v14 = vpop.permute.xlu0 %336 }
  0xcb   :  { %588 = vmatmul.mubr.msk.bf16.vlgmr.msra.gmra.mrb[0].mxu0 %vm409_vm10, %v332_v6  ;;  %590 = vmatmul.mubr.msk.bf16.vlgmr.msra.gmra.mrb[0].mxu1 %vm409_vm10, %v332_v6 }
 0x19e   :  { %v460_v17 = vpop.f32.mrb[0].mxu0  ;;  %v501_v18 = vpop.f32.mrb[0].mxu1 }
 0x19f   :  { %v461_v21 = vadd.f32 %v460_v17, %v337_v14  ;;  %v502_v22 = vadd.f32 %v501_v18, %v337_v14  ;;  %v462_v23 = vpop.f32.mrb[1].mxu0  ;;  %v503_v24 = vpop.f32.mrb[1].mxu1 }
 0x1a0   :  { %v463_v26 = vadd.f32 %v462_v23, %v337_v14  ;;  %v504_v27 = vadd.f32 %v503_v24, %v337_v14  ;;  %v464_v28 = vpop.f32.mrb[2].mxu0  ;;  %v505_v29 = vpop.f32.mrb[2].mxu1 }
 0x1a1   :  { %v529_v30 = vmul.f32 %v512_v15, %v461_v21  ;;  %v531_v31 = vmul.f32 %v520_v16, %v502_v22  ;;  %v465_v32 = vpop.f32.mrb[3].mxu0  ;;  %v506_v33 = vpop.f32.mrb[3].mxu1 }
 0x1a2   :  { %v530_v34 = vmul.f32 %v516_v19, %v463_v26  ;;  %v532_v35 = vmul.f32 %v524_v20, %v504_v27 }
 0x1a3   :  { %vm534_vm11 = vcmp.ge.f32.partialorder %v529_v30, 0.0  ;;  %vm536_vm12 = vcmp.ge.f32.partialorder %v531_v31, 0.0  ;;  %v539_v36 = vmul.f32 %v538_v25, %v529_v30  ;;  %v541_v37 = vmul.f32 %v538_v25, %v531_v31 }
 0x1a4   :  { %vm535_vm13 = vcmp.ge.f32.partialorder %v530_v34, 0.0  ;;  %v540_v38 = vmul.f32 %v538_v25, %v530_v34  ;;  %vm537_vm14 = vcmp.ge.f32.partialorder %v532_v35, 0.0  ;;  %v542_v39 = vmul.f32 %v538_v25, %v532_v35 }
 0x1a5   :  { %v543_v40 = vsel %vm534_vm11, %v529_v30, %v539_v36  ;;  %v545_v41 = vsel %vm536_vm12, %v531_v31, %v541_v37 }
 0x1a6   :  { %v544_v42 = vsel %vm535_vm13, %v530_v34, %v540_v38  ;;  %v546_v43 = vsel %vm537_vm14, %v532_v35, %v542_v39 }
 0x1a7   :  { %v593_v44 = vpack.c.bf16 %v544_v42, %v543_v40  ;;  %v594_v45 = vpack.c.bf16 %v546_v43, %v545_v41 }
 0x1a9   :  { %564 = vst [vmem:[%s809_s5 + $0x4] sm:$0xff] %v593_v44  ;;  %565 = vst [vmem:[%s809_s5 + $0xc] sm:$0xff] %v594_v45 }

// kernel: rbpn_forward.32
= control target key start
LH: loop header
LB: loop body
LE: loop exit
PB: predicated region body
PF: predicated region fallthrough
CT: control target
= control target key end

     0   :  { %14 = vsyncpa [#allocation5], 0  ;;  %s2186_s0 = inlined_call_operand.vmem [shape: bf16[8,768], index: 0, kind: input, shape index: {}]   ;;  %s2187_s1 = inlined_call_operand.vmem [shape: f32[1,512], index: 1, kind: input, shape index: {}]   ;;  %s2188_s2 = inlined_call_operand.vmem [shape: bf16[8,72], index: 2, kind: input, shape index: {}]   ;;  %s2189_s3 = inlined_call_operand.vmem [shape: f32[8,1], index: 3, kind: input, shape index: {}]   ;;  %s2190_s4 = inlined_call_operand.vmem [shape: bf16[8,72], index: 4, kind: input, shape index: {}]   ;;  %s2191_s5 = inlined_call_operand.vmem [shape: f32[8,1], index: 5, kind: input, shape index: {}]   ;;  %s2192_s6 = inlined_call_operand.vmem [shape: bf16[32,72], index: 6, kind: input, shape index: {}]   ;;  %s2193_s7 = inlined_call_operand.vmem [shape: f32[32,1], index: 7, kind: input, shape index: {}]   ;;  %s2194_s8 = inlined_call_operand.vmem [shape: f32[3], index: 8, kind: input, shape index: {}]   ;;  %s2195_s9 = inlined_call_operand.vmem [shape: bf16[32,768], index: 9, kind: output, shape index: {}]  }
   0x1   :  { %s37_s11 = sshll.u32 %s2194_s8, 4  ;;  %s38_s11 = int_to_ptr.vmem [resolvable:$true] %s37_s11 }
   0x2   :  { %s1658_s12 = scalar_lea.vmem %s38_s11, 16  ;;  %p1663_p1 = scmp.lt.s32.totalorder %s38_s11, %s38_s11 }
   0x3   :  { %p1659_p0 = scmp.ne.s32.totalorder %s38_s11, %s1658_s12  ;;  %p1664_p2 = scmp.lt.s32.totalorder %s1658_s12, %s1658_s12 }
   0x5   :  { %p1665_p3 = por %p1664_p2, %p1663_p1 }
   0x7   :  { %p1666_p4 = pnand %p1665_p3, %p1659_p0 }
   0x9   :  { %1669 = shalt.err (!%p1666_p4)
}
   0xa   :  { %s1672_s13 = smov [#allocation4]  }
   0xb   :  { %40 = dma.vmem_to_smem %s38_s11, 16, %s1672_s13, [#allocation5]  }
   0xc   :  { %1670 = dma.done.wait [#allocation5], 16  }
   0xd   :  { %1671 = vsyncadd [#allocation5], 4294967280 }
   0xe   :  { %44 = sfence }
   0xf   :  { %v52_v0 = vld [vmem:[%s2186_s0 + $0x10] sm:$0xf]  ;;  %v50_v1 = vld [vmem:[%s2186_s0] sm:$0xff]  ;;  %s1673_s8 = smov 11   ;;  %v51_v2 = vld [vmem:[%s2186_s0 + $0x8] sm:$0xff]  ;;  %s1674_s20 = smov 10  }
  0x10   :  { %60 = vrot.lane.b32.xlu1 %v52_v0, %s1673_s8  ;;  %56 = vrot.lane.b32.xlu0 %v50_v1, %s1673_s8  ;;  %v77_v3 = vld [vmem:[%s2186_s0 + $0x10] sm:$0xf]  ;;  %s1675_s23 = smov 9   ;;  %s1676_s26 = smov 1   ;;  %v1773_v7 = vld [vmem:[%s2186_s0 + $0x4] sm:$0xff]  ;;  %v1680_v11 = vmov 0  }
  0x11   :  { %v101_v4 = vld [vmem:[%s2186_s0 + $0x10] sm:$0xf]  ;;  %s1677_s12 = smov 127   ;;  %v153_v8 = vld [vmem:[%s2186_s0 + $0x14] sm:$0xf]  ;;  %s1678_s15 = smov 119   ;;  %411 = vmatprep.mubr.bf16.mxu0 %v1680_v11  ;;  %452 = vmatprep.mubr.bf16.mxu1 %v1680_v11 }
  0x12   :  { %v125_v5 = vld [vmem:[%s2186_s0 + $0x10] sm:$0xf]  ;;  %v177_v9 = vld [vmem:[%s2186_s0 + $0x14] sm:$0xf]  ;;  %s1679_s18 = smov 118   ;;  %1474 = vst [vmem:[%s2195_s9] sm:$0xf] %v1680_v11  ;;  %1654 = vset.pattern.permute.xlu0 %v1680_v11  ;;  %1655 = vset.pattern.permute.xlu1 %v1680_v11 }
  0x13   :  { %v1768_v6 = vld [vmem:[%s2186_s0 + $0xc] sm:$0xff]  ;;  %v201_v10 = vld [vmem:[%s2186_s0 + $0x14] sm:$0xf]  ;;  %1475 = vst [vmem:[%s2195_s9 + $0x18] sm:$0xf] %v1680_v11  ;;  %47 = vst [vmem:[#allocation3] sm:$0xff] %v1680_v11 }
  0x14   :  { %81 = vrot.lane.b32.xlu1 %v50_v1, %s1674_s20  ;;  %58 = vrot.lane.b32.xlu0 %v51_v2, %s1673_s8  ;;  %1476 = vst [vmem:[%s2195_s9 + $0x30] sm:$0xf] %v1680_v11  ;;  %1477 = vst [vmem:[%s2195_s9 + $0x48] sm:$0xf] %v1680_v11  ;;  %s1681_s24 = smov 117   ;;  %vm65_vm0 = vcmask 1043456  }
  0x15   :  { %1534 = vst [vmem:[%s2195_s9 + $0x14] sm:$0xf] %v1680_v11  ;;  %1535 = vst [vmem:[%s2195_s9 + $0x2c] sm:$0xf] %v1680_v11  ;;  %v225_v12 = vld [vmem:[%s2186_s0 + $0x14] sm:$0xf] }
  0x16   :  { %1536 = vst [vmem:[%s2195_s9 + $0x44] sm:$0xf] %v1680_v11  ;;  %1537 = vst [vmem:[%s2195_s9 + $0x5c] sm:$0xf] %v1680_v11  ;;  %v266_v13 = vld [vmem:[%s2189_s3] sm:$0xff]  ;;  %vm67_vm1 = vcmask 89088  }
  0x17   :  { %48 = vst [vmem:[#allocation3 + $0x8] sm:$0xff] %v1680_v11  ;;  %49 = vst [vmem:[#allocation3 + $0x10] sm:$0xff] %v1680_v11  ;;  %vm91_vm2 = vcmask 80896   ;;  %vm115_vm3 = vcmask 72704   ;;  %vm139_vm4 = vcmask 7168   ;;  %vm167_vm5 = vcmask 1039360  }
  0x18   :  { %85 = vrot.lane.b32.xlu1 %v77_v3, %s1674_s20  ;;  %83 = vrot.lane.b32.xlu0 %v51_v2, %s1674_s20  ;;  %vm191_vm6 = vcmask 973824   ;;  %vm215_vm7 = vcmask 965632   ;;  %vm239_vm8 = vcmask 957440   ;;  %vm362_vm9 = vcmask 588800   ;;  %s1623_s19 = sld [smem:[#allocation4 + $0x2]] }
  0x1c   :  { %107 = vrot.lane.b32.xlu1 %v51_v2, %s1675_s23  ;;  %105 = vrot.lane.b32.xlu0 %v50_v1, %s1675_s23 }
  0x20   :  { %129 = vrot.lane.b32.xlu1 %v50_v1, %s1676_s26  ;;  %109 = vrot.lane.b32.xlu0 %v101_v4, %s1675_s23 }
  0x24   :  { %133 = vrot.lane.b32.xlu1 %v125_v5, %s1676_s26  ;;  %131 = vrot.lane.b32.xlu0 %v51_v2, %s1676_s26 }
  0x28   :  { %159 = vrot.lane.b32.xlu1 %v1768_v6, %s1677_s12  ;;  %157 = vrot.lane.b32.xlu0 %v1773_v7, %s1677_s12 }
  0x2c   :  { %181 = vrot.lane.b32.xlu1 %v1773_v7, %s1678_s15  ;;  %161 = vrot.lane.b32.xlu0 %v153_v8, %s1677_s12 }
  0x30   :  { %185 = vrot.lane.b32.xlu1 %v177_v9, %s1678_s15  ;;  %183 = vrot.lane.b32.xlu0 %v1768_v6, %s1678_s15 }
  0x34   :  { %207 = vrot.lane.b32.xlu1 %v1768_v6, %s1679_s18  ;;  %205 = vrot.lane.b32.xlu0 %v1773_v7, %s1679_s18 }
  0x38   :  { %229 = vrot.lane.b32.xlu1 %v1773_v7, %s1681_s24  ;;  %209 = vrot.lane.b32.xlu0 %v201_v10, %s1679_s18 }
  0x3c   :  { %233 = vrot.lane.b32.xlu1 %v225_v12, %s1681_s24  ;;  %231 = vrot.lane.b32.xlu0 %v1768_v6, %s1681_s24 }
  0x40   :  { %269 = vperm.xlu0 %1654, %v266_v13  }
  0x82   :  { %v61_v14 = vpop.permute.xlu1 %60  ;;  %v57_v15 = vpop.permute.xlu0 %56 }
  0x83   :  { %v64_v18 = vrot.slane %v61_v14, 4  ;;  %v62_v20 = vrot.slane %v57_v15, 4 }
  0x86   :  { %v82_v16 = vpop.permute.xlu1 %81  ;;  %v59_v17 = vpop.permute.xlu0 %58 }
  0x87   :  { %v63_v19 = vrot.slane %v59_v17, 4  ;;  %v87_v21 = vrot.slane %v82_v16, 4 }
  0x89   :  { %v66_v26 = vsel %vm65_vm0, %v62_v20, %v63_v19  ;;  %v69_v27 = vsel %vm65_vm0, %v63_v19, %v64_v18 }
  0x8a   :  { %v86_v22 = vpop.permute.xlu1 %85  ;;  %v84_v23 = vpop.permute.xlu0 %83  ;;  %v68_v32 = vsel %vm67_vm1, %v57_v15, %v66_v26  ;;  %v70_v34 = vsel %vm67_vm1, %v59_v17, %v69_v27 }
  0x8b   :  { %v89_v24 = vrot.slane %v86_v22, 4  ;;  %v88_v25 = vrot.slane %v84_v23, 4 }
  0x8d   :  { %v90_v28 = vsel %vm65_vm0, %v87_v21, %v88_v25  ;;  %v93_v29 = vsel %vm65_vm0, %v88_v25, %v89_v24 }
  0x8e   :  { %v108_v30 = vpop.permute.xlu1 %107  ;;  %v106_v31 = vpop.permute.xlu0 %105  ;;  %v92_v33 = vsel %vm91_vm2, %v82_v16, %v90_v28  ;;  %v94_v35 = vsel %vm91_vm2, %v84_v23, %v93_v29 }
  0x8f   :  { %v1544_v36 = vcombine.high %v68_v32, %v92_v33  ;;  %v1546_v37 = vcombine.high %v70_v34, %v94_v35  ;;  %v1543_v38 = vcombine.low %v68_v32, %v92_v33  ;;  %v1545_v39 = vcombine.low %v70_v34, %v94_v35 }
  0x90   :  { %v112_v42 = vrot.slane %v108_v30, 4  ;;  %v111_v43 = vrot.slane %v106_v31, 4 }
  0x91   :  { %379 = vmatprep.subr.bf16.mxu0 %v1544_v36  ;;  %420 = vmatprep.subr.bf16.mxu1 %v1546_v37 }
  0x92   :  { %v130_v40 = vpop.permute.xlu1 %129  ;;  %380 = vmatpush1.bf16.msra.mxu0 %v1543_v38  ;;  %421 = vmatpush1.bf16.msra.mxu1 %v1545_v39  ;;  %v110_v41 = vpop.permute.xlu0 %109  ;;  %v114_v48 = vsel %vm65_vm0, %v111_v43, %v112_v42 }
  0x93   :  { %v113_v44 = vrot.slane %v110_v41, 4  ;;  %v135_v45 = vrot.slane %v130_v40, 4  ;;  %v116_v54 = vsel %vm115_vm3, %v106_v31, %v114_v48 }
  0x95   :  { %v117_v49 = vsel %vm65_vm0, %v112_v42, %v113_v44 }
  0x96   :  { %v134_v46 = vpop.permute.xlu1 %133  ;;  %v132_v47 = vpop.permute.xlu0 %131  ;;  %v118_v55 = vsel %vm115_vm3, %v108_v30, %v117_v49 }
  0x97   :  { %v137_v50 = vrot.slane %v134_v46, 4  ;;  %v136_v51 = vrot.slane %v132_v47, 4 }
  0x99   :  { %v138_v52 = vsel %vm65_vm0, %v135_v45, %v136_v51  ;;  %v141_v53 = vsel %vm65_vm0, %v136_v51, %v137_v50 }
  0x9a   :  { %v142_v56 = vsel %vm139_vm4, %v132_v47, %v141_v53  ;;  %v160_v57 = vpop.permute.xlu1 %159  ;;  %v158_v58 = vpop.permute.xlu0 %157  ;;  %v140_v59 = vsel %vm139_vm4, %v130_v40, %v138_v52 }
  0x9b   :  { %v1549_v60 = vcombine.low %v118_v55, %v142_v56  ;;  %v1550_v61 = vcombine.high %v118_v55, %v142_v56  ;;  %v164_v62 = vrot.slane %v160_v57, 4  ;;  %v163_v63 = vrot.slane %v158_v58, 4  ;;  %v265_v55 = vld [vmem:[%s2188_s2] sm:$0xf]  ;;  %v616_v56 = vld [vmem:[#allocation3 + $0x14] sm:$0xf] }
  0x9c   :  { %v1548_v0 = vcombine.high %v116_v54, %v140_v59  ;;  %v1547_v1 = vcombine.low %v116_v54, %v140_v59  ;;  %624 = vrot.lane.b32.xlu0 %v616_v56, %s1677_s12  ;;  %v462_v59 = vlaneseq  ;;  %s486_s2 = sld [smem:[#allocation4]] }
  0x9d   :  { %v166_v2 = vsel %vm65_vm0, %v163_v63, %v164_v62  ;;  %422 = vmatprep.subr.bf16.mxu1 %v1550_v61  ;;  %v46_v63 = vld [vmem:[%s2187_s1] sm:$0xf] }
  0x9e   :  { %v168_v3 = vsel %vm167_vm5, %v158_v58, %v166_v2  ;;  %381 = vmatprep.subr.bf16.mxu0 %v1548_v0  ;;  %v182_v4 = vpop.permute.xlu1 %181  ;;  %423 = vmatpush1.bf16.msra.mxu1 %v1549_v60  ;;  %v162_v5 = vpop.permute.xlu0 %161  ;;  %v662_v58 = vld [vmem:[#allocation3 + $0x14] sm:$0xf]  ;;  %v463_v60 = vshrl.u32 %v462_v59, 7 }
  0x9f   :  { %v1551_v8 = vcombine.low %v1773_v7, %v168_v3  ;;  %v1552_v9 = vcombine.high %v1773_v7, %v168_v3  ;;  %382 = vmatpush1.bf16.msra.mxu0 %v1547_v1  ;;  %v165_v10 = vrot.slane %v162_v5, 4  ;;  %v187_v16 = vrot.slane %v182_v4, 4 }
  0xa0   :  { %670 = vrot.lane.b32.xlu0 %v662_v58, %s1679_s18  ;;  %v464_v61 = vsub.s32 0, %v463_v60  ;;  %v468_v0 = vsub.s32 1, %v463_v60  ;;  %v476_v1 = vsub.s32 3, %v463_v60 }
  0xa1   :  { %v169_v12 = vsel %vm65_vm0, %v164_v62, %v165_v10  ;;  %383 = vmatprep.subr.bf16.mxu0 %v1552_v9  ;;  %v472_v62 = vsub.s32 2, %v463_v60 }
  0xa2   :  { %v186_v13 = vpop.permute.xlu1 %185  ;;  %v184_v14 = vpop.permute.xlu0 %183  ;;  %v170_v15 = vsel %vm167_vm5, %v160_v57, %v169_v12  ;;  %v639_v57 = vld [vmem:[#allocation3 + $0x14] sm:$0xf]  ;;  %v1902_v3 = vrot.slane %v46_v63, %v464_v61  ;;  %v1906_v9 = vrot.slane %v46_v63, %v468_v0  ;;  %v1908_v10 = vrot.slane %v46_v63, %v476_v1 }
  0xa3   :  { %384 = vmatpush1.bf16.msra.mxu0 %v1551_v8  ;;  %v188_v17 = vrot.slane %v184_v14, 4  ;;  %v1554_v18 = vcombine.high %v1768_v6, %v170_v15  ;;  %v1553_v19 = vcombine.low %v1768_v6, %v170_v15  ;;  %v189_v22 = vrot.slane %v186_v13, 4  ;;  %647 = vrot.lane.b32.xlu1 %v639_v57, %s1678_s15 }
  0xa5   :  { %424 = vmatprep.subr.bf16.mxu1 %v1554_v18  ;;  %v190_v24 = vsel %vm65_vm0, %v187_v16, %v188_v17  ;;  %v193_v31 = vsel %vm65_vm0, %v188_v17, %v189_v22  ;;  %v491_v16 = vstv %s486_s2 }
  0xa6   :  { %v208_v20 = vpop.permute.xlu1 %207  ;;  %425 = vmatpush1.bf16.msra.mxu1 %v1553_v19  ;;  %v206_v21 = vpop.permute.xlu0 %205  ;;  %v192_v27 = vsel %vm191_vm6, %v182_v4, %v190_v24  ;;  %v194_v37 = vsel %vm191_vm6, %v184_v14, %v193_v31  ;;  %v1904_v4 = vrot.slane %v46_v63, %v472_v62 }
  0xa7   :  { %v212_v23 = vrot.slane %v208_v20, 4  ;;  %v211_v25 = vrot.slane %v206_v21, 4 }
  0xa9   :  { %v214_v26 = vsel %vm65_vm0, %v211_v25, %v212_v23 }
  0xaa   :  { %v216_v28 = vsel %vm215_vm7, %v206_v21, %v214_v26  ;;  %v230_v29 = vpop.permute.xlu1 %229  ;;  %v210_v30 = vpop.permute.xlu0 %209 }
  0xab   :  { %v1555_v32 = vcombine.low %v192_v27, %v216_v28  ;;  %v1556_v33 = vcombine.high %v192_v27, %v216_v28  ;;  %v213_v34 = vrot.slane %v210_v30, 4  ;;  %v235_v35 = vrot.slane %v230_v29, 4 }
  0xad   :  { %v217_v36 = vsel %vm65_vm0, %v212_v23, %v213_v34  ;;  %385 = vmatprep.subr.bf16.mxu0 %v1556_v33 }
  0xae   :  { %v234_v38 = vpop.permute.xlu1 %233  ;;  %386 = vmatpush1.bf16.msra.mxu0 %v1555_v32  ;;  %v232_v39 = vpop.permute.xlu0 %231  ;;  %v218_v40 = vsel %vm215_vm7, %v208_v20, %v217_v36 }
  0xaf   :  { %v237_v41 = vrot.slane %v234_v38, 4  ;;  %v236_v42 = vrot.slane %v232_v39, 4  ;;  %v1558_v43 = vcombine.high %v194_v37, %v218_v40  ;;  %v1557_v44 = vcombine.low %v194_v37, %v218_v40 }
  0xb1   :  { %v238_v45 = vsel %vm65_vm0, %v235_v35, %v236_v42  ;;  %v241_v46 = vsel %vm65_vm0, %v236_v42, %v237_v41  ;;  %426 = vmatprep.subr.bf16.mxu1 %v1558_v43  ;;  %v725_v43 = vld [vmem:[%s2191_s5] sm:$0xff] }
  0xb2   :  { %v242_v47 = vsel %vm239_vm8, %v232_v39, %v241_v46  ;;  %427 = vmatpush1.bf16.msra.mxu1 %v1557_v44  ;;  %v240_v48 = vsel %vm239_vm8, %v230_v29, %v238_v45  ;;  %v685_v44 = vld [vmem:[#allocation3 + $0x14] sm:$0xf] }
  0xb3   :  { %v1561_v49 = vcombine.low %v242_v47, %v242_v47  ;;  %v1562_v50 = vcombine.high %v242_v47, %v242_v47  ;;  %v1560_v51 = vcombine.high %v240_v48, %v240_v48  ;;  %v1559_v52 = vcombine.low %v240_v48, %v240_v48 }
  0xb5   :  { %1563 = vmatprep.subr.msk.bf16.mxu0 %vm65_vm0, %v1560_v51  ;;  %1565 = vmatprep.subr.msk.bf16.mxu1 %vm65_vm0, %v1562_v50  ;;  %v368_v53 = vsel %vm65_vm0, %v1559_v52, 0  ;;  %v374_v54 = vsel %vm65_vm0, %v1561_v49, 0 }
  0xb6   :  { %388 = vmatpush1.bf16.msra.mxu0 %v368_v53  ;;  %429 = vmatpush1.bf16.msra.mxu1 %v374_v54 }
  0xb9   :  { %1564 = vmatmul.mubr.msk.bf16.vlgmr.msra.gmra.mrb[0].mxu0 %vm362_vm9, %v265_v55  ;;  %1566 = vmatmul.mubr.msk.bf16.vlgmr.msra.gmra.mrb[0].mxu1 %vm362_vm9, %v265_v55 }
  0xba   :  { %868 = vmatprep.mubr.bf16.mxu0 %v1680_v11  ;;  %909 = vmatprep.mubr.bf16.mxu1 %v1680_v11 }
  0xbf   :  { %v270_v2 = vpop.permute.xlu0 %269 }
 0x10e   :  { %v1952_v45 = vpop.permute.xlu0 %624 }
 0x112   :  { %v1956_v47 = vpop.permute.xlu0 %670 }
 0x115   :  { %v1954_v46 = vpop.permute.xlu1 %647 }
 0x18c   :  { %v413_v5 = vpop.f32.mrb[0].mxu0  ;;  %v454_v8 = vpop.f32.mrb[0].mxu1 }
 0x18d   :  { %v414_v12 = vadd.f32 %v413_v5, %v270_v2  ;;  %v455_v13 = vadd.f32 %v454_v8, %v270_v2  ;;  %v415_v14 = vpop.f32.mrb[1].mxu0  ;;  %v456_v15 = vpop.f32.mrb[1].mxu1 }
 0x18e   :  { %v416_v17 = vadd.f32 %v415_v14, %v270_v2  ;;  %v457_v18 = vadd.f32 %v456_v15, %v270_v2  ;;  %v417_v19 = vpop.f32.mrb[2].mxu0  ;;  %v458_v20 = vpop.f32.mrb[2].mxu1 }
 0x18f   :  { %v482_v21 = vmul.f32 %v1902_v3, %v414_v12  ;;  %v484_v22 = vmul.f32 %v1904_v4, %v455_v13  ;;  %v418_v23 = vpop.f32.mrb[3].mxu0  ;;  %v459_v24 = vpop.f32.mrb[3].mxu1 }
 0x190   :  { %v483_v25 = vmul.f32 %v1906_v9, %v416_v17  ;;  %v485_v26 = vmul.f32 %v1908_v10, %v457_v18 }
 0x191   :  { %vm487_vm10 = vcmp.ge.f32.partialorder %v482_v21, 0.0  ;;  %v492_v27 = vmul.f32 %v491_v16, %v482_v21  ;;  %vm489_vm11 = vcmp.ge.f32.partialorder %v484_v22, 0.0  ;;  %v494_v28 = vmul.f32 %v491_v16, %v484_v22 }
 0x192   :  { %vm488_vm12 = vcmp.ge.f32.partialorder %v483_v25, 0.0  ;;  %v493_v29 = vmul.f32 %v491_v16, %v483_v25  ;;  %vm490_vm13 = vcmp.ge.f32.partialorder %v485_v26, 0.0  ;;  %v495_v30 = vmul.f32 %v491_v16, %v485_v26 }
 0x193   :  { %v496_v31 = vsel %vm487_vm10, %v482_v21, %v492_v27  ;;  %v498_v32 = vsel %vm489_vm11, %v484_v22, %v494_v28 }
 0x194   :  { %v497_v33 = vsel %vm488_vm12, %v483_v25, %v493_v29  ;;  %v499_v34 = vsel %vm490_vm13, %v485_v26, %v495_v30 }
 0x195   :  { %v1914_v35 = vpack.c.bf16 %v497_v33, %v496_v31  ;;  %v1916_v36 = vpack.c.bf16 %v499_v34, %v498_v32 }
 0x197   :  { %516 = vst [vmem:[#allocation3 + $0x4] sm:$0xff] %v1914_v35  ;;  %517 = vst [vmem:[#allocation3 + $0xc] sm:$0xff] %v1916_v36 }
 0x19e   :  { %v520_v37 = vld [vmem:[#allocation3 + $0x10] sm:$0xf]  ;;  %v518_v38 = vld [vmem:[#allocation3] sm:$0xff]  ;;  %v542_v39 = vld [vmem:[#allocation3 + $0x8] sm:$0xff] }
 0x19f   :  { %528 = vrot.lane.b32.xlu0 %v520_v37, %s1673_s8  ;;  %524 = vrot.lane.b32.xlu1 %v518_v38, %s1673_s8  ;;  %v566_v40 = vld [vmem:[#allocation3 + $0x10] sm:$0xf] }
 0x1a0   :  { %v543_v41 = vld [vmem:[#allocation3 + $0x10] sm:$0xf] }
 0x1a1   :  { %v589_v42 = vld [vmem:[#allocation3 + $0x10] sm:$0xf] }
 0x1a3   :  { %549 = vrot.lane.b32.xlu0 %v542_v39, %s1674_s20  ;;  %526 = vrot.lane.b32.xlu1 %v542_v39, %s1673_s8 }
 0x1a7   :  { %570 = vrot.lane.b32.xlu0 %v518_v38, %s1675_s23  ;;  %547 = vrot.lane.b32.xlu1 %v518_v38, %s1674_s20 }
 0x1ab   :  { %574 = vrot.lane.b32.xlu0 %v566_v40, %s1675_s23  ;;  %551 = vrot.lane.b32.xlu1 %v543_v41, %s1674_s20 }
 0x1af   :  { %595 = vrot.lane.b32.xlu0 %v542_v39, %s1676_s26  ;;  %572 = vrot.lane.b32.xlu1 %v542_v39, %s1675_s23  ;;  %v628_v39 = vrot.slane %v1952_v45, 4 }
 0x1b3   :  { %620 = vrot.lane.b32.xlu0 %v1914_v35, %s1677_s12  ;;  %593 = vrot.lane.b32.xlu1 %v518_v38, %s1676_s26 }
 0x1b7   :  { %645 = vrot.lane.b32.xlu0 %v1916_v36, %s1678_s15  ;;  %597 = vrot.lane.b32.xlu1 %v589_v42, %s1676_s26 }
 0x1bb   :  { %666 = vrot.lane.b32.xlu0 %v1914_v35, %s1679_s18  ;;  %622 = vrot.lane.b32.xlu1 %v1916_v36, %s1677_s12 }
 0x1bf   :  { %691 = vrot.lane.b32.xlu0 %v1916_v36, %s1681_s24  ;;  %643 = vrot.lane.b32.xlu1 %v1914_v35, %s1678_s15 }
 0x1c3   :  { %728 = vperm.xlu0 %1654, %v725_v43   ;;  %668 = vrot.lane.b32.xlu1 %v1916_v36, %s1679_s18 }
 0x1c7   :  { %689 = vrot.lane.b32.xlu1 %v1914_v35, %s1681_s24 }
 0x1cb   :  { %693 = vrot.lane.b32.xlu1 %v685_v44, %s1681_s24 }
 0x211   :  { %v529_v48 = vpop.permute.xlu0 %528  ;;  %v525_v49 = vpop.permute.xlu1 %524 }
 0x212   :  { %v530_v53 = vrot.slane %v525_v49, 4  ;;  %v532_v59 = vrot.slane %v529_v48, 4 }
 0x215   :  { %v550_v50 = vpop.permute.xlu0 %549  ;;  %v527_v51 = vpop.permute.xlu1 %526 }
 0x216   :  { %v531_v52 = vrot.slane %v527_v51, 4  ;;  %v554_v56 = vrot.slane %v550_v50, 4 }
 0x218   :  { %v533_v57 = vsel %vm65_vm0, %v530_v53, %v531_v52  ;;  %v535_v1 = vsel %vm65_vm0, %v531_v52, %v532_v59  ;;  %v651_v59 = vrot.slane %v1954_v46, 4 }
 0x219   :  { %v571_v54 = vpop.permute.xlu0 %570  ;;  %v548_v55 = vpop.permute.xlu1 %547  ;;  %v534_v61 = vsel %vm67_vm1, %v525_v49, %v533_v57  ;;  %v536_v13 = vsel %vm67_vm1, %v527_v51, %v535_v1 }
 0x21a   :  { %v553_v58 = vrot.slane %v548_v55, 4  ;;  %v576_v20 = vrot.slane %v571_v54, 4 }
 0x21c   :  { %v556_v60 = vsel %vm65_vm0, %v553_v58, %v554_v56 }
 0x21d   :  { %v557_v62 = vsel %vm91_vm2, %v548_v55, %v556_v60  ;;  %v575_v63 = vpop.permute.xlu0 %574  ;;  %v552_v0 = vpop.permute.xlu1 %551 }
 0x21e   :  { %v1569_v2 = vcombine.low %v534_v61, %v557_v62  ;;  %v1570_v5 = vcombine.high %v534_v61, %v557_v62  ;;  %v555_v8 = vrot.slane %v552_v0, 4  ;;  %v578_v26 = vrot.slane %v575_v63, 4 }
 0x21f   :  { %v674_v0 = vrot.slane %v1956_v47, 4 }
 0x220   :  { %v558_v12 = vsel %vm65_vm0, %v554_v56, %v555_v8  ;;  %836 = vmatprep.subr.bf16.mxu0 %v1570_v5 }
 0x221   :  { %v596_v14 = vpop.permute.xlu0 %595  ;;  %837 = vmatpush1.bf16.msra.mxu0 %v1569_v2  ;;  %v573_v15 = vpop.permute.xlu1 %572  ;;  %v559_v16 = vsel %vm91_vm2, %v550_v50, %v558_v12 }
 0x222   :  { %v577_v17 = vrot.slane %v573_v15, 4  ;;  %v1571_v18 = vcombine.low %v536_v13, %v559_v16  ;;  %v1572_v19 = vcombine.high %v536_v13, %v559_v16  ;;  %v600_v23 = vrot.slane %v596_v14, 4 }
 0x224   :  { %877 = vmatprep.subr.bf16.mxu1 %v1572_v19  ;;  %v579_v24 = vsel %vm65_vm0, %v576_v20, %v577_v17  ;;  %v581_v31 = vsel %vm65_vm0, %v577_v17, %v578_v26 }
 0x225   :  { %v621_v21 = vpop.permute.xlu0 %620  ;;  %878 = vmatpush1.bf16.msra.mxu1 %v1571_v18  ;;  %v594_v22 = vpop.permute.xlu1 %593  ;;  %v580_v28 = vsel %vm115_vm3, %v571_v54, %v579_v24  ;;  %v582_v40 = vsel %vm115_vm3, %v573_v15, %v581_v31 }
 0x226   :  { %v599_v25 = vrot.slane %v594_v22, 4  ;;  %v626_v43 = vrot.slane %v621_v21, 4 }
 0x228   :  { %v602_v27 = vsel %vm65_vm0, %v599_v25, %v600_v23 }
 0x229   :  { %v603_v29 = vsel %vm139_vm4, %v594_v22, %v602_v27  ;;  %v598_v30 = vpop.permute.xlu1 %597  ;;  %v646_v34 = vpop.permute.xlu0 %645 }
 0x22a   :  { %v1573_v32 = vcombine.low %v580_v28, %v603_v29  ;;  %v1574_v33 = vcombine.high %v580_v28, %v603_v29  ;;  %v601_v37 = vrot.slane %v598_v30, 4  ;;  %v650_v53 = vrot.slane %v646_v34, 4  ;;  %v724_v30 = vld [vmem:[%s2190_s4] sm:$0xf] }
 0x22c   :  { %v604_v38 = vsel %vm65_vm0, %v600_v23, %v601_v37  ;;  %838 = vmatprep.subr.bf16.mxu0 %v1574_v33  ;;  %v654_v62 = vsel %vm65_vm0, %v650_v53, %v651_v59  ;;  %v1094_v37 = vld [vmem:[#allocation3 + $0x14] sm:$0xf] }
 0x22d   :  { %839 = vmatpush1.bf16.msra.mxu0 %v1573_v32  ;;  %v623_v41 = vpop.permute.xlu1 %622  ;;  %v605_v42 = vsel %vm139_vm4, %v596_v14, %v604_v38  ;;  %v667_v50 = vpop.permute.xlu0 %666  ;;  %v655_v46 = vsel %vm191_vm6, %v646_v34, %v654_v62  ;;  %v1048_v34 = vld [vmem:[#allocation3 + $0x14] sm:$0xf] }
 0x22e   :  { %v627_v44 = vrot.slane %v623_v41, 4  ;;  %v1575_v48 = vcombine.low %v582_v40, %v605_v42  ;;  %v1576_v49 = vcombine.high %v582_v40, %v605_v42  ;;  %v672_v1 = vrot.slane %v667_v50, 4  ;;  %1056 = vrot.lane.b32.xlu1 %v1048_v34, %s1677_s12  ;;  %v1071_v38 = vld [vmem:[#allocation3 + $0x14] sm:$0xf] }
 0x22f   :  { %1079 = vrot.lane.b32.xlu0 %v1071_v38, %s1678_s15  ;;  %v924_v42 = vunpack.c.l.bf16 %v1773_v7 }
 0x230   :  { %v629_v51 = vsel %vm65_vm0, %v626_v43, %v627_v44  ;;  %v631_v52 = vsel %vm65_vm0, %v627_v44, %v628_v39  ;;  %879 = vmatprep.subr.bf16.mxu1 %v1576_v49 }
 0x231   :  { %v632_v54 = vsel %vm167_vm5, %v623_v41, %v631_v52  ;;  %880 = vmatpush1.bf16.msra.mxu1 %v1575_v48  ;;  %v644_v45 = vpop.permute.xlu1 %643  ;;  %v630_v55 = vsel %vm167_vm5, %v621_v21, %v629_v51  ;;  %v692_v2 = vpop.permute.xlu0 %691  ;;  %v925_v48 = vunpack.c.h.bf16 %v1773_v7 }
 0x232   :  { %v1579_v56 = vcombine.low %v1916_v36, %v632_v54  ;;  %v1580_v57 = vcombine.high %v1916_v36, %v632_v54  ;;  %v649_v58 = vrot.slane %v644_v45, 4  ;;  %v1577_v60 = vcombine.low %v1914_v35, %v630_v55  ;;  %1102 = vrot.lane.b32.xlu1 %v1094_v37, %s1679_s18 }
 0x233   :  { %v1578_v61 = vcombine.high %v1914_v35, %v630_v55  ;;  %v696_v12 = vrot.slane %v692_v2, 4 }
 0x234   :  { %881 = vmatprep.subr.bf16.mxu1 %v1580_v57  ;;  %v652_v5 = vsel %vm65_vm0, %v649_v58, %v650_v53  ;;  %v927_v58 = vunpack.c.h.bf16 %v1768_v6 }
 0x235   :  { %840 = vmatprep.subr.bf16.mxu0 %v1578_v61  ;;  %882 = vmatpush1.bf16.msra.mxu1 %v1579_v56  ;;  %v669_v63 = vpop.permute.xlu1 %668  ;;  %v653_v13 = vsel %vm191_vm6, %v644_v45, %v652_v5  ;;  %v926_v45 = vunpack.c.l.bf16 %v1768_v6 }
 0x236   :  { %841 = vmatpush1.bf16.msra.mxu0 %v1577_v60  ;;  %v673_v36 = vrot.slane %v669_v63, 4 }
 0x238   :  { %v675_v8 = vsel %vm65_vm0, %v672_v1, %v673_v36  ;;  %v677_v35 = vsel %vm65_vm0, %v673_v36, %v674_v0 }
 0x239   :  { %v678_v14 = vsel %vm215_vm7, %v669_v63, %v677_v35  ;;  %v690_v15 = vpop.permute.xlu1 %689  ;;  %v676_v47 = vsel %vm215_vm7, %v667_v50, %v675_v8 }
 0x23a   :  { %v1583_v16 = vcombine.low %v655_v46, %v678_v14  ;;  %v1584_v17 = vcombine.high %v655_v46, %v678_v14  ;;  %v695_v18 = vrot.slane %v690_v15, 4  ;;  %v1581_v19 = vcombine.low %v653_v13, %v676_v47  ;;  %v1163_v14 = vld [vmem:[%s2193_s7 + $0x18] sm:$0xff] }
 0x23b   :  { %v1582_v20 = vcombine.high %v653_v13, %v676_v47  ;;  %v1161_v13 = vld [vmem:[%s2193_s7 + $0x8] sm:$0xff]  ;;  %v1162_v47 = vld [vmem:[%s2193_s7 + $0x10] sm:$0xff] }
 0x23c   :  { %v698_v21 = vsel %vm65_vm0, %v695_v18, %v696_v12  ;;  %883 = vmatprep.subr.bf16.mxu1 %v1584_v17 }
 0x23d   :  { %v699_v22 = vsel %vm239_vm8, %v690_v15, %v698_v21  ;;  %842 = vmatprep.subr.bf16.mxu0 %v1582_v20  ;;  %884 = vmatpush1.bf16.msra.mxu1 %v1583_v16  ;;  %v694_v23 = vpop.permute.xlu1 %693  ;;  %v1160_v15 = vld [vmem:[%s2193_s7] sm:$0xff] }
 0x23e   :  { %v1585_v24 = vcombine.low %v699_v22, %v699_v22  ;;  %v1586_v25 = vcombine.high %v699_v22, %v699_v22  ;;  %843 = vmatpush1.bf16.msra.mxu0 %v1581_v19  ;;  %v697_v26 = vrot.slane %v694_v23, 4 }
 0x240   :  { %v700_v27 = vsel %vm65_vm0, %v696_v12, %v697_v26  ;;  %1589 = vmatprep.subr.msk.bf16.mxu0 %vm65_vm0, %v1586_v25  ;;  %v825_v28 = vsel %vm65_vm0, %v1585_v24, 0  ;;  %v1117_v12 = vld [vmem:[#allocation3 + $0x14] sm:$0xf] }
 0x241   :  { %v701_v29 = vsel %vm239_vm8, %v692_v2, %v700_v27 }
 0x242   :  { %845 = vmatpush1.bf16.msra.mxu0 %v825_v28  ;;  %v1588_v31 = vcombine.high %v701_v29, %v701_v29  ;;  %v1587_v32 = vcombine.low %v701_v29, %v701_v29  ;;  %v729_v39 = vpop.permute.xlu0 %728 }
 0x244   :  { %1591 = vmatprep.subr.msk.bf16.mxu1 %vm65_vm0, %v1588_v31  ;;  %v831_v33 = vsel %vm65_vm0, %v1587_v32, 0 }
 0x245   :  { %1590 = vmatmul.mubr.msk.bf16.vlgmr.msra.gmra.mrb[4].mxu0 %vm362_vm9, %v724_v30  ;;  %886 = vmatpush1.bf16.msra.mxu1 %v831_v33 }
 0x246   :  { %1334 = vmatprep.mubr.bf16.mxu0 %v1680_v11 }
 0x248   :  { %1592 = vmatmul.mubr.msk.bf16.vlgmr.msra.gmra.mrb[4].mxu1 %vm362_vm9, %v724_v30 }
 0x249   :  { %1387 = vmatprep.mubr.bf16.mxu1 %v1680_v11 }
 0x2a0   :  { %v2066_v16 = vpop.permute.xlu1 %1056 }
 0x2a1   :  { %v2070_v18 = vpop.permute.xlu0 %1079 }
 0x2a4   :  { %v2068_v17 = vpop.permute.xlu1 %1102 }
 0x318   :  { %v870_v40 = vpop.f32.mrb[4].mxu0 }
 0x319   :  { %v871_v41 = vadd.f32 %v870_v40, %v729_v39  ;;  %v872_v43 = vpop.f32.mrb[5].mxu0 }
 0x31a   :  { %v873_v44 = vadd.f32 %v872_v43, %v729_v39  ;;  %v874_v49 = vpop.f32.mrb[6].mxu0 }
 0x31b   :  { %v918_v50 = vmul.f32 %v871_v41, %v1902_v3  ;;  %v875_v51 = vpop.f32.mrb[7].mxu0  ;;  %v911_v52 = vpop.f32.mrb[4].mxu1 }
 0x31c   :  { %v919_v53 = vmul.f32 %v873_v44, %v1906_v9  ;;  %v912_v54 = vadd.f32 %v911_v52, %v729_v39  ;;  %v913_v55 = vpop.f32.mrb[5].mxu1 }
 0x31d   :  { %v928_v56 = vadd.f32 %v924_v42, %v918_v50  ;;  %v914_v57 = vadd.f32 %v913_v55, %v729_v39  ;;  %v915_v59 = vpop.f32.mrb[6].mxu1 }
 0x31e   :  { %v929_v60 = vadd.f32 %v925_v48, %v919_v53  ;;  %v920_v61 = vmul.f32 %v912_v54, %v1904_v4  ;;  %v916_v7 = vpop.f32.mrb[7].mxu1 }
 0x31f   :  { %v921_v62 = vmul.f32 %v914_v57, %v1908_v10 }
 0x320   :  { %v2019_v63 = vpack.c.bf16 %v929_v60, %v928_v56  ;;  %v930_v0 = vadd.f32 %v926_v45, %v920_v61 }
 0x321   :  { %v931_v1 = vadd.f32 %v927_v58, %v921_v62 }
 0x322   :  { %948 = vst [vmem:[#allocation3 + $0x4] sm:$0xff] %v2019_v63 }
 0x323   :  { %v2022_v2 = vpack.c.bf16 %v931_v1, %v930_v0 }
 0x325   :  { %949 = vst [vmem:[#allocation3 + $0xc] sm:$0xff] %v2022_v2 }
 0x329   :  { %v950_v5 = vld [vmem:[#allocation3] sm:$0xff] }
 0x32a   :  { %956 = vrot.lane.b32.xlu1 %v950_v5, %s1673_s8 }
 0x32c   :  { %v952_v6 = vld [vmem:[#allocation3 + $0x10] sm:$0xf]  ;;  %v951_v36 = vld [vmem:[#allocation3 + $0x8] sm:$0xff] }
 0x32d   :  { %958 = vrot.lane.b32.xlu0 %v951_v36, %s1673_s8  ;;  %v975_v46 = vld [vmem:[#allocation3 + $0x10] sm:$0xf] }
 0x32e   :  { %960 = vrot.lane.b32.xlu1 %v952_v6, %s1673_s8  ;;  %v998_v8 = vld [vmem:[#allocation3 + $0x10] sm:$0xf] }
 0x32f   :  { %v1021_v35 = vld [vmem:[#allocation3 + $0x10] sm:$0xf] }
 0x331   :  { %979 = vrot.lane.b32.xlu0 %v950_v5, %s1674_s20 }
 0x332   :  { %981 = vrot.lane.b32.xlu1 %v951_v36, %s1674_s20 }
 0x335   :  { %983 = vrot.lane.b32.xlu0 %v975_v46, %s1674_s20 }
 0x336   :  { %1002 = vrot.lane.b32.xlu1 %v950_v5, %s1675_s23 }
 0x339   :  { %1004 = vrot.lane.b32.xlu0 %v951_v36, %s1675_s23 }
 0x33a   :  { %1006 = vrot.lane.b32.xlu1 %v998_v8, %s1675_s23 }
 0x33d   :  { %1025 = vrot.lane.b32.xlu0 %v950_v5, %s1676_s26 }
 0x33e   :  { %1027 = vrot.lane.b32.xlu1 %v951_v36, %s1676_s26  ;;  %v1060_v36 = vrot.slane %v2066_v16, 4 }
 0x341   :  { %1029 = vrot.lane.b32.xlu0 %v1021_v35, %s1676_s26 }
 0x342   :  { %1052 = vrot.lane.b32.xlu1 %v2019_v63, %s1677_s12 }
 0x345   :  { %1054 = vrot.lane.b32.xlu0 %v2022_v2, %s1677_s12 }
 0x346   :  { %1077 = vrot.lane.b32.xlu1 %v2022_v2, %s1678_s15 }
 0x349   :  { %1075 = vrot.lane.b32.xlu0 %v2019_v63, %s1678_s15 }
 0x34a   :  { %1098 = vrot.lane.b32.xlu1 %v2019_v63, %s1679_s18 }
 0x34d   :  { %1100 = vrot.lane.b32.xlu0 %v2022_v2, %s1679_s18 }
 0x34e   :  { %1123 = vrot.lane.b32.xlu1 %v2022_v2, %s1681_s24 }
 0x351   :  { %1121 = vrot.lane.b32.xlu0 %v2019_v63, %s1681_s24 }
 0x352   :  { %1166 = vperm.xlu1 %1655, %v1160_v15  }
 0x355   :  { %1125 = vrot.lane.b32.xlu0 %v1117_v12, %s1681_s24 }
 0x356   :  { %1176 = vperm.xlu1 %1655, %v1162_v47  }
 0x359   :  { %1171 = vperm.xlu0 %1654, %v1161_v13  }
 0x35d   :  { %1181 = vperm.xlu0 %1654, %v1163_v14  }
 0x39c   :  { %v957_v19 = vpop.permute.xlu1 %956 }
 0x39d   :  { %v962_v23 = vrot.slane %v957_v19, 4 }
 0x39f   :  { %v959_v20 = vpop.permute.xlu0 %958 }
 0x3a0   :  { %v961_v21 = vpop.permute.xlu1 %960  ;;  %v963_v22 = vrot.slane %v959_v20, 4 }
 0x3a1   :  { %v964_v25 = vrot.slane %v961_v21, 4 }
 0x3a2   :  { %v965_v28 = vsel %vm65_vm0, %v962_v23, %v963_v22 }
 0x3a3   :  { %v980_v24 = vpop.permute.xlu0 %979  ;;  %v967_v32 = vsel %vm65_vm0, %v963_v22, %v964_v25  ;;  %v966_v37 = vsel %vm67_vm1, %v957_v19, %v965_v28  ;;  %v1083_v28 = vrot.slane %v2070_v18, 4 }
 0x3a4   :  { %v985_v26 = vrot.slane %v980_v24, 4  ;;  %v982_v27 = vpop.permute.xlu1 %981  ;;  %v968_v43 = vsel %vm67_vm1, %v959_v20, %v967_v32 }
 0x3a5   :  { %v986_v29 = vrot.slane %v982_v27, 4 }
 0x3a7   :  { %v988_v30 = vsel %vm65_vm0, %v985_v26, %v986_v29  ;;  %v984_v31 = vpop.permute.xlu0 %983 }
 0x3a8   :  { %v987_v33 = vrot.slane %v984_v31, 4  ;;  %v1003_v34 = vpop.permute.xlu1 %1002  ;;  %v989_v38 = vsel %vm91_vm2, %v980_v24, %v988_v30 }
 0x3a9   :  { %v1597_v39 = vcombine.low %v966_v37, %v989_v38  ;;  %v1598_v40 = vcombine.high %v966_v37, %v989_v38  ;;  %v1008_v52 = vrot.slane %v1003_v34, 4 }
 0x3aa   :  { %v990_v41 = vsel %vm65_vm0, %v986_v29, %v987_v33  ;;  %v1106_v33 = vrot.slane %v2068_v17, 4 }
 0x3ab   :  { %1302 = vmatprep.subr.bf16.mxu0 %v1598_v40  ;;  %v1005_v42 = vpop.permute.xlu0 %1004  ;;  %v991_v44 = vsel %vm91_vm2, %v982_v27, %v990_v41 }
 0x3ac   :  { %1303 = vmatpush1.bf16.msra.mxu0 %v1597_v39  ;;  %v1007_v48 = vpop.permute.xlu1 %1006  ;;  %v1599_v49 = vcombine.low %v968_v43, %v991_v44  ;;  %v1600_v50 = vcombine.high %v968_v43, %v991_v44  ;;  %v1009_v51 = vrot.slane %v1005_v42, 4 }
 0x3ad   :  { %v1010_v54 = vrot.slane %v1007_v48, 4 }
 0x3ae   :  { %1355 = vmatprep.subr.bf16.mxu1 %v1600_v50  ;;  %v1011_v56 = vsel %vm65_vm0, %v1008_v52, %v1009_v51 }
 0x3af   :  { %v1026_v53 = vpop.permute.xlu0 %1025  ;;  %1356 = vmatpush1.bf16.msra.mxu1 %v1599_v49  ;;  %v1013_v60 = vsel %vm65_vm0, %v1009_v51, %v1010_v54  ;;  %v1012_v62 = vsel %vm115_vm3, %v1003_v34, %v1011_v56 }
 0x3b0   :  { %v1031_v45 = vrot.slane %v1026_v53, 4  ;;  %v1028_v55 = vpop.permute.xlu1 %1027  ;;  %v1014_v8 = vsel %vm115_vm3, %v1005_v42, %v1013_v60  ;;  %v1656_v60 = vld [vmem:[%s2192_s6] sm:$0xff]  }
 0x3b1   :  { %v1032_v57 = vrot.slane %v1028_v55, 4 }
 0x3b3   :  { %v1034_v58 = vsel %vm65_vm0, %v1031_v45, %v1032_v57  ;;  %v1030_v59 = vpop.permute.xlu0 %1029 }
 0x3b4   :  { %v1033_v61 = vrot.slane %v1030_v59, 4  ;;  %v1053_v7 = vpop.permute.xlu1 %1052  ;;  %v1035_v0 = vsel %vm139_vm4, %v1026_v53, %v1034_v58 }
 0x3b5   :  { %v1601_v1 = vcombine.low %v1012_v62, %v1035_v0  ;;  %v1602_v5 = vcombine.high %v1012_v62, %v1035_v0  ;;  %v1058_v12 = vrot.slane %v1053_v7, 4  ;;  %v1657_v0 = vld [vmem:[%s2192_s6 + $0x8] sm:$0xff]  }
 0x3b6   :  { %v1036_v6 = vsel %vm65_vm0, %v1032_v57, %v1033_v61 }
 0x3b7   :  { %1304 = vmatprep.subr.bf16.mxu0 %v1602_v5  ;;  %v1055_v46 = vpop.permute.xlu0 %1054  ;;  %v1037_v35 = vsel %vm139_vm4, %v1028_v55, %v1036_v6 }
 0x3b8   :  { %v1059_v13 = vrot.slane %v1055_v46, 4  ;;  %1305 = vmatpush1.bf16.msra.mxu0 %v1601_v1  ;;  %v1078_v14 = vpop.permute.xlu1 %1077  ;;  %v1603_v15 = vcombine.low %v1014_v8, %v1037_v35  ;;  %v1604_v47 = vcombine.high %v1014_v8, %v1037_v35  ;;  %v2127_v35 = vstv %s1623_s19 }
 0x3b9   :  { %v1082_v16 = vrot.slane %v1078_v14, 4 }
 0x3ba   :  { %v1061_v19 = vsel %vm65_vm0, %v1058_v12, %v1059_v13  ;;  %v1063_v20 = vsel %vm65_vm0, %v1059_v13, %v1060_v36  ;;  %1357 = vmatprep.subr.bf16.mxu1 %v1604_v47 }
 0x3bb   :  { %v1064_v21 = vsel %vm167_vm5, %v1055_v46, %v1063_v20  ;;  %v1076_v22 = vpop.permute.xlu0 %1075  ;;  %1358 = vmatpush1.bf16.msra.mxu1 %v1603_v15  ;;  %v1062_v23 = vsel %vm167_vm5, %v1053_v7, %v1061_v19  ;;  %v1086_v31 = vsel %vm65_vm0, %v1082_v16, %v1083_v28 }
 0x3bc   :  { %v1607_v24 = vcombine.low %v2022_v2, %v1064_v21  ;;  %v1608_v25 = vcombine.high %v2022_v2, %v1064_v21  ;;  %v1081_v26 = vrot.slane %v1076_v22, 4  ;;  %v1099_v27 = vpop.permute.xlu1 %1098  ;;  %v1605_v29 = vcombine.low %v2019_v63, %v1062_v23 }
 0x3bd   :  { %v1606_v30 = vcombine.high %v2019_v63, %v1062_v23  ;;  %v1104_v37 = vrot.slane %v1099_v27, 4  ;;  %v1087_v18 = vsel %vm191_vm6, %v1078_v14, %v1086_v31 }
 0x3be   :  { %1359 = vmatprep.subr.bf16.mxu1 %v1608_v25  ;;  %v1084_v34 = vsel %vm65_vm0, %v1081_v26, %v1082_v16 }
 0x3bf   :  { %1306 = vmatprep.subr.bf16.mxu0 %v1606_v30  ;;  %v1101_v32 = vpop.permute.xlu0 %1100  ;;  %1360 = vmatpush1.bf16.msra.mxu1 %v1607_v24  ;;  %v1085_v40 = vsel %vm191_vm6, %v1076_v22, %v1084_v34 }
 0x3c0   :  { %v1105_v2 = vrot.slane %v1101_v32, 4  ;;  %1307 = vmatpush1.bf16.msra.mxu0 %v1605_v29  ;;  %v1124_v38 = vpop.permute.xlu1 %1123 }
 0x3c1   :  { %v1128_v42 = vrot.slane %v1124_v38, 4 }
 0x3c2   :  { %v1107_v39 = vsel %vm65_vm0, %v1104_v37, %v1105_v2  ;;  %v1109_v63 = vsel %vm65_vm0, %v1105_v2, %v1106_v33 }
 0x3c3   :  { %v1110_v41 = vsel %vm215_vm7, %v1101_v32, %v1109_v63  ;;  %v1122_v43 = vpop.permute.xlu0 %1121  ;;  %v1108_v17 = vsel %vm215_vm7, %v1099_v27, %v1107_v39 }
 0x3c4   :  { %v1611_v44 = vcombine.low %v1087_v18, %v1110_v41  ;;  %v1612_v48 = vcombine.high %v1087_v18, %v1110_v41  ;;  %v1127_v49 = vrot.slane %v1122_v43, 4  ;;  %v1609_v50 = vcombine.low %v1085_v40, %v1108_v17 }
 0x3c5   :  { %v1610_v51 = vcombine.high %v1085_v40, %v1108_v17 }
 0x3c6   :  { %v1130_v52 = vsel %vm65_vm0, %v1127_v49, %v1128_v42  ;;  %1361 = vmatprep.subr.bf16.mxu1 %v1612_v48 }
 0x3c7   :  { %v1131_v53 = vsel %vm239_vm8, %v1122_v43, %v1130_v52  ;;  %1308 = vmatprep.subr.bf16.mxu0 %v1610_v51  ;;  %v1126_v54 = vpop.permute.xlu0 %1125  ;;  %1362 = vmatpush1.bf16.msra.mxu1 %v1611_v44 }
 0x3c8   :  { %v1613_v45 = vcombine.low %v1131_v53, %v1131_v53  ;;  %v1614_v55 = vcombine.high %v1131_v53, %v1131_v53  ;;  %v1129_v56 = vrot.slane %v1126_v54, 4  ;;  %1309 = vmatpush1.bf16.msra.mxu0 %v1609_v50 }
 0x3ca   :  { %v1132_v57 = vsel %vm65_vm0, %v1128_v42, %v1129_v56  ;;  %1617 = vmatprep.subr.msk.bf16.mxu0 %vm65_vm0, %v1614_v55  ;;  %v1291_v58 = vsel %vm65_vm0, %v1613_v45, 0 }
 0x3cb   :  { %v1133_v59 = vsel %vm239_vm8, %v1124_v38, %v1132_v57 }
 0x3cc   :  { %1311 = vmatpush1.bf16.msra.mxu0 %v1291_v58  ;;  %v1616_v61 = vcombine.high %v1133_v59, %v1133_v59  ;;  %v1615_v7 = vcombine.low %v1133_v59, %v1133_v59 }
 0x3ce   :  { %1620 = vmatprep.subr.msk.bf16.mxu1 %vm65_vm0, %v1616_v61  ;;  %v1297_v62 = vsel %vm65_vm0, %v1615_v7, 0 }
 0x3cf   :  { %1618 = vmatmul.mubr.msk.bf16.vlgmr.msra.gmra.mrb[8].mxu0 %vm362_vm9, %v1656_v60  ;;  %1364 = vmatpush1.bf16.msra.mxu1 %v1297_v62 }
 0x3d0   :  { %1344 = vmatprep.mubr.bf16.mxu0 %v1680_v11 }
 0x3d1   :  { %v1167_v1 = vpop.permute.xlu1 %1166 }
 0x3d2   :  { %1621 = vmatmul.mubr.msk.bf16.vlgmr.msra.gmra.mrb[8].mxu1 %vm362_vm9, %v1656_v60 }
 0x3d3   :  { %1397 = vmatprep.mubr.bf16.mxu1 %v1680_v11 }
 0x3d5   :  { %v1177_v37 = vpop.permute.xlu1 %1176 }
 0x3d7   :  { %1619 = vmatmul.mubr.msk.bf16.gmra.mrb[12].mxu0 %vm362_vm9, %v1657_v0 }
 0x3d8   :  { %v1172_v46 = vpop.permute.xlu0 %1171 }
 0x3da   :  { %1622 = vmatmul.mubr.msk.bf16.gmra.mrb[12].mxu1 %vm362_vm9, %v1657_v0 }
 0x3dc   :  { %v1182_v63 = vpop.permute.xlu0 %1181 }
 0x4a2   :  { %v1336_v5 = vpop.f32.mrb[8].mxu0 }
 0x4a3   :  { %v1338_v6 = vpop.f32.mrb[9].mxu0  ;;  %v1337_v36 = vadd.f32 %v1336_v5, %v1167_v1 }
 0x4a4   :  { %v1340_v8 = vpop.f32.mrb[10].mxu0  ;;  %v1339_v12 = vadd.f32 %v1338_v6, %v1167_v1 }
 0x4a5   :  { %v1341_v13 = vadd.f32 %v1340_v8, %v1172_v46  ;;  %v1408_v14 = vmul.f32 %v1337_v36, %v1902_v3  ;;  %v1342_v15 = vpop.f32.mrb[11].mxu0  ;;  %v1389_v47 = vpop.f32.mrb[8].mxu1 }
 0x4a6   :  { %v1409_v11 = vmul.f32 %v1339_v12, %v1906_v9  ;;  %v1343_v19 = vadd.f32 %v1342_v15, %v1172_v46  ;;  %v1390_v20 = vadd.f32 %v1389_v47, %v1167_v1  ;;  %v1391_v21 = vpop.f32.mrb[9].mxu1 }
 0x4a7   :  { %v1412_v16 = vmul.f32 %v1341_v13, %v1902_v3  ;;  %vm1425_vm14 = vcmp.ge.f32.partialorder %v1408_v14, 0.0  ;;  %v1442_v22 = vmul.f32 %v2127_v35, %v1408_v14  ;;  %v1392_v23 = vadd.f32 %v1391_v21, %v1167_v1  ;;  %v1393_v24 = vpop.f32.mrb[10].mxu1 }
 0x4a8   :  { %vm1426_vm15 = vcmp.ge.f32.partialorder %v1409_v11, 0.0  ;;  %v1443_v25 = vmul.f32 %v2127_v35, %v1409_v11  ;;  %v1413_v26 = vmul.f32 %v1343_v19, %v1906_v9  ;;  %v1410_v27 = vmul.f32 %v1390_v20, %v1904_v4  ;;  %v1395_v28 = vpop.f32.mrb[11].mxu1 }
 0x4a9   :  { %vm1429_vm0 = vcmp.ge.f32.partialorder %v1412_v16, 0.0  ;;  %v1446_v29 = vmul.f32 %v2127_v35, %v1412_v16  ;;  %v1458_v30 = vsel %vm1425_vm14, %v1408_v14, %v1442_v22  ;;  %v1411_v31 = vmul.f32 %v1392_v23, %v1908_v10 }
 0x4aa   :  { %v1459_v32 = vsel %vm1426_vm15, %v1409_v11, %v1443_v25  ;;  %vm1430_vm1 = vcmp.ge.f32.partialorder %v1413_v26, 0.0  ;;  %v1447_v33 = vmul.f32 %v2127_v35, %v1413_v26  ;;  %vm1427_vm2 = vcmp.ge.f32.partialorder %v1410_v27, 0.0  ;;  %v1346_v34 = vpop.f32.mrb[12].mxu0 }
 0x4ab   :  { %v1462_v2 = vsel %vm1429_vm0, %v1412_v16, %v1446_v29  ;;  %v1636_v38 = vpack.c.bf16 %v1459_v32, %v1458_v30  ;;  %v1444_v18 = vmul.f32 %v2127_v35, %v1410_v27  ;;  %vm1428_vm3 = vcmp.ge.f32.partialorder %v1411_v31, 0.0  ;;  %v1348_v39 = vpop.f32.mrb[13].mxu0 }
 0x4ac   :  { %v1463_v40 = vsel %vm1430_vm1, %v1413_v26, %v1447_v33  ;;  %v1445_v41 = vmul.f32 %v2127_v35, %v1411_v31  ;;  %v1394_v42 = vadd.f32 %v1393_v24, %v1172_v46  ;;  %v1396_v43 = vadd.f32 %v1395_v28, %v1172_v46  ;;  %v1350_v17 = vpop.f32.mrb[14].mxu0 }
 0x4ad   :  { %1526 = vst [vmem:[%s2195_s9 + $0x4] sm:$0xff] %v1636_v38  ;;  %v1638_v44 = vpack.c.bf16 %v1463_v40, %v1462_v2  ;;  %v1460_v48 = vsel %vm1427_vm2, %v1410_v27, %v1444_v18  ;;  %v1347_v49 = vadd.f32 %v1346_v34, %v1177_v37  ;;  %v1349_v50 = vadd.f32 %v1348_v39, %v1177_v37  ;;  %v1352_v51 = vpop.f32.mrb[15].mxu0  ;;  %v1399_v52 = vpop.f32.mrb[12].mxu1 }
 0x4ae   :  { %v1461_v53 = vsel %vm1428_vm3, %v1411_v31, %v1445_v41  ;;  %v1414_v54 = vmul.f32 %v1394_v42, %v1904_v4  ;;  %v1415_v45 = vmul.f32 %v1396_v43, %v1908_v10  ;;  %v1351_v55 = vadd.f32 %v1350_v17, %v1182_v63  ;;  %v1401_v56 = vpop.f32.mrb[13].mxu1 }
 0x4af   :  { %1528 = vst [vmem:[%s2195_s9 + $0x1c] sm:$0xff] %v1638_v44  ;;  %v1637_v57 = vpack.c.bf16 %v1461_v53, %v1460_v48  ;;  %v1416_v58 = vmul.f32 %v1347_v49, %v1902_v3  ;;  %v1417_v59 = vmul.f32 %v1349_v50, %v1906_v9  ;;  %v1353_v60 = vadd.f32 %v1352_v51, %v1182_v63  ;;  %v1403_v61 = vpop.f32.mrb[14].mxu1 }
 0x4b0   :  { %vm1431_vm4 = vcmp.ge.f32.partialorder %v1414_v54, 0.0  ;;  %v1448_v7 = vmul.f32 %v2127_v35, %v1414_v54  ;;  %vm1432_vm5 = vcmp.ge.f32.partialorder %v1415_v45, 0.0  ;;  %v1449_v62 = vmul.f32 %v2127_v35, %v1415_v45  ;;  %v1405_v0 = vpop.f32.mrb[15].mxu1 }
 0x4b1   :  { %1527 = vst [vmem:[%s2195_s9 + $0xc] sm:$0xff] %v1637_v57  ;;  %vm1433_vm6 = vcmp.ge.f32.partialorder %v1416_v58, 0.0  ;;  %vm1434_vm7 = vcmp.ge.f32.partialorder %v1417_v59, 0.0  ;;  %v1450_v1 = vmul.f32 %v2127_v35, %v1416_v58  ;;  %v1451_v5 = vmul.f32 %v2127_v35, %v1417_v59 }
 0x4b2   :  { %v1464_v6 = vsel %vm1431_vm4, %v1414_v54, %v1448_v7  ;;  %v1465_v36 = vsel %vm1432_vm5, %v1415_v45, %v1449_v62  ;;  %v1420_v46 = vmul.f32 %v1351_v55, %v1902_v3  ;;  %v1421_v8 = vmul.f32 %v1353_v60, %v1906_v9 }
 0x4b3   :  { %v1639_v12 = vpack.c.bf16 %v1465_v36, %v1464_v6  ;;  %v1466_v13 = vsel %vm1433_vm6, %v1416_v58, %v1450_v1  ;;  %v1467_v14 = vsel %vm1434_vm7, %v1417_v59, %v1451_v5  ;;  %v1400_v15 = vadd.f32 %v1399_v52, %v1177_v37 }
 0x4b4   :  { %v1640_v47 = vpack.c.bf16 %v1467_v14, %v1466_v13  ;;  %vm1437_vm8 = vcmp.ge.f32.partialorder %v1420_v46, 0.0  ;;  %v1454_v11 = vmul.f32 %v2127_v35, %v1420_v46  ;;  %vm1438_vm9 = vcmp.ge.f32.partialorder %v1421_v8, 0.0 }
 0x4b5   :  { %1529 = vst [vmem:[%s2195_s9 + $0x24] sm:$0xff] %v1639_v12  ;;  %v1455_v19 = vmul.f32 %v2127_v35, %v1421_v8  ;;  %v1418_v20 = vmul.f32 %v1400_v15, %v1904_v4  ;;  %v1402_v3 = vadd.f32 %v1401_v56, %v1177_v37  ;;  %v1404_v21 = vadd.f32 %v1403_v61, %v1182_v63 }
 0x4b6   :  { %1530 = vst [vmem:[%s2195_s9 + $0x34] sm:$0xff] %v1640_v47  ;;  %v1470_v9 = vsel %vm1437_vm8, %v1420_v46, %v1454_v11  ;;  %v1406_v16 = vadd.f32 %v1405_v0, %v1182_v63 }
 0x4b7   :  { %v1471_v22 = vsel %vm1438_vm9, %v1421_v8, %v1455_v19  ;;  %vm1435_vm10 = vcmp.ge.f32.partialorder %v1418_v20, 0.0  ;;  %v1452_v23 = vmul.f32 %v2127_v35, %v1418_v20  ;;  %v1419_v24 = vmul.f32 %v1402_v3, %v1908_v10 }
 0x4b8   :  { %v1642_v25 = vpack.c.bf16 %v1471_v22, %v1470_v9  ;;  %v1422_v26 = vmul.f32 %v1404_v21, %v1904_v4  ;;  %v1423_v27 = vmul.f32 %v1406_v16, %v1908_v10 }
 0x4b9   :  { %v1468_v28 = vsel %vm1435_vm10, %v1418_v20, %v1452_v23  ;;  %vm1436_vm11 = vcmp.ge.f32.partialorder %v1419_v24, 0.0  ;;  %v1453_v29 = vmul.f32 %v2127_v35, %v1419_v24 }
 0x4ba   :  { %1532 = vst [vmem:[%s2195_s9 + $0x4c] sm:$0xff] %v1642_v25  ;;  %vm1439_vm12 = vcmp.ge.f32.partialorder %v1422_v26, 0.0  ;;  %v1456_v30 = vmul.f32 %v2127_v35, %v1422_v26  ;;  %vm1440_vm13 = vcmp.ge.f32.partialorder %v1423_v27, 0.0  ;;  %v1457_v31 = vmul.f32 %v2127_v35, %v1423_v27 }
 0x4bb   :  { %v1469_v32 = vsel %vm1436_vm11, %v1419_v24, %v1453_v29 }
 0x4bc   :  { %v1641_v33 = vpack.c.bf16 %v1469_v32, %v1468_v28  ;;  %v1472_v34 = vsel %vm1439_vm12, %v1422_v26, %v1456_v30  ;;  %v1473_v4 = vsel %vm1440_vm13, %v1423_v27, %v1457_v31 }
 0x4bd   :  { %v1643_v37 = vpack.c.bf16 %v1473_v4, %v1472_v34 }
 0x4be   :  { %1531 = vst [vmem:[%s2195_s9 + $0x3c] sm:$0xff] %v1641_v33 }
 0x4bf   :  { %1533 = vst [vmem:[%s2195_s9 + $0x54] sm:$0xff] %v1643_v37 }
 0x4c0   :  { %1542 = vsyncpa [#allocation5], 1 }

// kernel: rbpn_forward.44
= control target key start
LH: loop header
LB: loop body
LE: loop exit
PB: predicated region body
PF: predicated region fallthrough
CT: control target
= control target key end

     0   :  { %15 = vsyncpa [#allocation6], 0  ;;  %s2912_s0 = inlined_call_operand.vmem [shape: bf16[8,1024], index: 0, kind: input, shape index: {}]   ;;  %s2913_s1 = inlined_call_operand.vmem [shape: f32[1,768], index: 1, kind: input, shape index: {}]   ;;  %s2914_s2 = inlined_call_operand.vmem [shape: bf16[8,1024], index: 2, kind: input, shape index: {}]   ;;  %s2915_s3 = inlined_call_operand.vmem [shape: bf16[8,72], index: 3, kind: input, shape index: {}]   ;;  %s2916_s4 = inlined_call_operand.vmem [shape: f32[8,1], index: 4, kind: input, shape index: {}]   ;;  %s2917_s5 = inlined_call_operand.vmem [shape: bf16[8,72], index: 5, kind: input, shape index: {}]   ;;  %s2918_s6 = inlined_call_operand.vmem [shape: f32[8,1], index: 6, kind: input, shape index: {}]   ;;  %s2919_s7 = inlined_call_operand.vmem [shape: bf16[8,72], index: 7, kind: input, shape index: {}]   ;;  %s2920_s8 = inlined_call_operand.vmem [shape: f32[8,1], index: 8, kind: input, shape index: {}]   ;;  %s2921_s9 = inlined_call_operand.vmem [shape: f32[3], index: 9, kind: input, shape index: {}]   ;;  %s2922_s10 = inlined_call_operand.vmem [shape: bf16[8,1024], index: 10, kind: output, shape index: {}]  }
   0x1   :  { %s40_s15 = sshll.u32 %s2921_s9, 4  ;;  %s41_s15 = int_to_ptr.vmem [resolvable:$true] %s40_s15 }
   0x2   :  { %s2152_s16 = scalar_lea.vmem %s41_s15, 16  ;;  %p2157_p1 = scmp.lt.s32.totalorder %s41_s15, %s41_s15 }
   0x3   :  { %p2153_p0 = scmp.ne.s32.totalorder %s41_s15, %s2152_s16  ;;  %p2158_p2 = scmp.lt.s32.totalorder %s2152_s16, %s2152_s16 }
   0x5   :  { %p2159_p3 = por %p2158_p2, %p2157_p1 }
   0x7   :  { %p2160_p4 = pnand %p2159_p3, %p2153_p0 }
   0x9   :  { %2163 = shalt.err (!%p2160_p4)
}
   0xa   :  { %s2166_s17 = smov [#allocation5]  }
   0xb   :  { %43 = dma.vmem_to_smem %s41_s15, 16, %s2166_s17, [#allocation6]  }
   0xc   :  { %2164 = dma.done.wait [#allocation6], 16  }
   0xd   :  { %2165 = vsyncadd [#allocation6], 4294967280 }
   0xe   :  { %47 = sfence }
   0xf   :  { %v50_v0 = vld [vmem:[%s2912_s0] sm:$0xff]  ;;  %v51_v2 = vld [vmem:[%s2912_s0 + $0x8] sm:$0xff]  ;;  %v52_v5 = vld [vmem:[%s2912_s0 + $0x10] sm:$0xff]  ;;  %s2167_s13 = smov 18   ;;  %s2168_s14 = smov 19   ;;  %v2175_v15 = vmov 0  }
  0x10   :  { %v54_v1 = vld [vmem:[%s2914_s2] sm:$0xff]  ;;  %v55_v4 = vld [vmem:[%s2914_s2 + $0x8] sm:$0xff]  ;;  %v56_v6 = vld [vmem:[%s2914_s2 + $0x10] sm:$0xff]  ;;  %s2169_s15 = smov 17   ;;  %s2171_s16 = smov 127   ;;  %565 = vmatprep.mubr.bf16.mxu0 %v2175_v15  ;;  %1979 = vst [vmem:[%s2922_s10] sm:$0xf] %v2175_v15  ;;  %606 = vmatprep.mubr.bf16.mxu1 %v2175_v15 }
  0x11   :  { %v58_v3 = vsub.bf16 %v50_v0, %v54_v1  ;;  %v59_v7 = vsub.bf16 %v51_v2, %v55_v4  ;;  %v60_v8 = vsub.bf16 %v52_v5, %v56_v6  ;;  %v53_v9 = vld [vmem:[%s2912_s0 + $0x18] sm:$0xff]  ;;  %s2172_s17 = smov 111   ;;  %s2173_s18 = smov 110   ;;  %2007 = vst [vmem:[%s2922_s10 + $0x1c] sm:$0xf] %v2175_v15  ;;  %66 = vst [vmem:[#allocation3] sm:$0xff] %v2175_v15  ;;  %2150 = vset.pattern.permute.xlu0 %v2175_v15 }
  0x12   :  { %v57_v10 = vld [vmem:[%s2914_s2 + $0x18] sm:$0xff]  ;;  %s2170_s2 = smov 1   ;;  %s2174_s19 = smov 109   ;;  %67 = vst [vmem:[#allocation3 + $0x8] sm:$0xff] %v2175_v15  ;;  %68 = vst [vmem:[#allocation3 + $0x10] sm:$0xff] %v2175_v15  ;;  %2151 = vset.pattern.permute.xlu1 %v2175_v15  ;;  %v369_v24 = vld [vmem:[%s2916_s4] sm:$0xff] }
  0x13   :  { %62 = vst [vmem:[#allocation4] sm:$0xff] %v58_v3  ;;  %112 = vrot.lane.b32.xlu1 %v58_v3, %s2167_s13  ;;  %78 = vrot.lane.b32.xlu0 %v58_v3, %s2168_s14  ;;  %v61_v11 = vsub.bf16 %v53_v9, %v57_v10  ;;  %63 = vst [vmem:[#allocation4 + $0x8] sm:$0xff] %v59_v7  ;;  %vm90_vm0 = vcmask 1043456   ;;  %vm92_vm1 = vcmask 154624   ;;  %vm125_vm2 = vcmask 146432  }
  0x14   :  { %64 = vst [vmem:[#allocation4 + $0x10] sm:$0xff] %v60_v8  ;;  %69 = vst [vmem:[#allocation3 + $0x18] sm:$0xff] %v2175_v15  ;;  %vm158_vm3 = vcmask 138240   ;;  %vm191_vm4 = vcmask 7168   ;;  %vm230_vm5 = vcmask 1039360   ;;  %vm263_vm6 = vcmask 908288  }
  0x15   :  { %65 = vst [vmem:[#allocation4 + $0x18] sm:$0xff] %v61_v11  ;;  %vm296_vm7 = vcmask 900096   ;;  %vm329_vm8 = vcmask 891904   ;;  %vm510_vm9 = vcmask 588800  }
  0x17   :  { %114 = vrot.lane.b32.xlu1 %v59_v7, %s2167_s13  ;;  %80 = vrot.lane.b32.xlu0 %v59_v7, %s2168_s14 }
  0x1a   :  { %v2268_v13 = vld [vmem:[#allocation4 + $0x4] sm:$0xff] }
  0x1b   :  { %147 = vrot.lane.b32.xlu1 %v59_v7, %s2169_s15  ;;  %145 = vrot.lane.b32.xlu0 %v58_v3, %s2169_s15  ;;  %v2266_v12 = vld [vmem:[#allocation4 + $0xc] sm:$0xff] }
  0x1c   :  { %v73_v14 = vld [vmem:[#allocation4 + $0x18] sm:$0xf]  ;;  %v212_v19 = vld [vmem:[#allocation4 + $0x1c] sm:$0xf] }
  0x1d   :  { %v107_v16 = vld [vmem:[#allocation4 + $0x18] sm:$0xf]  ;;  %v245_v21 = vld [vmem:[#allocation4 + $0x1c] sm:$0xf] }
  0x1e   :  { %v140_v17 = vld [vmem:[#allocation4 + $0x18] sm:$0xf]  ;;  %v278_v22 = vld [vmem:[#allocation4 + $0x1c] sm:$0xf] }
  0x1f   :  { %180 = vrot.lane.b32.xlu1 %v59_v7, %s2170_s2  ;;  %178 = vrot.lane.b32.xlu0 %v58_v3, %s2170_s2  ;;  %v173_v18 = vld [vmem:[#allocation4 + $0x18] sm:$0xf]  ;;  %v311_v23 = vld [vmem:[#allocation4 + $0x1c] sm:$0xf] }
  0x20   :  { %v2310_v20 = vld [vmem:[#allocation4 + $0x14] sm:$0xff] }
  0x23   :  { %219 = vrot.lane.b32.xlu1 %v2266_v12, %s2171_s16  ;;  %217 = vrot.lane.b32.xlu0 %v2268_v13, %s2171_s16 }
  0x27   :  { %252 = vrot.lane.b32.xlu1 %v2266_v12, %s2172_s17  ;;  %250 = vrot.lane.b32.xlu0 %v2268_v13, %s2172_s17 }
  0x2b   :  { %285 = vrot.lane.b32.xlu1 %v2266_v12, %s2173_s18  ;;  %283 = vrot.lane.b32.xlu0 %v2268_v13, %s2173_s18 }
  0x2f   :  { %318 = vrot.lane.b32.xlu1 %v2266_v12, %s2174_s19  ;;  %316 = vrot.lane.b32.xlu0 %v2268_v13, %s2174_s19 }
  0x33   :  { %84 = vrot.lane.b32.xlu1 %v73_v14, %s2168_s14  ;;  %82 = vrot.lane.b32.xlu0 %v60_v8, %s2168_s14 }
  0x37   :  { %118 = vrot.lane.b32.xlu1 %v107_v16, %s2167_s13  ;;  %116 = vrot.lane.b32.xlu0 %v60_v8, %s2167_s13 }
  0x3b   :  { %151 = vrot.lane.b32.xlu1 %v140_v17, %s2169_s15  ;;  %149 = vrot.lane.b32.xlu0 %v60_v8, %s2169_s15 }
  0x3f   :  { %184 = vrot.lane.b32.xlu1 %v173_v18, %s2170_s2  ;;  %182 = vrot.lane.b32.xlu0 %v60_v8, %s2170_s2 }
  0x43   :  { %223 = vrot.lane.b32.xlu1 %v212_v19, %s2171_s16  ;;  %221 = vrot.lane.b32.xlu0 %v2310_v20, %s2171_s16 }
  0x47   :  { %256 = vrot.lane.b32.xlu1 %v245_v21, %s2172_s17  ;;  %254 = vrot.lane.b32.xlu0 %v2310_v20, %s2172_s17 }
  0x4b   :  { %289 = vrot.lane.b32.xlu1 %v278_v22, %s2173_s18  ;;  %287 = vrot.lane.b32.xlu0 %v2310_v20, %s2173_s18 }
  0x4f   :  { %322 = vrot.lane.b32.xlu1 %v311_v23, %s2174_s19  ;;  %320 = vrot.lane.b32.xlu0 %v2310_v20, %s2174_s19 }
  0x53   :  { %372 = vperm.xlu0 %2150, %v369_v24  }
  0x85   :  { %v113_v25 = vpop.permute.xlu1 %112  ;;  %v79_v26 = vpop.permute.xlu0 %78 }
  0x86   :  { %v120_v27 = vrot.slane %v113_v25, 4  ;;  %v86_v30 = vrot.slane %v79_v26, 4 }
  0x89   :  { %v2327_v28 = vpop.permute.xlu1 %114  ;;  %v2329_v29 = vpop.permute.xlu0 %80 }
  0x8a   :  { %v121_v31 = vrot.slane %v2327_v28, 4  ;;  %v87_v32 = vrot.slane %v2329_v29, 4 }
  0x8c   :  { %v91_v33 = vsel %vm90_vm0, %v86_v30, %v87_v32  ;;  %v124_v34 = vsel %vm90_vm0, %v120_v27, %v121_v31 }
  0x8d   :  { %v2339_v35 = vpop.permute.xlu1 %147  ;;  %v146_v36 = vpop.permute.xlu0 %145  ;;  %v93_v37 = vsel %vm92_vm1, %v79_v26, %v91_v33  ;;  %v126_v38 = vsel %vm125_vm2, %v113_v25, %v124_v34  ;;  %v2390_v33 = vld [vmem:[%s2915_s3] sm:$0xf]  ;;  %s693_s3 = sld [smem:[#allocation5]] }
  0x8e   :  { %v154_v39 = vrot.slane %v2339_v35, 4  ;;  %v153_v40 = vrot.slane %v146_v36, 4  ;;  %v2014_v41 = vcombine.high %v93_v37, %v126_v38  ;;  %v2013_v42 = vcombine.low %v93_v37, %v126_v38 }
  0x90   :  { %533 = vmatprep.subr.bf16.mxu0 %v2014_v41  ;;  %v157_v45 = vsel %vm90_vm0, %v153_v40, %v154_v39 }
  0x91   :  { %v2344_v43 = vpop.permute.xlu1 %180  ;;  %534 = vmatpush1.bf16.msra.mxu0 %v2013_v42  ;;  %v179_v44 = vpop.permute.xlu0 %178  ;;  %v159_v49 = vsel %vm158_vm3, %v146_v36, %v157_v45 }
  0x92   :  { %v187_v46 = vrot.slane %v2344_v43, 4  ;;  %v186_v47 = vrot.slane %v179_v44, 4 }
  0x94   :  { %v190_v48 = vsel %vm90_vm0, %v186_v47, %v187_v46 }
  0x95   :  { %v192_v50 = vsel %vm191_vm4, %v179_v44, %v190_v48  ;;  %v2355_v51 = vpop.permute.xlu1 %219  ;;  %v218_v52 = vpop.permute.xlu0 %217 }
  0x96   :  { %v2019_v53 = vcombine.low %v159_v49, %v192_v50  ;;  %v2020_v54 = vcombine.high %v159_v49, %v192_v50  ;;  %v226_v55 = vrot.slane %v2355_v51, 4  ;;  %v225_v56 = vrot.slane %v218_v52, 4 }
  0x98   :  { %v229_v57 = vsel %vm90_vm0, %v225_v56, %v226_v55  ;;  %535 = vmatprep.subr.bf16.mxu0 %v2020_v54 }
  0x99   :  { %v231_v58 = vsel %vm230_vm5, %v218_v52, %v229_v57  ;;  %v2362_v59 = vpop.permute.xlu1 %252  ;;  %536 = vmatpush1.bf16.msra.mxu0 %v2019_v53  ;;  %v251_v60 = vpop.permute.xlu0 %250 }
  0x9a   :  { %v2025_v61 = vcombine.low %v2268_v13, %v231_v58  ;;  %v2026_v62 = vcombine.high %v2268_v13, %v231_v58  ;;  %v259_v63 = vrot.slane %v2362_v59, 4  ;;  %v258_v0 = vrot.slane %v251_v60, 4 }
  0x9c   :  { %537 = vmatprep.subr.bf16.mxu0 %v2026_v62  ;;  %v262_v3 = vsel %vm90_vm0, %v258_v0, %v259_v63 }
  0x9d   :  { %v2367_v1 = vpop.permute.xlu1 %285  ;;  %538 = vmatpush1.bf16.msra.mxu0 %v2025_v61  ;;  %v284_v2 = vpop.permute.xlu0 %283  ;;  %v264_v7 = vsel %vm263_vm6, %v251_v60, %v262_v3 }
  0x9e   :  { %v292_v4 = vrot.slane %v2367_v1, 4  ;;  %v291_v5 = vrot.slane %v284_v2, 4 }
  0xa0   :  { %v295_v6 = vsel %vm90_vm0, %v291_v5, %v292_v4 }
  0xa1   :  { %v297_v8 = vsel %vm296_vm7, %v284_v2, %v295_v6  ;;  %v2378_v9 = vpop.permute.xlu1 %318  ;;  %v317_v10 = vpop.permute.xlu0 %316 }
  0xa2   :  { %v2031_v11 = vcombine.low %v264_v7, %v297_v8  ;;  %v2032_v13 = vcombine.high %v264_v7, %v297_v8  ;;  %v325_v14 = vrot.slane %v2378_v9, 4  ;;  %v324_v16 = vrot.slane %v317_v10, 4 }
  0xa4   :  { %v328_v17 = vsel %vm90_vm0, %v324_v16, %v325_v14  ;;  %539 = vmatprep.subr.bf16.mxu0 %v2032_v13 }
  0xa5   :  { %v330_v18 = vsel %vm329_vm8, %v317_v10, %v328_v17  ;;  %v85_v19 = vpop.permute.xlu1 %84  ;;  %540 = vmatpush1.bf16.msra.mxu0 %v2031_v11  ;;  %v83_v21 = vpop.permute.xlu0 %82 }
  0xa6   :  { %v2037_v22 = vcombine.low %v330_v18, %v330_v18  ;;  %v2038_v23 = vcombine.high %v330_v18, %v330_v18  ;;  %v89_v24 = vrot.slane %v85_v19, 4  ;;  %v88_v25 = vrot.slane %v83_v21, 4 }
  0xa8   :  { %2043 = vmatprep.subr.msk.bf16.mxu0 %vm90_vm0, %v2038_v23  ;;  %v516_v26 = vsel %vm90_vm0, %v2037_v22, 0  ;;  %v96_v34 = vsel %vm90_vm0, %v88_v25, %v89_v24  ;;  %v94_v38 = vsel %vm90_vm0, %v87_v32, %v88_v25 }
  0xa9   :  { %v119_v27 = vpop.permute.xlu1 %118  ;;  %542 = vmatpush1.bf16.msra.mxu0 %v516_v26  ;;  %v117_v30 = vpop.permute.xlu0 %116  ;;  %v97_v42 = vsel %vm92_vm1, %v83_v21, %v96_v34  ;;  %v95_v48 = vsel %vm92_vm1, %v2329_v29, %v94_v38 }
  0xaa   :  { %v123_v36 = vrot.slane %v119_v27, 4  ;;  %v122_v37 = vrot.slane %v117_v30, 4 }
  0xac   :  { %v129_v40 = vsel %vm90_vm0, %v122_v37, %v123_v36  ;;  %v127_v41 = vsel %vm90_vm0, %v121_v31, %v122_v37  ;;  %2044 = vmatmul.mubr.msk.bf16.vlgmr.msra.gmra.mrb[0].mxu0 %vm510_vm9, %v2390_v33 }
  0xad   :  { %v130_v44 = vsel %vm125_vm2, %v117_v30, %v129_v40  ;;  %v152_v45 = vpop.permute.xlu1 %151  ;;  %v150_v47 = vpop.permute.xlu0 %149  ;;  %v128_v32 = vsel %vm125_vm2, %v2327_v28, %v127_v41  ;;  %647 = vmatprep.mubr.bf16.mxu0 %v2175_v15 }
  0xae   :  { %v2017_v49 = vcombine.low %v97_v42, %v130_v44  ;;  %v2018_v50 = vcombine.high %v97_v42, %v130_v44  ;;  %v156_v31 = vrot.slane %v152_v45, 4  ;;  %v155_v52 = vrot.slane %v150_v47, 4 }
  0xaf   :  { %v2016_v53 = vcombine.high %v95_v48, %v128_v32  ;;  %v2015_v54 = vcombine.low %v95_v48, %v128_v32 }
  0xb0   :  { %615 = vmatprep.subr.bf16.mxu0 %v2018_v50  ;;  %v160_v29 = vsel %vm90_vm0, %v154_v39, %v155_v52  ;;  %v162_v58 = vsel %vm90_vm0, %v155_v52, %v156_v31 }
  0xb1   :  { %574 = vmatprep.subr.bf16.mxu1 %v2016_v53  ;;  %v185_v56 = vpop.permute.xlu1 %184  ;;  %616 = vmatpush1.bf16.msra.mxu0 %v2017_v49  ;;  %v183_v57 = vpop.permute.xlu0 %182  ;;  %v163_v0 = vsel %vm158_vm3, %v150_v47, %v162_v58  ;;  %v161_v39 = vsel %vm158_vm3, %v2339_v35, %v160_v29 }
  0xb2   :  { %v189_v28 = vrot.slane %v185_v56, 4  ;;  %575 = vmatpush1.bf16.msra.mxu1 %v2015_v54  ;;  %v188_v60 = vrot.slane %v183_v57, 4 }
  0xb4   :  { %v193_v61 = vsel %vm90_vm0, %v187_v46, %v188_v60  ;;  %v195_v62 = vsel %vm90_vm0, %v188_v60, %v189_v28  ;;  %v49_v28 = vld [vmem:[%s2913_s1] sm:$0x3f] }
  0xb5   :  { %v196_v2 = vsel %vm191_vm4, %v183_v57, %v195_v62  ;;  %v224_v3 = vpop.permute.xlu1 %223  ;;  %v222_v5 = vpop.permute.xlu0 %221  ;;  %v194_v6 = vsel %vm191_vm4, %v2344_v43, %v193_v61 }
  0xb6   :  { %v2023_v7 = vcombine.low %v163_v0, %v196_v2  ;;  %v2024_v8 = vcombine.high %v163_v0, %v196_v2  ;;  %v228_v10 = vrot.slane %v224_v3, 4  ;;  %v227_v11 = vrot.slane %v222_v5, 4 }
  0xb7   :  { %v2022_v13 = vcombine.high %v161_v39, %v194_v6  ;;  %v2021_v46 = vcombine.low %v161_v39, %v194_v6  ;;  %v700_v39 = vstv %s693_s3 }
  0xb8   :  { %v232_v16 = vsel %vm90_vm0, %v226_v55, %v227_v11  ;;  %v234_v17 = vsel %vm90_vm0, %v227_v11, %v228_v10  ;;  %617 = vmatprep.subr.bf16.mxu0 %v2024_v8 }
  0xb9   :  { %v235_v18 = vsel %vm230_vm5, %v222_v5, %v234_v17  ;;  %576 = vmatprep.subr.bf16.mxu1 %v2022_v13  ;;  %v257_v35 = vpop.permute.xlu1 %256  ;;  %618 = vmatpush1.bf16.msra.mxu0 %v2023_v7  ;;  %v255_v19 = vpop.permute.xlu0 %254  ;;  %v233_v43 = vsel %vm230_vm5, %v2355_v51, %v232_v16 }
  0xba   :  { %v2029_v21 = vcombine.low %v2310_v20, %v235_v18  ;;  %v2030_v22 = vcombine.high %v2310_v20, %v235_v18  ;;  %v261_v23 = vrot.slane %v257_v35, 4  ;;  %577 = vmatpush1.bf16.msra.mxu1 %v2021_v46  ;;  %v260_v24 = vrot.slane %v255_v19, 4 }
  0xbb   :  { %v2028_v55 = vcombine.high %v2266_v12, %v233_v43  ;;  %v2027_v25 = vcombine.low %v2266_v12, %v233_v43 }
  0xbc   :  { %619 = vmatprep.subr.bf16.mxu0 %v2030_v22  ;;  %v265_v51 = vsel %vm90_vm0, %v259_v63, %v260_v24  ;;  %v267_v30 = vsel %vm90_vm0, %v260_v24, %v261_v23 }
  0xbd   :  { %578 = vmatprep.subr.bf16.mxu1 %v2028_v55  ;;  %v290_v26 = vpop.permute.xlu1 %289  ;;  %620 = vmatpush1.bf16.msra.mxu0 %v2029_v21  ;;  %v288_v27 = vpop.permute.xlu0 %287  ;;  %v268_v37 = vsel %vm263_vm6, %v255_v19, %v267_v30  ;;  %v266_v63 = vsel %vm263_vm6, %v2362_v59, %v265_v51 }
  0xbe   :  { %v294_v34 = vrot.slane %v290_v26, 4  ;;  %579 = vmatpush1.bf16.msra.mxu1 %v2027_v25  ;;  %v293_v20 = vrot.slane %v288_v27, 4 }
  0xc0   :  { %v298_v36 = vsel %vm90_vm0, %v292_v4, %v293_v20  ;;  %v300_v12 = vsel %vm90_vm0, %v293_v20, %v294_v34 }
  0xc1   :  { %v301_v38 = vsel %vm296_vm7, %v288_v27, %v300_v12  ;;  %v323_v40 = vpop.permute.xlu1 %322  ;;  %v321_v41 = vpop.permute.xlu0 %320  ;;  %v299_v42 = vsel %vm296_vm7, %v2367_v1, %v298_v36 }
  0xc2   :  { %v2035_v44 = vcombine.low %v268_v37, %v301_v38  ;;  %v2036_v45 = vcombine.high %v268_v37, %v301_v38  ;;  %v327_v47 = vrot.slane %v323_v40, 4  ;;  %v326_v48 = vrot.slane %v321_v41, 4 }
  0xc3   :  { %v2034_v32 = vcombine.high %v266_v63, %v299_v42  ;;  %v2033_v4 = vcombine.low %v266_v63, %v299_v42 }
  0xc4   :  { %v331_v49 = vsel %vm90_vm0, %v325_v14, %v326_v48  ;;  %v333_v50 = vsel %vm90_vm0, %v326_v48, %v327_v47  ;;  %621 = vmatprep.subr.bf16.mxu0 %v2036_v45 }
  0xc5   :  { %v334_v31 = vsel %vm329_vm8, %v321_v41, %v333_v50  ;;  %580 = vmatprep.subr.bf16.mxu1 %v2034_v32  ;;  %622 = vmatpush1.bf16.msra.mxu0 %v2035_v44  ;;  %v332_v59 = vsel %vm329_vm8, %v2378_v9, %v331_v49  ;;  %v657_v9 = vlaneseq }
  0xc6   :  { %v2041_v1 = vcombine.low %v334_v31, %v334_v31  ;;  %v2042_v52 = vcombine.high %v334_v31, %v334_v31  ;;  %581 = vmatpush1.bf16.msra.mxu1 %v2033_v4  ;;  %v2040_v53 = vcombine.high %v332_v59, %v332_v59  ;;  %v2039_v54 = vcombine.low %v332_v59, %v332_v59 }
  0xc7   :  { %v658_v57 = vshrl.u32 %v657_v9, 7 }
  0xc8   :  { %2045 = vmatprep.subr.msk.bf16.mxu1 %vm90_vm0, %v2040_v53  ;;  %2047 = vmatprep.subr.msk.bf16.mxu0 %vm90_vm0, %v2042_v52  ;;  %v522_v14 = vsel %vm90_vm0, %v2039_v54, 0  ;;  %v528_v56 = vsel %vm90_vm0, %v2041_v1, 0 }
  0xc9   :  { %624 = vmatpush1.bf16.msra.mxu0 %v528_v56  ;;  %v659_v29 = vsub.s32 0, %v658_v57  ;;  %v663_v58 = vsub.s32 1, %v658_v57  ;;  %v675_v18 = vsub.s32 4, %v658_v57  ;;  %v667_v35 = vsub.s32 2, %v658_v57  ;;  %v877_v56 = vld [vmem:[#allocation3 + $0x1c] sm:$0xf] }
  0xca   :  { %583 = vmatpush1.bf16.msra.mxu1 %v522_v14  ;;  %v679_v19 = vsub.s32 5, %v658_v57  ;;  %v671_v43 = vsub.s32 3, %v658_v57  ;;  %v941_v57 = vld [vmem:[#allocation3 + $0x1c] sm:$0xf] }
  0xcb   :  { %v2468_v61 = vrot.slane %v49_v28, %v659_v29  ;;  %v2470_v0 = vrot.slane %v49_v28, %v663_v58  ;;  %v2478_v21 = vrot.slane %v49_v28, %v675_v18  ;;  %v2480_v22 = vrot.slane %v49_v28, %v667_v35  ;;  %v909_v29 = vld [vmem:[#allocation3 + $0x1c] sm:$0xf]  ;;  %v1030_v58 = vld [vmem:[%s2918_s6] sm:$0xff] }
  0xcc   :  { %2048 = vmatmul.mubr.msk.bf16.vlgmr.msra.gmra.mrb[4].mxu0 %vm510_vm9, %v2390_v33  ;;  %v2482_v24 = vrot.slane %v49_v28, %v679_v19  ;;  %v2484_v26 = vrot.slane %v49_v28, %v671_v43  ;;  %v973_v28 = vld [vmem:[#allocation3 + $0x1c] sm:$0xf] }
  0xcd   :  { %2046 = vmatmul.mubr.msk.bf16.vlgmr.msra.gmra.mrb[0].mxu1 %vm510_vm9, %v2390_v33  ;;  %1265 = vmatprep.mubr.bf16.mxu0 %v2175_v15 }
  0xce   :  { %1224 = vmatprep.mubr.bf16.mxu1 %v2175_v15 }
  0xd2   :  { %v373_v60 = vpop.permute.xlu0 %372 }
 0x17f   :  { %v567_v62 = vpop.f32.mrb[0].mxu0 }
 0x180   :  { %v569_v33 = vpop.f32.mrb[1].mxu0  ;;  %v568_v2 = vadd.f32 %v567_v62, %v373_v60 }
 0x181   :  { %v570_v3 = vadd.f32 %v569_v33, %v373_v60  ;;  %v571_v5 = vpop.f32.mrb[2].mxu0 }
 0x182   :  { %v687_v6 = vmul.f32 %v2468_v61, %v568_v2  ;;  %v572_v7 = vpop.f32.mrb[3].mxu0 }
 0x183   :  { %v688_v8 = vmul.f32 %v2470_v0, %v570_v3 }
 0x184   :  { %vm694_vm10 = vcmp.ge.f32.partialorder %v687_v6, 0.0  ;;  %v701_v10 = vmul.f32 %v700_v39, %v687_v6 }
 0x185   :  { %vm695_vm11 = vcmp.ge.f32.partialorder %v688_v8, 0.0  ;;  %v702_v11 = vmul.f32 %v700_v39, %v688_v8 }
 0x186   :  { %v707_v13 = vsel %vm694_vm10, %v687_v6, %v701_v10 }
 0x187   :  { %v708_v46 = vsel %vm695_vm11, %v688_v8, %v702_v11 }
 0x188   :  { %v2474_v16 = vpack.c.bf16 %v708_v46, %v707_v13 }
 0x18a   :  { %737 = vst [vmem:[#allocation3 + $0x4] sm:$0xff] %v2474_v16 }
 0x191   :  { %v740_v17 = vld [vmem:[#allocation3] sm:$0xff] }
 0x192   :  { %748 = vrot.lane.b32.xlu1 %v740_v17, %s2168_s14 }
 0x19f   :  { %v649_v23 = vpop.f32.mrb[4].mxu0 }
 0x1a0   :  { %v608_v55 = vpop.f32.mrb[0].mxu1  ;;  %v650_v25 = vadd.f32 %v649_v23, %v373_v60  ;;  %v651_v27 = vpop.f32.mrb[5].mxu0 }
 0x1a1   :  { %v609_v51 = vadd.f32 %v608_v55, %v373_v60  ;;  %v610_v30 = vpop.f32.mrb[1].mxu1  ;;  %v652_v34 = vadd.f32 %v651_v27, %v373_v60  ;;  %v653_v20 = vpop.f32.mrb[6].mxu0 }
 0x1a2   :  { %v691_v36 = vmul.f32 %v2478_v21, %v650_v25  ;;  %v611_v12 = vadd.f32 %v610_v30, %v373_v60  ;;  %v612_v37 = vpop.f32.mrb[2].mxu1  ;;  %v654_v38 = vpop.f32.mrb[7].mxu0 }
 0x1a3   :  { %v689_v40 = vmul.f32 %v2480_v22, %v609_v51  ;;  %v692_v41 = vmul.f32 %v2482_v24, %v652_v34  ;;  %v613_v63 = vpop.f32.mrb[3].mxu1 }
 0x1a4   :  { %vm698_vm12 = vcmp.ge.f32.partialorder %v691_v36, 0.0  ;;  %v705_v42 = vmul.f32 %v700_v39, %v691_v36  ;;  %v690_v44 = vmul.f32 %v2484_v26, %v611_v12 }
 0x1a5   :  { %vm696_vm13 = vcmp.ge.f32.partialorder %v689_v40, 0.0  ;;  %v703_v45 = vmul.f32 %v700_v39, %v689_v40  ;;  %vm699_vm14 = vcmp.ge.f32.partialorder %v692_v41, 0.0  ;;  %v706_v47 = vmul.f32 %v700_v39, %v692_v41 }
 0x1a6   :  { %v711_v48 = vsel %vm698_vm12, %v691_v36, %v705_v42  ;;  %vm697_vm15 = vcmp.ge.f32.partialorder %v690_v44, 0.0  ;;  %v704_v32 = vmul.f32 %v700_v39, %v690_v44 }
 0x1a7   :  { %v709_v4 = vsel %vm696_vm13, %v689_v40, %v703_v45  ;;  %v712_v49 = vsel %vm699_vm14, %v692_v41, %v706_v47 }
 0x1a8   :  { %v710_v50 = vsel %vm697_vm15, %v690_v44, %v704_v32  ;;  %v2490_v31 = vpack.c.bf16 %v712_v49, %v711_v48 }
 0x1a9   :  { %v2492_v59 = vpack.c.bf16 %v710_v50, %v709_v4 }
 0x1aa   :  { %739 = vst [vmem:[#allocation3 + $0x14] sm:$0xff] %v2490_v31 }
 0x1ab   :  { %738 = vst [vmem:[#allocation3 + $0xc] sm:$0xff] %v2492_v59 }
 0x1b1   :  { %v743_v53 = vld [vmem:[#allocation3 + $0x18] sm:$0xf] }
 0x1b2   :  { %v773_v1 = vld [vmem:[#allocation3 + $0x8] sm:$0xff]  ;;  %v742_v52 = vld [vmem:[#allocation3 + $0x10] sm:$0xff]  ;;  %v807_v54 = vld [vmem:[#allocation3 + $0x18] sm:$0xf] }
 0x1b3   :  { %782 = vrot.lane.b32.xlu0 %v773_v1, %s2167_s13  ;;  %750 = vrot.lane.b32.xlu1 %v773_v1, %s2168_s14  ;;  %v775_v14 = vld [vmem:[#allocation3 + $0x18] sm:$0xf] }
 0x1b4   :  { %v839_v9 = vld [vmem:[#allocation3 + $0x18] sm:$0xf] }
 0x1b7   :  { %812 = vrot.lane.b32.xlu0 %v740_v17, %s2169_s15  ;;  %780 = vrot.lane.b32.xlu1 %v740_v17, %s2167_s13 }
 0x1bb   :  { %846 = vrot.lane.b32.xlu0 %v773_v1, %s2170_s2  ;;  %814 = vrot.lane.b32.xlu1 %v773_v1, %s2169_s15 }
 0x1bf   :  { %882 = vrot.lane.b32.xlu0 %v2474_v16, %s2171_s16  ;;  %844 = vrot.lane.b32.xlu1 %v740_v17, %s2170_s2 }
 0x1c3   :  { %916 = vrot.lane.b32.xlu0 %v2492_v59, %s2172_s17  ;;  %884 = vrot.lane.b32.xlu1 %v2492_v59, %s2171_s16 }
 0x1c7   :  { %946 = vrot.lane.b32.xlu0 %v2474_v16, %s2173_s18  ;;  %914 = vrot.lane.b32.xlu1 %v2474_v16, %s2172_s17 }
 0x1cb   :  { %752 = vrot.lane.b32.xlu0 %v742_v52, %s2168_s14  ;;  %948 = vrot.lane.b32.xlu1 %v2492_v59, %s2173_s18 }
 0x1cf   :  { %816 = vrot.lane.b32.xlu0 %v742_v52, %s2169_s15  ;;  %784 = vrot.lane.b32.xlu1 %v742_v52, %s2167_s13 }
 0x1d3   :  { %886 = vrot.lane.b32.xlu0 %v2490_v31, %s2171_s16  ;;  %848 = vrot.lane.b32.xlu1 %v742_v52, %s2170_s2 }
 0x1d7   :  { %950 = vrot.lane.b32.xlu0 %v2490_v31, %s2173_s18  ;;  %978 = vrot.lane.b32.xlu1 %v2474_v16, %s2174_s19 }
 0x1db   :  { %980 = vrot.lane.b32.xlu0 %v2492_v59, %s2174_s19  ;;  %918 = vrot.lane.b32.xlu1 %v2490_v31, %s2172_s17 }
 0x1df   :  { %754 = vrot.lane.b32.xlu0 %v743_v53, %s2168_s14  ;;  %982 = vrot.lane.b32.xlu1 %v2490_v31, %s2174_s19 }
 0x1e3   :  { %818 = vrot.lane.b32.xlu0 %v807_v54, %s2169_s15  ;;  %786 = vrot.lane.b32.xlu1 %v775_v14, %s2167_s13 }
 0x1e7   :  { %888 = vrot.lane.b32.xlu0 %v877_v56, %s2171_s16  ;;  %850 = vrot.lane.b32.xlu1 %v839_v9, %s2170_s2 }
 0x1eb   :  { %952 = vrot.lane.b32.xlu0 %v941_v57, %s2173_s18  ;;  %920 = vrot.lane.b32.xlu1 %v909_v29, %s2172_s17 }
 0x1ef   :  { %1033 = vperm.xlu0 %2150, %v1030_v58   ;;  %984 = vrot.lane.b32.xlu1 %v973_v28, %s2174_s19 }
 0x204   :  { %v749_v60 = vpop.permute.xlu1 %748 }
 0x205   :  { %v756_v3 = vrot.slane %v749_v60, 4 }
 0x225   :  { %v2542_v62 = vpop.permute.xlu0 %782  ;;  %v2544_v33 = vpop.permute.xlu1 %750 }
 0x226   :  { %v757_v2 = vrot.slane %v2544_v33, 4  ;;  %v789_v6 = vrot.slane %v2542_v62, 4 }
 0x228   :  { %v760_v7 = vsel %vm90_vm0, %v756_v3, %v757_v2 }
 0x229   :  { %v813_v5 = vpop.permute.xlu0 %812  ;;  %v781_v39 = vpop.permute.xlu1 %780  ;;  %v761_v11 = vsel %vm92_vm1, %v749_v60, %v760_v7 }
 0x22a   :  { %v788_v8 = vrot.slane %v781_v39, 4  ;;  %v820_v43 = vrot.slane %v813_v5, 4 }
 0x22c   :  { %v792_v10 = vsel %vm90_vm0, %v788_v8, %v789_v6 }
 0x22d   :  { %v793_v13 = vsel %vm125_vm2, %v781_v39, %v792_v10  ;;  %v2552_v46 = vpop.permute.xlu0 %846  ;;  %v2554_v17 = vpop.permute.xlu1 %814 }
 0x22e   :  { %v2052_v18 = vcombine.low %v761_v11, %v793_v13  ;;  %v2053_v35 = vcombine.high %v761_v11, %v793_v13  ;;  %v821_v19 = vrot.slane %v2554_v17, 4  ;;  %v853_v25 = vrot.slane %v2552_v46, 4 }
 0x230   :  { %1192 = vmatprep.subr.bf16.mxu1 %v2053_v35  ;;  %v824_v27 = vsel %vm90_vm0, %v820_v43, %v821_v19 }
 0x231   :  { %v883_v23 = vpop.permute.xlu0 %882  ;;  %1193 = vmatpush1.bf16.msra.mxu1 %v2052_v18  ;;  %v845_v55 = vpop.permute.xlu1 %844  ;;  %v825_v34 = vsel %vm158_vm3, %v813_v5, %v824_v27 }
 0x232   :  { %v852_v51 = vrot.slane %v845_v55, 4  ;;  %v890_v37 = vrot.slane %v883_v23, 4 }
 0x234   :  { %v856_v30 = vsel %vm90_vm0, %v852_v51, %v853_v25 }
 0x235   :  { %v857_v20 = vsel %vm191_vm4, %v845_v55, %v856_v30  ;;  %v2562_v36 = vpop.permute.xlu0 %916  ;;  %v885_v12 = vpop.permute.xlu1 %884 }
 0x236   :  { %v2058_v38 = vcombine.low %v825_v34, %v857_v20  ;;  %v2059_v40 = vcombine.high %v825_v34, %v857_v20  ;;  %v891_v41 = vrot.slane %v885_v12, 4  ;;  %v923_v4 = vrot.slane %v2562_v36, 4 }
 0x238   :  { %v894_v63 = vsel %vm90_vm0, %v890_v37, %v891_v41  ;;  %1194 = vmatprep.subr.bf16.mxu1 %v2059_v40 }
 0x239   :  { %v947_v42 = vpop.permute.xlu0 %946  ;;  %1195 = vmatpush1.bf16.msra.mxu1 %v2058_v38  ;;  %v915_v44 = vpop.permute.xlu1 %914  ;;  %v895_v45 = vsel %vm230_vm5, %v883_v23, %v894_v63 }
 0x23a   :  { %v922_v47 = vrot.slane %v915_v44, 4  ;;  %v2064_v48 = vcombine.low %v2474_v16, %v895_v45  ;;  %v2065_v32 = vcombine.high %v2474_v16, %v895_v45  ;;  %v954_v1 = vrot.slane %v947_v42, 4 }
 0x23c   :  { %1196 = vmatprep.subr.bf16.mxu1 %v2065_v32  ;;  %v926_v52 = vsel %vm90_vm0, %v922_v47, %v923_v4 }
 0x23d   :  { %v2569_v49 = vpop.permute.xlu0 %752  ;;  %1197 = vmatpush1.bf16.msra.mxu1 %v2064_v48  ;;  %v949_v50 = vpop.permute.xlu1 %948  ;;  %v927_v56 = vsel %vm263_vm6, %v915_v44, %v926_v52 }
 0x23e   :  { %v758_v53 = vrot.slane %v2569_v49, 4  ;;  %v955_v54 = vrot.slane %v949_v50, 4 }
 0x240   :  { %v958_v14 = vsel %vm90_vm0, %v954_v1, %v955_v54  ;;  %v762_v16 = vsel %vm90_vm0, %v757_v2, %v758_v53 }
 0x241   :  { %v2578_v9 = vpop.permute.xlu0 %816  ;;  %v2580_v57 = vpop.permute.xlu1 %784  ;;  %v959_v29 = vsel %vm296_vm7, %v947_v42, %v958_v14  ;;  %v763_v8 = vsel %vm92_vm1, %v2544_v33, %v762_v16 }
 0x242   :  { %v822_v58 = vrot.slane %v2578_v9, 4  ;;  %v790_v28 = vrot.slane %v2580_v57, 4  ;;  %v2070_v60 = vcombine.low %v927_v56, %v959_v29  ;;  %v2071_v3 = vcombine.high %v927_v56, %v959_v29 }
 0x244   :  { %v794_v5 = vsel %vm90_vm0, %v789_v6, %v790_v28  ;;  %1198 = vmatprep.subr.bf16.mxu1 %v2071_v3  ;;  %v826_v2 = vsel %vm90_vm0, %v821_v19, %v822_v58  ;;  %v1029_v3 = vld [vmem:[%s2917_s5] sm:$0xf] }
 0x245   :  { %v2591_v39 = vpop.permute.xlu0 %886  ;;  %1199 = vmatpush1.bf16.msra.mxu1 %v2070_v60  ;;  %v2593_v7 = vpop.permute.xlu1 %848  ;;  %v795_v10 = vsel %vm125_vm2, %v2542_v62, %v794_v5  ;;  %v827_v62 = vsel %vm158_vm3, %v2554_v17, %v826_v2 }
 0x246   :  { %v892_v11 = vrot.slane %v2591_v39, 4  ;;  %v854_v6 = vrot.slane %v2593_v7, 4  ;;  %v2054_v13 = vcombine.low %v763_v8, %v795_v10  ;;  %v2055_v18 = vcombine.high %v763_v8, %v795_v10 }
 0x248   :  { %v896_v35 = vsel %vm90_vm0, %v891_v41, %v892_v11  ;;  %v858_v19 = vsel %vm90_vm0, %v853_v25, %v854_v6  ;;  %1233 = vmatprep.subr.bf16.mxu0 %v2055_v18 }
 0x249   :  { %v2607_v43 = vpop.permute.xlu0 %950  ;;  %1234 = vmatpush1.bf16.msra.mxu0 %v2054_v13  ;;  %v979_v33 = vpop.permute.xlu1 %978  ;;  %v859_v23 = vsel %vm191_vm4, %v2552_v46, %v858_v19  ;;  %v897_v55 = vsel %vm230_vm5, %v885_v12, %v896_v35 }
 0x24a   :  { %v956_v27 = vrot.slane %v2607_v43, 4  ;;  %v2060_v51 = vcombine.low %v827_v62, %v859_v23  ;;  %v2061_v30 = vcombine.high %v827_v62, %v859_v23  ;;  %v2067_v25 = vcombine.high %v2492_v59, %v897_v55 }
 0x24b   :  { %v986_v37 = vrot.slane %v979_v33, 4  ;;  %v2066_v12 = vcombine.low %v2492_v59, %v897_v55 }
 0x24c   :  { %1235 = vmatprep.subr.bf16.mxu0 %v2061_v30  ;;  %v960_v17 = vsel %vm90_vm0, %v955_v54, %v956_v27 }
 0x24d   :  { %v981_v34 = vpop.permute.xlu0 %980  ;;  %1236 = vmatpush1.bf16.msra.mxu0 %v2060_v51  ;;  %v2616_v20 = vpop.permute.xlu1 %918  ;;  %v961_v47 = vsel %vm296_vm7, %v949_v50, %v960_v17 }
 0x24e   :  { %v987_v38 = vrot.slane %v981_v34, 4  ;;  %v924_v46 = vrot.slane %v2616_v20, 4  ;;  %1237 = vmatprep.subr.bf16.mxu0 %v2067_v25 }
 0x250   :  { %v990_v40 = vsel %vm90_vm0, %v986_v37, %v987_v38  ;;  %v928_v41 = vsel %vm90_vm0, %v923_v4, %v924_v46 }
 0x251   :  { %v755_v63 = vpop.permute.xlu0 %754  ;;  %1238 = vmatpush1.bf16.msra.mxu0 %v2066_v12  ;;  %v2627_v42 = vpop.permute.xlu1 %982  ;;  %v991_v44 = vsel %vm329_vm8, %v979_v33, %v990_v40  ;;  %v929_v45 = vsel %vm263_vm6, %v2562_v36, %v928_v41 }
 0x252   :  { %v759_v48 = vrot.slane %v755_v63, 4  ;;  %v988_v59 = vrot.slane %v2627_v42, 4  ;;  %v2077_v32 = vcombine.high %v991_v44, %v991_v44  ;;  %v2072_v1 = vcombine.low %v929_v45, %v961_v47 }
 0x253   :  { %v2073_v52 = vcombine.high %v929_v45, %v961_v47  ;;  %v2076_v54 = vcombine.low %v991_v44, %v991_v44 }
 0x254   :  { %v992_v4 = vsel %vm90_vm0, %v987_v38, %v988_v59  ;;  %2082 = vmatprep.subr.msk.bf16.mxu1 %vm90_vm0, %v2077_v32  ;;  %v764_v14 = vsel %vm90_vm0, %v758_v53, %v759_v48 }
 0x255   :  { %1239 = vmatprep.subr.bf16.mxu0 %v2073_v52  ;;  %v819_v56 = vpop.permute.xlu0 %818  ;;  %v1175_v36 = vsel %vm90_vm0, %v2076_v54, 0  ;;  %v787_v50 = vpop.permute.xlu1 %786  ;;  %v993_v16 = vsel %vm329_vm8, %v981_v34, %v992_v4  ;;  %v765_v35 = vsel %vm92_vm1, %v2569_v49, %v764_v14  ;;  %v1322_v14 = vld [vmem:[#allocation4 + $0xc] sm:$0xff] }
 0x256   :  { %v823_v29 = vrot.slane %v819_v56, 4  ;;  %1201 = vmatpush1.bf16.msra.mxu1 %v1175_v36  ;;  %1240 = vmatpush1.bf16.msra.mxu0 %v2072_v1  ;;  %v791_v60 = vrot.slane %v787_v50, 4  ;;  %v2079_v5 = vcombine.high %v993_v16, %v993_v16  ;;  %v2078_v2 = vcombine.low %v993_v16, %v993_v16 }
 0x258   :  { %v796_v53 = vsel %vm90_vm0, %v790_v28, %v791_v60  ;;  %2084 = vmatprep.subr.msk.bf16.mxu0 %vm90_vm0, %v2079_v5  ;;  %v1181_v8 = vsel %vm90_vm0, %v2078_v2, 0  ;;  %v828_v10 = vsel %vm90_vm0, %v822_v58, %v823_v29 }
 0x259   :  { %2083 = vmatmul.mubr.msk.bf16.vlgmr.msra.gmra.mrb[4].mxu1 %vm510_vm9, %v1029_v3  ;;  %v889_v13 = vpop.permute.xlu0 %888  ;;  %v851_v18 = vpop.permute.xlu1 %850  ;;  %v797_v19 = vsel %vm125_vm2, %v2580_v57, %v796_v53  ;;  %v829_v51 = vsel %vm158_vm3, %v2578_v9, %v828_v10 }
 0x25a   :  { %v893_v33 = vrot.slane %v889_v13, 4  ;;  %1242 = vmatpush1.bf16.msra.mxu0 %v1181_v8  ;;  %v855_v28 = vrot.slane %v851_v18, 4  ;;  %v2056_v62 = vcombine.low %v765_v35, %v797_v19  ;;  %v2057_v23 = vcombine.high %v765_v35, %v797_v19  ;;  %1306 = vmatprep.mubr.bf16.mxu1 %v2175_v15 }
 0x25b   :  { %v1327_v8 = vunpack.c.h.bf16 %v1322_v14 }
 0x25c   :  { %v898_v58 = vsel %vm90_vm0, %v892_v11, %v893_v33  ;;  %v860_v55 = vsel %vm90_vm0, %v854_v6, %v855_v28  ;;  %1274 = vmatprep.subr.bf16.mxu1 %v2057_v23 }
 0x25d   :  { %2085 = vmatmul.mubr.msk.bf16.vlgmr.msra.gmra.mrb[8].mxu0 %vm510_vm9, %v1029_v3  ;;  %v953_v49 = vpop.permute.xlu0 %952  ;;  %1275 = vmatpush1.bf16.msra.mxu1 %v2056_v62  ;;  %v921_v57 = vpop.permute.xlu1 %920  ;;  %v861_v30 = vsel %vm191_vm4, %v2593_v7, %v860_v55  ;;  %v899_v25 = vsel %vm230_vm5, %v2591_v39, %v898_v58  ;;  %v1323_v55 = vld [vmem:[#allocation4 + $0x14] sm:$0xff] }
 0x25e   :  { %v957_v11 = vrot.slane %v953_v49, 4  ;;  %v925_v34 = vrot.slane %v921_v57, 4  ;;  %v2062_v17 = vcombine.low %v829_v51, %v861_v30  ;;  %v2063_v37 = vcombine.high %v829_v51, %v861_v30  ;;  %1847 = vmatprep.mubr.bf16.mxu0 %v2175_v15 }
 0x25f   :  { %v2069_v7 = vcombine.high %v2490_v31, %v899_v25  ;;  %v2068_v41 = vcombine.low %v2490_v31, %v899_v25  ;;  %v1500_v31 = vld [vmem:[#allocation3 + $0x1c] sm:$0xf]  ;;  %v1328_v51 = vunpack.c.l.bf16 %v1323_v55 }
 0x260   :  { %v962_v6 = vsel %vm90_vm0, %v956_v27, %v957_v11  ;;  %v930_v9 = vsel %vm90_vm0, %v924_v46, %v925_v34  ;;  %1276 = vmatprep.subr.bf16.mxu1 %v2063_v37  ;;  %1511 = vrot.lane.b32.xlu0 %v1500_v31, %s2171_s16  ;;  %v1329_v11 = vunpack.c.h.bf16 %v1323_v55 }
 0x261   :  { %1277 = vmatpush1.bf16.msra.mxu1 %v2062_v17  ;;  %v985_v38 = vpop.permute.xlu1 %984  ;;  %v931_v39 = vsel %vm263_vm6, %v2616_v20, %v930_v9  ;;  %v963_v12 = vsel %vm296_vm7, %v2607_v43, %v962_v6  ;;  %v1321_v20 = vld [vmem:[#allocation4 + $0x4] sm:$0xff] }
 0x262   :  { %v989_v40 = vrot.slane %v985_v38, 4  ;;  %1278 = vmatprep.subr.bf16.mxu1 %v2069_v7  ;;  %v2075_v63 = vcombine.high %v931_v39, %v963_v12  ;;  %v2074_v44 = vcombine.low %v931_v39, %v963_v12  ;;  %v1324_v32 = vunpack.c.l.bf16 %v1321_v20 }
 0x263   :  { %v1325_v54 = vunpack.c.h.bf16 %v1321_v20 }
 0x264   :  { %v994_v27 = vsel %vm90_vm0, %v988_v59, %v989_v40 }
 0x265   :  { %v995_v46 = vsel %vm329_vm8, %v2627_v42, %v994_v27  ;;  %1279 = vmatpush1.bf16.msra.mxu1 %v2068_v41 }
 0x266   :  { %1280 = vmatprep.subr.bf16.mxu1 %v2075_v63  ;;  %v2081_v45 = vcombine.high %v995_v46, %v995_v46  ;;  %v2080_v47 = vcombine.low %v995_v46, %v995_v46  ;;  %v1532_v63 = vld [vmem:[#allocation3 + $0x1c] sm:$0xf] }
 0x267   :  { %v1564_v46 = vld [vmem:[#allocation3 + $0x1c] sm:$0xf] }
 0x268   :  { %v1187_v43 = vsel %vm90_vm0, %v2080_v47, 0 }
 0x269   :  { %1281 = vmatpush1.bf16.msra.mxu1 %v2074_v44  ;;  %v1596_v44 = vld [vmem:[#allocation3 + $0x1c] sm:$0xf] }
 0x26a   :  { %2086 = vmatprep.subr.msk.bf16.mxu1 %vm90_vm0, %v2081_v45  ;;  %v1653_v45 = vld [vmem:[%s2920_s8] sm:$0xff] }
 0x26d   :  { %1283 = vmatpush1.bf16.msra.mxu1 %v1187_v43 }
 0x26e   :  { %v1034_v42 = vpop.permute.xlu0 %1033 }
 0x270   :  { %2087 = vmatmul.mubr.msk.bf16.vlgmr.msra.gmra.mrb[8].mxu1 %vm510_vm9, %v1029_v3  ;;  %v1326_v3 = vunpack.c.l.bf16 %v1322_v14 }
 0x271   :  { %1888 = vmatprep.mubr.bf16.mxu1 %v2175_v15 }
 0x2d2   :  { %v2753_v47 = vpop.permute.xlu0 %1511 }
 0x32c   :  { %v1226_v48 = vpop.f32.mrb[4].mxu1 }
 0x32d   :  { %v1227_v59 = vadd.f32 %v1226_v48, %v1034_v42  ;;  %v1228_v1 = vpop.f32.mrb[5].mxu1 }
 0x32e   :  { %v1229_v52 = vadd.f32 %v1228_v1, %v1034_v42  ;;  %v1230_v4 = vpop.f32.mrb[6].mxu1 }
 0x32f   :  { %v1315_v56 = vmul.f32 %v1227_v59, %v2468_v61  ;;  %v1231_v36 = vpop.f32.mrb[7].mxu1 }
 0x330   :  { %v1316_v50 = vmul.f32 %v1229_v52, %v2470_v0  ;;  %v1267_v16 = vpop.f32.mrb[8].mxu0 }
 0x331   :  { %v1330_v29 = vadd.f32 %v1324_v32, %v1315_v56  ;;  %v1268_v60 = vadd.f32 %v1267_v16, %v1034_v42  ;;  %v1269_v5 = vpop.f32.mrb[9].mxu0 }
 0x332   :  { %v1331_v2 = vadd.f32 %v1325_v54, %v1316_v50  ;;  %v1270_v53 = vadd.f32 %v1269_v5, %v1034_v42  ;;  %v1271_v10 = vpop.f32.mrb[10].mxu0 }
 0x333   :  { %v1317_v13 = vmul.f32 %v1268_v60, %v2480_v22  ;;  %v1272_v18 = vpop.f32.mrb[11].mxu0 }
 0x334   :  { %v2695_v35 = vpack.c.bf16 %v1331_v2, %v1330_v29  ;;  %v1318_v19 = vmul.f32 %v1270_v53, %v2484_v26 }
 0x335   :  { %v1332_v33 = vadd.f32 %v1326_v3, %v1317_v13 }
 0x336   :  { %1360 = vst [vmem:[#allocation3 + $0x4] sm:$0xff] %v2695_v35  ;;  %v1333_v28 = vadd.f32 %v1327_v8, %v1318_v19 }
 0x338   :  { %v2699_v62 = vpack.c.bf16 %v1333_v28, %v1332_v33 }
 0x33a   :  { %1361 = vst [vmem:[#allocation3 + $0xc] sm:$0xff] %v2699_v62 }
 0x33d   :  { %v1363_v23 = vld [vmem:[#allocation3] sm:$0xff] }
 0x33e   :  { %1371 = vrot.lane.b32.xlu1 %v1363_v23, %s2168_s14 }
 0x341   :  { %v1364_v58 = vld [vmem:[#allocation3 + $0x8] sm:$0xff] }
 0x342   :  { %1403 = vrot.lane.b32.xlu1 %v1363_v23, %s2167_s13  ;;  %1373 = vrot.lane.b32.xlu0 %v1364_v58, %s2168_s14 }
 0x343   :  { %v1308_v49 = vpop.f32.mrb[8].mxu1 }
 0x344   :  { %v1309_v57 = vadd.f32 %v1308_v49, %v1034_v42  ;;  %v1310_v30 = vpop.f32.mrb[9].mxu1 }
 0x345   :  { %v1311_v25 = vadd.f32 %v1310_v30, %v1034_v42  ;;  %v1312_v34 = vpop.f32.mrb[10].mxu1 }
 0x346   :  { %v1319_v17 = vmul.f32 %v1309_v57, %v2478_v21  ;;  %1435 = vrot.lane.b32.xlu1 %v1363_v23, %s2169_s15  ;;  %1405 = vrot.lane.b32.xlu0 %v1364_v58, %s2167_s13  ;;  %v1313_v37 = vpop.f32.mrb[11].mxu1 }
 0x347   :  { %v1320_v6 = vmul.f32 %v1311_v25, %v2482_v24 }
 0x348   :  { %v1334_v9 = vadd.f32 %v1328_v51, %v1319_v17 }
 0x349   :  { %v1335_v7 = vadd.f32 %v1329_v11, %v1320_v6 }
 0x34a   :  { %1467 = vrot.lane.b32.xlu1 %v1363_v23, %s2170_s2  ;;  %1437 = vrot.lane.b32.xlu0 %v1364_v58, %s2169_s15 }
 0x34b   :  { %v2711_v38 = vpack.c.bf16 %v1335_v7, %v1334_v9 }
 0x34d   :  { %1362 = vst [vmem:[#allocation3 + $0x14] sm:$0xff] %v2711_v38 }
 0x34e   :  { %1505 = vrot.lane.b32.xlu1 %v2695_v35, %s2171_s16  ;;  %1469 = vrot.lane.b32.xlu0 %v1364_v58, %s2170_s2 }
 0x352   :  { %1537 = vrot.lane.b32.xlu1 %v2695_v35, %s2172_s17  ;;  %1507 = vrot.lane.b32.xlu0 %v2699_v62, %s2171_s16 }
 0x354   :  { %v1365_v39 = vld [vmem:[#allocation3 + $0x10] sm:$0xff]  ;;  %v1366_v12 = vld [vmem:[#allocation3 + $0x18] sm:$0xf] }
 0x355   :  { %v1398_v40 = vld [vmem:[#allocation3 + $0x18] sm:$0xf] }
 0x356   :  { %1569 = vrot.lane.b32.xlu1 %v2695_v35, %s2173_s18  ;;  %1539 = vrot.lane.b32.xlu0 %v2699_v62, %s2172_s17  ;;  %v1430_v41 = vld [vmem:[#allocation3 + $0x18] sm:$0xf] }
 0x357   :  { %v1462_v27 = vld [vmem:[#allocation3 + $0x18] sm:$0xf] }
 0x35a   :  { %1601 = vrot.lane.b32.xlu1 %v2695_v35, %s2174_s19  ;;  %1571 = vrot.lane.b32.xlu0 %v2699_v62, %s2173_s18 }
 0x35e   :  { %1603 = vrot.lane.b32.xlu0 %v2699_v62, %s2174_s19  ;;  %1375 = vrot.lane.b32.xlu1 %v1365_v39, %s2168_s14 }
 0x362   :  { %1377 = vrot.lane.b32.xlu0 %v1366_v12, %s2168_s14  ;;  %1407 = vrot.lane.b32.xlu1 %v1365_v39, %s2167_s13 }
 0x366   :  { %1409 = vrot.lane.b32.xlu0 %v1398_v40, %s2167_s13  ;;  %1439 = vrot.lane.b32.xlu1 %v1365_v39, %s2169_s15 }
 0x36a   :  { %1441 = vrot.lane.b32.xlu0 %v1430_v41, %s2169_s15  ;;  %1471 = vrot.lane.b32.xlu1 %v1365_v39, %s2170_s2 }
 0x36e   :  { %1473 = vrot.lane.b32.xlu0 %v1462_v27, %s2170_s2  ;;  %1509 = vrot.lane.b32.xlu1 %v2711_v38, %s2171_s16 }
 0x372   :  { %1543 = vrot.lane.b32.xlu0 %v1532_v63, %s2172_s17  ;;  %1541 = vrot.lane.b32.xlu1 %v2711_v38, %s2172_s17 }
 0x376   :  { %1575 = vrot.lane.b32.xlu0 %v1564_v46, %s2173_s18  ;;  %1573 = vrot.lane.b32.xlu1 %v2711_v38, %s2173_s18 }
 0x37a   :  { %1607 = vrot.lane.b32.xlu0 %v1596_v44, %s2174_s19  ;;  %1605 = vrot.lane.b32.xlu1 %v2711_v38, %s2174_s19 }
 0x37e   :  { %1656 = vperm.xlu1 %2151, %v1653_v45  }
 0x3b0   :  { %v1372_v43 = vpop.permute.xlu1 %1371 }
 0x3b1   :  { %v1379_v48 = vrot.slane %v1372_v43, 4 }
 0x3b4   :  { %v2755_v31 = vpop.permute.xlu0 %1373  ;;  %v1404_v20 = vpop.permute.xlu1 %1403 }
 0x3b5   :  { %v1380_v42 = vrot.slane %v2755_v31, 4  ;;  %v1411_v52 = vrot.slane %v1404_v20, 4 }
 0x3b7   :  { %v1383_v1 = vsel %vm90_vm0, %v1379_v48, %v1380_v42 }
 0x3b8   :  { %v2758_v59 = vpop.permute.xlu0 %1405  ;;  %v1436_v32 = vpop.permute.xlu1 %1435  ;;  %v1384_v36 = vsel %vm92_vm1, %v1372_v43, %v1383_v1 }
 0x3b9   :  { %v1412_v54 = vrot.slane %v2758_v59, 4  ;;  %v1443_v3 = vrot.slane %v1436_v32, 4 }
 0x3bb   :  { %v1415_v4 = vsel %vm90_vm0, %v1411_v52, %v1412_v54 }
 0x3bc   :  { %v2765_v14 = vpop.permute.xlu0 %1437  ;;  %v1468_v56 = vpop.permute.xlu1 %1467  ;;  %v1416_v50 = vsel %vm125_vm2, %v1404_v20, %v1415_v4 }
 0x3bd   :  { %v1444_v16 = vrot.slane %v2765_v14, 4  ;;  %v2091_v29 = vcombine.low %v1384_v36, %v1416_v50  ;;  %v2092_v60 = vcombine.high %v1384_v36, %v1416_v50  ;;  %v1475_v8 = vrot.slane %v1468_v56, 4 }
 0x3bf   :  { %1815 = vmatprep.subr.bf16.mxu0 %v2092_v60  ;;  %v1447_v53 = vsel %vm90_vm0, %v1443_v3, %v1444_v16 }
 0x3c0   :  { %v2770_v5 = vpop.permute.xlu0 %1469  ;;  %1816 = vmatpush1.bf16.msra.mxu0 %v2091_v29  ;;  %v1506_v2 = vpop.permute.xlu1 %1505  ;;  %v1448_v33 = vsel %vm158_vm3, %v1436_v32, %v1447_v53 }
 0x3c1   :  { %v1476_v10 = vrot.slane %v2770_v5, 4  ;;  %v1513_v23 = vrot.slane %v1506_v2, 4 }
 0x3c3   :  { %v1479_v13 = vsel %vm90_vm0, %v1475_v8, %v1476_v10 }
 0x3c4   :  { %v2779_v18 = vpop.permute.xlu0 %1507  ;;  %v1538_v19 = vpop.permute.xlu1 %1537  ;;  %v1480_v28 = vsel %vm191_vm4, %v1468_v56, %v1479_v13 }
 0x3c5   :  { %v1514_v58 = vrot.slane %v2779_v18, 4  ;;  %v2097_v55 = vcombine.low %v1448_v33, %v1480_v28  ;;  %v2098_v49 = vcombine.high %v1448_v33, %v1480_v28  ;;  %v1545_v37 = vrot.slane %v1538_v19, 4 }
 0x3c7   :  { %v1517_v57 = vsel %vm90_vm0, %v1513_v23, %v1514_v58  ;;  %1817 = vmatprep.subr.bf16.mxu0 %v2098_v49 }
 0x3c8   :  { %v2787_v51 = vpop.permute.xlu0 %1539  ;;  %1818 = vmatpush1.bf16.msra.mxu0 %v2097_v55  ;;  %v1570_v30 = vpop.permute.xlu1 %1569  ;;  %v1518_v25 = vsel %vm230_vm5, %v1506_v2, %v1517_v57 }
 0x3c9   :  { %v1546_v11 = vrot.slane %v2787_v51, 4  ;;  %v2103_v34 = vcombine.low %v2695_v35, %v1518_v25  ;;  %v2104_v17 = vcombine.high %v2695_v35, %v1518_v25  ;;  %v1577_v39 = vrot.slane %v1570_v30, 4 }
 0x3cb   :  { %1819 = vmatprep.subr.bf16.mxu0 %v2104_v17  ;;  %v1549_v7 = vsel %vm90_vm0, %v1545_v37, %v1546_v11 }
 0x3cc   :  { %v2793_v6 = vpop.permute.xlu0 %1571  ;;  %1820 = vmatpush1.bf16.msra.mxu0 %v2103_v34  ;;  %v1602_v9 = vpop.permute.xlu1 %1601  ;;  %v1550_v63 = vsel %vm263_vm6, %v1538_v19, %v1549_v7  ;;  %v2825_v19 = vld [vmem:[%s2919_s7] sm:$0xf]  ;;  %v1516_v7 = vrot.slane %v2753_v47, 4  ;;  %s2127_s7 = sld [smem:[#allocation5 + $0x2]] }
 0x3cd   :  { %v1578_v12 = vrot.slane %v2793_v6, 4  ;;  %v1609_v41 = vrot.slane %v1602_v9, 4 }
 0x3cf   :  { %v1581_v40 = vsel %vm90_vm0, %v1577_v39, %v1578_v12 }
 0x3d0   :  { %v2802_v27 = vpop.permute.xlu0 %1603  ;;  %v1376_v35 = vpop.permute.xlu1 %1375  ;;  %v1582_v46 = vsel %vm296_vm7, %v1570_v30, %v1581_v40 }
 0x3d1   :  { %v1610_v44 = vrot.slane %v2802_v27, 4  ;;  %v1381_v45 = vrot.slane %v1376_v35, 4  ;;  %v2109_v43 = vcombine.low %v1550_v63, %v1582_v46  ;;  %v2110_v20 = vcombine.high %v1550_v63, %v1582_v46 }
 0x3d3   :  { %v1613_v48 = vsel %vm90_vm0, %v1609_v41, %v1610_v44  ;;  %1821 = vmatprep.subr.bf16.mxu0 %v2110_v20  ;;  %v1385_v32 = vsel %vm90_vm0, %v1380_v42, %v1381_v45 }
 0x3d4   :  { %v1378_v1 = vpop.permute.xlu0 %1377  ;;  %1822 = vmatpush1.bf16.msra.mxu0 %v2109_v43  ;;  %v1408_v52 = vpop.permute.xlu1 %1407  ;;  %v1614_v4 = vsel %vm329_vm8, %v1602_v9, %v1613_v48  ;;  %v1386_v8 = vsel %vm92_vm1, %v2755_v31, %v1385_v32 }
 0x3d5   :  { %v1382_v56 = vrot.slane %v1378_v1, 4  ;;  %v1413_v36 = vrot.slane %v1408_v52, 4  ;;  %v2116_v50 = vcombine.high %v1614_v4, %v1614_v4  ;;  %v2115_v29 = vcombine.low %v1614_v4, %v1614_v4 }
 0x3d7   :  { %v1417_v60 = vsel %vm90_vm0, %v1412_v54, %v1413_v36  ;;  %2121 = vmatprep.subr.msk.bf16.mxu0 %vm90_vm0, %v2116_v50  ;;  %v1798_v3 = vsel %vm90_vm0, %v2115_v29, 0  ;;  %v1387_v2 = vsel %vm90_vm0, %v1381_v45, %v1382_v56 }
 0x3d8   :  { %v1410_v42 = vpop.permute.xlu0 %1409  ;;  %1824 = vmatpush1.bf16.msra.mxu0 %v1798_v3  ;;  %v1440_v53 = vpop.permute.xlu1 %1439  ;;  %v1418_v13 = vsel %vm125_vm2, %v2758_v59, %v1417_v60  ;;  %v1388_v59 = vsel %vm92_vm1, %v1376_v35, %v1387_v2 }
 0x3d9   :  { %v1414_v54 = vrot.slane %v1410_v42, 4  ;;  %v1445_v33 = vrot.slane %v1440_v53, 4  ;;  %v2093_v28 = vcombine.low %v1386_v8, %v1418_v13  ;;  %v2094_v23 = vcombine.high %v1386_v8, %v1418_v13 }
 0x3db   :  { %v1419_v55 = vsel %vm90_vm0, %v1413_v36, %v1414_v54  ;;  %1856 = vmatprep.subr.bf16.mxu1 %v2094_v23  ;;  %2122 = vmatmul.mubr.msk.bf16.vlgmr.msra.gmra.mrb[12].mxu0 %vm510_vm9, %v2825_v19  ;;  %v1449_v30 = vsel %vm90_vm0, %v1444_v16, %v1445_v33 }
 0x3dc   :  { %v1442_v49 = vpop.permute.xlu0 %1441  ;;  %1857 = vmatpush1.bf16.msra.mxu1 %v2093_v28  ;;  %v1472_v31 = vpop.permute.xlu1 %1471  ;;  %v1420_v57 = vsel %vm125_vm2, %v1408_v52, %v1419_v55  ;;  %1929 = vmatprep.mubr.bf16.mxu0 %v2175_v15  ;;  %v1450_v15 = vsel %vm158_vm3, %v2765_v14, %v1449_v30 }
 0x3dd   :  { %v1477_v25 = vrot.slane %v1472_v31, 4  ;;  %v2095_v34 = vcombine.low %v1388_v59, %v1420_v57  ;;  %v2096_v17 = vcombine.high %v1388_v59, %v1420_v57  ;;  %v1446_v37 = vrot.slane %v1442_v49, 4 }
 0x3df   :  { %v1481_v9 = vsel %vm90_vm0, %v1476_v10, %v1477_v25  ;;  %1897 = vmatprep.subr.bf16.mxu0 %v2096_v17  ;;  %v1451_v45 = vsel %vm90_vm0, %v1445_v33, %v1446_v37 }
 0x3e0   :  { %v1474_v39 = vpop.permute.xlu0 %1473  ;;  %1898 = vmatpush1.bf16.msra.mxu0 %v2095_v34  ;;  %v1510_v40 = vpop.permute.xlu1 %1509  ;;  %v1482_v16 = vsel %vm191_vm4, %v2770_v5, %v1481_v9  ;;  %v1452_v4 = vsel %vm158_vm3, %v1440_v53, %v1451_v45 }
 0x3e1   :  { %v1478_v41 = vrot.slane %v1474_v39, 4  ;;  %v1515_v35 = vrot.slane %v1510_v40, 4  ;;  %v2099_v63 = vcombine.low %v1450_v15, %v1482_v16  ;;  %v2100_v46 = vcombine.high %v1450_v15, %v1482_v16  ;;  %v1964_v15 = vld [vmem:[%s2912_s0 + $0x4] sm:$0xff] }
 0x3e3   :  { %v1483_v10 = vsel %vm90_vm0, %v1477_v25, %v1478_v41  ;;  %v1519_v47 = vsel %vm90_vm0, %v1514_v58, %v1515_v35  ;;  %v1521_v43 = vsel %vm90_vm0, %v1515_v35, %v1516_v7  ;;  %1858 = vmatprep.subr.bf16.mxu1 %v2100_v46  ;;  %v1951_v41 = vstv %s2127_s7 }
 0x3e4   :  { %v1544_v20 = vpop.permute.xlu0 %1543  ;;  %1859 = vmatpush1.bf16.msra.mxu1 %v2099_v63  ;;  %v1542_v14 = vpop.permute.xlu1 %1541  ;;  %v1520_v5 = vsel %vm230_vm5, %v2779_v18, %v1519_v47  ;;  %v1484_v48 = vsel %vm191_vm4, %v1472_v31, %v1483_v10  ;;  %v1522_v32 = vsel %vm230_vm5, %v1510_v40, %v1521_v43  ;;  %v1967_v10 = vunpack.c.l.bf16 %v1964_v15 }
 0x3e5   :  { %v1548_v1 = vrot.slane %v1544_v20, 4  ;;  %v1547_v52 = vrot.slane %v1542_v14, 4  ;;  %v2105_v56 = vcombine.low %v2699_v62, %v1520_v5  ;;  %v2106_v58 = vcombine.high %v2699_v62, %v1520_v5 }
 0x3e6   :  { %v2101_v36 = vcombine.low %v1452_v4, %v1484_v48  ;;  %v2102_v50 = vcombine.high %v1452_v4, %v1484_v48  ;;  %v2108_v29 = vcombine.high %v2711_v38, %v1522_v32  ;;  %v2107_v62 = vcombine.low %v2711_v38, %v1522_v32  ;;  %v1966_v4 = vld [vmem:[%s2912_s0 + $0x14] sm:$0xff] }
 0x3e7   :  { %1860 = vmatprep.subr.bf16.mxu1 %v2106_v58  ;;  %v1551_v3 = vsel %vm90_vm0, %v1546_v11, %v1547_v52  ;;  %v1553_v2 = vsel %vm90_vm0, %v1547_v52, %v1548_v1  ;;  %v1968_v43 = vunpack.c.h.bf16 %v1964_v15 }
 0x3e8   :  { %1899 = vmatprep.subr.bf16.mxu0 %v2102_v50  ;;  %v1576_v60 = vpop.permute.xlu0 %1575  ;;  %v1574_v18 = vpop.permute.xlu1 %1573  ;;  %1861 = vmatpush1.bf16.msra.mxu1 %v2105_v56  ;;  %v1554_v54 = vsel %vm263_vm6, %v1542_v14, %v1553_v2  ;;  %v1552_v23 = vsel %vm263_vm6, %v2787_v51, %v1551_v3 }
 0x3e9   :  { %v1580_v42 = vrot.slane %v1576_v60, 4  ;;  %1900 = vmatpush1.bf16.msra.mxu0 %v2101_v36  ;;  %v1579_v53 = vrot.slane %v1574_v18, 4 }
 0x3ea   :  { %1901 = vmatprep.subr.bf16.mxu0 %v2108_v29 }
 0x3eb   :  { %v1583_v8 = vsel %vm90_vm0, %v1578_v12, %v1579_v53  ;;  %v1585_v13 = vsel %vm90_vm0, %v1579_v53, %v1580_v42 }
 0x3ec   :  { %v1586_v33 = vsel %vm296_vm7, %v1574_v18, %v1585_v13  ;;  %v1608_v11 = vpop.permute.xlu0 %1607  ;;  %v1606_v28 = vpop.permute.xlu1 %1605  ;;  %v1584_v55 = vsel %vm296_vm7, %v2793_v6, %v1583_v8 }
 0x3ed   :  { %v2113_v49 = vcombine.low %v1554_v54, %v1586_v33  ;;  %v2114_v38 = vcombine.high %v1554_v54, %v1586_v33  ;;  %v1612_v31 = vrot.slane %v1608_v11, 4  ;;  %1902 = vmatpush1.bf16.msra.mxu0 %v2107_v62  ;;  %v1611_v59 = vrot.slane %v1606_v28, 4 }
 0x3ee   :  { %v2111_v12 = vcombine.low %v1552_v23, %v1584_v55  ;;  %v2112_v57 = vcombine.high %v1552_v23, %v1584_v55  ;;  %v1971_v62 = vunpack.c.l.bf16 %v1966_v4 }
 0x3ef   :  { %v1615_v30 = vsel %vm90_vm0, %v1610_v44, %v1611_v59  ;;  %v1617_v25 = vsel %vm90_vm0, %v1611_v59, %v1612_v31  ;;  %1903 = vmatprep.subr.bf16.mxu0 %v2114_v38 }
 0x3f0   :  { %v1618_v34 = vsel %vm329_vm8, %v1606_v28, %v1617_v25  ;;  %1862 = vmatprep.subr.bf16.mxu1 %v2112_v57  ;;  %v1616_v51 = vsel %vm329_vm8, %v2802_v27, %v1615_v30  ;;  %v1972_v28 = vunpack.c.h.bf16 %v1966_v4 }
 0x3f1   :  { %v2119_v6 = vcombine.low %v1618_v34, %v1618_v34  ;;  %v2120_v17 = vcombine.high %v1618_v34, %v1618_v34  ;;  %1863 = vmatpush1.bf16.msra.mxu1 %v2111_v12  ;;  %1904 = vmatpush1.bf16.msra.mxu0 %v2113_v49  ;;  %v2118_v37 = vcombine.high %v1616_v51, %v1616_v51 }
 0x3f2   :  { %v2117_v9 = vcombine.low %v1616_v51, %v1616_v51 }
 0x3f3   :  { %2123 = vmatprep.subr.msk.bf16.mxu1 %vm90_vm0, %v2118_v37  ;;  %2125 = vmatprep.subr.msk.bf16.mxu0 %vm90_vm0, %v2120_v17  ;;  %v1810_v44 = vsel %vm90_vm0, %v2119_v6, 0 }
 0x3f4   :  { %v1804_v7 = vsel %vm90_vm0, %v2117_v9, 0 }
 0x3f5   :  { %1865 = vmatpush1.bf16.msra.mxu1 %v1804_v7  ;;  %1906 = vmatpush1.bf16.msra.mxu0 %v1810_v44 }
 0x3f8   :  { %2124 = vmatmul.mubr.msk.bf16.vlgmr.msra.gmra.mrb[12].mxu1 %vm510_vm9, %v2825_v19  ;;  %2126 = vmatmul.mubr.msk.bf16.vlgmr.msra.gmra.mrb[16].mxu0 %vm510_vm9, %v2825_v19 }
 0x3fd   :  { %v1657_v27 = vpop.permute.xlu1 %1656 }
 0x4ae   :  { %v1849_v39 = vpop.f32.mrb[12].mxu0 }
 0x4af   :  { %v1851_v40 = vpop.f32.mrb[13].mxu0  ;;  %v1850_v16 = vadd.f32 %v1849_v39, %v1657_v27 }
 0x4b0   :  { %v1852_v35 = vadd.f32 %v1851_v40, %v1657_v27  ;;  %v1853_v63 = vpop.f32.mrb[14].mxu0 }
 0x4b1   :  { %v1938_v46 = vmul.f32 %v1850_v16, %v2468_v61  ;;  %v1854_v45 = vpop.f32.mrb[15].mxu0  ;;  %v1965_v61 = vld [vmem:[%s2912_s0 + $0xc] sm:$0xff] }
 0x4b2   :  { %v1939_v47 = vmul.f32 %v1852_v35, %v2470_v0  ;;  %v1969_v42 = vunpack.c.l.bf16 %v1965_v61  ;;  %v1970_v33 = vunpack.c.h.bf16 %v1965_v61 }
 0x4b3   :  { %vm1945_vm0 = vcmp.ge.f32.partialorder %v1938_v46, 0.0  ;;  %v1952_v19 = vmul.f32 %v1951_v41, %v1938_v46 }
 0x4b4   :  { %vm1946_vm1 = vcmp.ge.f32.partialorder %v1939_v47, 0.0  ;;  %v1953_v20 = vmul.f32 %v1951_v41, %v1939_v47 }
 0x4b5   :  { %v1958_v14 = vsel %vm1945_vm0, %v1938_v46, %v1952_v19 }
 0x4b6   :  { %v1959_v5 = vsel %vm1946_vm1, %v1939_v47, %v1953_v20  ;;  %v1973_v48 = vadd.f32 %v1967_v10, %v1958_v14 }
 0x4b7   :  { %v1974_v32 = vadd.f32 %v1968_v43, %v1959_v5 }
 0x4b9   :  { %v2137_v1 = vpack.c.bf16 %v1974_v32, %v1973_v48 }
 0x4bb   :  { %2004 = vst [vmem:[%s2922_s10 + $0x4] sm:$0xff] %v2137_v1 }
 0x4cb   :  { %v1890_v52 = vpop.f32.mrb[12].mxu1  ;;  %v1931_v0 = vpop.f32.mrb[16].mxu0 }
 0x4cc   :  { %v1891_v56 = vadd.f32 %v1890_v52, %v1657_v27  ;;  %v1932_v58 = vadd.f32 %v1931_v0, %v1657_v27  ;;  %v1892_v36 = vpop.f32.mrb[13].mxu1  ;;  %v1933_v50 = vpop.f32.mrb[17].mxu0 }
 0x4cd   :  { %v1893_v29 = vadd.f32 %v1892_v36, %v1657_v27  ;;  %v1934_v60 = vadd.f32 %v1933_v50, %v1657_v27  ;;  %v1894_v18 = vpop.f32.mrb[14].mxu1  ;;  %v1935_v3 = vpop.f32.mrb[18].mxu0 }
 0x4ce   :  { %v1940_v2 = vmul.f32 %v1891_v56, %v2480_v22  ;;  %v1942_v53 = vmul.f32 %v1932_v58, %v2478_v21  ;;  %v1895_v8 = vpop.f32.mrb[15].mxu1  ;;  %v1936_v13 = vpop.f32.mrb[19].mxu0 }
 0x4cf   :  { %v1941_v54 = vmul.f32 %v1893_v29, %v2484_v26  ;;  %v1943_v11 = vmul.f32 %v1934_v60, %v2482_v24 }
 0x4d0   :  { %vm1947_vm2 = vcmp.ge.f32.partialorder %v1940_v2, 0.0  ;;  %v1954_v23 = vmul.f32 %v1951_v41, %v1940_v2  ;;  %vm1949_vm3 = vcmp.ge.f32.partialorder %v1942_v53, 0.0  ;;  %v1956_v55 = vmul.f32 %v1951_v41, %v1942_v53 }
 0x4d1   :  { %vm1948_vm4 = vcmp.ge.f32.partialorder %v1941_v54, 0.0  ;;  %v1955_v49 = vmul.f32 %v1951_v41, %v1941_v54  ;;  %vm1950_vm5 = vcmp.ge.f32.partialorder %v1943_v11, 0.0  ;;  %v1957_v22 = vmul.f32 %v1951_v41, %v1943_v11 }
 0x4d2   :  { %v1960_v38 = vsel %vm1947_vm2, %v1940_v2, %v1954_v23  ;;  %v1962_v31 = vsel %vm1949_vm3, %v1942_v53, %v1956_v55 }
 0x4d3   :  { %v1975_v21 = vadd.f32 %v1969_v42, %v1960_v38  ;;  %v1977_v59 = vadd.f32 %v1971_v62, %v1962_v31  ;;  %v1961_v12 = vsel %vm1948_vm4, %v1941_v54, %v1955_v49  ;;  %v1963_v57 = vsel %vm1950_vm5, %v1943_v11, %v1957_v22 }
 0x4d4   :  { %v1976_v30 = vadd.f32 %v1970_v33, %v1961_v12  ;;  %v1978_v26 = vadd.f32 %v1972_v28, %v1963_v57 }
 0x4d6   :  { %v2138_v25 = vpack.c.bf16 %v1976_v30, %v1975_v21  ;;  %v2139_v34 = vpack.c.bf16 %v1978_v26, %v1977_v59 }
 0x4d8   :  { %2005 = vst [vmem:[%s2922_s10 + $0xc] sm:$0xff] %v2138_v25  ;;  %2006 = vst [vmem:[%s2922_s10 + $0x14] sm:$0xff] %v2139_v34 }
 0x4d9   :  { %2012 = vsyncpa [#allocation6], 1 }

// kernel: rbpn_forward.45
= control target key start
LH: loop header
LB: loop body
LE: loop exit
PB: predicated region body
PF: predicated region fallthrough
CT: control target
= control target key end

     0   :  { %12 = vsyncpa [#allocation5], 0  ;;  %s1982_s0 = inlined_call_operand.vmem [shape: bf16[8,1024], index: 0, kind: input, shape index: {}]   ;;  %s1983_s1 = inlined_call_operand.vmem [shape: f32[1,768], index: 1, kind: input, shape index: {}]   ;;  %s1984_s2 = inlined_call_operand.vmem [shape: bf16[8,72], index: 2, kind: input, shape index: {}]   ;;  %s1985_s3 = inlined_call_operand.vmem [shape: f32[8,1], index: 3, kind: input, shape index: {}]   ;;  %s1986_s4 = inlined_call_operand.vmem [shape: bf16[8,72], index: 4, kind: input, shape index: {}]   ;;  %s1987_s5 = inlined_call_operand.vmem [shape: f32[8,1], index: 5, kind: input, shape index: {}]   ;;  %s1988_s6 = inlined_call_operand.vmem [shape: f32[2], index: 6, kind: input, shape index: {}]   ;;  %s1989_s7 = inlined_call_operand.vmem [shape: bf16[8,1024], index: 7, kind: output, shape index: {}]  }
   0x1   :  { %s31_s26 = sshll.u32 %s1988_s6, 4  ;;  %s32_s26 = int_to_ptr.vmem [resolvable:$true] %s31_s26 }
   0x2   :  { %s1440_s27 = scalar_lea.vmem %s32_s26, 16  ;;  %p1445_p1 = scmp.lt.s32.totalorder %s32_s26, %s32_s26 }
   0x3   :  { %p1441_p0 = scmp.ne.s32.totalorder %s32_s26, %s1440_s27  ;;  %p1446_p2 = scmp.lt.s32.totalorder %s1440_s27, %s1440_s27 }
   0x5   :  { %p1447_p3 = por %p1446_p2, %p1445_p1 }
   0x7   :  { %p1448_p4 = pnand %p1447_p3, %p1441_p0 }
   0x9   :  { %1451 = shalt.err (!%p1448_p4)
}
   0xa   :  { %s1454_s28 = smov [#allocation4]  }
   0xb   :  { %34 = dma.vmem_to_smem %s32_s26, 16, %s1454_s28, [#allocation5]  }
   0xc   :  { %1452 = dma.done.wait [#allocation5], 16  }
   0xd   :  { %1453 = vsyncadd [#allocation5], 4294967280 }
   0xe   :  { %38 = sfence }
   0xf   :  { %v47_v0 = vld [vmem:[%s1982_s0 + $0x10] sm:$0xff]  ;;  %v45_v1 = vld [vmem:[%s1982_s0] sm:$0xff]  ;;  %s1455_s6 = smov 19   ;;  %v46_v2 = vld [vmem:[%s1982_s0 + $0x8] sm:$0xff]  ;;  %s1456_s12 = smov 18   ;;  %v1463_v6 = vmov 0  }
  0x10   :  { %57 = vrot.lane.b32.xlu1 %v47_v0, %s1455_s6  ;;  %53 = vrot.lane.b32.xlu0 %v45_v1, %s1455_s6  ;;  %s1457_s13 = smov 17   ;;  %s1458_s14 = smov 1   ;;  %v1531_v3 = vld [vmem:[%s1982_s0 + $0xc] sm:$0xff]  ;;  %v1536_v4 = vld [vmem:[%s1982_s0 + $0x4] sm:$0xff]  ;;  %41 = vst [vmem:[#allocation3] sm:$0xff] %v1463_v6  ;;  %42 = vst [vmem:[#allocation3 + $0x8] sm:$0xff] %v1463_v6 }
  0x11   :  { %s1459_s19 = smov 127   ;;  %v1545_v5 = vld [vmem:[%s1982_s0 + $0x14] sm:$0xff]  ;;  %s1460_s22 = smov 111   ;;  %540 = vmatprep.mubr.bf16.mxu0 %v1463_v6  ;;  %1311 = vst [vmem:[%s1989_s7] sm:$0xf] %v1463_v6  ;;  %1339 = vst [vmem:[%s1989_s7 + $0x1c] sm:$0xf] %v1463_v6  ;;  %581 = vmatprep.mubr.bf16.mxu1 %v1463_v6 }
  0x12   :  { %s1461_s23 = smov 110   ;;  %s1462_s24 = smov 109   ;;  %43 = vst [vmem:[#allocation3 + $0x10] sm:$0xff] %v1463_v6  ;;  %44 = vst [vmem:[#allocation3 + $0x18] sm:$0xff] %v1463_v6  ;;  %1439 = vset.pattern.permute.xlu0 %v1463_v6  ;;  %v82_v7 = vld [vmem:[%s1982_s0 + $0x18] sm:$0xf] }
  0x13   :  { %v48_v8 = vld [vmem:[%s1982_s0 + $0x18] sm:$0xf]  ;;  %v220_v11 = vld [vmem:[%s1982_s0 + $0x1c] sm:$0xf]  ;;  %v344_v15 = vld [vmem:[%s1985_s3] sm:$0xff]  ;;  %vm65_vm0 = vcmask 1043456  }
  0x14   :  { %87 = vrot.lane.b32.xlu1 %v45_v1, %s1456_s12  ;;  %55 = vrot.lane.b32.xlu0 %v46_v2, %s1455_s6  ;;  %v148_v9 = vld [vmem:[%s1982_s0 + $0x18] sm:$0xf]  ;;  %v187_v12 = vld [vmem:[%s1982_s0 + $0x1c] sm:$0xf]  ;;  %vm67_vm1 = vcmask 154624   ;;  %vm100_vm2 = vcmask 146432  }
  0x15   :  { %v115_v10 = vld [vmem:[%s1982_s0 + $0x18] sm:$0xf]  ;;  %v286_v13 = vld [vmem:[%s1982_s0 + $0x1c] sm:$0xf]  ;;  %vm133_vm3 = vcmask 138240   ;;  %vm166_vm4 = vcmask 7168  }
  0x16   :  { %v253_v14 = vld [vmem:[%s1982_s0 + $0x1c] sm:$0xf]  ;;  %vm205_vm5 = vcmask 1039360   ;;  %vm238_vm6 = vcmask 908288   ;;  %vm271_vm7 = vcmask 900096   ;;  %vm304_vm8 = vcmask 891904  }
  0x17   :  { %vm485_vm9 = vcmask 588800  }
  0x18   :  { %91 = vrot.lane.b32.xlu1 %v47_v0, %s1456_s12  ;;  %89 = vrot.lane.b32.xlu0 %v46_v2, %s1456_s12 }
  0x1c   :  { %122 = vrot.lane.b32.xlu1 %v46_v2, %s1457_s13  ;;  %120 = vrot.lane.b32.xlu0 %v45_v1, %s1457_s13 }
  0x20   :  { %153 = vrot.lane.b32.xlu1 %v45_v1, %s1458_s14  ;;  %124 = vrot.lane.b32.xlu0 %v47_v0, %s1457_s13 }
  0x24   :  { %157 = vrot.lane.b32.xlu1 %v47_v0, %s1458_s14  ;;  %155 = vrot.lane.b32.xlu0 %v46_v2, %s1458_s14 }
  0x28   :  { %194 = vrot.lane.b32.xlu1 %v1531_v3, %s1459_s19  ;;  %192 = vrot.lane.b32.xlu0 %v1536_v4, %s1459_s19 }
  0x2c   :  { %225 = vrot.lane.b32.xlu1 %v1536_v4, %s1460_s22  ;;  %196 = vrot.lane.b32.xlu0 %v1545_v5, %s1459_s19 }
  0x30   :  { %229 = vrot.lane.b32.xlu1 %v1545_v5, %s1460_s22  ;;  %227 = vrot.lane.b32.xlu0 %v1531_v3, %s1460_s22 }
  0x34   :  { %260 = vrot.lane.b32.xlu1 %v1531_v3, %s1461_s23  ;;  %258 = vrot.lane.b32.xlu0 %v1536_v4, %s1461_s23 }
  0x38   :  { %291 = vrot.lane.b32.xlu1 %v1536_v4, %s1462_s24  ;;  %262 = vrot.lane.b32.xlu0 %v1545_v5, %s1461_s23 }
  0x3c   :  { %295 = vrot.lane.b32.xlu1 %v1545_v5, %s1462_s24  ;;  %293 = vrot.lane.b32.xlu0 %v1531_v3, %s1462_s24 }
  0x40   :  { %93 = vrot.lane.b32.xlu1 %v82_v7, %s1456_s12  ;;  %59 = vrot.lane.b32.xlu0 %v48_v8, %s1455_s6 }
  0x44   :  { %159 = vrot.lane.b32.xlu1 %v148_v9, %s1458_s14  ;;  %126 = vrot.lane.b32.xlu0 %v115_v10, %s1457_s13 }
  0x48   :  { %231 = vrot.lane.b32.xlu1 %v220_v11, %s1460_s22  ;;  %198 = vrot.lane.b32.xlu0 %v187_v12, %s1459_s19 }
  0x4c   :  { %297 = vrot.lane.b32.xlu1 %v286_v13, %s1462_s24  ;;  %264 = vrot.lane.b32.xlu0 %v253_v14, %s1461_s23 }
  0x50   :  { %347 = vperm.xlu0 %1439, %v344_v15  }
  0x82   :  { %v1617_v16 = vpop.permute.xlu1 %57  ;;  %v54_v17 = vpop.permute.xlu0 %53 }
  0x83   :  { %v63_v20 = vrot.slane %v1617_v16, 4  ;;  %v61_v22 = vrot.slane %v54_v17, 4 }
  0x86   :  { %v88_v18 = vpop.permute.xlu1 %87  ;;  %v56_v19 = vpop.permute.xlu0 %55 }
  0x87   :  { %v62_v21 = vrot.slane %v56_v19, 4  ;;  %v95_v23 = vrot.slane %v88_v18, 4 }
  0x89   :  { %v66_v28 = vsel %vm65_vm0, %v61_v22, %v62_v21  ;;  %v69_v29 = vsel %vm65_vm0, %v62_v21, %v63_v20 }
  0x8a   :  { %v1620_v24 = vpop.permute.xlu1 %91  ;;  %v90_v25 = vpop.permute.xlu0 %89  ;;  %v68_v34 = vsel %vm67_vm1, %v54_v17, %v66_v28  ;;  %v70_v36 = vsel %vm67_vm1, %v56_v19, %v69_v29 }
  0x8b   :  { %v97_v26 = vrot.slane %v1620_v24, 4  ;;  %v96_v27 = vrot.slane %v90_v25, 4 }
  0x8d   :  { %v99_v30 = vsel %vm65_vm0, %v95_v23, %v96_v27  ;;  %v102_v31 = vsel %vm65_vm0, %v96_v27, %v97_v26 }
  0x8e   :  { %v123_v32 = vpop.permute.xlu1 %122  ;;  %v121_v33 = vpop.permute.xlu0 %120  ;;  %v101_v35 = vsel %vm100_vm2, %v88_v18, %v99_v30  ;;  %v103_v37 = vsel %vm100_vm2, %v90_v25, %v102_v31 }
  0x8f   :  { %v1346_v38 = vcombine.high %v68_v34, %v101_v35  ;;  %v1348_v39 = vcombine.high %v70_v36, %v103_v37  ;;  %v1345_v40 = vcombine.low %v68_v34, %v101_v35  ;;  %v1347_v41 = vcombine.low %v70_v36, %v103_v37 }
  0x90   :  { %v129_v44 = vrot.slane %v123_v32, 4  ;;  %v128_v45 = vrot.slane %v121_v33, 4 }
  0x91   :  { %508 = vmatprep.subr.bf16.mxu0 %v1346_v38  ;;  %549 = vmatprep.subr.bf16.mxu1 %v1348_v39 }
  0x92   :  { %v154_v42 = vpop.permute.xlu1 %153  ;;  %509 = vmatpush1.bf16.msra.mxu0 %v1345_v40  ;;  %550 = vmatpush1.bf16.msra.mxu1 %v1347_v41  ;;  %v1635_v43 = vpop.permute.xlu0 %124  ;;  %v132_v50 = vsel %vm65_vm0, %v128_v45, %v129_v44 }
  0x93   :  { %v130_v46 = vrot.slane %v1635_v43, 4  ;;  %v161_v47 = vrot.slane %v154_v42, 4  ;;  %v134_v56 = vsel %vm133_vm3, %v121_v33, %v132_v50 }
  0x95   :  { %v135_v52 = vsel %vm65_vm0, %v129_v44, %v130_v46 }
  0x96   :  { %v1638_v48 = vpop.permute.xlu1 %157  ;;  %v156_v49 = vpop.permute.xlu0 %155  ;;  %v136_v57 = vsel %vm133_vm3, %v123_v32, %v135_v52 }
  0x97   :  { %v163_v51 = vrot.slane %v1638_v48, 4  ;;  %v162_v53 = vrot.slane %v156_v49, 4 }
  0x99   :  { %v165_v54 = vsel %vm65_vm0, %v161_v47, %v162_v53  ;;  %v168_v55 = vsel %vm65_vm0, %v162_v53, %v163_v51 }
  0x9a   :  { %v169_v58 = vsel %vm166_vm4, %v156_v49, %v168_v55  ;;  %v195_v59 = vpop.permute.xlu1 %194  ;;  %v193_v60 = vpop.permute.xlu0 %192  ;;  %v167_v61 = vsel %vm166_vm4, %v154_v42, %v165_v54 }
  0x9b   :  { %v1353_v62 = vcombine.low %v136_v57, %v169_v58  ;;  %v1354_v63 = vcombine.high %v136_v57, %v169_v58  ;;  %v201_v0 = vrot.slane %v195_v59, 4  ;;  %v200_v1 = vrot.slane %v193_v60, 4 }
  0x9c   :  { %v1352_v2 = vcombine.high %v134_v56, %v167_v61  ;;  %v1351_v7 = vcombine.low %v134_v56, %v167_v61 }
  0x9d   :  { %v204_v8 = vsel %vm65_vm0, %v200_v1, %v201_v0  ;;  %551 = vmatprep.subr.bf16.mxu1 %v1354_v63 }
  0x9e   :  { %v206_v9 = vsel %vm205_vm5, %v193_v60, %v204_v8  ;;  %510 = vmatprep.subr.bf16.mxu0 %v1352_v2  ;;  %v226_v10 = vpop.permute.xlu1 %225  ;;  %552 = vmatpush1.bf16.msra.mxu1 %v1353_v62  ;;  %v1655_v11 = vpop.permute.xlu0 %196 }
  0x9f   :  { %v1357_v12 = vcombine.low %v1536_v4, %v206_v9  ;;  %v1358_v13 = vcombine.high %v1536_v4, %v206_v9  ;;  %511 = vmatpush1.bf16.msra.mxu0 %v1351_v7  ;;  %v202_v14 = vrot.slane %v1655_v11, 4  ;;  %v233_v21 = vrot.slane %v226_v10, 4 }
  0xa1   :  { %v207_v15 = vsel %vm65_vm0, %v201_v0, %v202_v14  ;;  %512 = vmatprep.subr.bf16.mxu0 %v1358_v13  ;;  %v343_v13 = vld [vmem:[%s1984_s2] sm:$0xf]  ;;  %s668_s2 = sld [smem:[#allocation4]] }
  0xa2   :  { %v1663_v17 = vpop.permute.xlu1 %229  ;;  %v228_v18 = vpop.permute.xlu0 %227  ;;  %v208_v19 = vsel %vm205_vm5, %v195_v59, %v207_v15 }
  0xa3   :  { %513 = vmatpush1.bf16.msra.mxu0 %v1357_v12  ;;  %v234_v22 = vrot.slane %v228_v18, 4  ;;  %v1360_v23 = vcombine.high %v1531_v3, %v208_v19  ;;  %v1359_v4 = vcombine.low %v1531_v3, %v208_v19  ;;  %v235_v28 = vrot.slane %v1663_v17, 4 }
  0xa5   :  { %553 = vmatprep.subr.bf16.mxu1 %v1360_v23  ;;  %v237_v30 = vsel %vm65_vm0, %v233_v21, %v234_v22  ;;  %v240_v36 = vsel %vm65_vm0, %v234_v22, %v235_v28 }
  0xa6   :  { %v261_v25 = vpop.permute.xlu1 %260  ;;  %554 = vmatpush1.bf16.msra.mxu1 %v1359_v4  ;;  %v259_v27 = vpop.permute.xlu0 %258  ;;  %v239_v33 = vsel %vm238_vm6, %v226_v10, %v237_v30  ;;  %v241_v42 = vsel %vm238_vm6, %v228_v18, %v240_v36 }
  0xa7   :  { %v267_v29 = vrot.slane %v261_v25, 4  ;;  %v266_v31 = vrot.slane %v259_v27, 4 }
  0xa9   :  { %v270_v32 = vsel %vm65_vm0, %v266_v31, %v267_v29 }
  0xaa   :  { %v272_v34 = vsel %vm271_vm7, %v259_v27, %v270_v32  ;;  %v292_v35 = vpop.permute.xlu1 %291  ;;  %v1673_v3 = vpop.permute.xlu0 %262 }
  0xab   :  { %v1363_v37 = vcombine.low %v239_v33, %v272_v34  ;;  %v1364_v38 = vcombine.high %v239_v33, %v272_v34  ;;  %v268_v39 = vrot.slane %v1673_v3, 4  ;;  %v299_v40 = vrot.slane %v292_v35, 4 }
  0xad   :  { %v273_v41 = vsel %vm65_vm0, %v267_v29, %v268_v39  ;;  %514 = vmatprep.subr.bf16.mxu0 %v1364_v38 }
  0xae   :  { %v1683_v44 = vpop.permute.xlu1 %295  ;;  %515 = vmatpush1.bf16.msra.mxu0 %v1363_v37  ;;  %v294_v45 = vpop.permute.xlu0 %293  ;;  %v274_v47 = vsel %vm271_vm7, %v261_v25, %v273_v41 }
  0xaf   :  { %v301_v49 = vrot.slane %v1683_v44, 4  ;;  %v300_v50 = vrot.slane %v294_v45, 4  ;;  %v1366_v52 = vcombine.high %v241_v42, %v274_v47  ;;  %v1365_v53 = vcombine.low %v241_v42, %v274_v47  ;;  %v40_v47 = vld [vmem:[%s1983_s1] sm:$0x3f] }
  0xb1   :  { %v303_v54 = vsel %vm65_vm0, %v299_v40, %v300_v50  ;;  %v306_v55 = vsel %vm65_vm0, %v300_v50, %v301_v49  ;;  %555 = vmatprep.subr.bf16.mxu1 %v1366_v52 }
  0xb2   :  { %v307_v56 = vsel %vm304_vm8, %v294_v45, %v306_v55  ;;  %v94_v57 = vpop.permute.xlu1 %93  ;;  %556 = vmatpush1.bf16.msra.mxu1 %v1365_v53  ;;  %v60_v58 = vpop.permute.xlu0 %59  ;;  %v305_v59 = vsel %vm304_vm8, %v292_v35, %v303_v54 }
  0xb3   :  { %v1371_v60 = vcombine.low %v307_v56, %v307_v56  ;;  %v1372_v61 = vcombine.high %v307_v56, %v307_v56  ;;  %v98_v62 = vrot.slane %v94_v57, 4  ;;  %v64_v63 = vrot.slane %v60_v58, 4 }
  0xb4   :  { %v1370_v0 = vcombine.high %v305_v59, %v305_v59  ;;  %v1369_v1 = vcombine.low %v305_v59, %v305_v59 }
  0xb5   :  { %v104_v2 = vsel %vm65_vm0, %v97_v26, %v98_v62  ;;  %v71_v7 = vsel %vm65_vm0, %v63_v20, %v64_v63  ;;  %1377 = vmatprep.subr.msk.bf16.mxu1 %vm65_vm0, %v1372_v61  ;;  %v497_v8 = vsel %vm65_vm0, %v1371_v60, 0  ;;  %v675_v63 = vstv %s668_s2 }
  0xb6   :  { %1375 = vmatprep.subr.msk.bf16.mxu0 %vm65_vm0, %v1370_v0  ;;  %v160_v9 = vpop.permute.xlu1 %159  ;;  %v491_v10 = vsel %vm65_vm0, %v1369_v1, 0  ;;  %558 = vmatpush1.bf16.msra.mxu1 %v497_v8  ;;  %v127_v12 = vpop.permute.xlu0 %126  ;;  %v72_v26 = vsel %vm67_vm1, %v1617_v16, %v71_v7  ;;  %v105_v20 = vsel %vm100_vm2, %v1620_v24, %v104_v2 }
  0xb7   :  { %v164_v15 = vrot.slane %v160_v9, 4  ;;  %517 = vmatpush1.bf16.msra.mxu0 %v491_v10  ;;  %v131_v18 = vrot.slane %v127_v12, 4  ;;  %v1349_v19 = vcombine.low %v72_v26, %v105_v20  ;;  %v1350_v21 = vcombine.high %v72_v26, %v105_v20 }
  0xb9   :  { %v170_v22 = vsel %vm65_vm0, %v163_v51, %v164_v15  ;;  %v137_v23 = vsel %vm65_vm0, %v130_v46, %v131_v18  ;;  %1378 = vmatmul.mubr.msk.bf16.vlgmr.msra.gmra.mrb[0].mxu1 %vm485_vm9, %v343_v13  ;;  %590 = vmatprep.subr.bf16.mxu0 %v1350_v21 }
  0xba   :  { %1376 = vmatmul.mubr.msk.bf16.vlgmr.msra.gmra.mrb[0].mxu0 %vm485_vm9, %v343_v13  ;;  %v232_v16 = vpop.permute.xlu1 %231  ;;  %v199_v24 = vpop.permute.xlu0 %198  ;;  %v138_v4 = vsel %vm133_vm3, %v1635_v43, %v137_v23  ;;  %v171_v25 = vsel %vm166_vm4, %v1638_v48, %v170_v22  ;;  %1199 = vmatprep.mubr.bf16.mxu1 %v1463_v6 }
  0xbb   :  { %v236_v51 = vrot.slane %v232_v16, 4  ;;  %v203_v27 = vrot.slane %v199_v24, 4  ;;  %591 = vmatpush1.bf16.msra.mxu0 %v1349_v19  ;;  %v1355_v29 = vcombine.low %v138_v4, %v171_v25  ;;  %v1356_v46 = vcombine.high %v138_v4, %v171_v25  ;;  %622 = vmatprep.mubr.bf16.mxu0 %v1463_v6 }
  0xbd   :  { %v209_v30 = vsel %vm65_vm0, %v202_v14, %v203_v27  ;;  %592 = vmatprep.subr.bf16.mxu0 %v1356_v46  ;;  %v242_v43 = vsel %vm65_vm0, %v235_v28, %v236_v51 }
  0xbe   :  { %v298_v31 = vpop.permute.xlu1 %297  ;;  %v265_v48 = vpop.permute.xlu0 %264  ;;  %v210_v32 = vsel %vm205_vm5, %v1655_v11, %v209_v30  ;;  %v243_v37 = vsel %vm238_vm6, %v1663_v17, %v242_v43  ;;  %v852_v17 = vld [vmem:[#allocation3 + $0x1c] sm:$0xf] }
  0xbf   :  { %v302_v33 = vrot.slane %v298_v31, 4  ;;  %v269_v34 = vrot.slane %v265_v48, 4  ;;  %593 = vmatpush1.bf16.msra.mxu0 %v1355_v29  ;;  %v1361_v35 = vcombine.low %v1545_v5, %v210_v32  ;;  %v1362_v36 = vcombine.high %v1545_v5, %v210_v32  ;;  %863 = vrot.lane.b32.xlu1 %v852_v17, %s1459_s19 }
  0xc1   :  { %v308_v14 = vsel %vm65_vm0, %v301_v49, %v302_v33  ;;  %v275_v28 = vsel %vm65_vm0, %v268_v39, %v269_v34  ;;  %594 = vmatprep.subr.bf16.mxu0 %v1362_v36 }
  0xc2   :  { %v276_v11 = vsel %vm271_vm7, %v1673_v3, %v275_v28  ;;  %v309_v38 = vsel %vm304_vm8, %v1683_v44, %v308_v14  ;;  %v632_v3 = vlaneseq }
  0xc3   :  { %595 = vmatpush1.bf16.msra.mxu0 %v1361_v35  ;;  %v1367_v5 = vcombine.low %v243_v37, %v276_v11  ;;  %v1368_v40 = vcombine.high %v243_v37, %v276_v11  ;;  %v1374_v41 = vcombine.high %v309_v38, %v309_v38  ;;  %v1373_v42 = vcombine.low %v309_v38, %v309_v38 }
  0xc4   :  { %v633_v44 = vshrl.u32 %v632_v3, 7  ;;  %v884_v3 = vld [vmem:[#allocation3 + $0x1c] sm:$0xf] }
  0xc5   :  { %596 = vmatprep.subr.bf16.mxu0 %v1368_v40  ;;  %v503_v39 = vsel %vm65_vm0, %v1373_v42, 0 }
  0xc6   :  { %v642_v45 = vsub.s32 2, %v633_v44  ;;  %v634_v49 = vsub.s32 0, %v633_v44  ;;  %v646_v50 = vsub.s32 3, %v633_v44  ;;  %v638_v52 = vsub.s32 1, %v633_v44 }
  0xc7   :  { %597 = vmatpush1.bf16.msra.mxu0 %v1367_v5  ;;  %v650_v51 = vsub.s32 4, %v633_v44  ;;  %v654_v27 = vsub.s32 5, %v633_v44  ;;  %v916_v44 = vld [vmem:[#allocation3 + $0x1c] sm:$0xf] }
  0xc8   :  { %1379 = vmatprep.subr.msk.bf16.mxu0 %vm65_vm0, %v1374_v41  ;;  %v1754_v54 = vrot.slane %v40_v47, %v642_v45  ;;  %v1756_v55 = vrot.slane %v40_v47, %v634_v49  ;;  %v1758_v57 = vrot.slane %v40_v47, %v646_v50  ;;  %v1760_v60 = vrot.slane %v40_v47, %v638_v52  ;;  %v1005_v45 = vld [vmem:[%s1987_s5] sm:$0xff] }
  0xc9   :  { %v1774_v46 = vrot.slane %v40_v47, %v650_v51  ;;  %v1776_v43 = vrot.slane %v40_v47, %v654_v27  ;;  %v948_v47 = vld [vmem:[#allocation3 + $0x1c] sm:$0xf] }
  0xcb   :  { %599 = vmatpush1.bf16.msra.mxu0 %v503_v39 }
  0xce   :  { %1380 = vmatmul.mubr.msk.bf16.vlgmr.msra.gmra.mrb[4].mxu0 %vm485_vm9, %v343_v13 }
  0xcf   :  { %1240 = vmatprep.mubr.bf16.mxu0 %v1463_v6  ;;  %v348_v53 = vpop.permute.xlu0 %347 }
 0x131   :  { %v1827_v49 = vpop.permute.xlu1 %863 }
 0x18c   :  { %v583_v56 = vpop.f32.mrb[0].mxu1 }
 0x18d   :  { %v542_v58 = vpop.f32.mrb[0].mxu0  ;;  %v584_v59 = vadd.f32 %v583_v56, %v348_v53  ;;  %v585_v61 = vpop.f32.mrb[1].mxu1 }
 0x18e   :  { %v543_v62 = vadd.f32 %v542_v58, %v348_v53  ;;  %v544_v0 = vpop.f32.mrb[1].mxu0  ;;  %v586_v1 = vadd.f32 %v585_v61, %v348_v53  ;;  %v587_v2 = vpop.f32.mrb[2].mxu1 }
 0x18f   :  { %v664_v7 = vmul.f32 %v1754_v54, %v584_v59  ;;  %v545_v8 = vadd.f32 %v544_v0, %v348_v53  ;;  %v546_v9 = vpop.f32.mrb[2].mxu0  ;;  %v588_v10 = vpop.f32.mrb[3].mxu1 }
 0x190   :  { %v662_v12 = vmul.f32 %v1756_v55, %v543_v62  ;;  %v665_v13 = vmul.f32 %v1758_v57, %v586_v1  ;;  %v547_v26 = vpop.f32.mrb[3].mxu0 }
 0x191   :  { %vm671_vm10 = vcmp.ge.f32.partialorder %v664_v7, 0.0  ;;  %v678_v20 = vmul.f32 %v675_v63, %v664_v7  ;;  %v663_v15 = vmul.f32 %v1760_v60, %v545_v8 }
 0x192   :  { %vm669_vm11 = vcmp.ge.f32.partialorder %v662_v12, 0.0  ;;  %v676_v18 = vmul.f32 %v675_v63, %v662_v12  ;;  %vm672_vm12 = vcmp.ge.f32.partialorder %v665_v13, 0.0  ;;  %v679_v19 = vmul.f32 %v675_v63, %v665_v13 }
 0x193   :  { %v684_v21 = vsel %vm671_vm10, %v664_v7, %v678_v20  ;;  %vm670_vm13 = vcmp.ge.f32.partialorder %v663_v15, 0.0  ;;  %v677_v22 = vmul.f32 %v675_v63, %v663_v15 }
 0x194   :  { %v682_v23 = vsel %vm669_vm11, %v662_v12, %v676_v18  ;;  %v685_v16 = vsel %vm672_vm12, %v665_v13, %v679_v19 }
 0x195   :  { %v683_v24 = vsel %vm670_vm13, %v663_v15, %v677_v22  ;;  %v1766_v4 = vpack.c.bf16 %v685_v16, %v684_v21 }
 0x196   :  { %v1768_v25 = vpack.c.bf16 %v683_v24, %v682_v23 }
 0x197   :  { %713 = vst [vmem:[#allocation3 + $0xc] sm:$0xff] %v1766_v4 }
 0x198   :  { %712 = vst [vmem:[#allocation3 + $0x4] sm:$0xff] %v1768_v25 }
 0x19f   :  { %v747_v29 = vld [vmem:[#allocation3] sm:$0xff]  ;;  %v716_v33 = vld [vmem:[#allocation3 + $0x8] sm:$0xff] }
 0x1a0   :  { %755 = vrot.lane.b32.xlu0 %v747_v29, %s1456_s12  ;;  %723 = vrot.lane.b32.xlu1 %v747_v29, %s1455_s6 }
 0x1a1   :  { %v624_v30 = vpop.f32.mrb[4].mxu0 }
 0x1a2   :  { %v625_v31 = vadd.f32 %v624_v30, %v348_v53  ;;  %v626_v48 = vpop.f32.mrb[5].mxu0 }
 0x1a3   :  { %v627_v32 = vadd.f32 %v626_v48, %v348_v53  ;;  %v628_v34 = vpop.f32.mrb[6].mxu0 }
 0x1a4   :  { %v666_v35 = vmul.f32 %v1774_v46, %v625_v31  ;;  %787 = vrot.lane.b32.xlu0 %v747_v29, %s1457_s13  ;;  %725 = vrot.lane.b32.xlu1 %v716_v33, %s1455_s6  ;;  %v629_v36 = vpop.f32.mrb[7].mxu0 }
 0x1a5   :  { %v667_v14 = vmul.f32 %v1776_v43, %v627_v32 }
 0x1a6   :  { %vm673_vm14 = vcmp.ge.f32.partialorder %v666_v35, 0.0  ;;  %v680_v28 = vmul.f32 %v675_v63, %v666_v35 }
 0x1a7   :  { %vm674_vm15 = vcmp.ge.f32.partialorder %v667_v14, 0.0  ;;  %v681_v37 = vmul.f32 %v675_v63, %v667_v14 }
 0x1a8   :  { %v686_v11 = vsel %vm673_vm14, %v666_v35, %v680_v28  ;;  %819 = vrot.lane.b32.xlu0 %v747_v29, %s1458_s14  ;;  %757 = vrot.lane.b32.xlu1 %v716_v33, %s1456_s12 }
 0x1a9   :  { %v687_v38 = vsel %vm674_vm15, %v667_v14, %v681_v37 }
 0x1aa   :  { %v1784_v5 = vpack.c.bf16 %v687_v38, %v686_v11 }
 0x1ac   :  { %714 = vst [vmem:[#allocation3 + $0x14] sm:$0xff] %v1784_v5  ;;  %857 = vrot.lane.b32.xlu0 %v1768_v25, %s1459_s19  ;;  %789 = vrot.lane.b32.xlu1 %v716_v33, %s1457_s13 }
 0x1b0   :  { %889 = vrot.lane.b32.xlu0 %v1768_v25, %s1460_s22  ;;  %821 = vrot.lane.b32.xlu1 %v716_v33, %s1458_s14 }
 0x1b3   :  { %v717_v40 = vld [vmem:[#allocation3 + $0x10] sm:$0xff]  ;;  %v718_v41 = vld [vmem:[#allocation3 + $0x18] sm:$0xf] }
 0x1b4   :  { %921 = vrot.lane.b32.xlu0 %v1768_v25, %s1461_s23  ;;  %859 = vrot.lane.b32.xlu1 %v1766_v4, %s1459_s19  ;;  %v750_v42 = vld [vmem:[#allocation3 + $0x18] sm:$0xf] }
 0x1b5   :  { %v782_v39 = vld [vmem:[#allocation3 + $0x18] sm:$0xf] }
 0x1b6   :  { %v814_v17 = vld [vmem:[#allocation3 + $0x18] sm:$0xf] }
 0x1b8   :  { %953 = vrot.lane.b32.xlu0 %v1768_v25, %s1462_s24  ;;  %891 = vrot.lane.b32.xlu1 %v1766_v4, %s1460_s22 }
 0x1bc   :  { %727 = vrot.lane.b32.xlu0 %v717_v40, %s1455_s6  ;;  %923 = vrot.lane.b32.xlu1 %v1766_v4, %s1461_s23 }
 0x1c0   :  { %759 = vrot.lane.b32.xlu0 %v717_v40, %s1456_s12  ;;  %955 = vrot.lane.b32.xlu1 %v1766_v4, %s1462_s24 }
 0x1c4   :  { %791 = vrot.lane.b32.xlu0 %v717_v40, %s1457_s13  ;;  %729 = vrot.lane.b32.xlu1 %v718_v41, %s1455_s6 }
 0x1c8   :  { %823 = vrot.lane.b32.xlu0 %v717_v40, %s1458_s14  ;;  %761 = vrot.lane.b32.xlu1 %v750_v42, %s1456_s12 }
 0x1cc   :  { %861 = vrot.lane.b32.xlu0 %v1784_v5, %s1459_s19  ;;  %793 = vrot.lane.b32.xlu1 %v782_v39, %s1457_s13 }
 0x1d0   :  { %893 = vrot.lane.b32.xlu0 %v1784_v5, %s1460_s22  ;;  %825 = vrot.lane.b32.xlu1 %v814_v17, %s1458_s14 }
 0x1d4   :  { %925 = vrot.lane.b32.xlu0 %v1784_v5, %s1461_s23  ;;  %895 = vrot.lane.b32.xlu1 %v884_v3, %s1460_s22 }
 0x1d8   :  { %957 = vrot.lane.b32.xlu0 %v1784_v5, %s1462_s24  ;;  %927 = vrot.lane.b32.xlu1 %v916_v44, %s1461_s23 }
 0x1dc   :  { %1008 = vperm.xlu0 %1439, %v1005_v45   ;;  %959 = vrot.lane.b32.xlu1 %v948_v47, %s1462_s24 }
 0x212   :  { %v756_v50 = vpop.permute.xlu0 %755  ;;  %v724_v52 = vpop.permute.xlu1 %723 }
 0x213   :  { %v731_v59 = vrot.slane %v724_v52, 4  ;;  %v763_v63 = vrot.slane %v756_v50, 4 }
 0x216   :  { %v788_v53 = vpop.permute.xlu0 %787  ;;  %v1829_v56 = vpop.permute.xlu1 %725 }
 0x217   :  { %v732_v58 = vrot.slane %v1829_v56, 4  ;;  %v795_v20 = vrot.slane %v788_v53, 4 }
 0x219   :  { %v735_v0 = vsel %vm65_vm0, %v731_v59, %v732_v58 }
 0x21a   :  { %v820_v61 = vpop.permute.xlu0 %819  ;;  %v1832_v62 = vpop.permute.xlu1 %757  ;;  %v736_v9 = vsel %vm67_vm1, %v724_v52, %v735_v0 }
 0x21b   :  { %v764_v1 = vrot.slane %v1832_v62, 4  ;;  %v827_v19 = vrot.slane %v820_v61, 4 }
 0x21d   :  { %v767_v2 = vsel %vm65_vm0, %v763_v63, %v764_v1 }
 0x21e   :  { %v858_v7 = vpop.permute.xlu0 %857  ;;  %v1837_v8 = vpop.permute.xlu1 %789  ;;  %v768_v10 = vsel %vm100_vm2, %v756_v50, %v767_v2 }
 0x21f   :  { %v796_v12 = vrot.slane %v1837_v8, 4  ;;  %v1384_v13 = vcombine.low %v736_v9, %v768_v10  ;;  %v1385_v26 = vcombine.high %v736_v9, %v768_v10  ;;  %v865_v29 = vrot.slane %v858_v7, 4 }
 0x221   :  { %1167 = vmatprep.subr.bf16.mxu1 %v1385_v26  ;;  %v799_v21 = vsel %vm65_vm0, %v795_v20, %v796_v12 }
 0x222   :  { %v890_v15 = vpop.permute.xlu0 %889  ;;  %1168 = vmatpush1.bf16.msra.mxu1 %v1384_v13  ;;  %v1842_v18 = vpop.permute.xlu1 %821  ;;  %v800_v51 = vsel %vm133_vm3, %v788_v53, %v799_v21 }
 0x223   :  { %v828_v22 = vrot.slane %v1842_v18, 4  ;;  %v897_v37 = vrot.slane %v890_v15, 4 }
 0x225   :  { %v831_v23 = vsel %vm65_vm0, %v827_v19, %v828_v22 }
 0x226   :  { %v922_v16 = vpop.permute.xlu0 %921  ;;  %v1851_v24 = vpop.permute.xlu1 %859  ;;  %v832_v27 = vsel %vm166_vm4, %v820_v61, %v831_v23 }
 0x227   :  { %v866_v30 = vrot.slane %v1851_v24, 4  ;;  %v1390_v31 = vcombine.low %v800_v51, %v832_v27  ;;  %v1391_v48 = vcombine.high %v800_v51, %v832_v27  ;;  %v929_v40 = vrot.slane %v922_v16, 4 }
 0x229   :  { %v869_v32 = vsel %vm65_vm0, %v865_v29, %v866_v30  ;;  %1169 = vmatprep.subr.bf16.mxu1 %v1391_v48  ;;  %v1898_v29 = vld [vmem:[%s1986_s4] sm:$0xf] }
 0x22a   :  { %v954_v33 = vpop.permute.xlu0 %953  ;;  %1170 = vmatpush1.bf16.msra.mxu1 %v1390_v31  ;;  %v1859_v34 = vpop.permute.xlu1 %891  ;;  %v870_v35 = vsel %vm205_vm5, %v858_v7, %v869_v32 }
 0x22b   :  { %v898_v36 = vrot.slane %v1859_v34, 4  ;;  %v1396_v14 = vcombine.low %v1768_v25, %v870_v35  ;;  %v1397_v28 = vcombine.high %v1768_v25, %v870_v35  ;;  %v961_v3 = vrot.slane %v954_v33, 4 }
 0x22d   :  { %1171 = vmatprep.subr.bf16.mxu1 %v1397_v28  ;;  %v901_v41 = vsel %vm65_vm0, %v897_v37, %v898_v36 }
 0x22e   :  { %v728_v11 = vpop.permute.xlu0 %727  ;;  %1172 = vmatpush1.bf16.msra.mxu1 %v1396_v14  ;;  %v1865_v38 = vpop.permute.xlu1 %923  ;;  %v902_v47 = vsel %vm238_vm6, %v890_v15, %v901_v41 }
 0x22f   :  { %v733_v42 = vrot.slane %v728_v11, 4  ;;  %v930_v39 = vrot.slane %v1865_v38, 4 }
 0x231   :  { %v933_v17 = vsel %vm65_vm0, %v929_v40, %v930_v39  ;;  %v737_v25 = vsel %vm65_vm0, %v732_v58, %v733_v42 }
 0x232   :  { %v760_v44 = vpop.permute.xlu0 %759  ;;  %v1875_v45 = vpop.permute.xlu1 %955  ;;  %v934_v50 = vsel %vm271_vm7, %v922_v16, %v933_v17  ;;  %v738_v9 = vsel %vm67_vm1, %v1829_v56, %v737_v25 }
 0x233   :  { %v765_v52 = vrot.slane %v760_v44, 4  ;;  %v962_v53 = vrot.slane %v1875_v45, 4  ;;  %v1402_v59 = vcombine.low %v902_v47, %v934_v50  ;;  %v1403_v61 = vcombine.high %v902_v47, %v934_v50 }
 0x235   :  { %v769_v63 = vsel %vm65_vm0, %v764_v1, %v765_v52  ;;  %v965_v0 = vsel %vm65_vm0, %v961_v3, %v962_v53  ;;  %1173 = vmatprep.subr.bf16.mxu1 %v1403_v61  ;;  %v868_v3 = vrot.slane %v1827_v49, 4 }
 0x236   :  { %v792_v58 = vpop.permute.xlu0 %791  ;;  %1174 = vmatpush1.bf16.msra.mxu1 %v1402_v59  ;;  %v730_v2 = vpop.permute.xlu1 %729  ;;  %v966_v7 = vsel %vm304_vm8, %v954_v33, %v965_v0  ;;  %v770_v10 = vsel %vm100_vm2, %v1832_v62, %v769_v63 }
 0x237   :  { %v797_v13 = vrot.slane %v792_v58, 4  ;;  %v734_v26 = vrot.slane %v730_v2, 4  ;;  %v1409_v20 = vcombine.high %v966_v7, %v966_v7  ;;  %v1386_v1 = vcombine.low %v738_v9, %v770_v10 }
 0x238   :  { %v1387_v15 = vcombine.high %v738_v9, %v770_v10  ;;  %v1408_v19 = vcombine.low %v966_v7, %v966_v7 }
 0x239   :  { %1414 = vmatprep.subr.msk.bf16.mxu1 %vm65_vm0, %v1409_v20  ;;  %v801_v56 = vsel %vm65_vm0, %v796_v12, %v797_v13  ;;  %v739_v51 = vsel %vm65_vm0, %v733_v42, %v734_v26 }
 0x23a   :  { %1208 = vmatprep.subr.bf16.mxu0 %v1387_v15  ;;  %v824_v21 = vpop.permute.xlu0 %823  ;;  %v1150_v23 = vsel %vm65_vm0, %v1408_v19, 0  ;;  %v762_v16 = vpop.permute.xlu1 %761  ;;  %v802_v33 = vsel %vm133_vm3, %v1837_v8, %v801_v56  ;;  %v740_v14 = vsel %vm67_vm1, %v728_v11, %v739_v51 }
 0x23b   :  { %v829_v62 = vrot.slane %v824_v21, 4  ;;  %1176 = vmatpush1.bf16.msra.mxu1 %v1150_v23  ;;  %1209 = vmatpush1.bf16.msra.mxu0 %v1386_v1  ;;  %v766_v27 = vrot.slane %v762_v16, 4 }
 0x23d   :  { %v833_v31 = vsel %vm65_vm0, %v828_v22, %v829_v62  ;;  %v771_v48 = vsel %vm65_vm0, %v765_v52, %v766_v27 }
 0x23e   :  { %1415 = vmatmul.mubr.msk.bf16.vlgmr.msra.gmra.mrb[4].mxu1 %vm485_vm9, %v1898_v29  ;;  %v862_v12 = vpop.permute.xlu0 %861  ;;  %v794_v32 = vpop.permute.xlu1 %793  ;;  %v834_v35 = vsel %vm166_vm4, %v1842_v18, %v833_v31  ;;  %v772_v28 = vsel %vm100_vm2, %v760_v44, %v771_v48 }
 0x23f   :  { %v867_v37 = vrot.slane %v862_v12, 4  ;;  %v798_v40 = vrot.slane %v794_v32, 4  ;;  %v1392_v22 = vcombine.low %v802_v33, %v834_v35  ;;  %v1393_v41 = vcombine.high %v802_v33, %v834_v35  ;;  %1281 = vmatprep.mubr.bf16.mxu1 %v1463_v6 }
 0x240   :  { %v1388_v42 = vcombine.low %v740_v14, %v772_v28  ;;  %v1389_v17 = vcombine.high %v740_v14, %v772_v28 }
 0x241   :  { %v871_v8 = vsel %vm65_vm0, %v866_v30, %v867_v37  ;;  %1210 = vmatprep.subr.bf16.mxu0 %v1393_v41  ;;  %v873_v44 = vsel %vm65_vm0, %v867_v37, %v868_v3  ;;  %v803_v6 = vsel %vm65_vm0, %v797_v13, %v798_v40  ;;  %v1296_v37 = vld [vmem:[%s1982_s0 + $0x4] sm:$0xff] }
 0x242   :  { %1249 = vmatprep.subr.bf16.mxu1 %v1389_v17  ;;  %v894_v18 = vpop.permute.xlu0 %893  ;;  %1211 = vmatpush1.bf16.msra.mxu0 %v1392_v22  ;;  %v826_v11 = vpop.permute.xlu1 %825  ;;  %v872_v25 = vsel %vm205_vm5, %v1851_v24, %v871_v8  ;;  %v874_v59 = vsel %vm205_vm5, %v862_v12, %v873_v44  ;;  %v804_v0 = vsel %vm133_vm3, %v792_v58, %v803_v6  ;;  %v1300_v8 = vunpack.c.h.bf16 %v1296_v37 }
 0x243   :  { %v899_v47 = vrot.slane %v894_v18, 4  ;;  %1250 = vmatpush1.bf16.msra.mxu1 %v1388_v42  ;;  %v830_v50 = vrot.slane %v826_v11, 4  ;;  %v1398_v49 = vcombine.low %v1766_v4, %v872_v25  ;;  %v1399_v52 = vcombine.high %v1766_v4, %v872_v25 }
 0x244   :  { %v1401_v13 = vcombine.high %v1784_v5, %v874_v59  ;;  %v1400_v56 = vcombine.low %v1784_v5, %v874_v59  ;;  %v1299_v42 = vunpack.c.l.bf16 %v1296_v37 }
 0x245   :  { %v835_v30 = vsel %vm65_vm0, %v829_v62, %v830_v50  ;;  %v903_v61 = vsel %vm65_vm0, %v898_v36, %v899_v47  ;;  %1212 = vmatprep.subr.bf16.mxu0 %v1399_v52  ;;  %v1297_v50 = vld [vmem:[%s1982_s0 + $0xc] sm:$0xff] }
 0x246   :  { %v926_v24 = vpop.permute.xlu0 %925  ;;  %v896_v63 = vpop.permute.xlu1 %895  ;;  %v836_v2 = vsel %vm166_vm4, %v824_v21, %v835_v30  ;;  %1213 = vmatpush1.bf16.msra.mxu0 %v1398_v49  ;;  %v904_v58 = vsel %vm238_vm6, %v1859_v34, %v903_v61  ;;  %v1301_v30 = vunpack.c.l.bf16 %v1297_v50  ;;  %v1302_v61 = vunpack.c.h.bf16 %v1297_v50 }
 0x247   :  { %v931_v7 = vrot.slane %v926_v24, 4  ;;  %v900_v9 = vrot.slane %v896_v63, 4  ;;  %v1394_v10 = vcombine.low %v804_v0, %v836_v2  ;;  %v1395_v4 = vcombine.high %v804_v0, %v836_v2 }
 0x249   :  { %v935_v26 = vsel %vm65_vm0, %v930_v39, %v931_v7  ;;  %1251 = vmatprep.subr.bf16.mxu1 %v1395_v4  ;;  %v905_v36 = vsel %vm65_vm0, %v899_v47, %v900_v9 }
 0x24a   :  { %v958_v20 = vpop.permute.xlu0 %957  ;;  %1252 = vmatpush1.bf16.msra.mxu1 %v1394_v10  ;;  %v928_v1 = vpop.permute.xlu1 %927  ;;  %v936_v15 = vsel %vm271_vm7, %v1865_v38, %v935_v26  ;;  %v906_v62 = vsel %vm238_vm6, %v894_v18, %v905_v36 }
 0x24b   :  { %v963_v19 = vrot.slane %v958_v20, 4  ;;  %v932_v21 = vrot.slane %v928_v1, 4  ;;  %1253 = vmatprep.subr.bf16.mxu1 %v1401_v13  ;;  %v1404_v23 = vcombine.low %v904_v58, %v936_v15  ;;  %v1405_v16 = vcombine.high %v904_v58, %v936_v15 }
 0x24d   :  { %v967_v39 = vsel %vm65_vm0, %v962_v53, %v963_v19  ;;  %v937_v51 = vsel %vm65_vm0, %v931_v7, %v932_v21  ;;  %1214 = vmatprep.subr.bf16.mxu0 %v1405_v16 }
 0x24e   :  { %1215 = vmatpush1.bf16.msra.mxu0 %v1404_v23  ;;  %1254 = vmatpush1.bf16.msra.mxu1 %v1400_v56  ;;  %v960_v34 = vpop.permute.xlu1 %959  ;;  %v968_v38 = vsel %vm304_vm8, %v1875_v45, %v967_v39  ;;  %v938_v27 = vsel %vm271_vm7, %v926_v24, %v937_v51 }
 0x24f   :  { %v964_v31 = vrot.slane %v960_v34, 4  ;;  %v1411_v48 = vcombine.high %v968_v38, %v968_v38  ;;  %v1406_v5 = vcombine.low %v906_v62, %v938_v27  ;;  %v1407_v12 = vcombine.high %v906_v62, %v938_v27 }
 0x250   :  { %v1410_v32 = vcombine.low %v968_v38, %v968_v38 }
 0x251   :  { %v969_v53 = vsel %vm65_vm0, %v963_v19, %v964_v31  ;;  %1416 = vmatprep.subr.msk.bf16.mxu0 %vm65_vm0, %v1411_v48  ;;  %1255 = vmatprep.subr.bf16.mxu1 %v1407_v12 }
 0x252   :  { %v970_v33 = vsel %vm304_vm8, %v958_v20, %v969_v53  ;;  %v1156_v35 = vsel %vm65_vm0, %v1410_v32, 0  ;;  %1256 = vmatpush1.bf16.msra.mxu1 %v1406_v5 }
 0x253   :  { %1217 = vmatpush1.bf16.msra.mxu0 %v1156_v35  ;;  %v1413_v45 = vcombine.high %v970_v33, %v970_v33  ;;  %v1412_v14 = vcombine.low %v970_v33, %v970_v33 }
 0x255   :  { %1418 = vmatprep.subr.msk.bf16.mxu1 %vm65_vm0, %v1413_v45  ;;  %v1162_v28 = vsel %vm65_vm0, %v1412_v14, 0 }
 0x256   :  { %1417 = vmatmul.mubr.msk.bf16.vlgmr.msra.gmra.mrb[8].mxu0 %vm485_vm9, %v1898_v29  ;;  %1258 = vmatpush1.bf16.msra.mxu1 %v1162_v28 }
 0x259   :  { %1419 = vmatmul.mubr.msk.bf16.vlgmr.msra.gmra.mrb[8].mxu1 %vm485_vm9, %v1898_v29 }
 0x25b   :  { %v1009_v40 = vpop.permute.xlu0 %1008 }
 0x311   :  { %v1201_v22 = vpop.f32.mrb[4].mxu1 }
 0x312   :  { %v1202_v41 = vadd.f32 %v1201_v22, %v1009_v40  ;;  %v1203_v17 = vpop.f32.mrb[5].mxu1 }
 0x313   :  { %v1204_v3 = vadd.f32 %v1203_v17, %v1009_v40  ;;  %v1205_v18 = vpop.f32.mrb[6].mxu1 }
 0x314   :  { %v1290_v11 = vmul.f32 %v1202_v41, %v1756_v55  ;;  %v1206_v25 = vpop.f32.mrb[7].mxu1  ;;  %v1298_v55 = vld [vmem:[%s1982_s0 + $0x14] sm:$0xff] }
 0x315   :  { %v1291_v44 = vmul.f32 %v1204_v3, %v1760_v60  ;;  %v1303_v10 = vunpack.c.l.bf16 %v1298_v55  ;;  %v1304_v36 = vunpack.c.h.bf16 %v1298_v55 }
 0x316   :  { %v1305_v6 = vadd.f32 %v1299_v42, %v1290_v11 }
 0x317   :  { %v1306_v47 = vadd.f32 %v1300_v8, %v1291_v44 }
 0x319   :  { %v1426_v29 = vpack.c.bf16 %v1306_v47, %v1305_v6 }
 0x31b   :  { %1336 = vst [vmem:[%s1989_s7 + $0x4] sm:$0xff] %v1426_v29 }
 0x329   :  { %v1242_v49 = vpop.f32.mrb[8].mxu0 }
 0x32a   :  { %v1243_v52 = vadd.f32 %v1242_v49, %v1009_v40  ;;  %v1244_v59 = vpop.f32.mrb[9].mxu0 }
 0x32b   :  { %v1245_v60 = vadd.f32 %v1244_v59, %v1009_v40  ;;  %v1246_v24 = vpop.f32.mrb[10].mxu0 }
 0x32c   :  { %v1292_v63 = vmul.f32 %v1243_v52, %v1754_v54  ;;  %v1247_v0 = vpop.f32.mrb[11].mxu0  ;;  %v1283_v2 = vpop.f32.mrb[8].mxu1 }
 0x32d   :  { %v1293_v7 = vmul.f32 %v1245_v60, %v1758_v57  ;;  %v1284_v9 = vadd.f32 %v1283_v2, %v1009_v40  ;;  %v1285_v4 = vpop.f32.mrb[9].mxu1 }
 0x32e   :  { %v1307_v13 = vadd.f32 %v1301_v30, %v1292_v63  ;;  %v1286_v26 = vadd.f32 %v1285_v4, %v1009_v40  ;;  %v1287_v20 = vpop.f32.mrb[10].mxu1 }
 0x32f   :  { %v1308_v1 = vadd.f32 %v1302_v61, %v1293_v7  ;;  %v1294_v58 = vmul.f32 %v1284_v9, %v1774_v46  ;;  %v1288_v15 = vpop.f32.mrb[11].mxu1 }
 0x330   :  { %v1295_v19 = vmul.f32 %v1286_v26, %v1776_v43 }
 0x331   :  { %v1427_v21 = vpack.c.bf16 %v1308_v1, %v1307_v13  ;;  %v1309_v23 = vadd.f32 %v1303_v10, %v1294_v58 }
 0x332   :  { %v1310_v54 = vadd.f32 %v1304_v36, %v1295_v19 }
 0x333   :  { %1337 = vst [vmem:[%s1989_s7 + $0xc] sm:$0xff] %v1427_v21 }
 0x334   :  { %v1428_v57 = vpack.c.bf16 %v1310_v54, %v1309_v23 }
 0x336   :  { %1338 = vst [vmem:[%s1989_s7 + $0x14] sm:$0xff] %v1428_v57 }
 0x337   :  { %1344 = vsyncpa [#allocation5], 1 }

// kernel: rbpn_forward.59
= control target key start
LH: loop header
LB: loop body
LE: loop exit
PB: predicated region body
PF: predicated region fallthrough
CT: control target
= control target key end

     0   :  { %s1010_s25 = smov 19   ;;  %s1011_s26 = smov 18   ;;  %vm696_vm0 = vcmask 130048   ;;  %v1018_v49 = vmov 0   ;;  %vm74_vm1 = vcmask 154624   ;;  %vm144_vm2 = vcmask 146432   ;;  %s1400_s0 = inlined_call_operand.vmem [shape: bf16[16,1024], index: 0, kind: input, shape index: {}]   ;;  %s1401_s4 = inlined_call_operand.<no memory space> [shape: f32[1], index: 4, kind: input, shape index: {}]   ;;  %s1402_s2 = inlined_call_operand.vmem [shape: bf16[3,144], index: 2, kind: input, shape index: {}]   ;;  %s1403_s3 = inlined_call_operand.vmem [shape: f32[3,1], index: 3, kind: input, shape index: {}]   ;;  %s1404_s5 = inlined_call_operand.vmem [shape: bf16[3,1024], index: 5, kind: output, shape index: {}]   ;;  %s1405_s1 = inlined_call_operand.vmem [shape: f32[1,768], index: 1, kind: input, shape index: {}]  }
   0x1   :  { %v23_v0 = vld [vmem:[%s1400_s0] sm:$0xff]  ;;  %v24_v2 = vld [vmem:[%s1400_s0 + $0x8] sm:$0xff]  ;;  %s1012_s27 = smov 17   ;;  %s1013_s28 = smov 1   ;;  %v25_v16 = vld [vmem:[%s1400_s0 + $0x10] sm:$0xff]  ;;  %1009 = vset.pattern.permute.xlu0 %v1018_v49  ;;  %vm214_vm3 = vcmask 138240  }
   0x2   :  { %v27_v1 = vld [vmem:[%s1400_s0 + $0x20] sm:$0xff]  ;;  %v28_v5 = vld [vmem:[%s1400_s0 + $0x28] sm:$0xff]  ;;  %s1014_s12 = smov 127   ;;  %s1015_s13 = smov 111   ;;  %v29_v17 = vld [vmem:[%s1400_s0 + $0x30] sm:$0xff]  ;;  %vm284_vm4 = vcmask 7168  }
   0x3   :  { %v931_v3 = vcombine.high %v23_v0, %v27_v1  ;;  %v930_v4 = vcombine.low %v23_v0, %v27_v1  ;;  %v932_v6 = vcombine.low %v24_v2, %v28_v5  ;;  %v345_v7 = vld [vmem:[%s1400_s0 + $0x4] sm:$0xff]  ;;  %v1081_v9 = vld [vmem:[%s1400_s0 + $0xc] sm:$0xff]  ;;  %s1016_s14 = smov 110   ;;  %s1017_s17 = smov 109   ;;  %v933_v18 = vcombine.high %v24_v2, %v28_v5  ;;  %v26_v20 = vld [vmem:[%s1400_s0 + $0x18] sm:$0xf] }
   0x4   :  { %v349_v8 = vld [vmem:[%s1400_s0 + $0x24] sm:$0xff]  ;;  %v1086_v10 = vld [vmem:[%s1400_s0 + $0x2c] sm:$0xff]  ;;  %v1117_v14 = vld.sshfl [vmem:[%s1402_s2] sm:$0x33 pattern:$0x76325410]  ;;  %v934_v19 = vcombine.low %v25_v16, %v29_v17  ;;  %v935_v22 = vcombine.high %v25_v16, %v29_v17 }
   0x5   :  { %62 = vrot.lane.b32.xlu0 %v931_v3, %s1010_s25  ;;  %60 = vrot.lane.b32.xlu1 %v930_v4, %s1010_s25  ;;  %v1090_v11 = vcombine.high %v345_v7, %v349_v8  ;;  %v1094_v12 = vcombine.low %v1081_v9, %v1086_v10  ;;  %v1100_v13 = vcombine.low %v345_v7, %v349_v8  ;;  %v30_v21 = vld [vmem:[%s1400_s0 + $0x38] sm:$0xf]  ;;  %v348_v37 = vld [vmem:[%s1400_s0 + $0x1c] sm:$0xf]  ;;  %vm396_vm5 = vcmask 1039360  }
   0x6   :  { %v1121_v15 = vcombine.high %v1117_v14, %v1117_v14  ;;  %v936_v23 = vcombine.low %v26_v20, %v30_v21  ;;  %v96_v24 = vld [vmem:[%s1400_s0 + $0x18] sm:$0xf]  ;;  %v1189_v35 = vcombine.high %v1081_v9, %v1086_v10  ;;  %v352_v38 = vld [vmem:[%s1400_s0 + $0x3c] sm:$0xf]  ;;  %v680_v51 = vld [vmem:[%s1403_s3] sm:$0x7] }
   0x7   :  { %v100_v25 = vld [vmem:[%s1400_s0 + $0x38] sm:$0xf]  ;;  %v970_v40 = vcombine.low %v348_v37, %v352_v38  ;;  %v418_v41 = vld [vmem:[%s1400_s0 + $0x1c] sm:$0xf]  ;;  %vm466_vm6 = vcmask 908288   ;;  %vm536_vm7 = vcmask 900096  }
   0x8   :  { %993 = vmatprep.mubr.msk.bf16.mxu0 %vm696_vm0, %v1121_v15  ;;  %994 = vmatprep.mubr.msk.bf16.mxu1 %vm696_vm0, %v1121_v15  ;;  %v943_v26 = vcombine.low %v96_v24, %v100_v25  ;;  %v166_v27 = vld [vmem:[%s1400_s0 + $0x18] sm:$0xf]  ;;  %v422_v42 = vld [vmem:[%s1400_s0 + $0x3c] sm:$0xf]  ;;  %vm606_vm8 = vcmask 891904   ;;  %vm860_vm9 = vcmask 1041408  }
   0x9   :  { %64 = vrot.lane.b32.xlu0 %v932_v6, %s1010_s25  ;;  %132 = vrot.lane.b32.xlu1 %v931_v3, %s1011_s26  ;;  %v170_v28 = vld [vmem:[%s1400_s0 + $0x38] sm:$0xf]  ;;  %v977_v43 = vcombine.low %v418_v41, %v422_v42  ;;  %v488_v44 = vld [vmem:[%s1400_s0 + $0x1c] sm:$0xf]  ;;  %vm861_vm10 = vsmask.f32 1280 }
   0xa   :  { %v950_v29 = vcombine.low %v166_v27, %v170_v28  ;;  %v236_v30 = vld [vmem:[%s1400_s0 + $0x18] sm:$0xf]  ;;  %v492_v45 = vld [vmem:[%s1400_s0 + $0x3c] sm:$0xf]  ;;  %vm1344_vm11 = vmand %vm860_vm9, %vm861_vm10  ;;  %vm905_vm12 = vcmask 1043458   ;;  %vm909_vm15 = vcmask 1045508  }
   0xb   :  { %v240_v31 = vld [vmem:[%s1400_s0 + $0x38] sm:$0xf]  ;;  %v984_v46 = vcombine.low %v488_v44, %v492_v45  ;;  %v558_v47 = vld [vmem:[%s1400_s0 + $0x1c] sm:$0xf]  ;;  %vm906_vm13 = vsmask.f32 3328 }
   0xc   :  { %v957_v32 = vcombine.low %v236_v30, %v240_v31  ;;  %v347_v33 = vld [vmem:[%s1400_s0 + $0x14] sm:$0xff]  ;;  %v562_v48 = vld [vmem:[%s1400_s0 + $0x3c] sm:$0xf]  ;;  %vm1364_vm14 = vmand %vm905_vm12, %vm906_vm13 }
   0xd   :  { %134 = vrot.lane.b32.xlu0 %v932_v6, %s1011_s26  ;;  %130 = vrot.lane.b32.xlu1 %v930_v4, %s1011_s26  ;;  %v351_v34 = vld [vmem:[%s1400_s0 + $0x34] sm:$0xff]  ;;  %v991_v50 = vcombine.low %v558_v47, %v562_v48 }
   0xe   :  { %v1191_v36 = vcombine.low %v347_v33, %v351_v34  ;;  %v1203_v39 = vcombine.high %v347_v33, %v351_v34 }
  0x11   :  { %202 = vrot.lane.b32.xlu0 %v931_v3, %s1012_s27  ;;  %204 = vrot.lane.b32.xlu1 %v932_v6, %s1012_s27 }
  0x15   :  { %200 = vrot.lane.b32.xlu0 %v930_v4, %s1012_s27  ;;  %272 = vrot.lane.b32.xlu1 %v931_v3, %s1013_s28 }
  0x19   :  { %274 = vrot.lane.b32.xlu0 %v932_v6, %s1013_s28  ;;  %270 = vrot.lane.b32.xlu1 %v930_v4, %s1013_s28 }
  0x1d   :  { %384 = vrot.lane.b32.xlu0 %v1090_v11, %s1014_s12  ;;  %386 = vrot.lane.b32.xlu1 %v1094_v12, %s1014_s12 }
  0x21   :  { %382 = vrot.lane.b32.xlu0 %v1100_v13, %s1014_s12  ;;  %454 = vrot.lane.b32.xlu1 %v1090_v11, %s1015_s13 }
  0x25   :  { %456 = vrot.lane.b32.xlu0 %v1094_v12, %s1015_s13  ;;  %452 = vrot.lane.b32.xlu1 %v1100_v13, %s1015_s13 }
  0x29   :  { %524 = vrot.lane.b32.xlu0 %v1090_v11, %s1016_s14  ;;  %526 = vrot.lane.b32.xlu1 %v1094_v12, %s1016_s14 }
  0x2d   :  { %522 = vrot.lane.b32.xlu0 %v1100_v13, %s1016_s14  ;;  %594 = vrot.lane.b32.xlu1 %v1090_v11, %s1017_s17 }
  0x31   :  { %596 = vrot.lane.b32.xlu0 %v1094_v12, %s1017_s17  ;;  %592 = vrot.lane.b32.xlu1 %v1100_v13, %s1017_s17 }
  0x35   :  { %66 = vrot.lane.b32.xlu0 %v933_v18, %s1010_s25  ;;  %68 = vrot.lane.b32.xlu1 %v934_v19, %s1010_s25 }
  0x39   :  { %70 = vrot.lane.b32.xlu0 %v935_v22, %s1010_s25  ;;  %72 = vrot.lane.b32.xlu1 %v936_v23, %s1010_s25 }
  0x3d   :  { %136 = vrot.lane.b32.xlu0 %v933_v18, %s1011_s26  ;;  %138 = vrot.lane.b32.xlu1 %v934_v19, %s1011_s26 }
  0x41   :  { %140 = vrot.lane.b32.xlu0 %v935_v22, %s1011_s26  ;;  %142 = vrot.lane.b32.xlu1 %v943_v26, %s1011_s26 }
  0x45   :  { %206 = vrot.lane.b32.xlu0 %v933_v18, %s1012_s27  ;;  %208 = vrot.lane.b32.xlu1 %v934_v19, %s1012_s27 }
  0x49   :  { %210 = vrot.lane.b32.xlu0 %v935_v22, %s1012_s27  ;;  %212 = vrot.lane.b32.xlu1 %v950_v29, %s1012_s27 }
  0x4d   :  { %276 = vrot.lane.b32.xlu0 %v933_v18, %s1013_s28  ;;  %278 = vrot.lane.b32.xlu1 %v934_v19, %s1013_s28 }
  0x51   :  { %280 = vrot.lane.b32.xlu0 %v935_v22, %s1013_s28  ;;  %282 = vrot.lane.b32.xlu1 %v957_v32, %s1013_s28 }
  0x55   :  { %388 = vrot.lane.b32.xlu0 %v1189_v35, %s1014_s12  ;;  %390 = vrot.lane.b32.xlu1 %v1191_v36, %s1014_s12 }
  0x59   :  { %392 = vrot.lane.b32.xlu0 %v1203_v39, %s1014_s12  ;;  %394 = vrot.lane.b32.xlu1 %v970_v40, %s1014_s12 }
  0x5d   :  { %458 = vrot.lane.b32.xlu0 %v1189_v35, %s1015_s13  ;;  %460 = vrot.lane.b32.xlu1 %v1191_v36, %s1015_s13 }
  0x61   :  { %462 = vrot.lane.b32.xlu0 %v1203_v39, %s1015_s13  ;;  %464 = vrot.lane.b32.xlu1 %v977_v43, %s1015_s13 }
  0x65   :  { %528 = vrot.lane.b32.xlu0 %v1189_v35, %s1016_s14  ;;  %530 = vrot.lane.b32.xlu1 %v1191_v36, %s1016_s14 }
  0x69   :  { %532 = vrot.lane.b32.xlu0 %v1203_v39, %s1016_s14  ;;  %534 = vrot.lane.b32.xlu1 %v984_v46, %s1016_s14 }
  0x6d   :  { %598 = vrot.lane.b32.xlu0 %v1189_v35, %s1017_s17  ;;  %600 = vrot.lane.b32.xlu1 %v1191_v36, %s1017_s17 }
  0x71   :  { %602 = vrot.lane.b32.xlu0 %v1203_v39, %s1017_s17  ;;  %604 = vrot.lane.b32.xlu1 %v991_v50, %s1017_s17 }
  0x75   :  { %683 = vperm.xlu0 %1009, %v680_v51  }
  0x77   :  { %v63_v52 = vpop.permute.xlu0 %62  ;;  %v61_v53 = vpop.permute.xlu1 %60 }
  0x78   :  { %v75_v57 = vsel %vm74_vm1, %v61_v53, %v63_v52 }
  0x7b   :  { %v1250_v54 = vpop.permute.xlu0 %64  ;;  %v133_v55 = vpop.permute.xlu1 %132 }
  0x7c   :  { %v76_v56 = vsel %vm74_vm1, %v63_v52, %v1250_v54 }
  0x7d   :  { %700 = vmatprep.subr.bf16.mxu0 %v76_v56 }
  0x7e   :  { %701 = vmatpush1.bf16.msra.mxu0 %v75_v57 }
  0x7f   :  { %v1255_v58 = vpop.permute.xlu0 %134  ;;  %v131_v59 = vpop.permute.xlu1 %130 }
  0x80   :  { %v146_v60 = vsel %vm144_vm2, %v133_v55, %v1255_v58  ;;  %v145_v61 = vsel %vm144_vm2, %v131_v59, %v133_v55 }
  0x81   :  { %702 = vmatprep.subr.bf16.mxu0 %v146_v60 }
  0x82   :  { %703 = vmatpush1.bf16.msra.mxu0 %v145_v61 }
  0x83   :  { %v203_v62 = vpop.permute.xlu0 %202  ;;  %v1260_v63 = vpop.permute.xlu1 %204 }
  0x84   :  { %v216_v0 = vsel %vm214_vm3, %v203_v62, %v1260_v63 }
  0x85   :  { %704 = vmatprep.subr.bf16.mxu0 %v216_v0 }
  0x87   :  { %v201_v1 = vpop.permute.xlu0 %200  ;;  %v273_v2 = vpop.permute.xlu1 %272 }
  0x88   :  { %v215_v3 = vsel %vm214_vm3, %v201_v1, %v203_v62 }
  0x89   :  { %705 = vmatpush1.bf16.msra.mxu0 %v215_v3 }
  0x8b   :  { %v1265_v4 = vpop.permute.xlu0 %274  ;;  %v271_v5 = vpop.permute.xlu1 %270 }
  0x8c   :  { %v286_v6 = vsel %vm284_vm4, %v273_v2, %v1265_v4  ;;  %v285_v7 = vsel %vm284_vm4, %v271_v5, %v273_v2 }
  0x8d   :  { %706 = vmatprep.subr.bf16.mxu0 %v286_v6 }
  0x8e   :  { %707 = vmatpush1.bf16.msra.mxu0 %v285_v7 }
  0x8f   :  { %v385_v8 = vpop.permute.xlu0 %384  ;;  %v1270_v9 = vpop.permute.xlu1 %386  ;;  %708 = vmatprep.subr.bf16.mxu0 %v1090_v11 }
  0x90   :  { %v398_v10 = vsel %vm396_vm5, %v385_v8, %v1270_v9 }
  0x92   :  { %709 = vmatpush1.bf16.msra.mxu0 %v1100_v13 }
  0x93   :  { %v383_v16 = vpop.permute.xlu0 %382  ;;  %710 = vmatprep.subr.bf16.mxu0 %v398_v10  ;;  %v455_v17 = vpop.permute.xlu1 %454 }
  0x94   :  { %v397_v18 = vsel %vm396_vm5, %v383_v16, %v385_v8 }
  0x96   :  { %711 = vmatpush1.bf16.msra.mxu0 %v397_v18 }
  0x97   :  { %v1277_v19 = vpop.permute.xlu0 %456  ;;  %v453_v20 = vpop.permute.xlu1 %452 }
  0x98   :  { %v468_v21 = vsel %vm466_vm6, %v455_v17, %v1277_v19  ;;  %v467_v11 = vsel %vm466_vm6, %v453_v20, %v455_v17 }
  0x99   :  { %712 = vmatprep.subr.bf16.mxu0 %v468_v21 }
  0x9a   :  { %713 = vmatpush1.bf16.msra.mxu0 %v467_v11 }
  0x9b   :  { %v525_v13 = vpop.permute.xlu0 %524  ;;  %v1282_v22 = vpop.permute.xlu1 %526 }
  0x9c   :  { %v538_v23 = vsel %vm536_vm7, %v525_v13, %v1282_v22 }
  0x9d   :  { %714 = vmatprep.subr.bf16.mxu0 %v538_v23 }
  0x9f   :  { %v523_v24 = vpop.permute.xlu0 %522  ;;  %v595_v25 = vpop.permute.xlu1 %594 }
  0xa0   :  { %v537_v26 = vsel %vm536_vm7, %v523_v24, %v525_v13 }
  0xa1   :  { %715 = vmatpush1.bf16.msra.mxu0 %v537_v26 }
  0xa3   :  { %v1287_v27 = vpop.permute.xlu0 %596  ;;  %v593_v28 = vpop.permute.xlu1 %592 }
  0xa4   :  { %v608_v29 = vsel %vm606_vm8, %v595_v25, %v1287_v27  ;;  %v607_v30 = vsel %vm606_vm8, %v593_v28, %v595_v25 }
  0xa5   :  { %716 = vmatprep.subr.bf16.mxu0 %v608_v29 }
  0xa6   :  { %717 = vmatpush1.bf16.msra.mxu0 %v607_v30 }
  0xa7   :  { %v67_v31 = vpop.permute.xlu0 %66  ;;  %v69_v32 = vpop.permute.xlu1 %68 }
  0xa8   :  { %v78_v33 = vsel %vm74_vm1, %v67_v31, %v69_v32  ;;  %v77_v34 = vsel %vm74_vm1, %v1250_v54, %v67_v31 }
  0xa9   :  { %741 = vmatprep.subr.bf16.mxu1 %v78_v33  ;;  %733 = vmatmul.mubr.bf16.vlgmr.msra.gmra.mrb[0].mxu0 %v1117_v14 }
  0xaa   :  { %742 = vmatpush1.bf16.msra.mxu1 %v77_v34  ;;  %995 = vmatprep.mubr.msk.bf16.mxu0 %vm696_vm0, %v1121_v15  ;;  %vm910_vm0 = vsmask.f32 5376 }
  0xab   :  { %v71_v37 = vpop.permute.xlu0 %70  ;;  %v73_v38 = vpop.permute.xlu1 %72 }
  0xac   :  { %v79_v40 = vsel %vm74_vm1, %v69_v32, %v71_v37  ;;  %v80_v41 = vsel %vm74_vm1, %v71_v37, %v73_v38  ;;  %v824_v38 = vlaneseq  ;;  %vm908_vm1 = vmor %vm1364_vm14, %vm1344_vm11 }
  0xad   :  { %782 = vmatprep.subr.bf16.mxu0 %v80_v41 }
  0xae   :  { %783 = vmatpush1.bf16.msra.mxu0 %v79_v40  ;;  %v825_v40 = vshrl.u32 %v824_v38, 7 }
  0xaf   :  { %v137_v42 = vpop.permute.xlu0 %136  ;;  %v139_v43 = vpop.permute.xlu1 %138 }
  0xb0   :  { %v148_v44 = vsel %vm144_vm2, %v137_v42, %v139_v43  ;;  %v147_v45 = vsel %vm144_vm2, %v1255_v58, %v137_v42  ;;  %v826_v41 = vsub.s32 0, %v825_v40  ;;  %v22_v42 = vld [vmem:[%s1405_s1] sm:$0x3f] }
  0xb1   :  { %743 = vmatprep.subr.bf16.mxu1 %v148_v44 }
  0xb2   :  { %744 = vmatpush1.bf16.msra.mxu1 %v147_v45  ;;  %v827_v45 = vrot.slane %v22_v42, %v826_v41 }
  0xb3   :  { %v141_v46 = vpop.permute.xlu0 %140  ;;  %v143_v47 = vpop.permute.xlu1 %142 }
  0xb4   :  { %v149_v15 = vsel %vm144_vm2, %v139_v43, %v141_v46  ;;  %v150_v48 = vsel %vm144_vm2, %v141_v46, %v143_v47  ;;  %v830_v43 = vsub.s32 1, %v825_v40  ;;  %vm911_vm2 = vmand %vm909_vm15, %vm910_vm0 }
  0xb5   :  { %784 = vmatprep.subr.bf16.mxu0 %v150_v48 }
  0xb6   :  { %785 = vmatpush1.bf16.msra.mxu0 %v149_v15  ;;  %v831_v47 = vrot.slane %v22_v42, %v830_v43 }
  0xb7   :  { %v207_v49 = vpop.permute.xlu0 %206  ;;  %v209_v50 = vpop.permute.xlu1 %208 }
  0xb8   :  { %v218_v51 = vsel %vm214_vm3, %v207_v49, %v209_v50  ;;  %v217_v52 = vsel %vm214_vm3, %v1260_v63, %v207_v49 }
  0xb9   :  { %745 = vmatprep.subr.bf16.mxu1 %v218_v51 }
  0xba   :  { %746 = vmatpush1.bf16.msra.mxu1 %v217_v52 }
  0xbb   :  { %v211_v53 = vpop.permute.xlu0 %210  ;;  %v213_v54 = vpop.permute.xlu1 %212 }
  0xbc   :  { %v219_v55 = vsel %vm214_vm3, %v209_v50, %v211_v53  ;;  %v220_v56 = vsel %vm214_vm3, %v211_v53, %v213_v54  ;;  %vm913_vm3 = vcmask 1047558  }
  0xbd   :  { %786 = vmatprep.subr.bf16.mxu0 %v220_v56  ;;  %v838_v56 = vsub.s32 3, %v825_v40 }
  0xbe   :  { %787 = vmatpush1.bf16.msra.mxu0 %v219_v55  ;;  %v834_v55 = vsub.s32 2, %v825_v40 }
  0xbf   :  { %v277_v57 = vpop.permute.xlu0 %276  ;;  %v279_v58 = vpop.permute.xlu1 %278 }
  0xc0   :  { %v288_v59 = vsel %vm284_vm4, %v277_v57, %v279_v58  ;;  %v287_v60 = vsel %vm284_vm4, %v1265_v4, %v277_v57  ;;  %v1019_v57 = vmov 1983009808  }
  0xc1   :  { %747 = vmatprep.subr.bf16.mxu1 %v288_v59 }
  0xc2   :  { %748 = vmatpush1.bf16.msra.mxu1 %v287_v60  ;;  %v835_v60 = vrot.slane %v22_v42, %v834_v55 }
  0xc3   :  { %v281_v61 = vpop.permute.xlu0 %280  ;;  %v283_v62 = vpop.permute.xlu1 %282  ;;  %749 = vmatprep.subr.bf16.mxu1 %v1189_v35 }
  0xc4   :  { %v289_v63 = vsel %vm284_vm4, %v279_v58, %v281_v61  ;;  %v290_v0 = vsel %vm284_vm4, %v281_v61, %v283_v62  ;;  %v881_v58 = vunpack.c.l.s4 %v1019_v57  ;;  %v842_v61 = vsub.s32 4, %v825_v40 }
  0xc5   :  { %788 = vmatprep.subr.bf16.mxu0 %v290_v0  ;;  %vm914_vm4 = vsmask.f32 7424 }
  0xc6   :  { %750 = vmatpush1.bf16.msra.mxu1 %v1094_v12  ;;  %789 = vmatpush1.bf16.msra.mxu0 %v289_v63  ;;  %v839_v63 = vrot.slane %v22_v42, %v838_v56  ;;  %v882_v0 = vunpack.c.0.s8 %v881_v58 }
  0xc7   :  { %v389_v1 = vpop.permute.xlu0 %388  ;;  %v391_v2 = vpop.permute.xlu1 %390  ;;  %790 = vmatprep.subr.bf16.mxu0 %v1203_v39 }
  0xc8   :  { %v400_v3 = vsel %vm396_vm5, %v389_v1, %v391_v2  ;;  %v399_v4 = vsel %vm396_vm5, %v1270_v9, %v389_v1  ;;  %v846_v1 = vsub.s32 5, %v825_v40 }
  0xc9   :  { %751 = vmatprep.subr.bf16.mxu1 %v400_v3 }
  0xca   :  { %752 = vmatpush1.bf16.msra.mxu1 %v399_v4  ;;  %791 = vmatpush1.bf16.msra.mxu0 %v1191_v36 }
  0xcb   :  { %v393_v35 = vpop.permute.xlu0 %392  ;;  %v395_v5 = vpop.permute.xlu1 %394 }
  0xcc   :  { %v401_v6 = vsel %vm396_vm5, %v391_v2, %v393_v35  ;;  %v402_v12 = vsel %vm396_vm5, %v393_v35, %v395_v5  ;;  %vm1377_vm5 = vmor %vm911_vm2, %vm908_vm1 }
  0xcd   :  { %792 = vmatprep.subr.bf16.mxu0 %v402_v12  ;;  %v843_v12 = vrot.slane %v22_v42, %v842_v61 }
  0xce   :  { %793 = vmatpush1.bf16.msra.mxu0 %v401_v6 }
  0xcf   :  { %v459_v7 = vpop.permute.xlu0 %458  ;;  %v461_v8 = vpop.permute.xlu1 %460 }
  0xd0   :  { %v470_v39 = vsel %vm466_vm6, %v459_v7, %v461_v8  ;;  %v469_v10 = vsel %vm466_vm6, %v1277_v19, %v459_v7 }
  0xd1   :  { %753 = vmatprep.subr.bf16.mxu1 %v470_v39 }
  0xd2   :  { %754 = vmatpush1.bf16.msra.mxu1 %v469_v10  ;;  %v847_v10 = vrot.slane %v22_v42, %v846_v1 }
  0xd3   :  { %v463_v9 = vpop.permute.xlu0 %462  ;;  %v465_v16 = vpop.permute.xlu1 %464 }
  0xd4   :  { %v471_v36 = vsel %vm466_vm6, %v461_v8, %v463_v9  ;;  %v472_v17 = vsel %vm466_vm6, %v463_v9, %v465_v16  ;;  %v885_v8 = vsub.s32 %v882_v0, %v825_v40  ;;  %vm915_vm6 = vmand %vm913_vm3, %vm914_vm4 }
  0xd5   :  { %794 = vmatprep.subr.bf16.mxu0 %v472_v17 }
  0xd6   :  { %795 = vmatpush1.bf16.msra.mxu0 %v471_v36 }
  0xd7   :  { %v529_v18 = vpop.permute.xlu0 %528  ;;  %v531_v20 = vpop.permute.xlu1 %530 }
  0xd8   :  { %v540_v21 = vsel %vm536_vm7, %v529_v18, %v531_v20  ;;  %v539_v11 = vsel %vm536_vm7, %v1282_v22, %v529_v18 }
  0xd9   :  { %755 = vmatprep.subr.bf16.mxu1 %v540_v21 }
  0xda   :  { %756 = vmatpush1.bf16.msra.mxu1 %v539_v11 }
  0xdb   :  { %v533_v19 = vpop.permute.xlu0 %532  ;;  %v535_v13 = vpop.permute.xlu1 %534 }
  0xdc   :  { %v541_v23 = vsel %vm536_vm7, %v531_v20, %v533_v19  ;;  %v542_v24 = vsel %vm536_vm7, %v533_v19, %v535_v13  ;;  %vm916_vm7 = vmor %vm915_vm6, %vm1377_vm5 }
  0xdd   :  { %796 = vmatprep.subr.bf16.mxu0 %v542_v24  ;;  %v917_v24 = vld [vmem:[%s1404_s5 + $0x2] sm:$0xff] }
  0xde   :  { %797 = vmatpush1.bf16.msra.mxu0 %v541_v23 }
  0xdf   :  { %v599_v25 = vpop.permute.xlu0 %598  ;;  %v601_v26 = vpop.permute.xlu1 %600 }
  0xe0   :  { %v610_v28 = vsel %vm606_vm8, %v599_v25, %v601_v26  ;;  %v609_v29 = vsel %vm606_vm8, %v1287_v27, %v599_v25  ;;  %v863_v27 = vld [vmem:[%s1404_s5] sm:$0x3] }
  0xe1   :  { %757 = vmatprep.subr.bf16.mxu1 %v610_v28  ;;  %v864_v34 = vsel %vm1344_vm11, 0, %v863_v27  ;;  %v920_v28 = vld [vmem:[%s1404_s5 + $0xa] sm:$0xf] }
  0xe2   :  { %758 = vmatpush1.bf16.msra.mxu1 %v609_v29  ;;  %865 = vst [vmem:[%s1404_s5] sm:$0x3] %v864_v34 }
  0xe3   :  { %v603_v22 = vpop.permute.xlu0 %602  ;;  %v605_v30 = vpop.permute.xlu1 %604 }
  0xe4   :  { %v611_v31 = vsel %vm606_vm8, %v601_v26, %v603_v22  ;;  %v612_v32 = vsel %vm606_vm8, %v603_v22, %v605_v30 }
  0xe5   :  { %774 = vmatmul.mubr.bf16.vlgmr.msra.gmra.mrb[0].mxu1 %v1117_v14  ;;  %798 = vmatprep.subr.bf16.mxu0 %v612_v32 }
  0xe6   :  { %799 = vmatpush1.bf16.msra.mxu0 %v611_v31 }
  0xe9   :  { %815 = vmatmul.mubr.bf16.vlgmr.msra.gmra.mrb[4].mxu0 %v1117_v14  ;;  %v923_v14 = vld [vmem:[%s1404_s5 + $0xe] sm:$0x3] }
  0xea   :  { %v924_v37 = vsel %vm1344_vm11, 0, %v923_v14 }
  0xeb   :  { %925 = vst [vmem:[%s1404_s5 + $0xe] sm:$0x3] %v924_v37 }
  0xf4   :  { %v684_v44 = vpop.permute.xlu0 %683 }
 0x17c   :  { %v734_v46 = vpop.f32.mrb[0].mxu0 }
 0x17d   :  { %v736_v15 = vpop.f32.mrb[1].mxu0  ;;  %v735_v48 = vadd.f32 %v734_v46, %v684_v44 }
 0x17e   :  { %v738_v49 = vpop.f32.mrb[2].mxu0  ;;  %v737_v50 = vadd.f32 %v736_v15, %v684_v44 }
 0x17f   :  { %v854_v51 = vmul.f32 %v827_v45, %v735_v48  ;;  %v739_v52 = vpop.f32.mrb[3].mxu0 }
 0x180   :  { %v855_v53 = vmul.f32 %v831_v47, %v737_v50 }
 0x182   :  { %v996_v54 = vpack.c.bf16 %v855_v53, %v854_v51 }
 0x184   :  { %v886_v19 = vrot.slane %v996_v54, %v885_v8 }
 0x1b8   :  { %v775_v62 = vpop.f32.mrb[0].mxu1 }
 0x1b9   :  { %v776_v2 = vadd.f32 %v775_v62, %v684_v44  ;;  %v777_v3 = vpop.f32.mrb[1].mxu1 }
 0x1ba   :  { %v778_v4 = vadd.f32 %v777_v3, %v684_v44  ;;  %v779_v35 = vpop.f32.mrb[2].mxu1 }
 0x1bb   :  { %v856_v5 = vmul.f32 %v835_v60, %v776_v2  ;;  %v780_v6 = vpop.f32.mrb[3].mxu1 }
 0x1bc   :  { %v857_v7 = vmul.f32 %v839_v63, %v778_v4  ;;  %v816_v39 = vpop.f32.mrb[4].mxu0 }
 0x1bd   :  { %v817_v16 = vadd.f32 %v816_v39, %v684_v44  ;;  %v818_v36 = vpop.f32.mrb[5].mxu0 }
 0x1be   :  { %v997_v17 = vpack.c.bf16 %v857_v7, %v856_v5  ;;  %v819_v18 = vadd.f32 %v818_v36, %v684_v44  ;;  %v820_v20 = vpop.f32.mrb[6].mxu0 }
 0x1bf   :  { %v858_v21 = vmul.f32 %v843_v12, %v817_v16  ;;  %v821_v11 = vpop.f32.mrb[7].mxu0 }
 0x1c0   :  { %v893_v13 = vrot.slane %v997_v17, %v885_v8  ;;  %v859_v23 = vmul.f32 %v847_v10, %v819_v18 }
 0x1c2   :  { %v894_v25 = vcombine.low %v886_v19, %v893_v13  ;;  %v998_v26 = vpack.c.bf16 %v859_v23, %v858_v21 }
 0x1c4   :  { %v918_v29 = vsel %vm916_vm7, %v894_v25, %v917_v24  ;;  %v902_v22 = vrot.slane %v998_v26, %v885_v8 }
 0x1c5   :  { %919 = vst [vmem:[%s1404_s5 + $0x2] sm:$0xff] %v918_v29 }
 0x1c6   :  { %v921_v30 = vsel %vm908_vm1, %v902_v22, %v920_v28 }
 0x1c7   :  { %922 = vst [vmem:[%s1404_s5 + $0xa] sm:$0xf] %v921_v30 }

</bundles_post_ra>
